<compile_context>
chip_gen: v6e
topology: v6e:2x2x1
jax: 0.10.0
libtpu: 0.0.40
codegen_flags: <defaults>
</compile_context>

<pallas_src>
import functools

import jax
import jax.numpy as jnp
from jax.experimental import pallas as pl
from jax.experimental.pallas import tpu as pltpu

_EPS = 1e-5


def _vmem_capacity_bytes():
    try:
        return int(pltpu.get_tpu_info().vmem_capacity_bytes)
    except Exception:
        return 64 * 1024 * 1024  # conservative fallback (v7x-sized VMEM)


_VMEM_CAP = _vmem_capacity_bytes()
_VMEM_LIMIT = min(int(0.75 * _VMEM_CAP), 100 * 1024 * 1024)


# ----------------------------------------------------------------------------
# Fused Pallas kernel: Conv3x3+ReLU -> HetConv -> per-tile BN statistics
# ----------------------------------------------------------------------------
def _fused_features_kernel(x_ref, ymask_ref, cmask_ref, w1_ref, b1_ref, w2_ref,
                           z_ref, s1_ref, s2_ref, *, wp, m1e, mz, f11, f12):
    """One grid step = `th` output rows of one image.

    x_ref:     (MxE, 3)      bf16  row-flattened (th+4, W+4) input slab (+pad)
    ymask_ref: (M1E, 1)      bf16  validity mask for the y1 halo domain
    cmask_ref: (Mz, 1)       bf16  valid-column mask for the output domain
    w1_ref:    (9, 3, f11)   bf16  conv1 taps        b1_ref: (1, f11) f32
    w2_ref:    (9, f11, f12) bf16  HetConv taps (pwc folded into tap 4)
    z_ref:     (Mz, f12)     bf16  pre-BN activations (wide domain)
    s1_ref/s2_ref: (1, f12)  f32   per-tile sum / sum-of-squares (BN stats)
    """
    # Slicing is done on 32-bit values (robust relayouts); matmul operands are
    # cast to bf16 right before each dot, accumulation stays in f32 on the MXU.
    x = x_ref[...].astype(jnp.float32)                       # (MxE, 3)

    # ---- layer 1: Conv2d(3, f11, 3, pad=1) + bias + ReLU over the halo slab
    acc1 = jnp.zeros((m1e, f11), jnp.float32)
    for k in range(9):
        off = (k // 3) * wp + (k % 3)
        tap = x[off:off + m1e, :].astype(jnp.bfloat16)        # (M1E, 3)
        acc1 = acc1 + jnp.dot(tap, w1_ref[k],
                              preferred_element_type=jnp.float32)
    # mask zeroes out-of-image halo rows/cols (= layer-2 zero padding) and the
    # junk columns of the wide row-flattened domain.
    y1 = jnp.maximum(acc1 + b1_ref[...], 0.0) * ymask_ref[...]   # (M1E, f11) f32

    # ---- layer 2: HetConv = grouped 3x3 (+ folded 1x1), 9 taps of K=f11
    acc2 = jnp.zeros((mz, f12), jnp.float32)
    for k in range(9):
        off = (k // 3) * wp + (k % 3)
        tap = y1[off:off + mz, :].astype(jnp.bfloat16)        # (Mz, f11)
        acc2 = acc2 + jnp.dot(tap, w2_ref[k],
                              preferred_element_type=jnp.float32)

    z_ref[...] = acc2.astype(z_ref.dtype)                     # bf16 writeback

    # ---- per-tile BatchNorm statistics (junk columns excluded)
    # TODO(synk): plain sum / sum-of-squares can cancel for large means; a
    # Welford / shifted accumulation would be more robust at huge batch sizes.
    valid = cmask_ref[...] > 0.0                              # (Mz, 1) bool
    s1_ref[...] = jnp.sum(jnp.where(valid, acc2, 0.0), axis=0, keepdims=True)
    s2_ref[...] = jnp.sum(jnp.where(valid, acc2 * acc2, 0.0),
                          axis=0, keepdims=True)


# ----------------------------------------------------------------------------
# Tile selection (VMEM-derived, generation aware)
# ----------------------------------------------------------------------------
def _tile_bytes(th, w, f11, f12):
    wp = w + 4
    mxe = (th + 4) * wp + 16
    m1e = (th + 2) * wp + 8
    mz = th * wp
    lane = lambda c: -(-c // 128) * 128   # crude lane-padding model
    b = 0
    b += 2 * mxe * lane(3) * 2            # x slab (bf16), double-buffered
    b += 2 * m1e * lane(1) * 2            # ymask (bf16), double-buffered
    b += mz * lane(1) * 2                 # cmask
    b += 2 * (27 + 1) * lane(f11) * 4     # w1/b1 (padded, generous)
    b += 2 * 9 * f11 * lane(f12) * 2      # w2 (bf16), double-buffered
    b += 2 * mz * lane(f12) * 2           # z out tile (bf16), double-buffered
    b += 8 * lane(f12) * 4                # stats tiles
    # live in-kernel values: x (f32), acc1/y1 (f32), acc2 (f32) + tap copies
    b += mxe * lane(3) * 4 + 2 * m1e * lane(f11) * 4 + 2 * mz * lane(f12) * 4
    return b


def _pick_tile_h(h, w, f11, f12, vmem_limit):
    budget = max(vmem_limit // 2, 2 * 1024 * 1024)
    divisors = sorted(d for d in range(1, h + 1) if h % d == 0)
    best = divisors[0]
    for th in divisors:
        if _tile_bytes(th, w, f11, f12) <= budget:
            best = th
    return best


# ----------------------------------------------------------------------------
# Parameters (deterministic synthetic init matching the PyTorch scheme)
# ----------------------------------------------------------------------------
def init_params(key, f11, f12, p):
    k1, k2, k3 = jax.random.split(key, 3)
    cin = 3

    # Conv2d(3, f11, 3, padding=1): kaiming_normal (fan_out), zero bias.
    std1 = (2.0 / (f11 * 9)) ** 0.5
    w1 = jax.random.normal(k1, (3, 3, cin, f11), jnp.float32) * std1
    b1 = jnp.zeros((1, f11), jnp.float32)

    # HetConv.gwc: Conv2d(f11, f12, 3, padding=1, groups=p, bias=False)
    cin_g, cout_g = f11 // p, f12 // p
    stdg = (2.0 / (f12 * 9)) ** 0.5
    wg_groups = jax.random.normal(k2, (p, 3, 3, cin_g, cout_g), jnp.float32) * stdg
    wg = jnp.zeros((3, 3, f11, f12), jnp.float32)
    for g in range(p):  # exact block-diagonal dense expansion of the groups
        wg = wg.at[:, :,
                   g * cin_g:(g + 1) * cin_g,
                   g * cout_g:(g + 1) * cout_g].set(wg_groups[g])

    # HetConv.pwc: Conv2d(f11, f12, 1, bias=False) folded into the centre tap.
    stdp = (2.0 / f12) ** 0.5
    wpw = jax.random.normal(k3, (f11, f12), jnp.float32) * stdp
    wg = wg.at[1, 1].add(wpw)

    return {
        "w1": w1.reshape(9, cin, f11),       # (9, 3, f11)
        "b1": b1,                            # (1, f11)
        "w2": wg.reshape(9, f11, f12),       # (9, f11, f12), pwc folded in
        "gamma": jnp.ones((1, f12), jnp.float32),   # BatchNorm2d weight=1
        "beta": jnp.zeros((1, f12), jnp.float32),   # BatchNorm2d bias=0
    }


# ----------------------------------------------------------------------------
# Forward (equivalent of vgg16bn.forward, which only runs self.features)
# ----------------------------------------------------------------------------
@jax.jit
def vgg16bn_features_forward(x_nchw, params):
    n, _, h, w = x_nchw.shape
    f11 = params["w1"].shape[-1]
    f12 = params["w2"].shape[-1]
    wp = w + 4
    th = _pick_tile_h(h, w, f11, f12, _VMEM_LIMIT)
    t_tiles = h // th
    g = n * t_tiles
    mxe = (th + 4) * wp + 16          # x slab rows (+ zero tail so taps stay in range)
    m1w = (th + 2) * wp               # y1 halo-domain rows (wide)
    m1e = m1w + 8                     # + slack rows so HetConv taps stay in range
    mz = th * wp                      # output rows per tile (wide, junk cols masked)

    x_nhwc = jnp.transpose(x_nchw, (0, 2, 3, 1)).astype(jnp.float32)
    xp = jnp.pad(x_nhwc, ((0, 0), (2, 2), (2, 2), (0, 0))).astype(jnp.bfloat16)

    # Overlapping (th+4)-row slabs, flattened to (rows*(W+4), 3).
    # TODO(synk): replace with an in-kernel halo DMA (memory_space=pl.ANY +
    # make_async_copy) to avoid re-materializing the 4 overlap rows per slab.
    slabs = jnp.stack([xp[:, t * th:t * th + th + 4] for t in range(t_tiles)],
                      axis=1)                                  # (N, T, th+4, W+4, 3)
    xflat = slabs.reshape(n, t_tiles, (th + 4) * wp, 3)
    xflat = jnp.pad(xflat, ((0, 0), (0, 0), (0, mxe - (th + 4) * wp), (0, 0)))

    # y1 validity mask over the halo domain (implements layer-2 zero padding
    # and kills the junk columns / tail rows of the wide flattening).
    j1 = jnp.arange(m1e)
    ry, cy = j1 // wp, j1 % wp
    rows = jnp.arange(t_tiles)[:, None] * th - 1 + ry[None, :]
    ymask = ((rows >= 0) & (rows < h)
             & (cy[None, :] >= 1) & (cy[None, :] <= w)
             & (j1[None, :] < m1w)).astype(jnp.bfloat16)[:, :, None]  # (T, M1E, 1)

    jz = jnp.arange(mz)
    cmask = ((jz % wp) < w).astype(jnp.bfloat16)[:, None]             # (Mz, 1)

    w1 = params["w1"].astype(jnp.bfloat16)
    w2 = params["w2"].astype(jnp.bfloat16)
    b1 = params["b1"]

    kern = functools.partial(_fused_features_kernel, wp=wp, m1e=m1e, mz=mz,
                             f11=f11, f12=f12)
    flops = 2 * g * 9 * (m1e * 3 * f11 + mz * f11 * f12)
    bytes_accessed = (g * mxe * 3 * 2 + t_tiles * m1e * 2 + mz * 2
                      + 9 * f11 * (3 + f12) * 2 + f11 * 4
                      + g * mz * f12 * 2 + 2 * g * f12 * 4)

    z, s1, s2 = pl.pallas_call(
        kern,
        out_shape=(jax.ShapeDtypeStruct((g, mz, f12), jnp.bfloat16),
                   jax.ShapeDtypeStruct((g, 1, f12), jnp.float32),
                   jax.ShapeDtypeStruct((g, 1, f12), jnp.float32)),
        grid=(n, t_tiles),
        in_specs=[
            pl.BlockSpec((None, None, mxe, 3), lambda i, t: (i, t, 0, 0)),
            pl.BlockSpec((None, m1e, 1), lambda i, t: (t, 0, 0)),
            pl.BlockSpec((mz, 1), lambda i, t: (0, 0)),
            pl.BlockSpec((9, 3, f11), lambda i, t: (0, 0, 0)),
            pl.BlockSpec((1, f11), lambda i, t: (0, 0)),
            pl.BlockSpec((9, f11, f12), lambda i, t: (0, 0, 0)),
        ],
        out_specs=(
            pl.BlockSpec((None, mz, f12), lambda i, t: (i * t_tiles + t, 0, 0)),
            pl.BlockSpec((None, 1, f12), lambda i, t: (i * t_tiles + t, 0, 0)),
            pl.BlockSpec((None, 1, f12), lambda i, t: (i * t_tiles + t, 0, 0)),
        ),
        compiler_params=pltpu.CompilerParams(
            dimension_semantics=("parallel", "parallel"),
            vmem_limit_bytes=_VMEM_LIMIT),
        cost_estimate=pl.CostEstimate(flops=int(flops), transcendentals=0,
                                      bytes_accessed=int(bytes_accessed)),
    )(xflat, ymask, cmask, w1, b1, w2)

    # ---- BatchNorm finalize (tiny per-channel math) -------------------------
    count = jnp.float32(n * h * w)
    s1_tot = jnp.sum(s1[:, 0, :], axis=0)
    s2_tot = jnp.sum(s2[:, 0, :], axis=0)
    mean = s1_tot / count
    var = jnp.maximum(s2_tot / count - mean * mean, 0.0)   # biased variance
    inv = jax.lax.rsqrt(var + _EPS)
    scale = params["gamma"][0] * inv
    shift = params["beta"][0] - mean * scale

    # ---- BN affine + ReLU folded into the final NCHW writeback (no pass-B
    # kernel); in a full VGG stack this would be fused into the next conv's
    # Pallas load path instead.
    zr = z.reshape(n, t_tiles, th, wp, f12)[:, :, :, :w, :].reshape(n, h, w, f12)
    y = jnp.maximum(zr.astype(jnp.float32) * scale + shift, 0.0)
    return jnp.transpose(y, (0, 3, 1, 2))


if __name__ == "__main__":
    # Small shapes consistent with the module: batch=2, 3 input channels,
    # 16x16 spatial, f11=16, f12=32, p=4 (p divides both f11 and f12).
    F11, F12, P = 16, 32, 4

    key = jax.random.PRNGKey(0)
    kx, kp = jax.random.split(key)
    x = jax.random.normal(kx, (2, 3, 16, 16), jnp.float32)   # NCHW like PyTorch
    params = init_params(kp, F11, F12, P)

    out = vgg16bn_features_forward(x, params)
    jax.block_until_ready(out)
    assert out.shape == (2, F12, 16, 16), out.shape
    assert bool(jnp.isfinite(out).all())
    print("KERNEL_OK")
</pallas_src>

<mosaic_0001>
module attributes {stable_mosaic.version = 11 : i64} {
  func.func @_fused_features_kernel(%arg0: i32, %arg1: i32, %arg2: memref<1x1x416x3xbf16, #tpu.memory_space<vmem>>, %arg3: memref<1x368x1xbf16, #tpu.memory_space<vmem>>, %arg4: memref<320x1xbf16, #tpu.memory_space<vmem>>, %arg5: memref<9x3x16xbf16, #tpu.memory_space<vmem>>, %arg6: memref<1x16xf32, #tpu.memory_space<vmem>>, %arg7: memref<9x16x32xbf16, #tpu.memory_space<vmem>>, %arg8: memref<1x320x32xbf16, #tpu.memory_space<vmem>>, %arg9: memref<1x1x32xf32, #tpu.memory_space<vmem>>, %arg10: memref<1x1x32xf32, #tpu.memory_space<vmem>>) attributes {dimension_semantics = [#tpu.dimension_semantics<parallel>, #tpu.dimension_semantics<parallel>], iteration_bounds = array<i64: 2, 1>, scalar_prefetch = 0 : i64, scratch_operands = 0 : i64, tpu.core_type = #tpu.core_type<tc>, window_params = [{transform_indices = @transform_0, window_bounds = array<i64: 1, 1, 416, 3>}, {transform_indices = @transform_1, window_bounds = array<i64: 1, 368, 1>}, {pipeline_mode = #tpu.pipeline_mode<synchronous>, transform_indices = @transform_2, window_bounds = array<i64: 320, 1>}, {pipeline_mode = #tpu.pipeline_mode<synchronous>, transform_indices = @transform_3, window_bounds = array<i64: 9, 3, 16>}, {pipeline_mode = #tpu.pipeline_mode<synchronous>, transform_indices = @transform_4, window_bounds = array<i64: 1, 16>}, {pipeline_mode = #tpu.pipeline_mode<synchronous>, transform_indices = @transform_5, window_bounds = array<i64: 9, 16, 32>}, {transform_indices = @transform_6, window_bounds = array<i64: 1, 320, 32>}, {transform_indices = @transform_7, window_bounds = array<i64: 1, 1, 32>}, {transform_indices = @transform_8, window_bounds = array<i64: 1, 1, 32>}]} {
    %c0 = arith.constant 0 : index
    %c0_0 = arith.constant 0 : index
    %c0_1 = arith.constant 0 : index
    %c0_2 = arith.constant 0 : index
    %0 = vector.load %arg2[%c0, %c0_0, %c0_1, %c0_2] : memref<1x1x416x3xbf16, #tpu.memory_space<vmem>>, vector<1x1x416x3xbf16>
    %1 = vector.shape_cast %0 : vector<1x1x416x3xbf16> to vector<416x3xbf16>
    %2 = arith.extf %1 : vector<416x3xbf16> to vector<416x3xf32>
    %cst = arith.constant 0.000000e+00 : f32
    %3 = vector.broadcast %cst : f32 to vector<368x16xf32>
    %4 = vector.extract_strided_slice %2 {offsets = [0, 0], sizes = [368, 3], strides = [1, 1]} : vector<416x3xf32> to vector<368x3xf32>
    %5 = arith.truncf %4 : vector<368x3xf32> to vector<368x3xbf16>
    %c0_3 = arith.constant 0 : index
    %c0_4 = arith.constant 0 : index
    %c0_5 = arith.constant 0 : index
    %6 = vector.load %arg5[%c0_3, %c0_4, %c0_5] : memref<9x3x16xbf16, #tpu.memory_space<vmem>>, vector<1x3x16xbf16>
    %7 = vector.shape_cast %6 : vector<1x3x16xbf16> to vector<3x16xbf16>
    %cst_6 = arith.constant dense<0.000000e+00> : vector<368x16xf32>
    %8 = tpu.matmul %5, %7, %cst_6 {dimension_numbers = #tpu.dot_dimension_numbers<[1], [0], [0], [1], [0, 0, 1, 1], [], []>} : vector<368x3xbf16>, vector<3x16xbf16>, vector<368x16xf32> -> vector<368x16xf32>
    %9 = arith.addf %3, %8 : vector<368x16xf32>
    %10 = vector.extract_strided_slice %2 {offsets = [1, 0], sizes = [368, 3], strides = [1, 1]} : vector<416x3xf32> to vector<368x3xf32>
    %11 = arith.truncf %10 : vector<368x3xf32> to vector<368x3xbf16>
    %c1 = arith.constant 1 : index
    %c0_7 = arith.constant 0 : index
    %c0_8 = arith.constant 0 : index
    %12 = vector.load %arg5[%c1, %c0_7, %c0_8] : memref<9x3x16xbf16, #tpu.memory_space<vmem>>, vector<1x3x16xbf16>
    %13 = vector.shape_cast %12 : vector<1x3x16xbf16> to vector<3x16xbf16>
    %cst_9 = arith.constant dense<0.000000e+00> : vector<368x16xf32>
    %14 = tpu.matmul %11, %13, %cst_9 {dimension_numbers = #tpu.dot_dimension_numbers<[1], [0], [0], [1], [0, 0, 1, 1], [], []>} : vector<368x3xbf16>, vector<3x16xbf16>, vector<368x16xf32> -> vector<368x16xf32>
    %15 = arith.addf %9, %14 : vector<368x16xf32>
    %16 = vector.extract_strided_slice %2 {offsets = [2, 0], sizes = [368, 3], strides = [1, 1]} : vector<416x3xf32> to vector<368x3xf32>
    %17 = arith.truncf %16 : vector<368x3xf32> to vector<368x3xbf16>
    %c2 = arith.constant 2 : index
    %c0_10 = arith.constant 0 : index
    %c0_11 = arith.constant 0 : index
    %18 = vector.load %arg5[%c2, %c0_10, %c0_11] : memref<9x3x16xbf16, #tpu.memory_space<vmem>>, vector<1x3x16xbf16>
    %19 = vector.shape_cast %18 : vector<1x3x16xbf16> to vector<3x16xbf16>
    %cst_12 = arith.constant dense<0.000000e+00> : vector<368x16xf32>
    %20 = tpu.matmul %17, %19, %cst_12 {dimension_numbers = #tpu.dot_dimension_numbers<[1], [0], [0], [1], [0, 0, 1, 1], [], []>} : vector<368x3xbf16>, vector<3x16xbf16>, vector<368x16xf32> -> vector<368x16xf32>
    %21 = arith.addf %15, %20 : vector<368x16xf32>
    %22 = vector.extract_strided_slice %2 {offsets = [20, 0], sizes = [368, 3], strides = [1, 1]} : vector<416x3xf32> to vector<368x3xf32>
    %23 = arith.truncf %22 : vector<368x3xf32> to vector<368x3xbf16>
    %c3 = arith.constant 3 : index
    %c0_13 = arith.constant 0 : index
    %c0_14 = arith.constant 0 : index
    %24 = vector.load %arg5[%c3, %c0_13, %c0_14] : memref<9x3x16xbf16, #tpu.memory_space<vmem>>, vector<1x3x16xbf16>
    %25 = vector.shape_cast %24 : vector<1x3x16xbf16> to vector<3x16xbf16>
    %cst_15 = arith.constant dense<0.000000e+00> : vector<368x16xf32>
    %26 = tpu.matmul %23, %25, %cst_15 {dimension_numbers = #tpu.dot_dimension_numbers<[1], [0], [0], [1], [0, 0, 1, 1], [], []>} : vector<368x3xbf16>, vector<3x16xbf16>, vector<368x16xf32> -> vector<368x16xf32>
    %27 = arith.addf %21, %26 : vector<368x16xf32>
    %28 = vector.extract_strided_slice %2 {offsets = [21, 0], sizes = [368, 3], strides = [1, 1]} : vector<416x3xf32> to vector<368x3xf32>
    %29 = arith.truncf %28 : vector<368x3xf32> to vector<368x3xbf16>
    %c4 = arith.constant 4 : index
    %c0_16 = arith.constant 0 : index
    %c0_17 = arith.constant 0 : index
    %30 = vector.load %arg5[%c4, %c0_16, %c0_17] : memref<9x3x16xbf16, #tpu.memory_space<vmem>>, vector<1x3x16xbf16>
    %31 = vector.shape_cast %30 : vector<1x3x16xbf16> to vector<3x16xbf16>
    %cst_18 = arith.constant dense<0.000000e+00> : vector<368x16xf32>
    %32 = tpu.matmul %29, %31, %cst_18 {dimension_numbers = #tpu.dot_dimension_numbers<[1], [0], [0], [1], [0, 0, 1, 1], [], []>} : vector<368x3xbf16>, vector<3x16xbf16>, vector<368x16xf32> -> vector<368x16xf32>
    %33 = arith.addf %27, %32 : vector<368x16xf32>
    %34 = vector.extract_strided_slice %2 {offsets = [22, 0], sizes = [368, 3], strides = [1, 1]} : vector<416x3xf32> to vector<368x3xf32>
    %35 = arith.truncf %34 : vector<368x3xf32> to vector<368x3xbf16>
    %c5 = arith.constant 5 : index
    %c0_19 = arith.constant 0 : index
    %c0_20 = arith.constant 0 : index
    %36 = vector.load %arg5[%c5, %c0_19, %c0_20] : memref<9x3x16xbf16, #tpu.memory_space<vmem>>, vector<1x3x16xbf16>
    %37 = vector.shape_cast %36 : vector<1x3x16xbf16> to vector<3x16xbf16>
    %cst_21 = arith.constant dense<0.000000e+00> : vector<368x16xf32>
    %38 = tpu.matmul %35, %37, %cst_21 {dimension_numbers = #tpu.dot_dimension_numbers<[1], [0], [0], [1], [0, 0, 1, 1], [], []>} : vector<368x3xbf16>, vector<3x16xbf16>, vector<368x16xf32> -> vector<368x16xf32>
    %39 = arith.addf %33, %38 : vector<368x16xf32>
    %40 = vector.extract_strided_slice %2 {offsets = [40, 0], sizes = [368, 3], strides = [1, 1]} : vector<416x3xf32> to vector<368x3xf32>
    %41 = arith.truncf %40 : vector<368x3xf32> to vector<368x3xbf16>
    %c6 = arith.constant 6 : index
    %c0_22 = arith.constant 0 : index
    %c0_23 = arith.constant 0 : index
    %42 = vector.load %arg5[%c6, %c0_22, %c0_23] : memref<9x3x16xbf16, #tpu.memory_space<vmem>>, vector<1x3x16xbf16>
    %43 = vector.shape_cast %42 : vector<1x3x16xbf16> to vector<3x16xbf16>
    %cst_24 = arith.constant dense<0.000000e+00> : vector<368x16xf32>
    %44 = tpu.matmul %41, %43, %cst_24 {dimension_numbers = #tpu.dot_dimension_numbers<[1], [0], [0], [1], [0, 0, 1, 1], [], []>} : vector<368x3xbf16>, vector<3x16xbf16>, vector<368x16xf32> -> vector<368x16xf32>
    %45 = arith.addf %39, %44 : vector<368x16xf32>
    %46 = vector.extract_strided_slice %2 {offsets = [41, 0], sizes = [368, 3], strides = [1, 1]} : vector<416x3xf32> to vector<368x3xf32>
    %47 = arith.truncf %46 : vector<368x3xf32> to vector<368x3xbf16>
    %c7 = arith.constant 7 : index
    %c0_25 = arith.constant 0 : index
    %c0_26 = arith.constant 0 : index
    %48 = vector.load %arg5[%c7, %c0_25, %c0_26] : memref<9x3x16xbf16, #tpu.memory_space<vmem>>, vector<1x3x16xbf16>
    %49 = vector.shape_cast %48 : vector<1x3x16xbf16> to vector<3x16xbf16>
    %cst_27 = arith.constant dense<0.000000e+00> : vector<368x16xf32>
    %50 = tpu.matmul %47, %49, %cst_27 {dimension_numbers = #tpu.dot_dimension_numbers<[1], [0], [0], [1], [0, 0, 1, 1], [], []>} : vector<368x3xbf16>, vector<3x16xbf16>, vector<368x16xf32> -> vector<368x16xf32>
    %51 = arith.addf %45, %50 : vector<368x16xf32>
    %52 = vector.extract_strided_slice %2 {offsets = [42, 0], sizes = [368, 3], strides = [1, 1]} : vector<416x3xf32> to vector<368x3xf32>
    %53 = arith.truncf %52 : vector<368x3xf32> to vector<368x3xbf16>
    %c8 = arith.constant 8 : index
    %c0_28 = arith.constant 0 : index
    %c0_29 = arith.constant 0 : index
    %54 = vector.load %arg5[%c8, %c0_28, %c0_29] : memref<9x3x16xbf16, #tpu.memory_space<vmem>>, vector<1x3x16xbf16>
    %55 = vector.shape_cast %54 : vector<1x3x16xbf16> to vector<3x16xbf16>
    %cst_30 = arith.constant dense<0.000000e+00> : vector<368x16xf32>
    %56 = tpu.matmul %53, %55, %cst_30 {dimension_numbers = #tpu.dot_dimension_numbers<[1], [0], [0], [1], [0, 0, 1, 1], [], []>} : vector<368x3xbf16>, vector<3x16xbf16>, vector<368x16xf32> -> vector<368x16xf32>
    %57 = arith.addf %51, %56 : vector<368x16xf32>
    %c0_31 = arith.constant 0 : index
    %c0_32 = arith.constant 0 : index
    %58 = vector.load %arg6[%c0_31, %c0_32] : memref<1x16xf32, #tpu.memory_space<vmem>>, vector<1x16xf32>
    %59 = vector.broadcast %58 : vector<1x16xf32> to vector<368x16xf32>
    %60 = arith.addf %57, %59 : vector<368x16xf32>
    %cst_33 = arith.constant 0.000000e+00 : f32
    %61 = vector.broadcast %cst_33 : f32 to vector<368x16xf32>
    %62 = arith.maximumf %60, %61 : vector<368x16xf32>
    %c0_34 = arith.constant 0 : index
    %c0_35 = arith.constant 0 : index
    %c0_36 = arith.constant 0 : index
    %63 = vector.load %arg3[%c0_34, %c0_35, %c0_36] : memref<1x368x1xbf16, #tpu.memory_space<vmem>>, vector<1x368x1xbf16>
    %64 = vector.shape_cast %63 : vector<1x368x1xbf16> to vector<368x1xbf16>
    %65 = arith.extf %64 : vector<368x1xbf16> to vector<368x1xf32>
    %66 = vector.broadcast %65 : vector<368x1xf32> to vector<368x16xf32>
    %67 = arith.mulf %62, %66 : vector<368x16xf32>
    %cst_37 = arith.constant 0.000000e+00 : f32
    %68 = vector.broadcast %cst_37 : f32 to vector<320x32xf32>
    %69 = vector.extract_strided_slice %67 {offsets = [0, 0], sizes = [320, 16], strides = [1, 1]} : vector<368x16xf32> to vector<320x16xf32>
    %70 = arith.truncf %69 : vector<320x16xf32> to vector<320x16xbf16>
    %c0_38 = arith.constant 0 : index
    %c0_39 = arith.constant 0 : index
    %c0_40 = arith.constant 0 : index
    %71 = vector.load %arg7[%c0_38, %c0_39, %c0_40] : memref<9x16x32xbf16, #tpu.memory_space<vmem>>, vector<1x16x32xbf16>
    %72 = vector.shape_cast %71 : vector<1x16x32xbf16> to vector<16x32xbf16>
    %cst_41 = arith.constant dense<0.000000e+00> : vector<320x32xf32>
    %73 = tpu.matmul %70, %72, %cst_41 {dimension_numbers = #tpu.dot_dimension_numbers<[1], [0], [0], [1], [0, 0, 1, 1], [], []>} : vector<320x16xbf16>, vector<16x32xbf16>, vector<320x32xf32> -> vector<320x32xf32>
    %74 = arith.addf %68, %73 : vector<320x32xf32>
    %75 = vector.extract_strided_slice %67 {offsets = [1, 0], sizes = [320, 16], strides = [1, 1]} : vector<368x16xf32> to vector<320x16xf32>
    %76 = arith.truncf %75 : vector<320x16xf32> to vector<320x16xbf16>
    %c1_42 = arith.constant 1 : index
    %c0_43 = arith.constant 0 : index
    %c0_44 = arith.constant 0 : index
    %77 = vector.load %arg7[%c1_42, %c0_43, %c0_44] : memref<9x16x32xbf16, #tpu.memory_space<vmem>>, vector<1x16x32xbf16>
    %78 = vector.shape_cast %77 : vector<1x16x32xbf16> to vector<16x32xbf16>
    %cst_45 = arith.constant dense<0.000000e+00> : vector<320x32xf32>
    %79 = tpu.matmul %76, %78, %cst_45 {dimension_numbers = #tpu.dot_dimension_numbers<[1], [0], [0], [1], [0, 0, 1, 1], [], []>} : vector<320x16xbf16>, vector<16x32xbf16>, vector<320x32xf32> -> vector<320x32xf32>
    %80 = arith.addf %74, %79 : vector<320x32xf32>
    %81 = vector.extract_strided_slice %67 {offsets = [2, 0], sizes = [320, 16], strides = [1, 1]} : vector<368x16xf32> to vector<320x16xf32>
    %82 = arith.truncf %81 : vector<320x16xf32> to vector<320x16xbf16>
    %c2_46 = arith.constant 2 : index
    %c0_47 = arith.constant 0 : index
    %c0_48 = arith.constant 0 : index
    %83 = vector.load %arg7[%c2_46, %c0_47, %c0_48] : memref<9x16x32xbf16, #tpu.memory_space<vmem>>, vector<1x16x32xbf16>
    %84 = vector.shape_cast %83 : vector<1x16x32xbf16> to vector<16x32xbf16>
    %cst_49 = arith.constant dense<0.000000e+00> : vector<320x32xf32>
    %85 = tpu.matmul %82, %84, %cst_49 {dimension_numbers = #tpu.dot_dimension_numbers<[1], [0], [0], [1], [0, 0, 1, 1], [], []>} : vector<320x16xbf16>, vector<16x32xbf16>, vector<320x32xf32> -> vector<320x32xf32>
    %86 = arith.addf %80, %85 : vector<320x32xf32>
    %87 = vector.extract_strided_slice %67 {offsets = [20, 0], sizes = [320, 16], strides = [1, 1]} : vector<368x16xf32> to vector<320x16xf32>
    %88 = arith.truncf %87 : vector<320x16xf32> to vector<320x16xbf16>
    %c3_50 = arith.constant 3 : index
    %c0_51 = arith.constant 0 : index
    %c0_52 = arith.constant 0 : index
    %89 = vector.load %arg7[%c3_50, %c0_51, %c0_52] : memref<9x16x32xbf16, #tpu.memory_space<vmem>>, vector<1x16x32xbf16>
    %90 = vector.shape_cast %89 : vector<1x16x32xbf16> to vector<16x32xbf16>
    %cst_53 = arith.constant dense<0.000000e+00> : vector<320x32xf32>
    %91 = tpu.matmul %88, %90, %cst_53 {dimension_numbers = #tpu.dot_dimension_numbers<[1], [0], [0], [1], [0, 0, 1, 1], [], []>} : vector<320x16xbf16>, vector<16x32xbf16>, vector<320x32xf32> -> vector<320x32xf32>
    %92 = arith.addf %86, %91 : vector<320x32xf32>
    %93 = vector.extract_strided_slice %67 {offsets = [21, 0], sizes = [320, 16], strides = [1, 1]} : vector<368x16xf32> to vector<320x16xf32>
    %94 = arith.truncf %93 : vector<320x16xf32> to vector<320x16xbf16>
    %c4_54 = arith.constant 4 : index
    %c0_55 = arith.constant 0 : index
    %c0_56 = arith.constant 0 : index
    %95 = vector.load %arg7[%c4_54, %c0_55, %c0_56] : memref<9x16x32xbf16, #tpu.memory_space<vmem>>, vector<1x16x32xbf16>
    %96 = vector.shape_cast %95 : vector<1x16x32xbf16> to vector<16x32xbf16>
    %cst_57 = arith.constant dense<0.000000e+00> : vector<320x32xf32>
    %97 = tpu.matmul %94, %96, %cst_57 {dimension_numbers = #tpu.dot_dimension_numbers<[1], [0], [0], [1], [0, 0, 1, 1], [], []>} : vector<320x16xbf16>, vector<16x32xbf16>, vector<320x32xf32> -> vector<320x32xf32>
    %98 = arith.addf %92, %97 : vector<320x32xf32>
    %99 = vector.extract_strided_slice %67 {offsets = [22, 0], sizes = [320, 16], strides = [1, 1]} : vector<368x16xf32> to vector<320x16xf32>
    %100 = arith.truncf %99 : vector<320x16xf32> to vector<320x16xbf16>
    %c5_58 = arith.constant 5 : index
    %c0_59 = arith.constant 0 : index
    %c0_60 = arith.constant 0 : index
    %101 = vector.load %arg7[%c5_58, %c0_59, %c0_60] : memref<9x16x32xbf16, #tpu.memory_space<vmem>>, vector<1x16x32xbf16>
    %102 = vector.shape_cast %101 : vector<1x16x32xbf16> to vector<16x32xbf16>
    %cst_61 = arith.constant dense<0.000000e+00> : vector<320x32xf32>
    %103 = tpu.matmul %100, %102, %cst_61 {dimension_numbers = #tpu.dot_dimension_numbers<[1], [0], [0], [1], [0, 0, 1, 1], [], []>} : vector<320x16xbf16>, vector<16x32xbf16>, vector<320x32xf32> -> vector<320x32xf32>
    %104 = arith.addf %98, %103 : vector<320x32xf32>
    %105 = vector.extract_strided_slice %67 {offsets = [40, 0], sizes = [320, 16], strides = [1, 1]} : vector<368x16xf32> to vector<320x16xf32>
    %106 = arith.truncf %105 : vector<320x16xf32> to vector<320x16xbf16>
    %c6_62 = arith.constant 6 : index
    %c0_63 = arith.constant 0 : index
    %c0_64 = arith.constant 0 : index
    %107 = vector.load %arg7[%c6_62, %c0_63, %c0_64] : memref<9x16x32xbf16, #tpu.memory_space<vmem>>, vector<1x16x32xbf16>
    %108 = vector.shape_cast %107 : vector<1x16x32xbf16> to vector<16x32xbf16>
    %cst_65 = arith.constant dense<0.000000e+00> : vector<320x32xf32>
    %109 = tpu.matmul %106, %108, %cst_65 {dimension_numbers = #tpu.dot_dimension_numbers<[1], [0], [0], [1], [0, 0, 1, 1], [], []>} : vector<320x16xbf16>, vector<16x32xbf16>, vector<320x32xf32> -> vector<320x32xf32>
    %110 = arith.addf %104, %109 : vector<320x32xf32>
    %111 = vector.extract_strided_slice %67 {offsets = [41, 0], sizes = [320, 16], strides = [1, 1]} : vector<368x16xf32> to vector<320x16xf32>
    %112 = arith.truncf %111 : vector<320x16xf32> to vector<320x16xbf16>
    %c7_66 = arith.constant 7 : index
    %c0_67 = arith.constant 0 : index
    %c0_68 = arith.constant 0 : index
    %113 = vector.load %arg7[%c7_66, %c0_67, %c0_68] : memref<9x16x32xbf16, #tpu.memory_space<vmem>>, vector<1x16x32xbf16>
    %114 = vector.shape_cast %113 : vector<1x16x32xbf16> to vector<16x32xbf16>
    %cst_69 = arith.constant dense<0.000000e+00> : vector<320x32xf32>
    %115 = tpu.matmul %112, %114, %cst_69 {dimension_numbers = #tpu.dot_dimension_numbers<[1], [0], [0], [1], [0, 0, 1, 1], [], []>} : vector<320x16xbf16>, vector<16x32xbf16>, vector<320x32xf32> -> vector<320x32xf32>
    %116 = arith.addf %110, %115 : vector<320x32xf32>
    %117 = vector.extract_strided_slice %67 {offsets = [42, 0], sizes = [320, 16], strides = [1, 1]} : vector<368x16xf32> to vector<320x16xf32>
    %118 = arith.truncf %117 : vector<320x16xf32> to vector<320x16xbf16>
    %c8_70 = arith.constant 8 : index
    %c0_71 = arith.constant 0 : index
    %c0_72 = arith.constant 0 : index
    %119 = vector.load %arg7[%c8_70, %c0_71, %c0_72] : memref<9x16x32xbf16, #tpu.memory_space<vmem>>, vector<1x16x32xbf16>
    %120 = vector.shape_cast %119 : vector<1x16x32xbf16> to vector<16x32xbf16>
    %cst_73 = arith.constant dense<0.000000e+00> : vector<320x32xf32>
    %121 = tpu.matmul %118, %120, %cst_73 {dimension_numbers = #tpu.dot_dimension_numbers<[1], [0], [0], [1], [0, 0, 1, 1], [], []>} : vector<320x16xbf16>, vector<16x32xbf16>, vector<320x32xf32> -> vector<320x32xf32>
    %122 = arith.addf %116, %121 : vector<320x32xf32>
    %123 = arith.truncf %122 : vector<320x32xf32> to vector<320x32xbf16>
    %c0_74 = arith.constant 0 : index
    %c0_75 = arith.constant 0 : index
    %c0_76 = arith.constant 0 : index
    %124 = vector.load %arg8[%c0_74, %c0_75, %c0_76] : memref<1x320x32xbf16, #tpu.memory_space<vmem>>, vector<1x320x32xbf16>
    %125 = vector.shape_cast %124 : vector<1x320x32xbf16> to vector<320x32xbf16>
    %126 = vector.shape_cast %123 : vector<320x32xbf16> to vector<1x320x32xbf16>
    tpu.vector_store %arg8[%c0_74, %c0_75, %c0_76], %126 {strides = array<i32>} : memref<1x320x32xbf16, #tpu.memory_space<vmem>>, vector<1x320x32xbf16>,
    %c0_77 = arith.constant 0 : index
    %c0_78 = arith.constant 0 : index
    %127 = vector.load %arg4[%c0_77, %c0_78] : memref<320x1xbf16, #tpu.memory_space<vmem>>, vector<320x1xbf16>
    %cst_79 = arith.constant 0.000000e+00 : bf16
    %128 = vector.broadcast %cst_79 : bf16 to vector<320x1xbf16>
    %129 = arith.cmpf ogt, %127, %128 : vector<320x1xbf16>
    %cst_80 = arith.constant 0.000000e+00 : f32
    %130 = vector.shape_cast %129 : vector<320x1xi1> to vector<320x1xi1>
    %131 = vector.broadcast %130 : vector<320x1xi1> to vector<320x32xi1>
    %132 = vector.broadcast %cst_80 : f32 to vector<320x32xf32>
    %133 = arith.select %131, %122, %132 : vector<320x32xi1>, vector<320x32xf32>
    %cst_81 = arith.constant dense<0.000000e+00> : vector<32xf32>
    %134 = vector.multi_reduction <add>, %133, %cst_81 [0] : vector<320x32xf32> to vector<32xf32>
    %135 = vector.shape_cast %134 : vector<32xf32> to vector<1x32xf32>
    %c0_82 = arith.constant 0 : index
    %c0_83 = arith.constant 0 : index
    %c0_84 = arith.constant 0 : index
    %136 = vector.load %arg9[%c0_82, %c0_83, %c0_84] : memref<1x1x32xf32, #tpu.memory_space<vmem>>, vector<1x1x32xf32>
    %137 = vector.shape_cast %136 : vector<1x1x32xf32> to vector<1x32xf32>
    %138 = vector.shape_cast %135 : vector<1x32xf32> to vector<1x1x32xf32>
    tpu.vector_store %arg9[%c0_82, %c0_83, %c0_84], %138 {strides = array<i32>} : memref<1x1x32xf32, #tpu.memory_space<vmem>>, vector<1x1x32xf32>,
    %139 = arith.mulf %122, %122 : vector<320x32xf32>
    %cst_85 = arith.constant 0.000000e+00 : f32
    %140 = vector.shape_cast %129 : vector<320x1xi1> to vector<320x1xi1>
    %141 = vector.broadcast %140 : vector<320x1xi1> to vector<320x32xi1>
    %142 = vector.broadcast %cst_85 : f32 to vector<320x32xf32>
    %143 = arith.select %141, %139, %142 : vector<320x32xi1>, vector<320x32xf32>
    %cst_86 = arith.constant dense<0.000000e+00> : vector<32xf32>
    %144 = vector.multi_reduction <add>, %143, %cst_86 [0] : vector<320x32xf32> to vector<32xf32>
    %145 = vector.shape_cast %144 : vector<32xf32> to vector<1x32xf32>
    %c0_87 = arith.constant 0 : index
    %c0_88 = arith.constant 0 : index
    %c0_89 = arith.constant 0 : index
    %146 = vector.load %arg10[%c0_87, %c0_88, %c0_89] : memref<1x1x32xf32, #tpu.memory_space<vmem>>, vector<1x1x32xf32>
    %147 = vector.shape_cast %146 : vector<1x1x32xf32> to vector<1x32xf32>
    %148 = vector.shape_cast %145 : vector<1x32xf32> to vector<1x1x32xf32>
    tpu.vector_store %arg10[%c0_87, %c0_88, %c0_89], %148 {strides = array<i32>} : memref<1x1x32xf32, #tpu.memory_space<vmem>>, vector<1x1x32xf32>,
    return
  }
  func.func @transform_0(%arg0: i32, %arg1: i32) -> (i32, i32, i32, i32) {
    %c0_i32 = arith.constant 0 : i32
    %c0_i32_0 = arith.constant 0 : i32
    %c0_i32_1 = arith.constant 0 : i32
    return %arg0, %arg1, %c0_i32, %c0_i32_0 : i32, i32, i32, i32
  }
  func.func @transform_1(%arg0: i32, %arg1: i32) -> (i32, i32, i32) {
    %c0_i32 = arith.constant 0 : i32
    %c0_i32_0 = arith.constant 0 : i32
    %c0_i32_1 = arith.constant 0 : i32
    return %arg1, %c0_i32, %c0_i32_0 : i32, i32, i32
  }
  func.func @transform_2(%arg0: i32, %arg1: i32) -> (i32, i32) {
    %c0_i32 = arith.constant 0 : i32
    %c0_i32_0 = arith.constant 0 : i32
    %c0_i32_1 = arith.constant 0 : i32
    return %c0_i32, %c0_i32_0 : i32, i32
  }
  func.func @transform_3(%arg0: i32, %arg1: i32) -> (i32, i32, i32) {
    %c0_i32 = arith.constant 0 : i32
    %c0_i32_0 = arith.constant 0 : i32
    %c0_i32_1 = arith.constant 0 : i32
    %c0_i32_2 = arith.constant 0 : i32
    return %c0_i32, %c0_i32_0, %c0_i32_1 : i32, i32, i32
  }
  func.func @transform_4(%arg0: i32, %arg1: i32) -> (i32, i32) {
    %c0_i32 = arith.constant 0 : i32
    %c0_i32_0 = arith.constant 0 : i32
    %c0_i32_1 = arith.constant 0 : i32
    return %c0_i32, %c0_i32_0 : i32, i32
  }
  func.func @transform_5(%arg0: i32, %arg1: i32) -> (i32, i32, i32) {
    %c0_i32 = arith.constant 0 : i32
    %c0_i32_0 = arith.constant 0 : i32
    %c0_i32_1 = arith.constant 0 : i32
    %c0_i32_2 = arith.constant 0 : i32
    return %c0_i32, %c0_i32_0, %c0_i32_1 : i32, i32, i32
  }
  func.func @transform_6(%arg0: i32, %arg1: i32) -> (i32, i32, i32) {
    %c1_i32 = arith.constant 1 : i32
    %0 = arith.muli %arg0, %c1_i32 : i32
    %1 = arith.addi %0, %arg1 : i32
    %c0_i32 = arith.constant 0 : i32
    %c0_i32_0 = arith.constant 0 : i32
    %c0_i32_1 = arith.constant 0 : i32
    return %1, %c0_i32, %c0_i32_0 : i32, i32, i32
  }
  func.func @transform_7(%arg0: i32, %arg1: i32) -> (i32, i32, i32) {
    %c1_i32 = arith.constant 1 : i32
    %0 = arith.muli %arg0, %c1_i32 : i32
    %1 = arith.addi %0, %arg1 : i32
    %c0_i32 = arith.constant 0 : i32
    %c0_i32_0 = arith.constant 0 : i32
    %c0_i32_1 = arith.constant 0 : i32
    return %1, %c0_i32, %c0_i32_0 : i32, i32, i32
  }
  func.func @transform_8(%arg0: i32, %arg1: i32) -> (i32, i32, i32) {
    %c1_i32 = arith.constant 1 : i32
    %0 = arith.muli %arg0, %c1_i32 : i32
    %1 = arith.addi %0, %arg1 : i32
    %c0_i32 = arith.constant 0 : i32
    %c0_i32_0 = arith.constant 0 : i32
    %c0_i32_1 = arith.constant 0 : i32
    return %1, %c0_i32, %c0_i32_0 : i32, i32, i32
  }
}

</mosaic_0001>

<bundles_post_ra>
// kernel: vgg16bn_features_forward.1
= control target key start
LH: loop header
LB: loop body
LE: loop exit
PB: predicated region body
PF: predicated region fallthrough
CT: control target
= control target key end

     0   :  { %s11571_s27 = smov 0   ;;  %s11573_s28 = smov 0   ;;  %s16773_s0 = inlined_call_operand.vmem [shape: bf16[2,1,416,3], index: 0, kind: input, shape index: {}]   ;;  %s16774_s1 = inlined_call_operand.vmem [shape: bf16[1,368,1], index: 1, kind: input, shape index: {}]   ;;  %s16775_s2 = inlined_call_operand.vmem [shape: bf16[320,1], index: 2, kind: input, shape index: {}]   ;;  %s16776_s3 = inlined_call_operand.vmem [shape: bf16[9,3,16], index: 3, kind: input, shape index: {}]   ;;  %s16777_s4 = inlined_call_operand.vmem [shape: f32[1,16], index: 4, kind: input, shape index: {}]   ;;  %s16778_s5 = inlined_call_operand.vmem [shape: bf16[9,16,32], index: 5, kind: input, shape index: {}]   ;;  %s16779_s6 = inlined_call_operand.vmem [shape: bf16[2,320,32], index: 6, kind: output, shape index: {0}]   ;;  %s16780_s7 = inlined_call_operand.vmem [shape: f32[2,1,32], index: 7, kind: output, shape index: {1}]   ;;  %s16781_s8 = inlined_call_operand.vmem [shape: f32[2,1,32], index: 8, kind: output, shape index: {2}]  }
   0x1   :  { %s11575_s29 = smov 0  }
   0x2 LB: > { %s31_s30 = sadd.s32 1, %s11516_s28  ;;  %p8949_p0 = scmp.ge.s32.totalorder %s11520_s29, 1  ;;  %s11520_s29 = sphi %s11575_s29, %s19_s29   ;;  %s11516_s28 = sphi %s11573_s28, %s17495_s28   ;;  %s11512_s27 = sphi %s11571_s27, %s17494_s27  }
   0x3   : > { %p33_p1 = scmp.ge.s32.totalorder %s31_s30, 2  ;;  %p301_p2 = scmp.lt.s32.totalorder %s11520_s29, 3 }
   0x5   : > { %s17497_s30 = smov (%p33_p1, %s31_s30), 0  ;;  %p302_p3 = pnand %p8949_p0, %p301_p2 }
   0x7   : > { %305 = sbr.rel (%p302_p3) target bundleno = 1797 (0x705), region = 44 }
   0xc   : > { %v8976_v0 = vld [vmem:[%s16776_s3 + $0x2] sm:$0x3]  ;;  %vm777_vm0 = vcmask 1040384   ;;  %vm778_vm1 = vcmask 1041408   ;;  %v16823_v1 = vmov 0.0   ;;  %v11523_v2 = vmov 65535  }
   0xd   : > { %10024 = vmatprep.subr.bf16.mxu0 %v16823_v1  ;;  %v779_v3 = vsel %vm777_vm0, 4294967295, %v11523_v2  ;;  %p353_p4 = scmp.lt.s32.totalorder %s11512_s27, 1  ;;  %11248 = vmatprep.subr.bf16.mxu1 %v16823_v1  ;;  %vm11524_vm2 = vmmov 0   ;;  %v514_v5 = vld [vmem:[%s16776_s3] sm:$0x3]  ;;  %vm707_vm3 = vcmask 23552  }
   0xe   : > { %v11594_v4 = vsel %vm778_vm1, %v779_v3, 0  ;;  %10026 = vmatprep.mubr.msk.bf16.mxu0 %vm11524_vm2, %v16823_v1  ;;  %10132 = vmatprep.mubr.msk.bf16.mxu1 %vm11524_vm2, %v16823_v1  ;;  %vm518_vm4 = vsmask.f32 7424  ;;  %vm1682_vm5 = vcmask 1045504   ;;  %vm1293_vm6 = vcmask 1046528  }
   0xf   : > { %v782_v6 = vand.u32 %v8976_v0, %v11594_v4  ;;  %s17499_s27 = smov (!%p353_p4, %s11512_s27), 1  ;;  %v1048_v7 = vand.u32 %v11594_v4, %v514_v5  ;;  %vm2067_vm7 = vsmask.f32 5376  ;;  %vm2510_vm8 = vcmask 1044480  }
  0x10   : > { %s11250_s13 = smul.u32 208, %s17499_s27  ;;  %s377_s12 = scalar_lea.vmem %s16780_s7, %s17499_s27 }
  0x11   : > { %10025 = vmatpush3.bf16.msra.mxu0 %v782_v6  ;;  %11249 = vmatpush3.bf16.msra.mxu1 %v1048_v7  ;;  %s11251_s25 = smul.u32 160, %s17499_s27  ;;  %s382_s15 = scalar_lea.vmem %s16781_s8, %s17499_s27 }
  0x12   : > { %10118 = vmatprep.subr.bf16.mxu0 %v16823_v1  ;;  %10306 = vmatprep.subr.bf16.mxu1 %v16823_v1  ;;  %s11613_s16 = scalar_lea.vmem %s16773_s0, %s11250_s13 }
  0x13   : > { %v11616_v8 = vld [vmem:[%s11613_s16] sm:$0xff]   ;;  %v11619_v9 = vld [vmem:[%s11613_s16 + $0x8] sm:$0xff]   ;;  %v391_v10 = vld [vmem:[%s11613_s16 + $0x10] sm:$0xf]  ;;  %s16251_s9 = scalar_lea.vmem %s16779_s6, %s11251_s25 }
  0x14   : > { %v392_v11 = vld [vmem:[%s11613_s16 + $0x14] sm:$0xf]  ;;  %v393_v12 = vld [vmem:[%s11613_s16 + $0x18] sm:$0xf]  ;;  %v520_v13 = vshrl.u32 %v11616_v8, 16  ;;  %v522_v14 = vshll.u32 %v11616_v8, 16 }
  0x15   : > { %v527_v15 = vshll.u32 %v11619_v9, 16  ;;  %v11627_v16 = vcombine.low %v391_v10, %v392_v11  ;;  %v394_v17 = vld [vmem:[%s11613_s16 + $0x1c] sm:$0xf]  ;;  %v531_v18 = vshrl.u32 %v11619_v9, 16  ;;  %v395_v31 = vld [vmem:[%s11613_s16 + $0x20] sm:$0xf] }
  0x16   : > { %v11631_v19 = vcombine.low %v393_v12, %v394_v17  ;;  %v524_v20 = vrot.slane %v522_v14, 1  ;;  %v396_v32 = vld [vmem:[%s11613_s16 + $0x24] sm:$0xf]  ;;  %v397_v39 = vld [vmem:[%s11613_s16 + $0x28] sm:$0xf] }
  0x17   : > { %v529_v21 = vrot.slane %v527_v15, 1  ;;  %v11633_v22 = vrot.slane %v527_v15, 3  ;;  %v535_v23 = vshll.u32 %v11627_v16, 16  ;;  %v11636_v24 = vrot.slane %v531_v18, 2  ;;  %v398_v40 = vld [vmem:[%s11613_s16 + $0x2c] sm:$0xf] }
  0x18   : > { %v539_v25 = vshrl.u32 %v11627_v16, 16  ;;  %10133 = vmatmul.mubr.msk.bf16.vlgmr.msra.gmra.mxu1 %vm707_vm3, %v11631_v19  ;;  %v525_v26 = vor.u32 %v524_v20, %v520_v13  ;;  %v11653_v36 = vcombine.low %v395_v31, %v396_v32  ;;  %v16821_v38 = vshll.u32 %v11631_v19, 16  ;;  %v399_v47 = vld [vmem:[%s11613_s16 + $0x30] sm:$0xf]  ;;  %v400_v48 = vld [vmem:[%s11613_s16 + $0x34] sm:$0xf] }
  0x19   : > { %v2072_v27 = vrot.slane %v535_v23, 3  ;;  %10136 = vmatprep.mubr.msk.bf16.mxu1 %vm11524_vm2, %v16823_v1  ;;  %v533_v34 = vor.u32 %v531_v18, %v529_v21  ;;  %v537_v35 = vrot.slane %v535_v23, 1  ;;  %v11669_v43 = vcombine.low %v397_v39, %v398_v40  ;;  %v401_v55 = vld [vmem:[%s11613_s16 + $0x38] sm:$0xf]  ;;  %v402_v56 = vld [vmem:[%s11613_s16 + $0x3c] sm:$0xf] }
  0x1a   : > { %v2071_v29 = vrot.slane %v539_v25, 2  ;;  %v530_v30 = vsel %vm518_vm4, %v525_v26, %v529_v21  ;;  %v545_v42 = vrot.slane %v16821_v38, 1  ;;  %v16820_v45 = vshrl.u32 %v11631_v19, 16  ;;  %v403_v63 = vld [vmem:[%s11613_s16 + $0x40] sm:$0xf] }
  0x1b   : > { %10027 = vmatmul.mubr.msk.bf16.vlgmr.msra.gmra.mxu0 %vm707_vm3, %v530_v30  ;;  %v538_v37 = vsel %vm518_vm4, %v533_v34, %v537_v35  ;;  %v541_v41 = vor.u32 %v539_v25, %v537_v35  ;;  %v16819_v46 = vshll.u32 %v11653_v36, 16  ;;  %v11687_v51 = vcombine.low %v399_v47, %v400_v48  ;;  %v404_v0 = vld [vmem:[%s11613_s16 + $0x44] sm:$0xf]  ;;  %v405_v11 = vld [vmem:[%s11613_s16 + $0x48] sm:$0xf] }
  0x1c   : > { %v11649_v33 = vor.u32 %v2072_v27, %v2071_v29  ;;  %10119 = vmatpush3.bf16.msra.mxu0 %v1048_v7  ;;  %10030 = vmatprep.mubr.msk.bf16.mxu0 %vm11524_vm2, %v16823_v1  ;;  %v549_v49 = vor.u32 %v16820_v45, %v545_v42  ;;  %v16818_v53 = vshrl.u32 %v11653_v36, 16  ;;  %v16817_v54 = vshll.u32 %v11669_v43, 16  ;;  %v406_v12 = vld [vmem:[%s11613_s16 + $0x4c] sm:$0xf]  ;;  %v407_v21 = vld [vmem:[%s11613_s16 + $0x50] sm:$0xf] }
  0x1d   : > { %10212 = vmatprep.subr.bf16.mxu0 %v16823_v1  ;;  %v546_v44 = vsel %vm518_vm4, %v541_v41, %v545_v42  ;;  %v553_v50 = vrot.slane %v16819_v46, 1  ;;  %v11705_v59 = vcombine.low %v401_v55, %v402_v56  ;;  %v16816_v61 = vshrl.u32 %v11669_v43, 16  ;;  %v408_v23 = vld [vmem:[%s11613_s16 + $0x54] sm:$0xf]  ;;  %v11756_v26 = vld [vmem:[%s11613_s16 + $0xb8] sm:$0xf] }
  0x1e   : > { %v561_v58 = vrot.slane %v16817_v54, 1  ;;  %v16815_v62 = vshll.u32 %v11687_v51, 16  ;;  %v11723_v5 = vcombine.low %v403_v63, %v404_v0  ;;  %v16814_v7 = vshrl.u32 %v11687_v51, 16  ;;  %v11753_v25 = vld [vmem:[%s11613_s16 + $0xb4] sm:$0xf] }
  0x1f   : > { %v554_v52 = vsel %vm518_vm4, %v549_v49, %v553_v50  ;;  %v557_v57 = vor.u32 %v16818_v53, %v553_v50  ;;  %v16813_v10 = vshll.u32 %v11705_v59, 16  ;;  %v11741_v15 = vcombine.low %v405_v11, %v406_v12  ;;  %v410_v39 = vld [vmem:[%s11613_s16 + $0x5c] sm:$0xf]  ;;  %v411_v49 = vld [vmem:[%s11613_s16 + $0x60] sm:$0xf] }
  0x20   : > { %10137 = vmatmul.mubr.msk.bf16.gmra.mxu1 %vm707_vm3, %v11653_v36  ;;  %v565_v2 = vor.u32 %v16816_v61, %v561_v58  ;;  %v569_v3 = vrot.slane %v16815_v62, 1  ;;  %v16812_v18 = vshrl.u32 %v11705_v59, 16  ;;  %v16811_v20 = vshll.u32 %v11723_v5, 16  ;;  %v412_v50 = vld [vmem:[%s11613_s16 + $0x64] sm:$0xf] }
  0x21   : > { %10140 = vmatprep.mubr.msk.bf16.mxu1 %vm11524_vm2, %v16823_v1  ;;  %v562_v60 = vsel %vm518_vm4, %v557_v57, %v561_v58  ;;  %v577_v14 = vrot.slane %v16813_v10, 1  ;;  %v11761_v27 = vcombine.low %v11753_v25, %v11756_v26  ;;  %v11769_v31 = vcombine.low %v407_v21, %v408_v23  ;;  %v413_v63 = vld [vmem:[%s11613_s16 + $0x68] sm:$0xf]  ;;  %v414_v0 = vld [vmem:[%s11613_s16 + $0x6c] sm:$0xf] }
  0x22   : > { %v570_v6 = vsel %vm518_vm4, %v565_v2, %v569_v3  ;;  %v573_v13 = vor.u32 %v16814_v7, %v569_v3  ;;  %v585_v30 = vrot.slane %v16811_v20, 1  ;;  %v16810_v34 = vshrl.u32 %v11723_v5, 16  ;;  %v9049_v11 = vld [vmem:[%s16776_s3 + $0x6] sm:$0x3]  ;;  %v415_v21 = vld [vmem:[%s11613_s16 + $0x70] sm:$0xf] }
  0x23   : > { %10031 = vmatmul.mubr.msk.bf16.gmra.mxu0 %vm707_vm3, %v538_v37  ;;  %16853 = vst [vmem:[#allocation2_spill] sm:$0xff] %v11761_v27  ;;  %v581_v29 = vor.u32 %v16812_v18, %v577_v14  ;;  %v16809_v35 = vshll.u32 %v11741_v15, 16  ;;  %v409_v37 = vld [vmem:[%s11613_s16 + $0x58] sm:$0xf]  ;;  %v16808_v47 = vshrl.u32 %v11741_v15, 16  ;;  %v16807_v48 = vshll.u32 %v11769_v31, 16 }
  0x24   : > { %10034 = vmatprep.mubr.msk.bf16.mxu0 %vm11524_vm2, %v16823_v1  ;;  %v578_v17 = vsel %vm518_vm4, %v573_v13, %v577_v14  ;;  %v589_v40 = vor.u32 %v16810_v34, %v585_v30  ;;  %v11787_v42 = vcombine.low %v409_v37, %v410_v39  ;;  %v11805_v56 = vcombine.low %v411_v49, %v412_v50  ;;  %v416_v23 = vld [vmem:[%s11613_s16 + $0x74] sm:$0xf] }
  0x25   : > { %v586_v32 = vsel %vm518_vm4, %v581_v29, %v585_v30  ;;  %v593_v41 = vrot.slane %v16809_v35, 1  ;;  %v601_v55 = vrot.slane %v16807_v48, 1  ;;  %v16806_v58 = vshrl.u32 %v11769_v31, 16 }
  0x26   : > { %v16804_v13 = vshrl.u32 %v11787_v42, 16  ;;  %v16803_v14 = vshll.u32 %v11805_v56, 16  ;;  %v16802_v39 = vshrl.u32 %v11805_v56, 16 }
  0x27   : > { %v605_v2 = vor.u32 %v16806_v58, %v601_v55 }
  0x28   : > { %10141 = vmatmul.mubr.msk.bf16.gmra.mxu1 %vm707_vm3, %v11669_v43  ;;  %v617_v30 = vrot.slane %v16803_v14, 1 }
  0x29   : > { %10144 = vmatprep.mubr.msk.bf16.mxu1 %vm11524_vm2, %v16823_v1 }
  0x2a   : > { %v621_v49 = vor.u32 %v16802_v39, %v617_v30 }
  0x2b   : > { %10035 = vmatmul.mubr.msk.bf16.gmra.mxu0 %vm707_vm3, %v546_v44  ;;  %v594_v44 = vsel %vm518_vm4, %v589_v40, %v593_v41 }
  0x2c   : > { %10038 = vmatprep.mubr.msk.bf16.mxu0 %vm11524_vm2, %v16823_v1 }
  0x30   : > { %10145 = vmatmul.mubr.msk.bf16.gmra.mxu1 %vm707_vm3, %v11687_v51 }
  0x31   : > { %10148 = vmatprep.mubr.msk.bf16.mxu1 %vm11524_vm2, %v16823_v1 }
  0x33   : > { %10039 = vmatmul.mubr.msk.bf16.gmra.mxu0 %vm707_vm3, %v554_v52  ;;  %v597_v52 = vor.u32 %v16808_v47, %v593_v41  ;;  %v417_v41 = vld [vmem:[%s11613_s16 + $0x78] sm:$0xf] }
  0x34   : > { %10042 = vmatprep.mubr.msk.bf16.mxu0 %vm11524_vm2, %v16823_v1 }
  0x35   : > { %v602_v57 = vsel %vm518_vm4, %v597_v52, %v601_v55 }
  0x38   : > { %10149 = vmatmul.mubr.msk.bf16.gmra.mxu1 %vm707_vm3, %v11705_v59 }
  0x39   : > { %10152 = vmatprep.mubr.msk.bf16.mxu1 %vm11524_vm2, %v16823_v1 }
  0x3b   : > { %10043 = vmatmul.mubr.msk.bf16.gmra.mxu0 %vm707_vm3, %v562_v60  ;;  %v16805_v60 = vshll.u32 %v11787_v42, 16 }
  0x3c   : > { %10046 = vmatprep.mubr.msk.bf16.mxu0 %vm11524_vm2, %v16823_v1 }
  0x3d   : > { %v609_v3 = vrot.slane %v16805_v60, 1 }
  0x3f   : > { %v610_v12 = vsel %vm518_vm4, %v605_v2, %v609_v3  ;;  %v613_v29 = vor.u32 %v16804_v13, %v609_v3  ;;  %v420_v2 = vld [vmem:[%s11613_s16 + $0x84] sm:$0xf] }
  0x40   : > { %10153 = vmatmul.mubr.msk.bf16.gmra.mxu1 %vm707_vm3, %v11723_v5 }
  0x41   : > { %10156 = vmatprep.mubr.msk.bf16.mxu1 %vm11524_vm2, %v16823_v1  ;;  %v618_v37 = vsel %vm518_vm4, %v613_v29, %v617_v30  ;;  %v421_v29 = vld [vmem:[%s11613_s16 + $0x88] sm:$0xf]  ;;  %v422_v30 = vld [vmem:[%s11613_s16 + $0x8c] sm:$0xf] }
  0x43   : > { %10047 = vmatmul.mubr.msk.bf16.gmra.mxu0 %vm707_vm3, %v570_v6  ;;  %v11823_v6 = vcombine.low %v413_v63, %v414_v0  ;;  %v419_v0 = vld [vmem:[%s11613_s16 + $0x80] sm:$0xf] }
  0x44   : > { %10050 = vmatprep.mubr.msk.bf16.mxu0 %vm11524_vm2, %v16823_v1 }
  0x45   : > { %v16801_v40 = vshll.u32 %v11823_v6, 16 }
  0x47   : > { %v625_v50 = vrot.slane %v16801_v40, 1 }
  0x48   : > { %10157 = vmatmul.mubr.msk.bf16.gmra.mxu1 %vm707_vm3, %v11741_v15 }
  0x49   : > { %10160 = vmatprep.mubr.msk.bf16.mxu1 %vm11524_vm2, %v16823_v1  ;;  %v626_v55 = vsel %vm518_vm4, %v621_v49, %v625_v50 }
  0x4b   : > { %10051 = vmatmul.mubr.msk.bf16.gmra.mxu0 %vm707_vm3, %v578_v17  ;;  %v1800_v17 = vand.u32 %v9049_v11, %v11594_v4 }
  0x4c   : > { %10054 = vmatprep.mubr.msk.bf16.mxu0 %vm11524_vm2, %v16823_v1 }
  0x4d   : > { %10307 = vmatpush3.bf16.msra.mxu1 %v1800_v17 }
  0x4e   : > { %10494 = vmatprep.subr.bf16.mxu1 %v16823_v1 }
  0x50   : > { %10161 = vmatmul.mubr.msk.bf16.gmra.mxu1 %vm707_vm3, %v11769_v31 }
  0x51   : > { %10164 = vmatprep.mubr.msk.bf16.mxu1 %vm11524_vm2, %v16823_v1 }
  0x53   : > { %10055 = vmatmul.mubr.msk.bf16.gmra.mxu0 %vm707_vm3, %v586_v32  ;;  %v11846_v32 = vcombine.low %v415_v21, %v416_v23 }
  0x54   : > { %10058 = vmatprep.mubr.msk.bf16.mxu0 %vm11524_vm2, %v16823_v1 }
  0x55   : > { %v16790_v63 = vshll.u32 %v11846_v32, 16  ;;  %v16787_v21 = vshrl.u32 %v11846_v32, 16 }
  0x57   : > { %v633_v11 = vrot.slane %v16790_v63, 1  ;;  %v431_v63 = vld [vmem:[%s11613_s16 + $0xb0] sm:$0xf] }
  0x58   : > { %10165 = vmatmul.mubr.msk.bf16.gmra.mxu1 %vm707_vm3, %v11787_v42 }
  0x59   : > { %10168 = vmatprep.mubr.msk.bf16.mxu1 %vm11524_vm2, %v16823_v1 }
  0x5b   : > { %10059 = vmatmul.mubr.msk.bf16.gmra.mxu0 %vm707_vm3, %v594_v44  ;;  %v418_v44 = vld [vmem:[%s11613_s16 + $0x7c] sm:$0xf] }
  0x5c   : > { %10062 = vmatprep.mubr.msk.bf16.mxu0 %vm11524_vm2, %v16823_v1  ;;  %v11864_v52 = vcombine.low %v417_v41, %v418_v44  ;;  %v11900_v44 = vcombine.low %v421_v29, %v422_v30 }
  0x5e   : > { %v16786_v23 = vshll.u32 %v11864_v52, 16 }
  0x60   : > { %10169 = vmatmul.mubr.msk.bf16.gmra.mxu1 %vm707_vm3, %v11805_v56  ;;  %v641_v41 = vrot.slane %v16786_v23, 1 }
  0x61   : > { %10172 = vmatprep.mubr.msk.bf16.mxu1 %vm11524_vm2, %v16823_v1 }
  0x63   : > { %10063 = vmatmul.mubr.msk.bf16.gmra.mxu0 %vm707_vm3, %v602_v57  ;;  %v16795_v57 = vshrl.u32 %v11823_v6, 16 }
  0x64   : > { %10066 = vmatprep.mubr.msk.bf16.mxu0 %vm11524_vm2, %v16823_v1 }
  0x65   : > { %v629_v3 = vor.u32 %v16795_v57, %v625_v50  ;;  %v16783_v50 = vshrl.u32 %v11864_v52, 16 }
  0x67   : > { %v634_v17 = vsel %vm518_vm4, %v629_v3, %v633_v11  ;;  %v645_v3 = vor.u32 %v16783_v50, %v641_v41  ;;  %v16789_v50 = vshrl.u32 %v11900_v44, 16 }
  0x68   : > { %10173 = vmatmul.mubr.msk.bf16.gmra.mxu1 %vm707_vm3, %v11823_v6 }
  0x69   : > { %10176 = vmatprep.mubr.msk.bf16.mxu1 %vm11524_vm2, %v16823_v1 }
  0x6b   : > { %10067 = vmatmul.mubr.msk.bf16.gmra.mxu0 %vm707_vm3, %v610_v12  ;;  %v11882_v12 = vcombine.low %v419_v0, %v420_v2  ;;  %v423_v0 = vld [vmem:[%s11613_s16 + $0x90] sm:$0xf]  ;;  %v424_v2 = vld [vmem:[%s11613_s16 + $0x94] sm:$0xf] }
  0x6c   : > { %10070 = vmatprep.mubr.msk.bf16.mxu0 %vm11524_vm2, %v16823_v1 }
  0x6d   : > { %v16784_v30 = vshrl.u32 %v11882_v12, 16 }
  0x70   : > { %10177 = vmatmul.mubr.msk.bf16.gmra.mxu1 %vm707_vm3, %v11846_v32 }
  0x71   : > { %10180 = vmatprep.mubr.msk.bf16.mxu1 %vm11524_vm2, %v16823_v1 }
  0x73   : > { %10071 = vmatmul.mubr.msk.bf16.gmra.mxu0 %vm707_vm3, %v618_v37  ;;  %v637_v37 = vor.u32 %v16787_v21, %v633_v11  ;;  %v429_v21 = vld [vmem:[%s11613_s16 + $0xa8] sm:$0xf] }
  0x74   : > { %10074 = vmatprep.mubr.msk.bf16.mxu0 %vm11524_vm2, %v16823_v1 }
  0x75   : > { %v642_v49 = vsel %vm518_vm4, %v637_v37, %v641_v41  ;;  %v16785_v37 = vshll.u32 %v11900_v44, 16  ;;  %v425_v41 = vld [vmem:[%s11613_s16 + $0x98] sm:$0xf] }
  0x78   : > { %10181 = vmatmul.mubr.msk.bf16.gmra.mxu1 %vm707_vm3, %v11864_v52 }
  0x79   : > { %10184 = vmatprep.mubr.msk.bf16.mxu1 %vm11524_vm2, %v16823_v1 }
  0x7b   : > { %10075 = vmatmul.mubr.msk.bf16.gmra.mxu0 %vm707_vm3, %v626_v55  ;;  %v16782_v55 = vshll.u32 %v11882_v12, 16 }
  0x7c   : > { %10078 = vmatprep.mubr.msk.bf16.mxu0 %vm11524_vm2, %v16823_v1 }
  0x7d   : > { %v649_v11 = vrot.slane %v16782_v55, 1 }
  0x7f   : > { %v650_v29 = vsel %vm518_vm4, %v645_v3, %v649_v11 }
  0x80   : > { %10185 = vmatmul.mubr.msk.bf16.gmra.mxu1 %vm707_vm3, %v11882_v12 }
  0x81   : > { %10188 = vmatprep.mubr.msk.bf16.mxu1 %vm11524_vm2, %v16823_v1 }
  0x83   : > { %10079 = vmatmul.mubr.msk.bf16.gmra.mxu0 %vm707_vm3, %v634_v17  ;;  %v11918_v17 = vcombine.low %v423_v0, %v424_v2  ;;  %v653_v0 = vor.u32 %v16784_v30, %v649_v11  ;;  %v657_v2 = vrot.slane %v16785_v37, 1  ;;  %v427_v11 = vld [vmem:[%s11613_s16 + $0xa0] sm:$0xf]  ;;  %v428_v30 = vld [vmem:[%s11613_s16 + $0xa4] sm:$0xf] }
  0x84   : > { %10082 = vmatprep.mubr.msk.bf16.mxu0 %vm11524_vm2, %v16823_v1 }
  0x85   : > { %v658_v55 = vsel %vm518_vm4, %v653_v0, %v657_v2  ;;  %v11954_v0 = vcombine.low %v427_v11, %v428_v30  ;;  %v16794_v23 = vshrl.u32 %v11918_v17, 16 }
  0x88   : > { %10189 = vmatmul.mubr.msk.bf16.gmra.mxu1 %vm707_vm3, %v11900_v44 }
  0x89   : > { %10192 = vmatprep.mubr.msk.bf16.mxu1 %vm11524_vm2, %v16823_v1 }
  0x8b   : > { %10083 = vmatmul.mubr.msk.bf16.gmra.mxu0 %vm707_vm3, %v642_v49  ;;  %v426_v49 = vld [vmem:[%s11613_s16 + $0x9c] sm:$0xf] }
  0x8c   : > { %10086 = vmatprep.mubr.msk.bf16.mxu0 %vm11524_vm2, %v16823_v1  ;;  %v11936_v3 = vcombine.low %v425_v41, %v426_v49  ;;  %v661_v41 = vor.u32 %v16789_v50, %v657_v2  ;;  %v430_v2 = vld [vmem:[%s11613_s16 + $0xac] sm:$0xf] }
  0x8e   : > { %v16792_v50 = vshrl.u32 %v11936_v3, 16 }
  0x90   : > { %10193 = vmatmul.mubr.msk.bf16.gmra.mxu1 %vm707_vm3, %v11918_v17 }
  0x91   : > { %10196 = vmatprep.mubr.msk.bf16.mxu1 %vm11524_vm2, %v16823_v1 }
  0x93   : > { %10087 = vmatmul.mubr.msk.bf16.gmra.mxu0 %vm707_vm3, %v650_v29  ;;  %v16788_v29 = vshll.u32 %v11918_v17, 16 }
  0x94   : > { %10090 = vmatprep.mubr.msk.bf16.mxu0 %vm11524_vm2, %v16823_v1 }
  0x95   : > { %v665_v49 = vrot.slane %v16788_v29, 1 }
  0x97   : > { %v666_v37 = vsel %vm518_vm4, %v661_v41, %v665_v49  ;;  %v669_v30 = vor.u32 %v16794_v23, %v665_v49  ;;  %v11972_v41 = vcombine.low %v429_v21, %v430_v2  ;;  %v11990_v2 = vcombine.low %v431_v63, %v11753_v25 }
  0x98   : > { %10197 = vmatmul.mubr.msk.bf16.gmra.mxu1 %vm707_vm3, %v11936_v3 }
  0x99   : > { %10200 = vmatprep.mubr.msk.bf16.mxu1 %vm11524_vm2, %v16823_v1  ;;  %v16800_v23 = vshrl.u32 %v11972_v41, 16  ;;  %v16798_v57 = vshll.u32 %v11990_v2, 16 }
  0x9b   : > { %10091 = vmatmul.mubr.msk.bf16.gmra.mxu0 %vm707_vm3, %v658_v55  ;;  %v16791_v55 = vshll.u32 %v11936_v3, 16 }
  0x9c   : > { %10094 = vmatprep.mubr.msk.bf16.mxu0 %vm11524_vm2, %v16823_v1 }
  0x9d   : > { %v673_v11 = vrot.slane %v16791_v55, 1 }
  0x9f   : > { %v674_v29 = vsel %vm518_vm4, %v669_v30, %v673_v11  ;;  %v677_v21 = vor.u32 %v16792_v50, %v673_v11  ;;  %v16797_v30 = vshrl.u32 %v11954_v0, 16  ;;  %v1683_v11 = vrot.slane %v11619_v9, 2 }
  0xa0   : > { %10201 = vmatmul.mubr.msk.bf16.gmra.mxu1 %vm707_vm3, %v11954_v0  ;;  %v1684_v50 = vrot.slane %v11627_v16, 2 }
  0xa1   : > { %10204 = vmatprep.mubr.msk.bf16.mxu1 %vm11524_vm2, %v16823_v1 }
  0xa3   : > { %10095 = vmatmul.mubr.msk.bf16.gmra.mxu0 %vm707_vm3, %v666_v37  ;;  %v16793_v37 = vshll.u32 %v11954_v0, 16 }
  0xa4   : > { %10098 = vmatprep.mubr.msk.bf16.mxu0 %vm11524_vm2, %v16823_v1 }
  0xa5   : > { %v681_v49 = vrot.slane %v16793_v37, 1 }
  0xa7   : > { %v682_v55 = vsel %vm518_vm4, %v677_v21, %v681_v49  ;;  %v685_v25 = vor.u32 %v16797_v30, %v681_v49  ;;  %v1685_v21 = vsel %vm1682_vm5, %v1683_v11, %v1684_v50  ;;  %v697_v11 = vrot.slane %v16798_v57, 1 }
  0xa8   : > { %10205 = vmatmul.mubr.msk.bf16.gmra.mxu1 %vm707_vm3, %v11972_v41  ;;  %v1690_v57 = vrot.slane %v11669_v43, 2 }
  0xa9   : > { %10208 = vmatprep.mubr.msk.bf16.mxu1 %vm11524_vm2, %v16823_v1 }
  0xab   : > { %10099 = vmatmul.mubr.msk.bf16.gmra.mxu0 %vm707_vm3, %v674_v29  ;;  %v16796_v29 = vshll.u32 %v11972_v41, 16 }
  0xac   : > { %10102 = vmatprep.mubr.msk.bf16.mxu0 %vm11524_vm2, %v16823_v1 }
  0xad   : > { %v689_v63 = vrot.slane %v16796_v29, 1 }
  0xaf   : > { %v690_v37 = vsel %vm518_vm4, %v685_v25, %v689_v63  ;;  %v693_v49 = vor.u32 %v16800_v23, %v689_v63  ;;  %v12025_v25 = vcombine.low %v11756_v26, %v11756_v26  ;;  %v1688_v63 = vrot.slane %v11653_v36, 2 }
  0xb0   : > { %10209 = vmatmul.mubr.msk.bf16.gmra.mxu1 %vm707_vm3, %v11990_v2 }
  0xb1   : > { %10308 = vmatprep.mubr.msk.bf16.mxu1 %vm11524_vm2, %v16823_v1  ;;  %v698_v29 = vsel %vm518_vm4, %v693_v49, %v697_v11  ;;  %v703_v30 = vshll.u32 %v12025_v25, 16 }
  0xb3   : > { %10103 = vmatmul.mubr.msk.bf16.gmra.mxu0 %vm707_vm3, %v682_v55  ;;  %v1686_v55 = vrot.slane %v11631_v19, 2 }
  0xb4   : > { %10106 = vmatprep.mubr.msk.bf16.mxu0 %vm11524_vm2, %v16823_v1 }
  0xb5   : > { %v1689_v49 = vsel %vm1682_vm5, %v1686_v55, %v1688_v63 }
  0xb8   : > { %10309 = vmatmul.mubr.msk.bf16.vlgmr.msra.gmra.mxu1 %vm707_vm3, %v1685_v21  ;;  %v1687_v21 = vsel %vm1682_vm5, %v1684_v50, %v1686_v55  ;;  %v705_v50 = vrot.slane %v703_v30, 1  ;;  %v9023_v30 = vld [vmem:[%s16776_s3 + $0x4] sm:$0x3] }
  0xb9   : > { %10312 = vmatprep.mubr.msk.bf16.mxu1 %vm11524_vm2, %v16823_v1  ;;  %v1411_v55 = vand.u32 %v9023_v30, %v11594_v4 }
  0xbb   : > { %10107 = vmatmul.mubr.msk.bf16.gmra.mxu0 %vm707_vm3, %v690_v37  ;;  %v16799_v37 = vshrl.u32 %v11990_v2, 16 }
  0xbc   : > { %10110 = vmatprep.mubr.msk.bf16.mxu0 %vm11524_vm2, %v16823_v1 }
  0xbd   : > { %v701_v26 = vor.u32 %v16799_v37, %v697_v11  ;;  %v1692_v11 = vrot.slane %v11687_v51, 2 }
  0xc0   : > { %10313 = vmatmul.mubr.msk.bf16.gmra.mxu1 %vm707_vm3, %v1687_v21  ;;  %v706_v21 = vsel %vm518_vm4, %v701_v26, %v705_v50  ;;  %v1694_v50 = vrot.slane %v11705_v59, 2 }
  0xc1   : > { %10316 = vmatprep.mubr.msk.bf16.mxu1 %vm11524_vm2, %v16823_v1 }
  0xc3   : > { %10111 = vmatmul.mubr.msk.bf16.gmra.mxu0 %vm707_vm3, %v698_v29  ;;  %v1691_v29 = vsel %vm1682_vm5, %v1688_v63, %v1690_v57  ;;  %v1693_v63 = vsel %vm1682_vm5, %v1690_v57, %v1692_v11  ;;  %v1695_v57 = vsel %vm1682_vm5, %v1692_v11, %v1694_v50 }
  0xc4   : > { %10114 = vmatprep.mubr.msk.bf16.mxu0 %vm11524_vm2, %v16823_v1 }
  0xc8   : > { %10317 = vmatmul.mubr.msk.bf16.gmra.mxu1 %vm707_vm3, %v1689_v49 }
  0xc9   : > { %10320 = vmatprep.mubr.msk.bf16.mxu1 %vm11524_vm2, %v16823_v1 }
  0xcb   : > { %10115 = vmatmul.mubr.msk.bf16.gmra.mxu0 %vm707_vm3, %v706_v21 }
  0xcc   : > { %10120 = vmatprep.mubr.msk.bf16.mxu0 %vm11524_vm2, %v16823_v1 }
  0xd0   : > { %10321 = vmatmul.mubr.msk.bf16.gmra.mxu1 %vm707_vm3, %v1691_v29 }
  0xd1   : > { %10324 = vmatprep.mubr.msk.bf16.mxu1 %vm11524_vm2, %v16823_v1 }
  0xd3   : > { %10121 = vmatmul.mubr.msk.bf16.vlgmr.msra.gmra.mxu0 %vm707_vm3, %v11616_v8 }
  0xd4   : > { %10213 = vmatpush3.bf16.msra.mxu0 %v1411_v55  ;;  %10124 = vmatprep.mubr.msk.bf16.mxu0 %vm11524_vm2, %v16823_v1 }
  0xd5   : > { %10400 = vmatprep.subr.bf16.mxu0 %v16823_v1 }
  0xd8   : > { %v1108_v26 = vpop.f32.mrf.mxu1  ;;  %10325 = vmatmul.mubr.msk.bf16.gmra.mxu1 %vm707_vm3, %v1693_v63 }
  0xd9   : > { %10328 = vmatprep.mubr.msk.bf16.mxu1 %vm11524_vm2, %v16823_v1 }
  0xda   : > { %v10134_v49 = vpop.f32.mrf.mxu1 }
  0xdb   : > { %v12068_v21 = vpop.f32.mrf.mxu0  ;;  %10125 = vmatmul.mubr.msk.bf16.gmra.mxu0 %vm707_vm3, %v11619_v9  ;;  %v1696_v49 = vrot.slane %v11723_v5, 2 }
  0xdc   : > { %v1111_v29 = vpop.f32.mrf.mxu1  ;;  %10128 = vmatprep.mubr.msk.bf16.mxu0 %vm11524_vm2, %v16823_v1 }
  0xdd   : > { %v10028_v30 = vpop.f32.mrf.mxu0 }
  0xde   : > { %v10135_v55 = vpop.f32.mrf.mxu1  ;;  %v1294_v30 = vrot.slane %v11616_v8, 1 }
  0xdf   : > { %v12075_v63 = vpop.f32.mrf.mxu0  ;;  %v1697_v55 = vsel %vm1682_vm5, %v1694_v50, %v1696_v49 }
  0xe0   : > { %v12077_v37 = vpop.f32.mrf.mxu1  ;;  %10329 = vmatmul.mubr.msk.bf16.gmra.mxu1 %vm707_vm3, %v1695_v57  ;;  %v1295_v57 = vrot.slane %v11619_v9, 1  ;;  %v1698_v9 = vrot.slane %v11741_v15, 2 }
  0xe1   : > { %10332 = vmatprep.mubr.msk.bf16.mxu1 %vm11524_vm2, %v16823_v1  ;;  %v10029_v23 = vpop.f32.mrf.mxu0 }
  0xe2   : > { %v10138_v40 = vpop.f32.mrf.mxu1  ;;  %v1296_v58 = vsel %vm1293_vm6, %v1294_v30, %v1295_v57  ;;  %v1297_v30 = vrot.slane %v11627_v16, 1 }
  0xe3   : > { %v12083_v39 = vpop.f32.mrf.mxu0  ;;  %10129 = vmatmul.mubr.msk.bf16.gmra.mxu0 %vm707_vm3, %v11627_v16  ;;  %v9073_v40 = vld [vmem:[%s16776_s3 + $0x8] sm:$0x3] }
  0xe4   : > { %v12087_v11 = vpop.f32.mrf.mxu1  ;;  %10214 = vmatprep.mubr.msk.bf16.mxu0 %vm11524_vm2, %v16823_v1  ;;  %v2243_v8 = vand.u32 %v9073_v40, %v11594_v4 }
  0xe5   : > { %v10032_v14 = vpop.f32.mrf.mxu0 }
  0xe6   : > { %v10139_v23 = vpop.f32.mrf.mxu1 }
  0xe7   : > { %v12097_v13 = vpop.f32.mrf.mxu0 }
  0xe8   : > { %v12099_v60 = vpop.f32.mrf.mxu1  ;;  %10333 = vmatmul.mubr.msk.bf16.gmra.mxu1 %vm707_vm3, %v1697_v55  ;;  %v1699_v55 = vsel %vm1682_vm5, %v1696_v49, %v1698_v9 }
  0xe9   : > { %10336 = vmatprep.mubr.msk.bf16.mxu1 %vm11524_vm2, %v16823_v1  ;;  %v10033_v14 = vpop.f32.mrf.mxu0 }
  0xea   : > { %v10142_v50 = vpop.f32.mrf.mxu1 }
  0xeb   : > { %v12107_v48 = vpop.f32.mrf.mxu0  ;;  %10215 = vmatmul.mubr.msk.bf16.vlgmr.msra.gmra.mxu0 %vm707_vm3, %v1296_v58  ;;  %v1298_v58 = vsel %vm1293_vm6, %v1295_v57, %v1297_v30 }
  0xec   : > { %v12110_v23 = vpop.f32.mrf.mxu1  ;;  %10401 = vmatpush3.bf16.msra.mxu0 %v2243_v8  ;;  %10218 = vmatprep.mubr.msk.bf16.mxu0 %vm11524_vm2, %v16823_v1  ;;  %v1700_v8 = vrot.slane %v11769_v31, 2 }
  0xed   : > { %v10036_v40 = vpop.f32.mrf.mxu0  ;;  %10588 = vmatprep.subr.bf16.mxu0 %v16823_v1 }
  0xee   : > { %v10143_v47 = vpop.f32.mrf.mxu1  ;;  %v1701_v57 = vsel %vm1682_vm5, %v1698_v9, %v1700_v8 }
  0xef   : > { %v12117_v14 = vpop.f32.mrf.mxu0 }
  0xf0   : > { %v12119_v50 = vpop.f32.mrf.mxu1  ;;  %10337 = vmatmul.mubr.msk.bf16.gmra.mxu1 %vm707_vm3, %v1699_v55  ;;  %v1299_v55 = vrot.slane %v11631_v19, 1 }
  0xf1   : > { %10340 = vmatprep.mubr.msk.bf16.mxu1 %vm11524_vm2, %v16823_v1  ;;  %v10037_v35 = vpop.f32.mrf.mxu0 }
  0xf2   : > { %v10146_v34 = vpop.f32.mrf.mxu1  ;;  %v1300_v35 = vsel %vm1293_vm6, %v1297_v30, %v1299_v55 }
  0xf3   : > { %v842_v49 = vpop.f32.mrf.mxu0  ;;  %10219 = vmatmul.mubr.msk.bf16.gmra.mxu0 %vm707_vm3, %v1298_v58 }
  0xf4   : > { %v12127_v47 = vpop.f32.mrf.mxu1  ;;  %v12129_v40 = vadd.f32 %v1108_v26, %v842_v49  ;;  %10222 = vmatprep.mubr.msk.bf16.mxu0 %vm11524_vm2, %v16823_v1  ;;  %v1702_v26 = vrot.slane %v11787_v42, 2 }
  0xf5   : > { %v10040_v20 = vpop.f32.mrf.mxu0 }
  0xf6   : > { %v10147_v18 = vpop.f32.mrf.mxu1 }
  0xf7   : > { %v845_v10 = vpop.f32.mrf.mxu0 }
  0xf8   : > { %v12135_v7 = vpop.f32.mrf.mxu1  ;;  %10341 = vmatmul.mubr.msk.bf16.gmra.mxu1 %vm707_vm3, %v1701_v57  ;;  %v12138_v34 = vadd.f32 %v1111_v29, %v845_v10  ;;  %v1301_v10 = vrot.slane %v11653_v36, 1  ;;  %v1703_v29 = vsel %vm1682_vm5, %v1700_v8, %v1702_v26 }
  0xf9   : > { %10344 = vmatprep.mubr.msk.bf16.mxu1 %vm11524_vm2, %v16823_v1  ;;  %v10041_v58 = vpop.f32.mrf.mxu0 }
  0xfa   : > { %v10150_v49 = vpop.f32.mrf.mxu1 }
  0xfb   : > { %v850_v62 = vpop.f32.mrf.mxu0  ;;  %10223 = vmatmul.mubr.msk.bf16.gmra.mxu0 %vm707_vm3, %v1300_v35 }
  0xfc   : > { %v12145_v18 = vpop.f32.mrf.mxu1  ;;  %v12148_v20 = vadd.f32 %v12077_v37, %v850_v62  ;;  %10226 = vmatprep.mubr.msk.bf16.mxu0 %vm11524_vm2, %v16823_v1  ;;  %v1302_v62 = vsel %vm1293_vm6, %v1299_v55, %v1301_v10  ;;  %v1704_v37 = vrot.slane %v11805_v56, 2 }
  0xfd   : > { %v10044_v9 = vpop.f32.mrf.mxu0 }
  0xfe   : > { %16854 = vst [vmem:[#allocation3_spill] sm:$0xff] %v12148_v20  ;;  %v10151_v30 = vpop.f32.mrf.mxu1  ;;  %v1705_v55 = vsel %vm1682_vm5, %v1702_v26, %v1704_v37  ;;  %v11451_v20 = vld [vmem:[%s11613_s16 + $0xb8] sm:$0xf] }
  0xff   : > { %v853_v57 = vpop.f32.mrf.mxu0 }
 0x100   : > { %v12154_v58 = vpop.f32.mrf.mxu1  ;;  %10345 = vmatmul.mubr.msk.bf16.gmra.mxu1 %vm707_vm3, %v1703_v29  ;;  %v12158_v35 = vadd.f32 %v12087_v11, %v853_v57  ;;  %v1303_v11 = vrot.slane %v11669_v43, 1 }
 0x101   : > { %10348 = vmatprep.mubr.msk.bf16.mxu1 %vm11524_vm2, %v16823_v1  ;;  %v10045_v49 = vpop.f32.mrf.mxu0 }
 0x102   : > { %16855 = vst [vmem:[#allocation4_spill] sm:$0xff] %v12158_v35  ;;  %v10154_v61 = vpop.f32.mrf.mxu1  ;;  %v16891_v35 = vshll.u32 %v11741_v15, 16 }
 0x103   : > { %v858_v8 = vpop.f32.mrf.mxu0  ;;  %10227 = vmatmul.mubr.msk.bf16.gmra.mxu0 %vm707_vm3, %v1302_v62  ;;  %v1706_v62 = vrot.slane %v11823_v6, 2 }
 0x104   : > { %v12165_v9 = vpop.f32.mrf.mxu1  ;;  %v12168_v30 = vadd.f32 %v12099_v60, %v858_v8  ;;  %10230 = vmatprep.mubr.msk.bf16.mxu0 %vm11524_vm2, %v16823_v1  ;;  %v1304_v60 = vsel %vm1293_vm6, %v1301_v10, %v1303_v11 }
 0x105   : > { %v10048_v29 = vpop.f32.mrf.mxu0 }
 0x106   : > { %16856 = vst [vmem:[#allocation5_spill] sm:$0xff] %v12168_v30  ;;  %v10155_v57 = vpop.f32.mrf.mxu1 }
 0x107   : > { %v861_v54 = vpop.f32.mrf.mxu0 }
 0x108   : > { %v12174_v49 = vpop.f32.mrf.mxu1  ;;  %10349 = vmatmul.mubr.msk.bf16.gmra.mxu1 %vm707_vm3, %v1705_v55  ;;  %v12178_v61 = vadd.f32 %v12110_v23, %v861_v54  ;;  %v1305_v54 = vrot.slane %v11687_v51, 1  ;;  %v1707_v23 = vsel %vm1682_vm5, %v1704_v37, %v1706_v62 }
 0x109   : > { %10352 = vmatprep.mubr.msk.bf16.mxu1 %vm11524_vm2, %v16823_v1  ;;  %v10049_v8 = vpop.f32.mrf.mxu0 }
 0x10a   : > { %16857 = vst [vmem:[#allocation6_spill] sm:$0xff] %v12178_v61  ;;  %v10158_v53 = vpop.f32.mrf.mxu1 }
 0x10b   : > { %v866_v26 = vpop.f32.mrf.mxu0  ;;  %10231 = vmatmul.mubr.msk.bf16.gmra.mxu0 %vm707_vm3, %v1304_v60  ;;  %v1708_v60 = vrot.slane %v11846_v32, 2 }
 0x10c   : > { %v12185_v29 = vpop.f32.mrf.mxu1  ;;  %v12188_v57 = vadd.f32 %v12119_v50, %v866_v26  ;;  %10234 = vmatprep.mubr.msk.bf16.mxu0 %vm11524_vm2, %v16823_v1  ;;  %v1306_v50 = vsel %vm1293_vm6, %v1303_v11, %v1305_v54 }
 0x10d   : > { %v10052_v10 = vpop.f32.mrf.mxu0 }
 0x10e   : > { %16858 = vst [vmem:[#allocation7_spill] sm:$0xff] %v12188_v57  ;;  %v10159_v55 = vpop.f32.mrf.mxu1 }
 0x10f   : > { %v869_v46 = vpop.f32.mrf.mxu0 }
 0x110   : > { %v12194_v8 = vpop.f32.mrf.mxu1  ;;  %10353 = vmatmul.mubr.msk.bf16.gmra.mxu1 %vm707_vm3, %v1707_v23  ;;  %v12198_v53 = vadd.f32 %v12127_v47, %v869_v46  ;;  %v1307_v46 = vrot.slane %v11705_v59, 1  ;;  %v1709_v47 = vsel %vm1682_vm5, %v1706_v62, %v1708_v60 }
 0x111   : > { %10356 = vmatprep.mubr.msk.bf16.mxu1 %vm11524_vm2, %v16823_v1  ;;  %v10053_v26 = vpop.f32.mrf.mxu0 }
 0x112   : > { %16859 = vst [vmem:[#allocation8_spill] sm:$0xff] %v12198_v53  ;;  %v10162_v45 = vpop.f32.mrf.mxu1 }
 0x113   : > { %v874_v37 = vpop.f32.mrf.mxu0  ;;  %10235 = vmatmul.mubr.msk.bf16.gmra.mxu0 %vm707_vm3, %v1306_v50  ;;  %v1710_v50 = vrot.slane %v11864_v52, 2 }
 0x114   : > { %v12205_v10 = vpop.f32.mrf.mxu1  ;;  %v12208_v55 = vadd.f32 %v12135_v7, %v874_v37  ;;  %10238 = vmatprep.mubr.msk.bf16.mxu0 %vm11524_vm2, %v16823_v1  ;;  %v1308_v7 = vsel %vm1293_vm6, %v1305_v54, %v1307_v46 }
 0x115   : > { %v10056_v11 = vpop.f32.mrf.mxu0 }
 0x116   : > { %16860 = vst [vmem:[#allocation9_spill] sm:$0xff] %v12208_v55  ;;  %v10163_v23 = vpop.f32.mrf.mxu1 }
 0x117   : > { %v877_v38 = vpop.f32.mrf.mxu0 }
 0x118   : > { %v12214_v26 = vpop.f32.mrf.mxu1  ;;  %10357 = vmatmul.mubr.msk.bf16.gmra.mxu1 %vm707_vm3, %v1709_v47  ;;  %v12218_v45 = vadd.f32 %v12145_v18, %v877_v38  ;;  %v1309_v38 = vrot.slane %v11723_v5, 1  ;;  %v1711_v18 = vsel %vm1682_vm5, %v1708_v60, %v1710_v50  ;;  %v1712_v60 = vrot.slane %v11882_v12, 2 }
 0x119   : > { %10360 = vmatprep.mubr.msk.bf16.mxu1 %vm11524_vm2, %v16823_v1  ;;  %v10057_v37 = vpop.f32.mrf.mxu0 }
 0x11a   : > { %16861 = vst [vmem:[#allocation10_spill] sm:$0xff] %v12218_v45  ;;  %v10166_v28 = vpop.f32.mrf.mxu1 }
 0x11b   : > { %v882_v62 = vpop.f32.mrf.mxu0  ;;  %10239 = vmatmul.mubr.msk.bf16.gmra.mxu0 %vm707_vm3, %v1308_v7  ;;  %v9097_v28 = vld [vmem:[%s16776_s3 + $0xa] sm:$0x3]  ;;  %v1310_v7 = vsel %vm1293_vm6, %v1307_v46, %v1309_v38 }
 0x11c   : > { %v12225_v11 = vpop.f32.mrf.mxu1  ;;  %v12228_v23 = vadd.f32 %v12154_v58, %v882_v62  ;;  %10242 = vmatprep.mubr.msk.bf16.mxu0 %vm11524_vm2, %v16823_v1  ;;  %v2628_v62 = vand.u32 %v9097_v28, %v11594_v4  ;;  %v16866_v28 = vmov 0.0  }
 0x11d   : > { %v10060_v54 = vpop.f32.mrf.mxu0 }
 0x11e   : > { %16862 = vst [vmem:[#allocation11_spill] sm:$0xff] %v12228_v23  ;;  %v10167_v47 = vpop.f32.mrf.mxu1  ;;  %10495 = vmatpush3.bf16.msra.mxu1 %v2628_v62 }
 0x11f   : > { %v885_v27 = vpop.f32.mrf.mxu0  ;;  %10682 = vmatprep.subr.bf16.mxu1 %v16866_v28 }
 0x120   : > { %v12234_v37 = vpop.f32.mrf.mxu1  ;;  %10361 = vmatmul.mubr.msk.bf16.gmra.mxu1 %vm707_vm3, %v1711_v18  ;;  %v12241_v58 = vadd.f32 %v12165_v9, %v885_v27  ;;  %v16864_v18 = vor.u32 %v11633_v22, %v11636_v24  ;;  %v16865_v9 = vshll.u32 %v11631_v19, 16  ;;  %v1311_v22 = vrot.slane %v11741_v15, 1 }
 0x121   : > { %10364 = vmatprep.mubr.msk.bf16.mxu1 %vm11524_vm2, %v16823_v1  ;;  %v10061_v54 = vpop.f32.mrf.mxu0  ;;  %v1713_v24 = vsel %vm1682_vm5, %v1710_v50, %v1712_v60 }
 0x122   : > { %16863 = vst [vmem:[#allocation12_spill] sm:$0xff] %v12241_v58  ;;  %v10170_v47 = vpop.f32.mrf.mxu1  ;;  %v12253_v27 = vsel %vm2067_vm7, %v16864_v18, %v11649_v33  ;;  %v2076_v46 = vrot.slane %v16865_v9, 3  ;;  %v16867_v54 = vshrl.u32 %v11631_v19, 16 }
 0x123   : > { %v890_v58 = vpop.f32.mrf.mxu0  ;;  %10243 = vmatmul.mubr.msk.bf16.gmra.mxu0 %vm707_vm3, %v1310_v7 }
 0x124   : > { %v12258_v1 = vpop.f32.mrf.mxu1  ;;  %v2075_v62 = vrot.slane %v16867_v54, 2  ;;  %v12264_v47 = vadd.f32 %v12174_v49, %v890_v58  ;;  %10246 = vmatprep.mubr.msk.bf16.mxu0 %vm11524_vm2, %v16866_v28  ;;  %v1312_v49 = vsel %vm1293_vm6, %v1309_v38, %v1311_v22  ;;  %v1714_v58 = vrot.slane %v11900_v44, 2 }
 0x125   : > { %v10064_v18 = vpop.f32.mrf.mxu0  ;;  %v16871_v38 = vshrl.u32 %v11653_v36, 16 }
 0x126   : > { %16868 = vst [vmem:[#allocation13_spill] sm:$0xff] %v12264_v47  ;;  %v10171_v9 = vpop.f32.mrf.mxu1  ;;  %v2077_v54 = vor.u32 %v2076_v46, %v2075_v62  ;;  %v1715_v46 = vsel %vm1682_vm5, %v1712_v60, %v1714_v58 }
 0x127   : > { %v893_v7 = vpop.f32.mrf.mxu0  ;;  %v16870_v9 = vshll.u32 %v11653_v36, 16 }
 0x128   : > { %v12270_v23 = vpop.f32.mrf.mxu1  ;;  %10365 = vmatmul.mubr.msk.bf16.gmra.mxu1 %vm707_vm3, %v1713_v24  ;;  %v12274_v45 = vadd.f32 %v12185_v29, %v893_v7  ;;  %v12282_v18 = vsel %vm2067_vm7, %v11649_v33, %v2077_v54  ;;  %v2079_v7 = vrot.slane %v16871_v38, 2  ;;  %v1313_v33 = vrot.slane %v11769_v31, 1 }
 0x129   : > { %10368 = vmatprep.mubr.msk.bf16.mxu1 %vm11524_vm2, %v16866_v28  ;;  %v10065_v47 = vpop.f32.mrf.mxu0  ;;  %v2080_v24 = vrot.slane %v16870_v9, 3 }
 0x12a   : > { %16869 = vst [vmem:[#allocation14_spill] sm:$0xff] %v12274_v45  ;;  %v10174_v50 = vpop.f32.mrf.mxu1 }
 0x12b   : > { %v898_v55 = vpop.f32.mrf.mxu0  ;;  %10247 = vmatmul.mubr.msk.bf16.gmra.mxu0 %vm707_vm3, %v1312_v49  ;;  %v2081_v38 = vor.u32 %v2080_v24, %v2079_v7 }
 0x12c   : > { %v12287_v29 = vpop.f32.mrf.mxu1  ;;  %v12292_v45 = vadd.f32 %v12194_v8, %v898_v55  ;;  %10250 = vmatprep.mubr.msk.bf16.mxu0 %vm11524_vm2, %v16866_v28  ;;  %v1314_v8 = vsel %vm1293_vm6, %v1311_v22, %v1313_v33  ;;  %v1716_v55 = vrot.slane %v11918_v17, 2  ;;  %v16875_v22 = vshrl.u32 %v11669_v43, 16 }
 0x12d   : > { %v10068_v62 = vpop.f32.mrf.mxu0 }
 0x12e   : > { %16872 = vst [vmem:[#allocation15_spill] sm:$0xff] %v12292_v45  ;;  %v10175_v47 = vpop.f32.mrf.mxu1  ;;  %v12309_v62 = vsel %vm2067_vm7, %v2077_v54, %v2081_v38  ;;  %v1717_v54 = vsel %vm1682_vm5, %v1714_v58, %v1716_v55 }
 0x12f   : > { %v901_v50 = vpop.f32.mrf.mxu0  ;;  %v16874_v47 = vshll.u32 %v11669_v43, 16 }
 0x130   : > { %v12298_v9 = vpop.f32.mrf.mxu1  ;;  %10369 = vmatmul.mubr.msk.bf16.gmra.mxu1 %vm707_vm3, %v1715_v46  ;;  %v12302_v49 = vadd.f32 %v12205_v10, %v901_v50  ;;  %v2083_v50 = vrot.slane %v16875_v22, 2 }
 0x131   : > { %10372 = vmatprep.mubr.msk.bf16.mxu1 %vm11524_vm2, %v16866_v28  ;;  %v10069_v45 = vpop.f32.mrf.mxu0  ;;  %v2084_v53 = vrot.slane %v16874_v47, 3 }
 0x132   : > { %16873 = vst [vmem:[#allocation16_spill] sm:$0xff] %v12302_v49  ;;  %v10178_v60 = vpop.f32.mrf.mxu1  ;;  %v1315_v45 = vrot.slane %v11787_v42, 1 }
 0x133   : > { %v906_v46 = vpop.f32.mrf.mxu0  ;;  %10251 = vmatmul.mubr.msk.bf16.gmra.mxu0 %vm707_vm3, %v1314_v8  ;;  %v2085_v22 = vor.u32 %v2084_v53, %v2083_v50  ;;  %v1317_v53 = vrot.slane %v11805_v56, 1 }
 0x134   : > { %v12314_v10 = vpop.f32.mrf.mxu1  ;;  %v12319_v49 = vadd.f32 %v12214_v26, %v906_v46  ;;  %10254 = vmatprep.mubr.msk.bf16.mxu0 %vm11524_vm2, %v16866_v28  ;;  %v1316_v26 = vsel %vm1293_vm6, %v1313_v33, %v1315_v45  ;;  %v1718_v46 = vrot.slane %v11936_v3, 2  ;;  %v16879_v33 = vshrl.u32 %v11687_v51, 16 }
 0x135   : > { %v10072_v24 = vpop.f32.mrf.mxu0 }
 0x136   : > { %16876 = vst [vmem:[#allocation17_spill] sm:$0xff] %v12319_v49  ;;  %v10179_v7 = vpop.f32.mrf.mxu1  ;;  %v12336_v24 = vsel %vm2067_vm7, %v2081_v38, %v2085_v22 }
 0x137   : > { %v909_v60 = vpop.f32.mrf.mxu0  ;;  %v16878_v7 = vshll.u32 %v11687_v51, 16 }
 0x138   : > { %v12325_v47 = vpop.f32.mrf.mxu1  ;;  %10373 = vmatmul.mubr.msk.bf16.gmra.mxu1 %vm707_vm3, %v1717_v54  ;;  %v12329_v8 = vadd.f32 %v12225_v11, %v909_v60  ;;  %v2087_v60 = vrot.slane %v16879_v33, 2 }
 0x139   : > { %10376 = vmatprep.mubr.msk.bf16.mxu1 %vm11524_vm2, %v16866_v28  ;;  %v10073_v49 = vpop.f32.mrf.mxu0  ;;  %v2088_v57 = vrot.slane %v16878_v7, 3 }
 0x13a   : > { %16877 = vst [vmem:[#allocation18_spill] sm:$0xff] %v12329_v8  ;;  %v10182_v58 = vpop.f32.mrf.mxu1  ;;  %v1719_v49 = vsel %vm1682_vm5, %v1716_v55, %v1718_v46 }
 0x13b   : > { %v914_v54 = vpop.f32.mrf.mxu0  ;;  %10255 = vmatmul.mubr.msk.bf16.gmra.mxu0 %vm707_vm3, %v1316_v26  ;;  %v2089_v33 = vor.u32 %v2088_v57, %v2087_v60  ;;  %v1319_v57 = vrot.slane %v11823_v6, 1 }
 0x13c   : > { %v12341_v11 = vpop.f32.mrf.mxu1  ;;  %v12346_v8 = vadd.f32 %v12234_v37, %v914_v54  ;;  %10258 = vmatprep.mubr.msk.bf16.mxu0 %vm11524_vm2, %v16866_v28  ;;  %v1318_v37 = vsel %vm1293_vm6, %v1315_v45, %v1317_v53  ;;  %v1720_v54 = vrot.slane %v11954_v0, 2  ;;  %v16883_v45 = vshrl.u32 %v11705_v59, 16 }
 0x13d   : > { %v10076_v38 = vpop.f32.mrf.mxu0 }
 0x13e   : > { %16880 = vst [vmem:[#allocation19_spill] sm:$0xff] %v12346_v8  ;;  %v10183_v50 = vpop.f32.mrf.mxu1  ;;  %v12363_v38 = vsel %vm2067_vm7, %v2085_v22, %v2089_v33 }
 0x13f   : > { %v917_v58 = vpop.f32.mrf.mxu0  ;;  %v16882_v50 = vshll.u32 %v11705_v59, 16 }
 0x140   : > { %v12352_v7 = vpop.f32.mrf.mxu1  ;;  %10377 = vmatmul.mubr.msk.bf16.gmra.mxu1 %vm707_vm3, %v1719_v49  ;;  %v12356_v26 = vadd.f32 %v12258_v1, %v917_v58  ;;  %v2091_v58 = vrot.slane %v16883_v45, 2 }
 0x141   : > { %10380 = vmatprep.mubr.msk.bf16.mxu1 %vm11524_vm2, %v16866_v28  ;;  %v10077_v8 = vpop.f32.mrf.mxu0  ;;  %v2092_v61 = vrot.slane %v16882_v50, 3 }
 0x142   : > { %16881 = vst [vmem:[#allocation20_spill] sm:$0xff] %v12356_v26  ;;  %v10186_v55 = vpop.f32.mrf.mxu1  ;;  %v1721_v8 = vsel %vm1682_vm5, %v1718_v46, %v1720_v54 }
 0x143   : > { %v922_v49 = vpop.f32.mrf.mxu0  ;;  %10259 = vmatmul.mubr.msk.bf16.gmra.mxu0 %vm707_vm3, %v1318_v37  ;;  %v2093_v45 = vor.u32 %v2092_v61, %v2091_v58  ;;  %v1321_v61 = vrot.slane %v11846_v32, 1 }
 0x144   : > { %v12368_v1 = vpop.f32.mrf.mxu1  ;;  %v12373_v26 = vadd.f32 %v12270_v23, %v922_v49  ;;  %10262 = vmatprep.mubr.msk.bf16.mxu0 %vm11524_vm2, %v16866_v28  ;;  %v1320_v23 = vsel %vm1293_vm6, %v1317_v53, %v1319_v57  ;;  %v1722_v49 = vrot.slane %v11972_v41, 2  ;;  %v16887_v53 = vshrl.u32 %v11723_v5, 16 }
 0x145   : > { %v10080_v22 = vpop.f32.mrf.mxu0 }
 0x146   : > { %16884 = vst [vmem:[#allocation21_spill] sm:$0xff] %v12373_v26  ;;  %v10187_v60 = vpop.f32.mrf.mxu1  ;;  %v12390_v22 = vsel %vm2067_vm7, %v2089_v33, %v2093_v45 }
 0x147   : > { %v925_v55 = vpop.f32.mrf.mxu0  ;;  %v16886_v60 = vshll.u32 %v11723_v5, 16 }
 0x148   : > { %v12379_v50 = vpop.f32.mrf.mxu1  ;;  %10381 = vmatmul.mubr.msk.bf16.gmra.mxu1 %vm707_vm3, %v1721_v8  ;;  %v12383_v37 = vadd.f32 %v12287_v29, %v925_v55  ;;  %v2095_v55 = vrot.slane %v16887_v53, 2 }
 0x149   : > { %10384 = vmatprep.mubr.msk.bf16.mxu1 %vm11524_vm2, %v16866_v28  ;;  %v10081_v26 = vpop.f32.mrf.mxu0  ;;  %v2096_v30 = vrot.slane %v16886_v60, 3 }
 0x14a   : > { %16885 = vst [vmem:[#allocation22_spill] sm:$0xff] %v12383_v37  ;;  %v10190_v46 = vpop.f32.mrf.mxu1  ;;  %v1723_v26 = vsel %vm1682_vm5, %v1720_v54, %v1722_v49  ;;  %v434_v54 = vld [vmem:[%s11613_s16 + $0xbc] sm:$0xf] }
 0x14b   : > { %v930_v8 = vpop.f32.mrf.mxu0  ;;  %10263 = vmatmul.mubr.msk.bf16.gmra.mxu0 %vm707_vm3, %v1320_v23  ;;  %v2097_v53 = vor.u32 %v2096_v30, %v2095_v55  ;;  %v12428_v30 = vcombine.low %v11451_v20, %v434_v54 }
 0x14c   : > { %v12395_v29 = vpop.f32.mrf.mxu1  ;;  %v12400_v37 = vadd.f32 %v12298_v9, %v930_v8  ;;  %10266 = vmatprep.mubr.msk.bf16.mxu0 %vm11524_vm2, %v16866_v28  ;;  %v1322_v9 = vsel %vm1293_vm6, %v1319_v57, %v1321_v61  ;;  %v1724_v8 = vrot.slane %v11990_v2, 2 }
 0x14d   : > { %v10084_v33 = vpop.f32.mrf.mxu0  ;;  %16893 = vst [vmem:[#allocation26_spill] sm:$0xff] %v12428_v30 }
 0x14e   : > { %16888 = vst [vmem:[#allocation23_spill] sm:$0xff] %v12400_v37  ;;  %v10191_v58 = vpop.f32.mrf.mxu1  ;;  %v12418_v37 = vsel %vm2067_vm7, %v2093_v45, %v2097_v53  ;;  %v1725_v45 = vsel %vm1682_vm5, %v1722_v49, %v1724_v8 }
 0x14f   : > { %v933_v46 = vpop.f32.mrf.mxu0  ;;  %16890 = vst [vmem:[#allocation25_spill] sm:$0xff] %v12418_v37  ;;  %v16896_v37 = vshll.u32 %v11769_v31, 16 }
 0x150   : > { %v12406_v23 = vpop.f32.mrf.mxu1  ;;  %10385 = vmatmul.mubr.msk.bf16.gmra.mxu1 %vm707_vm3, %v1723_v26  ;;  %v12410_v60 = vadd.f32 %v12314_v10, %v933_v46  ;;  %v2100_v26 = vrot.slane %v16891_v35, 3  ;;  %v16892_v10 = vshrl.u32 %v11741_v15, 16  ;;  %v1323_v35 = vrot.slane %v11864_v52, 1 }
 0x151   : > { %10388 = vmatprep.mubr.msk.bf16.mxu1 %vm11524_vm2, %v16866_v28  ;;  %v10085_v33 = vpop.f32.mrf.mxu0 }
 0x152   : > { %16889 = vst [vmem:[#allocation24_spill] sm:$0xff] %v12410_v60  ;;  %v10194_v58 = vpop.f32.mrf.mxu1  ;;  %v2099_v46 = vrot.slane %v16892_v10, 2 }
 0x153   : > { %v938_v60 = vpop.f32.mrf.mxu0  ;;  %10267 = vmatmul.mubr.msk.bf16.gmra.mxu0 %vm707_vm3, %v1322_v9 }
 0x154   : > { %v12425_v57 = vpop.f32.mrf.mxu1  ;;  %v12431_v55 = vadd.f32 %v12325_v47, %v938_v60  ;;  %10270 = vmatprep.mubr.msk.bf16.mxu0 %vm11524_vm2, %v16866_v28  ;;  %v1324_v47 = vsel %vm1293_vm6, %v1321_v61, %v1323_v35  ;;  %v1726_v60 = vrot.slane %v12428_v30, 2  ;;  %v2101_v54 = vor.u32 %v2100_v26, %v2099_v46 }
 0x155   : > { %v10088_v33 = vpop.f32.mrf.mxu0 }
 0x156   : > { %16894 = vst [vmem:[#allocation27_spill] sm:$0xff] %v12431_v55  ;;  %v10195_v58 = vpop.f32.mrf.mxu1  ;;  %v435_v55 = vld [vmem:[%s11613_s16 + $0xc0] sm:$0xf]  ;;  %v1727_v26 = vsel %vm1682_vm5, %v1724_v8, %v1726_v60 }
 0x157   : > { %v941_v10 = vpop.f32.mrf.mxu0  ;;  %v12449_v58 = vsel %vm2067_vm7, %v2097_v53, %v2101_v54  ;;  %v1325_v53 = vrot.slane %v11882_v12, 1  ;;  %v12465_v46 = vcombine.low %v435_v55, %v435_v55 }
 0x158   : > { %v12437_v9 = vpop.f32.mrf.mxu1  ;;  %10389 = vmatmul.mubr.msk.bf16.gmra.mxu1 %vm707_vm3, %v1725_v45  ;;  %v12441_v20 = vadd.f32 %v12341_v11, %v941_v10  ;;  %v2104_v45 = vrot.slane %v16896_v37, 3  ;;  %v16897_v11 = vshrl.u32 %v11769_v31, 16 }
 0x159   : > { %10392 = vmatprep.mubr.msk.bf16.mxu1 %vm11524_vm2, %v16866_v28  ;;  %v10089_v49 = vpop.f32.mrf.mxu0  ;;  %16899 = vst [vmem:[#allocation30_spill] sm:$0xff] %v12465_v46 }
 0x15a   : > { %16895 = vst [vmem:[#allocation28_spill] sm:$0xff] %v12441_v20  ;;  %v10198_v33 = vpop.f32.mrf.mxu1  ;;  %v2103_v10 = vrot.slane %v16897_v11, 2 }
 0x15b   : > { %v946_v20 = vpop.f32.mrf.mxu0  ;;  %10271 = vmatmul.mubr.msk.bf16.gmra.mxu0 %vm707_vm3, %v1324_v47 }
 0x15c   : > { %v12456_v61 = vpop.f32.mrf.mxu1  ;;  %v12459_v30 = vadd.f32 %v12352_v7, %v946_v20  ;;  %10274 = vmatprep.mubr.msk.bf16.mxu0 %vm11524_vm2, %v16866_v28  ;;  %v1326_v7 = vsel %vm1293_vm6, %v1323_v35, %v1325_v53  ;;  %v1728_v20 = vrot.slane %v12465_v46, 2  ;;  %v2105_v8 = vor.u32 %v2104_v45, %v2103_v10 }
 0x15d   : > { %v10092_v37 = vpop.f32.mrf.mxu0  ;;  %v16902_v35 = vshll.u32 %v11787_v42, 16 }
 0x15e   : > { %16898 = vst [vmem:[#allocation29_spill] sm:$0xff] %v12459_v30  ;;  %v10199_v49 = vpop.f32.mrf.mxu1  ;;  %v12478_v37 = vsel %vm2067_vm7, %v2101_v54, %v2105_v8 }
 0x15f   : > { %v949_v33 = vpop.f32.mrf.mxu0  ;;  %16901 = vst [vmem:[#allocation32_spill] sm:$0xff] %v12478_v37 }
 0x160   : > { %v12467_v11 = vpop.f32.mrf.mxu1  ;;  %10393 = vmatmul.mubr.msk.bf16.gmra.mxu1 %vm707_vm3, %v1727_v26  ;;  %v12471_v47 = vadd.f32 %v12368_v1, %v949_v33  ;;  %v1327_v1 = vrot.slane %v11900_v44, 1  ;;  %v2108_v33 = vrot.slane %v16902_v35, 3 }
 0x161   : > { %10396 = vmatprep.mubr.msk.bf16.mxu1 %vm11524_vm2, %v16866_v28  ;;  %v10093_v55 = vpop.f32.mrf.mxu0 }
 0x162   : > { %16900 = vst [vmem:[#allocation31_spill] sm:$0xff] %v12471_v47  ;;  %v10202_v30 = vpop.f32.mrf.mxu1  ;;  %v16903_v47 = vshrl.u32 %v11787_v42, 16  ;;  %v1328_v55 = vsel %vm1293_vm6, %v1325_v53, %v1327_v1 }
 0x163   : > { %v954_v49 = vpop.f32.mrf.mxu0  ;;  %10275 = vmatmul.mubr.msk.bf16.gmra.mxu0 %vm707_vm3, %v1326_v7  ;;  %v1729_v30 = vsel %vm1682_vm5, %v1726_v60, %v1728_v20 }
 0x164   : > { %v12482_v26 = vpop.f32.mrf.mxu1  ;;  %v2107_v46 = vrot.slane %v16903_v47, 2  ;;  %v12489_v45 = vadd.f32 %v12379_v50, %v954_v49  ;;  %10278 = vmatprep.mubr.msk.bf16.mxu0 %vm11524_vm2, %v16866_v28  ;;  %v11452_v50 = vld [vmem:[%s11613_s16 + $0x8] sm:$0xff]   ;;  %v2512_v49 = vrot.slane %v11627_v16, 3 }
 0x165   : > { %v10096_v54 = vpop.f32.mrf.mxu0  ;;  %v2511_v47 = vrot.slane %v11452_v50, 3 }
 0x166   : > { %16904 = vst [vmem:[#allocation33_spill] sm:$0xff] %v12489_v45  ;;  %v10203_v10 = vpop.f32.mrf.mxu1  ;;  %v2109_v60 = vor.u32 %v2108_v33, %v2107_v46  ;;  %v1329_v46 = vrot.slane %v11918_v17, 1 }
 0x167   : > { %v957_v7 = vpop.f32.mrf.mxu0  ;;  %v16906_v10 = vshll.u32 %v11805_v56, 16 }
 0x168   : > { %v12495_v37 = vpop.f32.mrf.mxu1  ;;  %10397 = vmatmul.mubr.msk.bf16.gmra.mxu1 %vm707_vm3, %v1729_v30  ;;  %v12499_v35 = vadd.f32 %v12395_v29, %v957_v7  ;;  %v12506_v53 = vsel %vm2067_vm7, %v2105_v8, %v2109_v60  ;;  %v16907_v7 = vshrl.u32 %v11805_v56, 16  ;;  %v2513_v8 = vsel %vm2510_vm8, %v2511_v47, %v2512_v49 }
 0x169   : > { %10496 = vmatprep.mubr.msk.bf16.mxu1 %vm11524_vm2, %v16866_v28  ;;  %v10097_v20 = vpop.f32.mrf.mxu0  ;;  %v2112_v30 = vrot.slane %v16906_v10, 3 }
 0x16a   : > { %16905 = vst [vmem:[#allocation34_spill] sm:$0xff] %v12499_v35  ;;  %v10206_v54 = vpop.f32.mrf.mxu1  ;;  %v2111_v50 = vrot.slane %v16907_v7, 2 }
 0x16b   : > { %v962_v45 = vpop.f32.mrf.mxu0  ;;  %10279 = vmatmul.mubr.msk.bf16.gmra.mxu0 %vm707_vm3, %v1328_v55 }
 0x16c   : > { %v12511_v29 = vpop.f32.mrf.mxu1  ;;  %v12516_v16 = vadd.f32 %v12406_v23, %v962_v45  ;;  %10282 = vmatprep.mubr.msk.bf16.mxu0 %vm11524_vm2, %v16866_v28  ;;  %v1330_v23 = vsel %vm1293_vm6, %v1327_v1, %v1329_v46  ;;  %v2514_v45 = vrot.slane %v11631_v19, 3  ;;  %v2113_v7 = vor.u32 %v2112_v30, %v2111_v50 }
 0x16d   : > { %v10100_v33 = vpop.f32.mrf.mxu0  ;;  %v16912_v1 = vshrl.u32 %v11823_v6, 16  ;;  %v1331_v19 = vrot.slane %v11936_v3, 1 }
 0x16e   : > { %16908 = vst [vmem:[#allocation35_spill] sm:$0xff] %v12516_v16  ;;  %v10207_v20 = vpop.f32.mrf.mxu1  ;;  %v12533_v33 = vsel %vm2067_vm7, %v2109_v60, %v2113_v7  ;;  %v2515_v60 = vsel %vm2510_vm8, %v2512_v49, %v2514_v45 }
 0x16f   : > { %v965_v54 = vpop.f32.mrf.mxu0  ;;  %16910 = vst [vmem:[#allocation37_spill] sm:$0xff] %v12533_v33  ;;  %v16911_v20 = vshll.u32 %v11823_v6, 16  ;;  %v16940_v33 = vshrl.u32 %v11954_v0, 16 }
 0x170   : > { %v12522_v10 = vpop.f32.mrf.mxu1  ;;  %10497 = vmatmul.mubr.msk.bf16.vlgmr.msra.gmra.mxu1 %vm707_vm3, %v2513_v8  ;;  %v12526_v55 = vadd.f32 %v12425_v57, %v965_v54  ;;  %v2115_v54 = vrot.slane %v16912_v1, 2 }
 0x171   : > { %10500 = vmatprep.mubr.msk.bf16.mxu1 %vm11524_vm2, %v16866_v28  ;;  %v10101_v16 = vpop.f32.mrf.mxu0  ;;  %v2116_v35 = vrot.slane %v16911_v20, 3  ;;  %v2516_v20 = vrot.slane %v11653_v36, 3  ;;  %v1333_v36 = vrot.slane %v11954_v0, 1 }
 0x172   : > { %16909 = vst [vmem:[#allocation36_spill] sm:$0xff] %v12526_v55  ;;  %v10210_v47 = vpop.f32.mrf.mxu1 }
 0x173   : > { %v970_v8 = vpop.f32.mrf.mxu0  ;;  %10283 = vmatmul.mubr.msk.bf16.gmra.mxu0 %vm707_vm3, %v1330_v23 }
 0x174   : > { %v12538_v57 = vpop.f32.mrf.mxu1  ;;  %v12543_v55 = vadd.f32 %v12437_v9, %v970_v8  ;;  %10286 = vmatprep.mubr.msk.bf16.mxu0 %vm11524_vm2, %v16866_v28  ;;  %v1332_v9 = vsel %vm1293_vm6, %v1329_v46, %v1331_v19  ;;  %v2117_v8 = vor.u32 %v2116_v35, %v2115_v54  ;;  %v16917_v46 = vshrl.u32 %v11846_v32, 16 }
 0x175   : > { %v10104_v30 = vpop.f32.mrf.mxu0  ;;  %v2517_v35 = vsel %vm2510_vm8, %v2514_v45, %v2516_v20 }
 0x176   : > { %16913 = vst [vmem:[#allocation38_spill] sm:$0xff] %v12543_v55  ;;  %v10211_v50 = vpop.f32.mrf.mxu1  ;;  %v12560_v30 = vsel %vm2067_vm7, %v2113_v7, %v2117_v8 }
 0x177   : > { %v973_v16 = vpop.f32.mrf.mxu0  ;;  %16915 = vst [vmem:[#allocation40_spill] sm:$0xff] %v12560_v30  ;;  %v16916_v50 = vshll.u32 %v11846_v32, 16 }
 0x178   : > { %v12549_v47 = vpop.f32.mrf.mxu1  ;;  %10501 = vmatmul.mubr.msk.bf16.gmra.mxu1 %vm707_vm3, %v2515_v60  ;;  %v12553_v23 = vadd.f32 %v12456_v61, %v973_v16  ;;  %v2119_v16 = vrot.slane %v16917_v46, 2 }
 0x179   : > { %10504 = vmatprep.mubr.msk.bf16.mxu1 %vm11524_vm2, %v16866_v28  ;;  %v10105_v1 = vpop.f32.mrf.mxu0  ;;  %v2120_v55 = vrot.slane %v16916_v50, 3  ;;  %v2518_v50 = vrot.slane %v11669_v43, 3  ;;  %v1335_v43 = vrot.slane %v11972_v41, 1 }
 0x17a   : > { %16914 = vst [vmem:[#allocation39_spill] sm:$0xff] %v12553_v23  ;;  %v10310_v49 = vpop.f32.mrf.mxu1 }
 0x17b   : > { %v978_v60 = vpop.f32.mrf.mxu0  ;;  %10287 = vmatmul.mubr.msk.bf16.gmra.mxu0 %vm707_vm3, %v1332_v9 }
 0x17c   : > { %v12565_v61 = vpop.f32.mrf.mxu1  ;;  %v12570_v23 = vadd.f32 %v12467_v11, %v978_v60  ;;  %10290 = vmatprep.mubr.msk.bf16.mxu0 %vm11524_vm2, %v16866_v28  ;;  %v1334_v11 = vsel %vm1293_vm6, %v1331_v19, %v1333_v36  ;;  %v2121_v60 = vor.u32 %v2120_v55, %v2119_v16  ;;  %v16922_v19 = vshrl.u32 %v11864_v52, 16 }
 0x17d   : > { %v10108_v7 = vpop.f32.mrf.mxu0  ;;  %v2519_v55 = vsel %vm2510_vm8, %v2516_v20, %v2518_v50 }
 0x17e   : > { %16918 = vst [vmem:[#allocation41_spill] sm:$0xff] %v12570_v23  ;;  %v10311_v54 = vpop.f32.mrf.mxu1  ;;  %v12587_v7 = vsel %vm2067_vm7, %v2117_v8, %v2121_v60 }
 0x17f   : > { %v981_v1 = vpop.f32.mrf.mxu0  ;;  %16920 = vst [vmem:[#allocation43_spill] sm:$0xff] %v12587_v7  ;;  %v16921_v54 = vshll.u32 %v11864_v52, 16  ;;  %v16938_v7 = vshrl.u32 %v11936_v3, 16 }
 0x180   : > { %v12576_v49 = vpop.f32.mrf.mxu1  ;;  %10505 = vmatmul.mubr.msk.bf16.gmra.mxu1 %vm707_vm3, %v2517_v35  ;;  %v12580_v9 = vadd.f32 %v12482_v26, %v981_v1  ;;  %v2123_v1 = vrot.slane %v16922_v19, 2 }
 0x181   : > { %10508 = vmatprep.mubr.msk.bf16.mxu1 %vm11524_vm2, %v16866_v28  ;;  %v10109_v46 = vpop.f32.mrf.mxu0  ;;  %v2124_v23 = vrot.slane %v16921_v54, 3  ;;  %v2520_v54 = vrot.slane %v11687_v51, 3  ;;  %v1337_v51 = vrot.slane %v11990_v2, 1  ;;  %v2139_v30 = vrot.slane %v16938_v7, 2 }
 0x182   : > { %16919 = vst [vmem:[#allocation42_spill] sm:$0xff] %v12580_v9  ;;  %v10314_v45 = vpop.f32.mrf.mxu1  ;;  %v2528_v7 = vrot.slane %v11769_v31, 3  ;;  %v2143_v31 = vrot.slane %v16940_v33, 2  ;;  %v2530_v33 = vrot.slane %v11787_v42, 3 }
 0x183   : > { %v986_v35 = vpop.f32.mrf.mxu0  ;;  %10291 = vmatmul.mubr.msk.bf16.gmra.mxu0 %vm707_vm3, %v1334_v11 }
 0x184   : > { %v12592_v26 = vpop.f32.mrf.mxu1  ;;  %v12597_v9 = vadd.f32 %v12495_v37, %v986_v35  ;;  %10294 = vmatprep.mubr.msk.bf16.mxu0 %vm11524_vm2, %v16866_v28  ;;  %v1336_v37 = vsel %vm1293_vm6, %v1333_v36, %v1335_v43  ;;  %v2125_v35 = vor.u32 %v2124_v23, %v2123_v1  ;;  %v16927_v36 = vshrl.u32 %v11882_v12, 16 }
 0x185   : > { %v10112_v8 = vpop.f32.mrf.mxu0  ;;  %v2521_v23 = vsel %vm2510_vm8, %v2518_v50, %v2520_v54 }
 0x186   : > { %16923 = vst [vmem:[#allocation44_spill] sm:$0xff] %v12597_v9  ;;  %v10315_v16 = vpop.f32.mrf.mxu1  ;;  %v12614_v8 = vsel %vm2067_vm7, %v2121_v60, %v2125_v35 }
 0x187   : > { %v989_v46 = vpop.f32.mrf.mxu0  ;;  %16925 = vst [vmem:[#allocation46_spill] sm:$0xff] %v12614_v8  ;;  %v16926_v16 = vshll.u32 %v11882_v12, 16 }
 0x188   : > { %v12603_v45 = vpop.f32.mrf.mxu1  ;;  %10509 = vmatmul.mubr.msk.bf16.gmra.mxu1 %vm707_vm3, %v2519_v55  ;;  %v12607_v11 = vadd.f32 %v12511_v29, %v989_v46  ;;  %v2127_v46 = vrot.slane %v16927_v36, 2 }
 0x189   : > { %10512 = vmatprep.mubr.msk.bf16.mxu1 %vm11524_vm2, %v16866_v28  ;;  %v10113_v19 = vpop.f32.mrf.mxu0  ;;  %v2128_v9 = vrot.slane %v16926_v16, 3  ;;  %v2522_v16 = vrot.slane %v11705_v59, 3  ;;  %v1339_v59 = vrot.slane %v12025_v25, 1 }
 0x18a   : > { %16924 = vst [vmem:[#allocation45_spill] sm:$0xff] %v12607_v11  ;;  %v10318_v20 = vpop.f32.mrf.mxu1 }
 0x18b   : > { %v994_v55 = vpop.f32.mrf.mxu0  ;;  %10295 = vmatmul.mubr.msk.bf16.gmra.mxu0 %vm707_vm3, %v1336_v37 }
 0x18c   : > { %v12619_v29 = vpop.f32.mrf.mxu1  ;;  %v12624_v11 = vadd.f32 %v12522_v10, %v994_v55  ;;  %10298 = vmatprep.mubr.msk.bf16.mxu0 %vm11524_vm2, %v16866_v28  ;;  %v1338_v10 = vsel %vm1293_vm6, %v1335_v43, %v1337_v51  ;;  %v2129_v55 = vor.u32 %v2128_v9, %v2127_v46  ;;  %v16932_v43 = vshrl.u32 %v11900_v44, 16 }
 0x18d   : > { %v10116_v60 = vpop.f32.mrf.mxu0  ;;  %v2523_v9 = vsel %vm2510_vm8, %v2520_v54, %v2522_v16 }
 0x18e   : > { %16928 = vst [vmem:[#allocation47_spill] sm:$0xff] %v12624_v11  ;;  %v10319_v1 = vpop.f32.mrf.mxu1  ;;  %v12641_v60 = vsel %vm2067_vm7, %v2125_v35, %v2129_v55 }
 0x18f   : > { %v997_v19 = vpop.f32.mrf.mxu0  ;;  %16930 = vst [vmem:[#allocation49_spill] sm:$0xff] %v12641_v60 }
 0x190   : > { %v12630_v20 = vpop.f32.mrf.mxu1  ;;  %10513 = vmatmul.mubr.msk.bf16.gmra.mxu1 %vm707_vm3, %v2521_v23  ;;  %v12634_v37 = vadd.f32 %v12538_v57, %v997_v19  ;;  %v16931_v57 = vshll.u32 %v11900_v44, 16 }
 0x191   : > { %10516 = vmatprep.mubr.msk.bf16.mxu1 %vm11524_vm2, %v16866_v28  ;;  %v10117_v36 = vpop.f32.mrf.mxu0 }
 0x192   : > { %16929 = vst [vmem:[#allocation48_spill] sm:$0xff] %v12634_v37  ;;  %v10322_v50 = vpop.f32.mrf.mxu1  ;;  %v2132_v19 = vrot.slane %v16931_v57, 3  ;;  %v2131_v37 = vrot.slane %v16932_v43, 2  ;;  %v2524_v57 = vrot.slane %v11723_v5, 3 }
 0x193   : > { %v1084_v1 = vpop.f32.mrf.mxu0  ;;  %10299 = vmatmul.mubr.msk.bf16.gmra.mxu0 %vm707_vm3, %v1338_v10  ;;  %v1340_v10 = vsel %vm1293_vm6, %v1337_v51, %v1339_v59  ;;  %v16935_v51 = vshrl.u32 %v11918_v17, 16 }
 0x194   : > { %v12644_v23 = vpop.f32.mrf.mxu1  ;;  %10302 = vmatprep.mubr.msk.bf16.mxu0 %vm11524_vm2, %v16866_v28  ;;  %v2133_v43 = vor.u32 %v2132_v19, %v2131_v37  ;;  %v2525_v5 = vsel %vm2510_vm8, %v2522_v16, %v2524_v57  ;;  %v9144_v37 = vld [vmem:[%s16776_s3 + $0xc] sm:$0x3] }
 0x195   : > { %v10122_v35 = vpop.f32.mrf.mxu0  ;;  %v2135_v59 = vrot.slane %v16935_v51, 2 }
 0x196   : > { %v10323_v46 = vpop.f32.mrf.mxu1  ;;  %v12662_v25 = vsel %vm2067_vm7, %v2129_v55, %v2133_v43 }
 0x197   : > { %v1087_v36 = vpop.f32.mrf.mxu0  ;;  %16933 = vst [vmem:[#allocation50_spill] sm:$0xff] %v12662_v25 }
 0x198   : > { %v12654_v50 = vpop.f32.mrf.mxu1  ;;  %10517 = vmatmul.mubr.msk.bf16.gmra.mxu1 %vm707_vm3, %v2523_v9  ;;  %v16934_v9 = vshll.u32 %v11918_v17, 16 }
 0x199   : > { %10520 = vmatprep.mubr.msk.bf16.mxu1 %vm11524_vm2, %v16866_v28  ;;  %v10123_v11 = vpop.f32.mrf.mxu0 }
 0x19a   : > { %v10326_v60 = vpop.f32.mrf.mxu1  ;;  %v2136_v46 = vrot.slane %v16934_v9, 3  ;;  %v2526_v9 = vrot.slane %v11741_v15, 3 }
 0x19b   : > { %v1092_v54 = vpop.f32.mrf.mxu0  ;;  %10303 = vmatmul.mubr.msk.bf16.gmra.mxu0 %vm707_vm3, %v1340_v10  ;;  %v2988_v10 = vand.u32 %v9144_v37, %v11594_v4 }
 0x19c   : > { %v12665_v35 = vpop.f32.mrf.mxu1  ;;  %10402 = vmatprep.mubr.msk.bf16.mxu0 %vm11524_vm2, %v16866_v28  ;;  %v2137_v16 = vor.u32 %v2136_v46, %v2135_v59  ;;  %v2527_v15 = vsel %vm2510_vm8, %v2524_v57, %v2526_v9  ;;  %v1085_v57 = vadd.f32 %v1084_v1, %v12068_v21  ;;  %v2529_v21 = vsel %vm2510_vm8, %v2526_v9, %v2528_v7 }
 0x19d   : > { %v10126_v11 = vpop.f32.mrf.mxu0 }
 0x19e   : > { %v10327_v55 = vpop.f32.mrf.mxu1  ;;  %v12687_v25 = vsel %vm2067_vm7, %v2133_v43, %v2137_v16 }
 0x19f   : > { %v12677_v60 = vpop.f32.mrf.mxu0  ;;  %16936 = vst [vmem:[#allocation51_spill] sm:$0xff] %v12687_v25 }
 0x1a0   : > { %v12679_v19 = vpop.f32.mrf.mxu1  ;;  %10521 = vmatmul.mubr.msk.bf16.gmra.mxu1 %vm707_vm3, %v2525_v5  ;;  %v16937_v5 = vshll.u32 %v11936_v3, 16 }
 0x1a1   : > { %10524 = vmatprep.mubr.msk.bf16.mxu1 %vm11524_vm2, %v16866_v28  ;;  %v10127_v51 = vpop.f32.mrf.mxu0 }
 0x1a2   : > { %v10330_v11 = vpop.f32.mrf.mxu1  ;;  %v2140_v37 = vrot.slane %v16937_v5, 3 }
 0x1a3   : > { %v12689_v55 = vpop.f32.mrf.mxu0  ;;  %10403 = vmatmul.mubr.msk.bf16.vlgmr.msra.gmra.mxu0 %vm707_vm3, %v12253_v27 }
 0x1a4   : > { %v12693_v8 = vpop.f32.mrf.mxu1  ;;  %10589 = vmatpush3.bf16.msra.mxu0 %v2988_v10  ;;  %10406 = vmatprep.mubr.msk.bf16.mxu0 %vm11524_vm2, %v16866_v28  ;;  %v2141_v10 = vor.u32 %v2140_v37, %v2139_v30  ;;  %v1088_v37 = vadd.f32 %v1087_v36, %v12075_v63 }
 0x1a5   : > { %v10130_v43 = vpop.f32.mrf.mxu0  ;;  %10776 = vmatprep.subr.bf16.mxu0 %v16866_v28 }
 0x1a6   : > { %v10331_v46 = vpop.f32.mrf.mxu1  ;;  %v12713_v5 = vsel %vm2067_vm7, %v2137_v16, %v2141_v10 }
 0x1a7   : > { %v12703_v59 = vpop.f32.mrf.mxu0 }
 0x1a8   : > { %v12705_v27 = vpop.f32.mrf.mxu1  ;;  %10525 = vmatmul.mubr.msk.bf16.gmra.mxu1 %vm707_vm3, %v2527_v15  ;;  %v16939_v15 = vshll.u32 %v11954_v0, 16 }
 0x1a9   : > { %10528 = vmatprep.mubr.msk.bf16.mxu1 %vm11524_vm2, %v16866_v28  ;;  %v10131_v51 = vpop.f32.mrf.mxu0 }
 0x1aa   : > { %v10334_v11 = vpop.f32.mrf.mxu1  ;;  %v2144_v25 = vrot.slane %v16939_v15, 3 }
 0x1ab   : > { %v1447_v43 = vpop.f32.mrf.mxu0  ;;  %10407 = vmatmul.mubr.msk.bf16.gmra.mxu0 %vm707_vm3, %v12282_v18 }
 0x1ac   : > { %v12717_v46 = vpop.f32.mrf.mxu1  ;;  %v1630_v30 = vadd.f32 %v1447_v43, %v1085_v57  ;;  %10410 = vmatprep.mubr.msk.bf16.mxu0 %vm11524_vm2, %v16866_v28  ;;  %v2145_v57 = vor.u32 %v2144_v25, %v2143_v31  ;;  %v16942_v25 = vshrl.u32 %v11972_v41, 16 }
 0x1ad   : > { %v10216_v1 = vpop.f32.mrf.mxu0 }
 0x1ae   : > { %v10335_v16 = vpop.f32.mrf.mxu1  ;;  %v12728_v18 = vadd.f32 %v12549_v47, %v1630_v30  ;;  %v1093_v1 = vadd.f32 %v1092_v54, %v12083_v39  ;;  %v12741_v47 = vsel %vm2067_vm7, %v2141_v10, %v2145_v57  ;;  %v2147_v31 = vrot.slane %v16942_v25, 2 }
 0x1af   : > { %v1450_v51 = vpop.f32.mrf.mxu0  ;;  %v2531_v39 = vsel %vm2510_vm8, %v2528_v7, %v2530_v33  ;;  %v1096_v10 = vadd.f32 %v12677_v60, %v12097_v13  ;;  %v1101_v13 = vadd.f32 %v12689_v55, %v12107_v48  ;;  %v16944_v25 = vshrl.u32 %v11990_v2, 16 }
 0x1b0   : > { %v12730_v11 = vpop.f32.mrf.mxu1  ;;  %10529 = vmatmul.mubr.msk.bf16.gmra.mxu1 %vm707_vm3, %v2529_v21  ;;  %v1631_v15 = vadd.f32 %v1450_v51, %v1088_v37  ;;  %v16941_v21 = vshll.u32 %v11972_v41, 16 }
 0x1b1   : > { %10532 = vmatprep.mubr.msk.bf16.mxu1 %vm11524_vm2, %v16866_v28  ;;  %v10217_v9 = vpop.f32.mrf.mxu0 }
 0x1b2   : > { %v10338_v43 = vpop.f32.mrf.mxu1  ;;  %v12738_v63 = vadd.f32 %v12565_v61, %v1631_v15  ;;  %v2148_v42 = vrot.slane %v16941_v21, 3  ;;  %v2532_v9 = vrot.slane %v11805_v56, 3  ;;  %v16943_v56 = vshll.u32 %v11990_v2, 16 }
 0x1b3   : > { %v1455_v36 = vpop.f32.mrf.mxu0  ;;  %10411 = vmatmul.mubr.msk.bf16.gmra.mxu0 %vm707_vm3, %v12309_v62 }
 0x1b4   : > { %v12745_v30 = vpop.f32.mrf.mxu1  ;;  %v1632_v16 = vadd.f32 %v1455_v36, %v1093_v1  ;;  %10414 = vmatprep.mubr.msk.bf16.mxu0 %vm11524_vm2, %v16866_v28  ;;  %v2149_v7 = vor.u32 %v2148_v42, %v2147_v31  ;;  %v2152_v42 = vrot.slane %v16943_v56, 3  ;;  %v2151_v31 = vrot.slane %v16944_v25, 2 }
 0x1b5   : > { %v10220_v61 = vpop.f32.mrf.mxu0  ;;  %v2533_v48 = vsel %vm2510_vm8, %v2530_v33, %v2532_v9 }
 0x1b6   : > { %v10339_v54 = vpop.f32.mrf.mxu1  ;;  %v12757_v62 = vadd.f32 %v12576_v49, %v1632_v16  ;;  %v12771_v60 = vsel %vm2067_vm7, %v2145_v57, %v2149_v7  ;;  %v1104_v57 = vadd.f32 %v12703_v59, %v12117_v14  ;;  %v12795_v33 = vor.u32 %v2152_v42, %v2151_v31 }
 0x1b7   : > { %v1458_v37 = vpop.f32.mrf.mxu0 }
 0x1b8   : > { %v12759_v51 = vpop.f32.mrf.mxu1  ;;  %10533 = vmatmul.mubr.msk.bf16.gmra.mxu1 %vm707_vm3, %v2531_v39  ;;  %v1633_v15 = vadd.f32 %v1458_v37, %v1096_v10  ;;  %v2534_v10 = vrot.slane %v11823_v6, 3 }
 0x1b9   : > { %10536 = vmatprep.mubr.msk.bf16.mxu1 %vm11524_vm2, %v16866_v28  ;;  %v10221_v43 = vpop.f32.mrf.mxu0 }
 0x1ba   : > { %v10342_v1 = vpop.f32.mrf.mxu1  ;;  %v12768_v49 = vadd.f32 %v12592_v26, %v1633_v15  ;;  %v2535_v6 = vsel %vm2510_vm8, %v2532_v9, %v2534_v10 }
 0x1bb   : > { %v1463_v36 = vpop.f32.mrf.mxu0  ;;  %10415 = vmatmul.mubr.msk.bf16.gmra.mxu0 %vm707_vm3, %v12336_v24 }
 0x1bc   : > { %v12775_v21 = vpop.f32.mrf.mxu1  ;;  %v1634_v16 = vadd.f32 %v1463_v36, %v1101_v13  ;;  %10418 = vmatprep.mubr.msk.bf16.mxu0 %vm11524_vm2, %v16866_v28 }
 0x1bd   : > { %v10224_v26 = vpop.f32.mrf.mxu0 }
 0x1be   : > { %v10343_v55 = vpop.f32.mrf.mxu1  ;;  %v12787_v24 = vadd.f32 %v12603_v45, %v1634_v16  ;;  %v12802_v45 = vsel %vm2067_vm7, %v2149_v7, %v12795_v33  ;;  %v16945_v16 = vld [vmem:[#allocation3_spill] sm:$0xff] }
 0x1bf   : > { %v1466_v39 = vpop.f32.mrf.mxu0 }
 0x1c0   : > { %v12789_v61 = vpop.f32.mrf.mxu1  ;;  %10537 = vmatmul.mubr.msk.bf16.gmra.mxu1 %vm707_vm3, %v2533_v48  ;;  %v1635_v54 = vadd.f32 %v1466_v39, %v1104_v57 }
 0x1c1   : > { %10540 = vmatprep.mubr.msk.bf16.mxu1 %vm11524_vm2, %v16866_v28  ;;  %v10225_v37 = vpop.f32.mrf.mxu0 }
 0x1c2   : > { %v10346_v15 = vpop.f32.mrf.mxu1  ;;  %v12798_v14 = vadd.f32 %v12619_v29, %v1635_v54  ;;  %v2538_v54 = vrot.slane %v11864_v52, 3 }
 0x1c3   : > { %v1471_v59 = vpop.f32.mrf.mxu0  ;;  %10419 = vmatmul.mubr.msk.bf16.gmra.mxu0 %vm707_vm3, %v12363_v38 }
 0x1c4   : > { %v12806_v43 = vpop.f32.mrf.mxu1  ;;  %v1636_v1 = vadd.f32 %v1471_v59, %v12129_v40  ;;  %10422 = vmatprep.mubr.msk.bf16.mxu0 %vm11524_vm2, %v16866_v28  ;;  %v2536_v40 = vrot.slane %v11846_v32, 3 }
 0x1c5   : > { %v10228_v13 = vpop.f32.mrf.mxu0 }
 0x1c6   : > { %v10347_v29 = vpop.f32.mrf.mxu1  ;;  %v12813_v36 = vadd.f32 %v12630_v20, %v1636_v1 }
 0x1c7   : > { %v1474_v7 = vpop.f32.mrf.mxu0  ;;  %v2539_v29 = vsel %vm2510_vm8, %v2536_v40, %v2538_v54 }
 0x1c8   : > { %v12815_v56 = vpop.f32.mrf.mxu1  ;;  %10541 = vmatmul.mubr.msk.bf16.gmra.mxu1 %vm707_vm3, %v2535_v6  ;;  %v1637_v38 = vadd.f32 %v1474_v7, %v12138_v34  ;;  %v2537_v34 = vsel %vm2510_vm8, %v2534_v10, %v2536_v40  ;;  %v16948_v6 = vld [vmem:[#allocation5_spill] sm:$0xff]  ;;  %v2540_v40 = vrot.slane %v11882_v12, 3 }
 0x1c9   : > { %10544 = vmatprep.mubr.msk.bf16.mxu1 %vm11524_vm2, %v16866_v28  ;;  %v10229_v42 = vpop.f32.mrf.mxu0 }
 0x1ca   : > { %v10350_v25 = vpop.f32.mrf.mxu1  ;;  %v12823_v9 = vadd.f32 %v12644_v23, %v1637_v38  ;;  %v2541_v12 = vsel %vm2510_vm8, %v2538_v54, %v2540_v40 }
 0x1cb   : > { %v1479_v31 = vpop.f32.mrf.mxu0  ;;  %10423 = vmatmul.mubr.msk.bf16.gmra.mxu0 %vm707_vm3, %v12390_v22  ;;  %v16946_v22 = vld [vmem:[#allocation4_spill] sm:$0xff]  ;;  %v9169_v25 = vld [vmem:[%s16776_s3 + $0xe] sm:$0x3] }
 0x1cc   : > { %v12827_v20 = vpop.f32.mrf.mxu1  ;;  %v1638_v48 = vadd.f32 %v1479_v31, %v16945_v16  ;;  %10426 = vmatprep.mubr.msk.bf16.mxu0 %vm11524_vm2, %v16866_v28  ;;  %v16949_v31 = vld [vmem:[#allocation6_spill] sm:$0xff] }
 0x1cd   : > { %v10232_v26 = vpop.f32.mrf.mxu0 }
 0x1ce   : > { %v10351_v32 = vpop.f32.mrf.mxu1  ;;  %v12834_v55 = vadd.f32 %v12654_v50, %v1638_v48  ;;  %v16947_v50 = vld [vmem:[#allocation25_spill] sm:$0xff]  ;;  %v3491_v48 = vand.u32 %v9169_v25, %v11594_v4 }
 0x1cf   : > { %v1482_v23 = vpop.f32.mrf.mxu0  ;;  %v16953_v25 = vld [vmem:[#allocation9_spill] sm:$0xff] }
 0x1d0   : > { %v12836_v57 = vpop.f32.mrf.mxu1  ;;  %10545 = vmatmul.mubr.msk.bf16.gmra.mxu1 %vm707_vm3, %v2537_v34  ;;  %v1639_v39 = vadd.f32 %v1482_v23, %v16946_v22  ;;  %v16950_v22 = vld [vmem:[#allocation7_spill] sm:$0xff] }
 0x1d1   : > { %10548 = vmatprep.mubr.msk.bf16.mxu1 %vm11524_vm2, %v16866_v28  ;;  %v10233_v37 = vpop.f32.mrf.mxu0  ;;  %10683 = vmatpush3.bf16.msra.mxu1 %v3491_v48 }
 0x1d2   : > { %v10354_v15 = vpop.f32.mrf.mxu1  ;;  %v12844_v10 = vadd.f32 %v12665_v35, %v1639_v39 }
 0x1d3   : > { %v1487_v59 = vpop.f32.mrf.mxu0  ;;  %10427 = vmatmul.mubr.msk.bf16.gmra.mxu0 %vm707_vm3, %v16947_v50 }
 0x1d4   : > { %v12848_v1 = vpop.f32.mrf.mxu1  ;;  %v1640_v13 = vadd.f32 %v1487_v59, %v16948_v6  ;;  %10430 = vmatprep.mubr.msk.bf16.mxu0 %vm11524_vm2, %v16866_v28 }
 0x1d5   : > { %v10236_v7 = vpop.f32.mrf.mxu0 }
 0x1d6   : > { %v10355_v52 = vpop.f32.mrf.mxu1  ;;  %v12855_v38 = vadd.f32 %v12679_v19, %v1640_v13  ;;  %v2542_v13 = vrot.slane %v11900_v44, 3 }
 0x1d7   : > { %v1490_v35 = vpop.f32.mrf.mxu0 }
 0x1d8   : > { %v12857_v42 = vpop.f32.mrf.mxu1  ;;  %10549 = vmatmul.mubr.msk.bf16.gmra.mxu1 %vm707_vm3, %v2539_v29  ;;  %v1641_v16 = vadd.f32 %v1490_v35, %v16949_v31 }
 0x1d9   : > { %10552 = vmatprep.mubr.msk.bf16.mxu1 %vm11524_vm2, %v16866_v28  ;;  %v10237_v19 = vpop.f32.mrf.mxu0 }
 0x1da   : > { %v10358_v34 = vpop.f32.mrf.mxu1  ;;  %v12869_v26 = vadd.f32 %v12693_v8, %v1641_v16  ;;  %v2543_v16 = vsel %vm2510_vm8, %v2540_v40, %v2542_v13 }
 0x1db   : > { %v1495_v32 = vpop.f32.mrf.mxu0  ;;  %10431 = vmatmul.mubr.msk.bf16.gmra.mxu0 %vm707_vm3, %v12449_v58  ;;  %v16951_v58 = vld [vmem:[#allocation8_spill] sm:$0xff] }
 0x1dc   : > { %v12873_v23 = vpop.f32.mrf.mxu1  ;;  %v1642_v39 = vadd.f32 %v1495_v32, %v16950_v22  ;;  %10434 = vmatprep.mubr.msk.bf16.mxu0 %vm11524_vm2, %v16866_v28  ;;  %v16954_v32 = vld [vmem:[#allocation10_spill] sm:$0xff] }
 0x1dd   : > { %v10240_v37 = vpop.f32.mrf.mxu0 }
 0x1de   : > { %v10359_v15 = vpop.f32.mrf.mxu1  ;;  %v12880_v59 = vadd.f32 %v12705_v27, %v1642_v39  ;;  %v16952_v27 = vld [vmem:[#allocation32_spill] sm:$0xff]  ;;  %v2544_v39 = vrot.slane %v11918_v17, 3 }
 0x1df   : > { %v1498_v8 = vpop.f32.mrf.mxu0 }
 0x1e0   : > { %v12882_v50 = vpop.f32.mrf.mxu1  ;;  %10553 = vmatmul.mubr.msk.bf16.gmra.mxu1 %vm707_vm3, %v2541_v12  ;;  %v1643_v6 = vadd.f32 %v1498_v8, %v16951_v58  ;;  %v16955_v8 = vld [vmem:[#allocation11_spill] sm:$0xff] }
 0x1e1   : > { %10556 = vmatprep.mubr.msk.bf16.mxu1 %vm11524_vm2, %v16866_v28  ;;  %v10241_v29 = vpop.f32.mrf.mxu0 }
 0x1e2   : > { %v10362_v7 = vpop.f32.mrf.mxu1  ;;  %v12890_v54 = vadd.f32 %v12717_v46, %v1643_v6  ;;  %v2545_v6 = vsel %vm2510_vm8, %v2542_v13, %v2544_v39 }
 0x1e3   : > { %v1503_v52 = vpop.f32.mrf.mxu0  ;;  %10435 = vmatmul.mubr.msk.bf16.gmra.mxu0 %vm707_vm3, %v16952_v27 }
 0x1e4   : > { %v12894_v35 = vpop.f32.mrf.mxu1  ;;  %v1644_v31 = vadd.f32 %v1503_v52, %v16953_v25  ;;  %10438 = vmatprep.mubr.msk.bf16.mxu0 %vm11524_vm2, %v16866_v28  ;;  %v2546_v25 = vrot.slane %v11936_v3, 3 }
 0x1e5   : > { %v10244_v48 = vpop.f32.mrf.mxu0 }
 0x1e6   : > { %v10363_v44 = vpop.f32.mrf.mxu1  ;;  %v12901_v19 = vadd.f32 %v12730_v11, %v1644_v31 }
 0x1e7   : > { %v1506_v46 = vpop.f32.mrf.mxu0 }
 0x1e8   : > { %v12903_v34 = vpop.f32.mrf.mxu1  ;;  %10557 = vmatmul.mubr.msk.bf16.gmra.mxu1 %vm707_vm3, %v2543_v16  ;;  %v1645_v22 = vadd.f32 %v1506_v46, %v16954_v32  ;;  %v16958_v46 = vld [vmem:[#allocation13_spill] sm:$0xff] }
 0x1e9   : > { %10560 = vmatprep.mubr.msk.bf16.mxu1 %vm11524_vm2, %v16866_v28  ;;  %v10245_v12 = vpop.f32.mrf.mxu0 }
 0x1ea   : > { %v10366_v37 = vpop.f32.mrf.mxu1  ;;  %v12911_v40 = vadd.f32 %v12745_v30, %v1645_v22  ;;  %v2547_v22 = vsel %vm2510_vm8, %v2544_v39, %v2546_v25 }
 0x1eb   : > { %v1511_v15 = vpop.f32.mrf.mxu0  ;;  %10439 = vmatmul.mubr.msk.bf16.gmra.mxu0 %vm707_vm3, %v12506_v53  ;;  %v16956_v53 = vld [vmem:[#allocation12_spill] sm:$0xff] }
 0x1ec   : > { %v12915_v11 = vpop.f32.mrf.mxu1  ;;  %v1646_v58 = vadd.f32 %v1511_v15, %v16955_v8  ;;  %10442 = vmatprep.mubr.msk.bf16.mxu0 %vm11524_vm2, %v16866_v28  ;;  %v16959_v8 = vld [vmem:[#allocation14_spill] sm:$0xff] }
 0x1ed   : > { %v10248_v29 = vpop.f32.mrf.mxu0 }
 0x1ee   : > { %v10367_v17 = vpop.f32.mrf.mxu1  ;;  %v12922_v7 = vadd.f32 %v12759_v51, %v1646_v58  ;;  %v16957_v51 = vld [vmem:[#allocation37_spill] sm:$0xff] }
 0x1ef   : > { %v1514_v30 = vpop.f32.mrf.mxu0 }
 0x1f0   : > { %v12924_v52 = vpop.f32.mrf.mxu1  ;;  %10561 = vmatmul.mubr.msk.bf16.gmra.mxu1 %vm707_vm3, %v2545_v6  ;;  %v1647_v27 = vadd.f32 %v1514_v30, %v16956_v53  ;;  %v2548_v6 = vrot.slane %v11954_v0, 3 }
 0x1f1   : > { %10564 = vmatprep.mubr.msk.bf16.mxu1 %vm11524_vm2, %v16866_v28  ;;  %v10249_v31 = vpop.f32.mrf.mxu0 }
 0x1f2   : > { %v10370_v16 = vpop.f32.mrf.mxu1  ;;  %v12932_v13 = vadd.f32 %v12775_v21, %v1647_v27  ;;  %v16961_v27 = vld [vmem:[#allocation15_spill] sm:$0xff] }
 0x1f3   : > { %v1519_v48 = vpop.f32.mrf.mxu0  ;;  %10443 = vmatmul.mubr.msk.bf16.gmra.mxu0 %vm707_vm3, %v16957_v51  ;;  %v2549_v16 = vsel %vm2510_vm8, %v2546_v25, %v2548_v6 }
 0x1f4   : > { %v12936_v44 = vpop.f32.mrf.mxu1  ;;  %v1648_v32 = vadd.f32 %v1519_v48, %v16958_v46  ;;  %10446 = vmatprep.mubr.msk.bf16.mxu0 %vm11524_vm2, %v16866_v28 }
 0x1f5   : > { %v10252_v12 = vpop.f32.mrf.mxu0 }
 0x1f6   : > { %v10371_v3 = vpop.f32.mrf.mxu1  ;;  %v12943_v37 = vadd.f32 %v12789_v61, %v1648_v32  ;;  %v16960_v61 = vld [vmem:[#allocation40_spill] sm:$0xff]  ;;  %v2550_v12 = vrot.slane %v11972_v41, 3 }
 0x1f7   : > { %v1522_v21 = vpop.f32.mrf.mxu0  ;;  %v16963_v32 = vld [vmem:[#allocation16_spill] sm:$0xff] }
 0x1f8   : > { %v12945_v15 = vpop.f32.mrf.mxu1  ;;  %10565 = vmatmul.mubr.msk.bf16.gmra.mxu1 %vm707_vm3, %v2547_v22  ;;  %v1649_v58 = vadd.f32 %v1522_v21, %v16959_v8 }
 0x1f9   : > { %10568 = vmatprep.mubr.msk.bf16.mxu1 %vm11524_vm2, %v16866_v28  ;;  %v10253_v29 = vpop.f32.mrf.mxu0 }
 0x1fa   : > { %v10374_v17 = vpop.f32.mrf.mxu1  ;;  %v12953_v39 = vadd.f32 %v12806_v43, %v1649_v58  ;;  %v16966_v29 = vld [vmem:[#allocation17_spill] sm:$0xff] }
 0x1fb   : > { %v1527_v30 = vpop.f32.mrf.mxu0  ;;  %10447 = vmatmul.mubr.msk.bf16.gmra.mxu0 %vm707_vm3, %v16960_v61 }
 0x1fc   : > { %v12957_v53 = vpop.f32.mrf.mxu1  ;;  %v1650_v31 = vadd.f32 %v1527_v30, %v16961_v27  ;;  %10450 = vmatprep.mubr.msk.bf16.mxu0 %vm11524_vm2, %v16866_v28  ;;  %v2551_v30 = vsel %vm2510_vm8, %v2548_v6, %v2550_v12 }
 0x1fd   : > { %v10256_v48 = vpop.f32.mrf.mxu0 }
 0x1fe   : > { %v10375_v0 = vpop.f32.mrf.mxu1  ;;  %v12964_v51 = vadd.f32 %v12815_v56, %v1650_v31  ;;  %v16965_v56 = vld [vmem:[#allocation43_spill] sm:$0xff] }
 0x1ff   : > { %v1530_v43 = vpop.f32.mrf.mxu0  ;;  %v2552_v0 = vrot.slane %v11990_v2, 3 }
 0x200   : > { %16962 = vst [vmem:[#allocation3_spill] sm:$0xff] %v12964_v51  ;;  %v12966_v46 = vpop.f32.mrf.mxu1  ;;  %10569 = vmatmul.mubr.msk.bf16.gmra.mxu1 %vm707_vm3, %v2549_v16  ;;  %v1651_v22 = vadd.f32 %v1530_v43, %v16963_v32  ;;  %v16968_v16 = vld [vmem:[#allocation18_spill] sm:$0xff] }
 0x201   : > { %10572 = vmatprep.mubr.msk.bf16.mxu1 %vm11524_vm2, %v16866_v28  ;;  %v10257_v3 = vpop.f32.mrf.mxu0  ;;  %v11465_v51 = vld [vmem:[%s11613_s16 + $0x44] sm:$0xf] }
 0x202   : > { %v10378_v21 = vpop.f32.mrf.mxu1  ;;  %v12974_v25 = vadd.f32 %v12827_v20, %v1651_v22 }
 0x203   : > { %v1535_v8 = vpop.f32.mrf.mxu0  ;;  %10451 = vmatmul.mubr.msk.bf16.gmra.mxu0 %vm707_vm3, %v16965_v56  ;;  %v16971_v21 = vld [vmem:[#allocation19_spill] sm:$0xff]  ;;  %v2553_v56 = vsel %vm2510_vm8, %v2550_v12, %v2552_v0 }
 0x204   : > { %16964 = vst [vmem:[#allocation4_spill] sm:$0xff] %v12974_v25  ;;  %v12978_v58 = vpop.f32.mrf.mxu1  ;;  %v1652_v17 = vadd.f32 %v1535_v8, %v16966_v29  ;;  %10454 = vmatprep.mubr.msk.bf16.mxu0 %vm11524_vm2, %v16866_v28 }
 0x205   : > { %v10260_v61 = vpop.f32.mrf.mxu0 }
 0x206   : > { %v10379_v41 = vpop.f32.mrf.mxu1  ;;  %v12985_v27 = vadd.f32 %v12836_v57, %v1652_v17  ;;  %v16970_v57 = vld [vmem:[#allocation46_spill] sm:$0xff]  ;;  %v16973_v61 = vld [vmem:[#allocation20_spill] sm:$0xff] }
 0x207   : > { %v1538_v20 = vpop.f32.mrf.mxu0 }
 0x208   : > { %16967 = vst [vmem:[#allocation25_spill] sm:$0xff] %v12985_v27  ;;  %v12987_v31 = vpop.f32.mrf.mxu1  ;;  %10573 = vmatmul.mubr.msk.bf16.gmra.mxu1 %vm707_vm3, %v2551_v30  ;;  %v1653_v48 = vadd.f32 %v1538_v20, %v16968_v16  ;;  %v16974_v20 = vld [vmem:[#allocation26_spill] sm:$0xff] }
 0x209   : > { %10576 = vmatprep.mubr.msk.bf16.mxu1 %vm11524_vm2, %v16866_v28  ;;  %v10261_v43 = vpop.f32.mrf.mxu0  ;;  %v2554_v16 = vrot.slane %v16974_v20, 3 }
 0x20a   : > { %v10382_v32 = vpop.f32.mrf.mxu1  ;;  %v12995_v6 = vadd.f32 %v12848_v1, %v1653_v48 }
 0x20b   : > { %v1543_v22 = vpop.f32.mrf.mxu0  ;;  %10455 = vmatmul.mubr.msk.bf16.gmra.mxu0 %vm707_vm3, %v16970_v57  ;;  %v16976_v32 = vld [vmem:[#allocation49_spill] sm:$0xff] }
 0x20c   : > { %16969 = vst [vmem:[#allocation5_spill] sm:$0xff] %v12995_v6  ;;  %v12999_v3 = vpop.f32.mrf.mxu1  ;;  %v1654_v8 = vadd.f32 %v1543_v22, %v16971_v21  ;;  %10458 = vmatprep.mubr.msk.bf16.mxu0 %vm11524_vm2, %v16866_v28  ;;  %v16977_v57 = vld [vmem:[#allocation21_spill] sm:$0xff]  ;;  %v11458_v6 = vld [vmem:[%s11613_s16 + $0x28] sm:$0xf] }
 0x20d   : > { %v10264_v29 = vpop.f32.mrf.mxu0 }
 0x20e   : > { %v10383_v2 = vpop.f32.mrf.mxu1  ;;  %v13006_v17 = vadd.f32 %v12857_v42, %v1654_v8  ;;  %v2555_v8 = vsel %vm2510_vm8, %v2552_v0, %v2554_v16  ;;  %v11454_v29 = vld [vmem:[%s11613_s16 + $0x18] sm:$0xf]  ;;  %v11455_v0 = vld [vmem:[%s11613_s16 + $0x1c] sm:$0xf] }
 0x20f   : > { %v1546_v1 = vpop.f32.mrf.mxu0 }
 0x210   : > { %16972 = vst [vmem:[#allocation6_spill] sm:$0xff] %v13006_v17  ;;  %v13008_v30 = vpop.f32.mrf.mxu1  ;;  %10577 = vmatmul.mubr.msk.bf16.gmra.mxu1 %vm707_vm3, %v2553_v56  ;;  %v1655_v41 = vadd.f32 %v1546_v1, %v16973_v61  ;;  %v11453_v56 = vld [vmem:[%s11613_s16 + $0x14] sm:$0xf] }
 0x211   : > { %10580 = vmatprep.mubr.msk.bf16.mxu1 %vm11524_vm2, %v16866_v28  ;;  %v10265_v12 = vpop.f32.mrf.mxu0  ;;  %v13028_v2 = vcombine.low %v11453_v56, %v11454_v29  ;;  %v11456_v56 = vld [vmem:[%s11613_s16 + $0x20] sm:$0xf] }
 0x212   : > { %v10386_v48 = vpop.f32.mrf.mxu1  ;;  %v13016_v43 = vadd.f32 %v12873_v23, %v1655_v41  ;;  %v13042_v29 = vcombine.low %v11455_v0, %v11456_v56 }
 0x213   : > { %v1551_v42 = vpop.f32.mrf.mxu0  ;;  %10459 = vmatmul.mubr.msk.bf16.gmra.mxu0 %vm707_vm3, %v16976_v32  ;;  %v16979_v48 = vld [vmem:[#allocation30_spill] sm:$0xff]  ;;  %v3256_v0 = vshrl.u32 %v13028_v2, 16 }
 0x214   : > { %16975 = vst [vmem:[#allocation7_spill] sm:$0xff] %v13016_v43  ;;  %v13020_v22 = vpop.f32.mrf.mxu1  ;;  %v1656_v21 = vadd.f32 %v1551_v42, %v16977_v57  ;;  %10462 = vmatprep.mubr.msk.bf16.mxu0 %vm11524_vm2, %v16866_v28  ;;  %v2556_v42 = vrot.slane %v16979_v48, 3  ;;  %v16980_v32 = vld [vmem:[#allocation22_spill] sm:$0xff] }
 0x215   : > { %v10268_v23 = vpop.f32.mrf.mxu0 }
 0x216   : > { %v10387_v1 = vpop.f32.mrf.mxu1  ;;  %v13031_v61 = vadd.f32 %v12882_v50, %v1656_v21  ;;  %v3258_v23 = vshll.u32 %v13028_v2, 16 }
 0x217   : > { %v1554_v41 = vpop.f32.mrf.mxu0 }
 0x218   : > { %16978 = vst [vmem:[#allocation8_spill] sm:$0xff] %v13031_v61  ;;  %v13033_v12 = vpop.f32.mrf.mxu1  ;;  %10581 = vmatmul.mubr.msk.bf16.gmra.mxu1 %vm707_vm3, %v2555_v8  ;;  %v1657_v57 = vadd.f32 %v1554_v41, %v16980_v32  ;;  %v16982_v8 = vld [vmem:[#allocation50_spill] sm:$0xff]  ;;  %v2557_v41 = vsel %vm2510_vm8, %v2554_v16, %v2556_v42  ;;  %v16983_v32 = vld [vmem:[#allocation23_spill] sm:$0xff]  ;;  %v3260_v56 = vrot.slane %v3258_v23, 1  ;;  %v16985_v16 = vld [vmem:[#allocation24_spill] sm:$0xff] }
 0x219   : > { %10584 = vmatprep.mubr.msk.bf16.mxu1 %vm11524_vm2, %v16866_v28  ;;  %v10269_v50 = vpop.f32.mrf.mxu0  ;;  %v11457_v23 = vld [vmem:[%s11613_s16 + $0x24] sm:$0xf] }
 0x21a   : > { %v10390_v21 = vpop.f32.mrf.mxu1  ;;  %v13046_v1 = vadd.f32 %v12894_v35, %v1657_v57  ;;  %v3262_v35 = vshll.u32 %v13042_v29, 16  ;;  %v3261_v42 = vor.u32 %v3260_v56, %v3256_v0  ;;  %v13069_v27 = vcombine.low %v11457_v23, %v11458_v6 }
 0x21b   : > { %v1559_v61 = vpop.f32.mrf.mxu0  ;;  %10463 = vmatmul.mubr.msk.bf16.gmra.mxu0 %vm707_vm3, %v16982_v8  ;;  %v3266_v0 = vshrl.u32 %v13042_v29, 16 }
 0x21c   : > { %16981 = vst [vmem:[#allocation32_spill] sm:$0xff] %v13046_v1  ;;  %v13050_v43 = vpop.f32.mrf.mxu1  ;;  %v1658_v17 = vadd.f32 %v1559_v61, %v16983_v32  ;;  %10466 = vmatprep.mubr.msk.bf16.mxu0 %vm11524_vm2, %v16866_v28  ;;  %v3264_v32 = vrot.slane %v3262_v35, 1 }
 0x21d   : > { %v10272_v57 = vpop.f32.mrf.mxu0 }
 0x21e   : > { %v10391_v50 = vpop.f32.mrf.mxu1  ;;  %v13059_v21 = vadd.f32 %v12903_v34, %v1658_v17  ;;  %v3265_v6 = vsel %vm518_vm4, %v3261_v42, %v3264_v32  ;;  %v3268_v42 = vor.u32 %v3266_v0, %v3264_v32 }
 0x21f   : > { %v1562_v8 = vpop.f32.mrf.mxu0 }
 0x220   : > { %16984 = vst [vmem:[#allocation9_spill] sm:$0xff] %v13059_v21  ;;  %v13061_v1 = vpop.f32.mrf.mxu1  ;;  %10585 = vmatmul.mubr.msk.bf16.gmra.mxu1 %vm707_vm3, %v2557_v41  ;;  %v1659_v61 = vadd.f32 %v1562_v8, %v16985_v16  ;;  %v16987_v21 = vld [vmem:[#allocation51_spill] sm:$0xff] }
 0x221   : > { %10684 = vmatprep.mubr.msk.bf16.mxu1 %vm11524_vm2, %v16866_v28  ;;  %v10273_v57 = vpop.f32.mrf.mxu0  ;;  %v16988_v8 = vld [vmem:[#allocation27_spill] sm:$0xff] }
 0x222   : > { %v10394_v50 = vpop.f32.mrf.mxu1  ;;  %v13072_v34 = vadd.f32 %v12915_v11, %v1659_v61  ;;  %v3269_v11 = vshll.u32 %v13069_v27, 16  ;;  %v16990_v57 = vld [vmem:[#allocation28_spill] sm:$0xff] }
 0x223   : > { %v1567_v17 = vpop.f32.mrf.mxu0  ;;  %10467 = vmatmul.mubr.msk.bf16.gmra.mxu0 %vm707_vm3, %v16987_v21 }
 0x224   : > { %16986 = vst [vmem:[#allocation10_spill] sm:$0xff] %v13072_v34  ;;  %v13076_v41 = vpop.f32.mrf.mxu1  ;;  %v1660_v16 = vadd.f32 %v1567_v17, %v16988_v8  ;;  %10470 = vmatprep.mubr.msk.bf16.mxu0 %vm11524_vm2, %v16866_v28  ;;  %v3271_v17 = vrot.slane %v3269_v11, 1  ;;  %v11459_v8 = vld [vmem:[%s11613_s16 + $0x2c] sm:$0xf]  ;;  %v11460_v34 = vld [vmem:[%s11613_s16 + $0x30] sm:$0xf] }
 0x225   : > { %v10276_v56 = vpop.f32.mrf.mxu0  ;;  %v13095_v25 = vcombine.low %v11459_v8, %v11460_v34  ;;  %v3273_v34 = vshrl.u32 %v13069_v27, 16 }
 0x226   : > { %v10395_v35 = vpop.f32.mrf.mxu1  ;;  %v13085_v61 = vadd.f32 %v12924_v52, %v1660_v16  ;;  %v3272_v32 = vsel %vm518_vm4, %v3268_v42, %v3271_v17 }
 0x227   : > { %v1570_v21 = vpop.f32.mrf.mxu0  ;;  %v3275_v42 = vor.u32 %v3273_v34, %v3271_v17 }
 0x228   : > { %16989 = vst [vmem:[#allocation11_spill] sm:$0xff] %v13085_v61  ;;  %v13087_v23 = vpop.f32.mrf.mxu1  ;;  %10685 = vmatmul.mubr.msk.bf16.vlgmr.msra.gmra.mxu1 %vm707_vm3, %v3265_v6  ;;  %v1661_v50 = vadd.f32 %v1570_v21, %v16990_v57  ;;  %v16992_v21 = vld [vmem:[#allocation29_spill] sm:$0xff] }
 0x229   : > { %10688 = vmatprep.mubr.msk.bf16.mxu1 %vm11524_vm2, %v16866_v28  ;;  %v10277_v56 = vpop.f32.mrf.mxu0 }
 0x22a   : > { %v10398_v35 = vpop.f32.mrf.mxu1  ;;  %v13098_v52 = vadd.f32 %v12936_v44, %v1661_v50  ;;  %v3276_v44 = vshll.u32 %v13095_v25, 16  ;;  %v16994_v56 = vld [vmem:[#allocation31_spill] sm:$0xff] }
 0x22b   : > { %v1575_v16 = vpop.f32.mrf.mxu0  ;;  %10471 = vmatmul.mubr.msk.bf16.gmra.mxu0 %vm707_vm3, %v12713_v5 }
 0x22c   : > { %16991 = vst [vmem:[#allocation12_spill] sm:$0xff] %v13098_v52  ;;  %v13102_v6 = vpop.f32.mrf.mxu1  ;;  %v1662_v57 = vadd.f32 %v1575_v16, %v16992_v21  ;;  %10474 = vmatprep.mubr.msk.bf16.mxu0 %vm11524_vm2, %v16866_v28  ;;  %v3278_v16 = vrot.slane %v3276_v44, 1  ;;  %v11461_v21 = vld [vmem:[%s11613_s16 + $0x34] sm:$0xf]  ;;  %v11462_v52 = vld [vmem:[%s11613_s16 + $0x38] sm:$0xf] }
 0x22d   : > { %v10280_v0 = vpop.f32.mrf.mxu0  ;;  %v13121_v61 = vcombine.low %v11461_v21, %v11462_v52  ;;  %v3280_v52 = vshrl.u32 %v13095_v25, 16 }
 0x22e   : > { %v10399_v11 = vpop.f32.mrf.mxu1  ;;  %v13111_v50 = vadd.f32 %v12945_v15, %v1662_v57  ;;  %v3279_v17 = vsel %vm518_vm4, %v3275_v42, %v3278_v16 }
 0x22f   : > { %v1578_v5 = vpop.f32.mrf.mxu0  ;;  %v3282_v42 = vor.u32 %v3280_v52, %v3278_v16  ;;  %v17000_v16 = vld [vmem:[#allocation35_spill] sm:$0xff] }
 0x230   : > { %16993 = vst [vmem:[#allocation37_spill] sm:$0xff] %v13111_v50  ;;  %v13113_v8 = vpop.f32.mrf.mxu1  ;;  %10689 = vmatmul.mubr.msk.bf16.gmra.mxu1 %vm707_vm3, %v3272_v32  ;;  %v1663_v35 = vadd.f32 %v1578_v5, %v16994_v56  ;;  %v16996_v5 = vld [vmem:[#allocation33_spill] sm:$0xff] }
 0x231   : > { %10692 = vmatprep.mubr.msk.bf16.mxu1 %vm11524_vm2, %v16866_v28  ;;  %v10281_v0 = vpop.f32.mrf.mxu0 }
 0x232   : > { %v10498_v11 = vpop.f32.mrf.mxu1  ;;  %v13124_v15 = vadd.f32 %v12957_v53, %v1663_v35  ;;  %v3283_v53 = vshll.u32 %v13121_v61, 16  ;;  %v16998_v0 = vld [vmem:[#allocation34_spill] sm:$0xff] }
 0x233   : > { %v1583_v57 = vpop.f32.mrf.mxu0  ;;  %10475 = vmatmul.mubr.msk.bf16.gmra.mxu0 %vm707_vm3, %v12741_v47 }
 0x234   : > { %16995 = vst [vmem:[#allocation13_spill] sm:$0xff] %v13124_v15  ;;  %v13128_v32 = vpop.f32.mrf.mxu1  ;;  %v1664_v56 = vadd.f32 %v1583_v57, %v16996_v5  ;;  %10478 = vmatprep.mubr.msk.bf16.mxu0 %vm11524_vm2, %v16866_v28  ;;  %v3285_v57 = vrot.slane %v3283_v53, 1  ;;  %v11463_v5 = vld [vmem:[%s11613_s16 + $0x3c] sm:$0xf]  ;;  %v11464_v15 = vld [vmem:[%s11613_s16 + $0x40] sm:$0xf] }
 0x235   : > { %v10284_v34 = vpop.f32.mrf.mxu0  ;;  %v13147_v50 = vcombine.low %v11463_v5, %v11464_v15 }
 0x236   : > { %v10499_v44 = vpop.f32.mrf.mxu1  ;;  %v13137_v35 = vadd.f32 %v12966_v46, %v1664_v56  ;;  %v3286_v15 = vsel %vm518_vm4, %v3282_v42, %v3285_v57 }
 0x237   : > { %v1586_v47 = vpop.f32.mrf.mxu0  ;;  %v3290_v53 = vshll.u32 %v13147_v50, 16 }
 0x238   : > { %16997 = vst [vmem:[#allocation14_spill] sm:$0xff] %v13137_v35  ;;  %v13139_v21 = vpop.f32.mrf.mxu1  ;;  %10693 = vmatmul.mubr.msk.bf16.gmra.mxu1 %vm707_vm3, %v3279_v17  ;;  %v1665_v11 = vadd.f32 %v1586_v47, %v16998_v0  ;;  %v2156_v17 = vshrl.u32 %v16974_v20, 16  ;;  %v2159_v47 = vshll.u32 %v16974_v20, 16 }
 0x239   : > { %10696 = vmatprep.mubr.msk.bf16.mxu1 %vm11524_vm2, %v16866_v28  ;;  %v10285_v34 = vpop.f32.mrf.mxu0  ;;  %v3292_v35 = vrot.slane %v3290_v53, 1 }
 0x23a   : > { %v10502_v44 = vpop.f32.mrf.mxu1  ;;  %v13150_v46 = vadd.f32 %v12978_v58, %v1665_v11  ;;  %v3287_v58 = vshrl.u32 %v13121_v61, 16  ;;  %v2158_v34 = vrot.slane %v2156_v17, 2 }
 0x23b   : > { %v1591_v56 = vpop.f32.mrf.mxu0  ;;  %10479 = vmatmul.mubr.msk.bf16.gmra.mxu0 %vm707_vm3, %v12771_v60  ;;  %v2161_v44 = vrot.slane %v2159_v47, 3 }
 0x23c   : > { %16999 = vst [vmem:[#allocation40_spill] sm:$0xff] %v13150_v46  ;;  %v13156_v0 = vpop.f32.mrf.mxu1  ;;  %v1666_v52 = vadd.f32 %v1591_v56, %v17000_v16  ;;  %10482 = vmatprep.mubr.msk.bf16.mxu0 %vm11524_vm2, %v16866_v28  ;;  %v17002_v16 = vld [vmem:[#allocation36_spill] sm:$0xff]  ;;  %v3289_v42 = vor.u32 %v3287_v58, %v3285_v57  ;;  %v17004_v58 = vld [vmem:[#allocation38_spill] sm:$0xff] }
 0x23d   : > { %v10288_v60 = vpop.f32.mrf.mxu0 }
 0x23e   : > { %v10503_v11 = vpop.f32.mrf.mxu1  ;;  %v13165_v5 = vadd.f32 %v12987_v31, %v1666_v52  ;;  %v11466_v60 = vld [vmem:[%s11613_s16 + $0x48] sm:$0xf] }
 0x23f   : > { %v1594_v20 = vpop.f32.mrf.mxu0  ;;  %v13175_v11 = vcombine.low %v11465_v51, %v11466_v60  ;;  %v3293_v51 = vsel %vm518_vm4, %v3289_v42, %v3292_v35  ;;  %v17006_v42 = vld [vmem:[#allocation39_spill] sm:$0xff] }
 0x240   : > { %17001 = vst [vmem:[#allocation15_spill] sm:$0xff] %v13165_v5  ;;  %v13167_v56 = vpop.f32.mrf.mxu1  ;;  %10697 = vmatmul.mubr.msk.bf16.gmra.mxu1 %vm707_vm3, %v3286_v15  ;;  %v1667_v46 = vadd.f32 %v1594_v20, %v17002_v16  ;;  %v2162_v15 = vor.u32 %v2161_v44, %v2158_v34  ;;  %v2165_v20 = vshrl.u32 %v16979_v48, 16  ;;  %v2168_v16 = vshll.u32 %v16979_v48, 16 }
 0x241   : > { %10700 = vmatprep.mubr.msk.bf16.mxu1 %vm11524_vm2, %v16866_v28  ;;  %v10289_v31 = vpop.f32.mrf.mxu0 }
 0x242   : > { %v10506_v52 = vpop.f32.mrf.mxu1  ;;  %v13178_v17 = vadd.f32 %v12999_v3, %v1667_v46  ;;  %v3294_v3 = vshrl.u32 %v13147_v50, 16  ;;  %v2163_v60 = vsel %vm2067_vm7, %v12795_v33, %v2162_v15  ;;  %v2167_v31 = vrot.slane %v2165_v20, 2 }
 0x243   : > { %v1599_v47 = vpop.f32.mrf.mxu0  ;;  %10483 = vmatmul.mubr.msk.bf16.gmra.mxu0 %vm707_vm3, %v12802_v45  ;;  %v3297_v45 = vshll.u32 %v13175_v11, 16  ;;  %v2170_v52 = vrot.slane %v2168_v16, 3 }
 0x244   : > { %17003 = vst [vmem:[#allocation16_spill] sm:$0xff] %v13178_v17  ;;  %v13184_v57 = vpop.f32.mrf.mxu1  ;;  %v1668_v53 = vadd.f32 %v1599_v47, %v17004_v58  ;;  %10486 = vmatprep.mubr.msk.bf16.mxu0 %vm11524_vm2, %v16866_v28  ;;  %v11467_v17 = vld [vmem:[%s11613_s16 + $0x4c] sm:$0xf] }
 0x245   : > { %v10292_v46 = vpop.f32.mrf.mxu0  ;;  %v2171_v16 = vor.u32 %v2170_v52, %v2167_v31  ;;  %v17008_v52 = vld [vmem:[#allocation42_spill] sm:$0xff] }
 0x246   : > { %v10507_v34 = vpop.f32.mrf.mxu1  ;;  %v13193_v44 = vadd.f32 %v13008_v30, %v1668_v53  ;;  %v3296_v46 = vor.u32 %v3294_v3, %v3292_v35  ;;  %v11468_v30 = vld [vmem:[%s11613_s16 + $0x50] sm:$0xf] }
 0x247   : > { %v1602_v48 = vpop.f32.mrf.mxu0  ;;  %v3299_v34 = vrot.slane %v3297_v45, 1  ;;  %v13205_v53 = vcombine.low %v11467_v17, %v11468_v30 }
 0x248   : > { %17005 = vst [vmem:[#allocation43_spill] sm:$0xff] %v13193_v44  ;;  %v13197_v47 = vpop.f32.mrf.mxu1  ;;  %10701 = vmatmul.mubr.msk.bf16.gmra.mxu1 %vm707_vm3, %v3293_v51  ;;  %v1669_v58 = vadd.f32 %v1602_v48, %v17006_v42  ;;  %v17007_v48 = vld [vmem:[#allocation41_spill] sm:$0xff] }
 0x249   : > { %10704 = vmatprep.mubr.msk.bf16.mxu1 %vm11524_vm2, %v16866_v28  ;;  %v10293_v44 = vpop.f32.mrf.mxu0  ;;  %v3300_v35 = vsel %vm518_vm4, %v3296_v46, %v3299_v34 }
 0x24a   : > { %v10510_v5 = vpop.f32.mrf.mxu1  ;;  %v13208_v33 = vadd.f32 %v13020_v22, %v1669_v58  ;;  %v3304_v22 = vshll.u32 %v13205_v53, 16 }
 0x24b   : > { %v1607_v20 = vpop.f32.mrf.mxu0  ;;  %10487 = vmatmul.mubr.msk.bf16.gmra.mxu0 %vm707_vm3, %v2163_v60  ;;  %v3301_v5 = vshrl.u32 %v13175_v11, 16  ;;  %v2172_v60 = vsel %vm2067_vm7, %v2162_v15, %v2171_v16 }
 0x24c   : > { %v13211_v51 = vpop.f32.mrf.mxu1  ;;  %v1670_v42 = vadd.f32 %v1607_v20, %v17007_v48  ;;  %10490 = vmatprep.mubr.msk.bf16.mxu0 %vm11524_vm2, %v16866_v28  ;;  %v3306_v30 = vrot.slane %v3304_v22, 1  ;;  %v11469_v20 = vld [vmem:[%s11613_s16 + $0x54] sm:$0xf]  ;;  %v11470_v48 = vld [vmem:[%s11613_s16 + $0x58] sm:$0xf] }
 0x24d   : > { %v10296_v17 = vpop.f32.mrf.mxu0  ;;  %v3303_v46 = vor.u32 %v3301_v5, %v3299_v34  ;;  %v9193_v34 = vld [vmem:[%s16776_s3 + $0x10] sm:$0x3] }
 0x24e   : > { %v10511_v3 = vpop.f32.mrf.mxu1  ;;  %v13220_v45 = vadd.f32 %v13033_v12, %v1670_v42  ;;  %v13231_v17 = vcombine.low %v11469_v20, %v11470_v48  ;;  %v3899_v48 = vand.u32 %v9193_v34, %v11594_v4 }
 0x24f   : > { %v1610_v44 = vpop.f32.mrf.mxu0  ;;  %v3307_v5 = vsel %vm518_vm4, %v3303_v46, %v3306_v30 }
 0x250   : > { %v13223_v31 = vpop.f32.mrf.mxu1  ;;  %10705 = vmatmul.mubr.msk.bf16.gmra.mxu1 %vm707_vm3, %v3300_v35  ;;  %v1671_v58 = vadd.f32 %v1610_v44, %v17008_v52  ;;  %v17010_v35 = vld [vmem:[#allocation44_spill] sm:$0xff]  ;;  %v3311_v22 = vshll.u32 %v13231_v17, 16 }
 0x251   : > { %10708 = vmatprep.mubr.msk.bf16.mxu1 %vm11524_vm2, %v16866_v28  ;;  %v10297_v12 = vpop.f32.mrf.mxu0 }
 0x252   : > { %v10514_v42 = vpop.f32.mrf.mxu1  ;;  %v13234_v3 = vadd.f32 %v13050_v43, %v1671_v58  ;;  %v3308_v43 = vshrl.u32 %v13205_v53, 16 }
 0x253   : > { %v1615_v15 = vpop.f32.mrf.mxu0  ;;  %10491 = vmatmul.mubr.msk.bf16.gmra.mxu0 %vm707_vm3, %v2172_v60  ;;  %v17012_v42 = vld [vmem:[#allocation45_spill] sm:$0xff] }
 0x254   : > { %17009 = vst [vmem:[#allocation17_spill] sm:$0xff] %v13234_v3  ;;  %v13237_v16 = vpop.f32.mrf.mxu1  ;;  %v1672_v44 = vadd.f32 %v1615_v15, %v17010_v35  ;;  %10590 = vmatprep.mubr.msk.bf16.mxu0 %vm11524_vm2, %v16866_v28  ;;  %v3310_v46 = vor.u32 %v3308_v43, %v3306_v30  ;;  %v3313_v35 = vrot.slane %v3311_v22, 1  ;;  %v11471_v3 = vld [vmem:[%s11613_s16 + $0x5c] sm:$0xf] }
 0x255   : > { %v10300_v60 = vpop.f32.mrf.mxu0 }
 0x256   : > { %v10515_v52 = vpop.f32.mrf.mxu1  ;;  %v13249_v58 = vadd.f32 %v13061_v1, %v1672_v44  ;;  %v11472_v60 = vld [vmem:[%s11613_s16 + $0x60] sm:$0xf]  ;;  %v3314_v30 = vsel %vm518_vm4, %v3310_v46, %v3313_v35 }
 0x257   : > { %v1618_v20 = vpop.f32.mrf.mxu0  ;;  %v13260_v52 = vcombine.low %v11471_v3, %v11472_v60  ;;  %v3315_v3 = vshrl.u32 %v13231_v17, 16 }
 0x258   : > { %17011 = vst [vmem:[#allocation18_spill] sm:$0xff] %v13249_v58  ;;  %v13252_v12 = vpop.f32.mrf.mxu1  ;;  %10709 = vmatmul.mubr.msk.bf16.gmra.mxu1 %vm707_vm3, %v3307_v5  ;;  %v1673_v15 = vadd.f32 %v1618_v20, %v17012_v42  ;;  %v17015_v5 = vld [vmem:[#allocation47_spill] sm:$0xff] }
 0x259   : > { %10712 = vmatprep.mubr.msk.bf16.mxu1 %vm11524_vm2, %v16866_v28  ;;  %17013 = vst [vmem:[#allocation46_spill] sm:$0xff] %v13260_v52  ;;  %v10301_v1 = vpop.f32.mrf.mxu0  ;;  %v3317_v46 = vor.u32 %v3315_v3, %v3313_v35  ;;  %v3322_v3 = vshrl.u32 %v13260_v52, 16 }
 0x25a   : > { %v10518_v44 = vpop.f32.mrf.mxu1  ;;  %v13263_v58 = vadd.f32 %v13076_v41, %v1673_v15  ;;  %v3318_v41 = vshll.u32 %v13260_v52, 16 }
 0x25b   : > { %v1623_v4 = vpop.f32.mrf.mxu0  ;;  %10591 = vmatmul.mubr.msk.bf16.vlgmr.msra.gmra.mxu0 %vm707_vm3, %v13028_v2 }
 0x25c   : > { %17014 = vst [vmem:[#allocation19_spill] sm:$0xff] %v13263_v58  ;;  %v13267_v34 = vpop.f32.mrf.mxu1  ;;  %v1674_v20 = vadd.f32 %v1623_v4, %v17015_v5  ;;  %10777 = vmatpush3.bf16.msra.mxu0 %v3899_v48  ;;  %10594 = vmatprep.mubr.msk.bf16.mxu0 %vm11524_vm2, %v16866_v28  ;;  %v17016_v48 = vld [vmem:[#allocation48_spill] sm:$0xff]  ;;  %v3320_v44 = vrot.slane %v3318_v41, 1  ;;  %v11473_v4 = vld [vmem:[%s11613_s16 + $0x64] sm:$0xf] }
 0x25d   : > { %v10304_v43 = vpop.f32.mrf.mxu0  ;;  %v11474_v5 = vld [vmem:[%s11613_s16 + $0x68] sm:$0xf] }
 0x25e   : > { %v10519_v22 = vpop.f32.mrf.mxu1  ;;  %v13276_v42 = vadd.f32 %v13087_v23, %v1674_v20  ;;  %v13286_v58 = vcombine.low %v11473_v4, %v11474_v5  ;;  %v3321_v35 = vsel %vm518_vm4, %v3317_v46, %v3320_v44  ;;  %v3324_v46 = vor.u32 %v3322_v3, %v3320_v44 }
 0x25f   : > { %v1626_v15 = vpop.f32.mrf.mxu0 }
 0x260   : > { %v13278_v60 = vpop.f32.mrf.mxu1  ;;  %10713 = vmatmul.mubr.msk.bf16.gmra.mxu1 %vm707_vm3, %v3314_v30  ;;  %v1675_v1 = vadd.f32 %v1626_v15, %v17016_v48  ;;  %17017 = vst [vmem:[#allocation20_spill] sm:$0xff] %v13286_v58  ;;  %v3329_v3 = vshrl.u32 %v13286_v58, 16 }
 0x261   : > { %10716 = vmatprep.mubr.msk.bf16.mxu1 %vm11524_vm2, %v16866_v28  ;;  %v10305_v43 = vpop.f32.mrf.mxu0 }
 0x262   : > { %v10522_v22 = vpop.f32.mrf.mxu1  ;;  %v13289_v23 = vadd.f32 %v13102_v6, %v1675_v1  ;;  %v3325_v6 = vshll.u32 %v13286_v58, 16 }
 0x263   : > { %v2279_v20 = vpop.f32.mrf.mxu0  ;;  %10595 = vmatmul.mubr.msk.bf16.gmra.mxu0 %vm707_vm3, %v13042_v29  ;;  %v11475_v22 = vld [vmem:[%s11613_s16 + $0x6c] sm:$0xf] }
 0x264   : > { %17018 = vst [vmem:[#allocation26_spill] sm:$0xff] %v13289_v23  ;;  %v13293_v30 = vpop.f32.mrf.mxu1  ;;  %v2462_v15 = vadd.f32 %v2279_v20, %v12728_v18  ;;  %10598 = vmatprep.mubr.msk.bf16.mxu0 %vm11524_vm2, %v16866_v28  ;;  %v3327_v43 = vrot.slane %v3325_v6, 1  ;;  %v11476_v20 = vld [vmem:[%s11613_s16 + $0x70] sm:$0xf] }
 0x265   : > { %v10404_v41 = vpop.f32.mrf.mxu0  ;;  %v13312_v23 = vcombine.low %v11475_v22, %v11476_v20 }
 0x266   : > { %v10523_v48 = vpop.f32.mrf.mxu1  ;;  %v13302_v1 = vadd.f32 %v13113_v8, %v2462_v15  ;;  %v3328_v44 = vsel %vm518_vm4, %v3324_v46, %v3327_v43  ;;  %v3331_v46 = vor.u32 %v3329_v3, %v3327_v43 }
 0x267   : > { %v2282_v4 = vpop.f32.mrf.mxu0  ;;  %17019 = vst [vmem:[#allocation49_spill] sm:$0xff] %v13312_v23  ;;  %v3336_v3 = vshrl.u32 %v13312_v23, 16 }
 0x268   : > { %v13304_v5 = vpop.f32.mrf.mxu1  ;;  %10717 = vmatmul.mubr.msk.bf16.gmra.mxu1 %vm707_vm3, %v3321_v35  ;;  %v2463_v18 = vadd.f32 %v2282_v4, %v12738_v63 }
 0x269   : > { %10720 = vmatprep.mubr.msk.bf16.mxu1 %vm11524_vm2, %v16866_v28  ;;  %v10405_v41 = vpop.f32.mrf.mxu0 }
 0x26a   : > { %v10526_v48 = vpop.f32.mrf.mxu1  ;;  %v13315_v8 = vadd.f32 %v13128_v32, %v2463_v18  ;;  %v3332_v32 = vshll.u32 %v13312_v23, 16 }
 0x26b   : > { %v2287_v15 = vpop.f32.mrf.mxu0  ;;  %10599 = vmatmul.mubr.msk.bf16.gmra.mxu0 %vm707_vm3, %v13069_v27  ;;  %v11477_v48 = vld [vmem:[%s11613_s16 + $0x74] sm:$0xf] }
 0x26c   : > { %17020 = vst [vmem:[#allocation21_spill] sm:$0xff] %v13315_v8  ;;  %v13319_v35 = vpop.f32.mrf.mxu1  ;;  %v2464_v63 = vadd.f32 %v2287_v15, %v12757_v62  ;;  %10602 = vmatprep.mubr.msk.bf16.mxu0 %vm11524_vm2, %v16866_v28  ;;  %v3334_v41 = vrot.slane %v3332_v32, 1  ;;  %v11478_v15 = vld [vmem:[%s11613_s16 + $0x78] sm:$0xf] }
 0x26d   : > { %v10408_v6 = vpop.f32.mrf.mxu0  ;;  %v13338_v8 = vcombine.low %v11477_v48, %v11478_v15 }
 0x26e   : > { %v10527_v4 = vpop.f32.mrf.mxu1  ;;  %v13328_v18 = vadd.f32 %v13139_v21, %v2464_v63  ;;  %v3335_v43 = vsel %vm518_vm4, %v3331_v46, %v3334_v41  ;;  %v3338_v46 = vor.u32 %v3336_v3, %v3334_v41 }
 0x26f   : > { %v2290_v22 = vpop.f32.mrf.mxu0  ;;  %17021 = vst [vmem:[#allocation30_spill] sm:$0xff] %v13338_v8  ;;  %v3343_v3 = vshrl.u32 %v13338_v8, 16 }
 0x270   : > { %v13330_v20 = vpop.f32.mrf.mxu1  ;;  %10721 = vmatmul.mubr.msk.bf16.gmra.mxu1 %vm707_vm3, %v3328_v44  ;;  %v2465_v62 = vadd.f32 %v2290_v22, %v12768_v49 }
 0x271   : > { %10724 = vmatprep.mubr.msk.bf16.mxu1 %vm11524_vm2, %v16866_v28  ;;  %v10409_v6 = vpop.f32.mrf.mxu0 }
 0x272   : > { %v10530_v4 = vpop.f32.mrf.mxu1  ;;  %v13341_v21 = vadd.f32 %v13156_v0, %v2465_v62  ;;  %v3339_v0 = vshll.u32 %v13338_v8, 16 }
 0x273   : > { %v2295_v63 = vpop.f32.mrf.mxu0  ;;  %10603 = vmatmul.mubr.msk.bf16.gmra.mxu0 %vm707_vm3, %v13095_v25  ;;  %v11479_v4 = vld [vmem:[%s11613_s16 + $0x7c] sm:$0xf] }
 0x274   : > { %17022 = vst [vmem:[#allocation22_spill] sm:$0xff] %v13341_v21  ;;  %v13345_v44 = vpop.f32.mrf.mxu1  ;;  %v2466_v49 = vadd.f32 %v2295_v63, %v12787_v24  ;;  %10606 = vmatprep.mubr.msk.bf16.mxu0 %vm11524_vm2, %v16866_v28  ;;  %v3341_v6 = vrot.slane %v3339_v0, 1  ;;  %v11480_v63 = vld [vmem:[%s11613_s16 + $0x80] sm:$0xf] }
 0x275   : > { %v10412_v32 = vpop.f32.mrf.mxu0  ;;  %v13364_v21 = vcombine.low %v11479_v4, %v11480_v63 }
 0x276   : > { %v10531_v22 = vpop.f32.mrf.mxu1  ;;  %v13354_v62 = vadd.f32 %v13167_v56, %v2466_v49  ;;  %v3342_v41 = vsel %vm518_vm4, %v3338_v46, %v3341_v6  ;;  %v3345_v46 = vor.u32 %v3343_v3, %v3341_v6 }
 0x277   : > { %v2298_v48 = vpop.f32.mrf.mxu0  ;;  %17023 = vst [vmem:[#allocation50_spill] sm:$0xff] %v13364_v21  ;;  %v3350_v3 = vshrl.u32 %v13364_v21, 16 }
 0x278   : > { %v13356_v15 = vpop.f32.mrf.mxu1  ;;  %10725 = vmatmul.mubr.msk.bf16.gmra.mxu1 %vm707_vm3, %v3335_v43  ;;  %v2467_v24 = vadd.f32 %v2298_v48, %v12798_v14 }
 0x279   : > { %10728 = vmatprep.mubr.msk.bf16.mxu1 %vm11524_vm2, %v16866_v28  ;;  %v10413_v32 = vpop.f32.mrf.mxu0 }
 0x27a   : > { %v10534_v22 = vpop.f32.mrf.mxu1  ;;  %v13367_v56 = vadd.f32 %v13184_v57, %v2467_v24  ;;  %v3346_v57 = vshll.u32 %v13364_v21, 16 }
 0x27b   : > { %v2303_v49 = vpop.f32.mrf.mxu0  ;;  %10607 = vmatmul.mubr.msk.bf16.gmra.mxu0 %vm707_vm3, %v13121_v61  ;;  %v11481_v22 = vld [vmem:[%s11613_s16 + $0x84] sm:$0xf] }
 0x27c   : > { %17024 = vst [vmem:[#allocation23_spill] sm:$0xff] %v13367_v56  ;;  %v13371_v43 = vpop.f32.mrf.mxu1  ;;  %v2468_v14 = vadd.f32 %v2303_v49, %v12813_v36  ;;  %10610 = vmatprep.mubr.msk.bf16.mxu0 %vm11524_vm2, %v16866_v28  ;;  %v3348_v32 = vrot.slane %v3346_v57, 1  ;;  %v11482_v49 = vld [vmem:[%s11613_s16 + $0x88] sm:$0xf] }
 0x27d   : > { %v10416_v0 = vpop.f32.mrf.mxu0  ;;  %v13390_v56 = vcombine.low %v11481_v22, %v11482_v49 }
 0x27e   : > { %v10535_v48 = vpop.f32.mrf.mxu1  ;;  %v13380_v24 = vadd.f32 %v13197_v47, %v2468_v14  ;;  %v3349_v6 = vsel %vm518_vm4, %v3345_v46, %v3348_v32  ;;  %v3352_v46 = vor.u32 %v3350_v3, %v3348_v32 }
 0x27f   : > { %v2306_v4 = vpop.f32.mrf.mxu0  ;;  %v3357_v3 = vshrl.u32 %v13390_v56, 16 }
 0x280   : > { %v13382_v63 = vpop.f32.mrf.mxu1  ;;  %10729 = vmatmul.mubr.msk.bf16.gmra.mxu1 %vm707_vm3, %v3342_v41  ;;  %v2469_v36 = vadd.f32 %v2306_v4, %v12823_v9 }
 0x281   : > { %10732 = vmatprep.mubr.msk.bf16.mxu1 %vm11524_vm2, %v16866_v28  ;;  %v10417_v0 = vpop.f32.mrf.mxu0 }
 0x282   : > { %v10538_v48 = vpop.f32.mrf.mxu1  ;;  %v13393_v47 = vadd.f32 %v13211_v51, %v2469_v36  ;;  %v3353_v51 = vshll.u32 %v13390_v56, 16 }
 0x283   : > { %v2311_v14 = vpop.f32.mrf.mxu0  ;;  %10611 = vmatmul.mubr.msk.bf16.gmra.mxu0 %vm707_vm3, %v13147_v50  ;;  %v11483_v48 = vld [vmem:[%s11613_s16 + $0x8c] sm:$0xf] }
 0x284   : > { %17025 = vst [vmem:[#allocation24_spill] sm:$0xff] %v13393_v47  ;;  %v13397_v41 = vpop.f32.mrf.mxu1  ;;  %v2470_v9 = vadd.f32 %v2311_v14, %v12834_v55  ;;  %10614 = vmatprep.mubr.msk.bf16.mxu0 %vm11524_vm2, %v16866_v28  ;;  %v3355_v0 = vrot.slane %v3353_v51, 1  ;;  %v11484_v14 = vld [vmem:[%s11613_s16 + $0x90] sm:$0xf] }
 0x285   : > { %v10420_v57 = vpop.f32.mrf.mxu0  ;;  %v13416_v47 = vcombine.low %v11483_v48, %v11484_v14 }
 0x286   : > { %v10539_v4 = vpop.f32.mrf.mxu1  ;;  %v13406_v36 = vadd.f32 %v13223_v31, %v2470_v9  ;;  %v3356_v32 = vsel %vm518_vm4, %v3352_v46, %v3355_v0  ;;  %v3359_v46 = vor.u32 %v3357_v3, %v3355_v0 }
 0x287   : > { %v2314_v22 = vpop.f32.mrf.mxu0  ;;  %v3364_v3 = vshrl.u32 %v13416_v47, 16 }
 0x288   : > { %v13408_v49 = vpop.f32.mrf.mxu1  ;;  %10733 = vmatmul.mubr.msk.bf16.gmra.mxu1 %vm707_vm3, %v3349_v6  ;;  %v2471_v55 = vadd.f32 %v2314_v22, %v12844_v10 }
 0x289   : > { %10736 = vmatprep.mubr.msk.bf16.mxu1 %vm11524_vm2, %v16866_v28  ;;  %v10421_v57 = vpop.f32.mrf.mxu0 }
 0x28a   : > { %v10542_v4 = vpop.f32.mrf.mxu1  ;;  %v13419_v31 = vadd.f32 %v13237_v16, %v2471_v55  ;;  %v3360_v16 = vshll.u32 %v13416_v47, 16 }
 0x28b   : > { %v2319_v9 = vpop.f32.mrf.mxu0  ;;  %10615 = vmatmul.mubr.msk.bf16.gmra.mxu0 %vm707_vm3, %v13175_v11  ;;  %v11485_v4 = vld [vmem:[%s11613_s16 + $0x94] sm:$0xf] }
 0x28c   : > { %17026 = vst [vmem:[#allocation51_spill] sm:$0xff] %v13419_v31  ;;  %v13423_v6 = vpop.f32.mrf.mxu1  ;;  %v2472_v10 = vadd.f32 %v2319_v9, %v12855_v38  ;;  %10618 = vmatprep.mubr.msk.bf16.mxu0 %vm11524_vm2, %v16866_v28  ;;  %v3362_v57 = vrot.slane %v3360_v16, 1  ;;  %v11486_v9 = vld [vmem:[%s11613_s16 + $0x98] sm:$0xf] }
 0x28d   : > { %v10424_v51 = vpop.f32.mrf.mxu0  ;;  %v13442_v31 = vcombine.low %v11485_v4, %v11486_v9 }
 0x28e   : > { %v10543_v22 = vpop.f32.mrf.mxu1  ;;  %v13432_v55 = vadd.f32 %v13252_v12, %v2472_v10  ;;  %v3363_v0 = vsel %vm518_vm4, %v3359_v46, %v3362_v57  ;;  %v3366_v46 = vor.u32 %v3364_v3, %v3362_v57 }
 0x28f   : > { %v2322_v48 = vpop.f32.mrf.mxu0  ;;  %17027 = vst [vmem:[#allocation27_spill] sm:$0xff] %v13442_v31  ;;  %v3371_v3 = vshrl.u32 %v13442_v31, 16 }
 0x290   : > { %v13434_v14 = vpop.f32.mrf.mxu1  ;;  %10737 = vmatmul.mubr.msk.bf16.gmra.mxu1 %vm707_vm3, %v3356_v32  ;;  %v2473_v38 = vadd.f32 %v2322_v48, %v12869_v26 }
 0x291   : > { %10740 = vmatprep.mubr.msk.bf16.mxu1 %vm11524_vm2, %v16866_v28  ;;  %v10425_v51 = vpop.f32.mrf.mxu0 }
 0x292   : > { %v10546_v22 = vpop.f32.mrf.mxu1  ;;  %v13445_v12 = vadd.f32 %v13267_v34, %v2473_v38  ;;  %v3367_v34 = vshll.u32 %v13442_v31, 16 }
 0x293   : > { %v2327_v10 = vpop.f32.mrf.mxu0  ;;  %10619 = vmatmul.mubr.msk.bf16.gmra.mxu0 %vm707_vm3, %v13205_v53  ;;  %v11487_v22 = vld [vmem:[%s11613_s16 + $0x9c] sm:$0xf] }
 0x294   : > { %17028 = vst [vmem:[#allocation28_spill] sm:$0xff] %v13445_v12  ;;  %v13449_v32 = vpop.f32.mrf.mxu1  ;;  %v2474_v26 = vadd.f32 %v2327_v10, %v12880_v59  ;;  %10622 = vmatprep.mubr.msk.bf16.mxu0 %vm11524_vm2, %v16866_v28  ;;  %v3369_v51 = vrot.slane %v3367_v34, 1  ;;  %v11488_v10 = vld [vmem:[%s11613_s16 + $0xa0] sm:$0xf] }
 0x295   : > { %v10428_v16 = vpop.f32.mrf.mxu0  ;;  %v13468_v12 = vcombine.low %v11487_v22, %v11488_v10 }
 0x296   : > { %v10547_v48 = vpop.f32.mrf.mxu1  ;;  %v13458_v38 = vadd.f32 %v13278_v60, %v2474_v26  ;;  %v3370_v57 = vsel %vm518_vm4, %v3366_v46, %v3369_v51  ;;  %v3373_v46 = vor.u32 %v3371_v3, %v3369_v51 }
 0x297   : > { %v2330_v4 = vpop.f32.mrf.mxu0  ;;  %v3378_v3 = vshrl.u32 %v13468_v12, 16 }
 0x298   : > { %v13460_v9 = vpop.f32.mrf.mxu1  ;;  %10741 = vmatmul.mubr.msk.bf16.gmra.mxu1 %vm707_vm3, %v3363_v0  ;;  %v2475_v59 = vadd.f32 %v2330_v4, %v12890_v54 }
 0x299   : > { %10744 = vmatprep.mubr.msk.bf16.mxu1 %vm11524_vm2, %v16866_v28  ;;  %v10429_v16 = vpop.f32.mrf.mxu0 }
 0x29a   : > { %v10550_v48 = vpop.f32.mrf.mxu1  ;;  %v13471_v60 = vadd.f32 %v13293_v30, %v2475_v59  ;;  %v3374_v30 = vshll.u32 %v13468_v12, 16 }
 0x29b   : > { %v2335_v26 = vpop.f32.mrf.mxu0  ;;  %10623 = vmatmul.mubr.msk.bf16.gmra.mxu0 %vm707_vm3, %v13231_v17  ;;  %v11489_v48 = vld [vmem:[%s11613_s16 + $0xa4] sm:$0xf] }
 0x29c   : > { %17029 = vst [vmem:[#allocation29_spill] sm:$0xff] %v13471_v60  ;;  %v13475_v0 = vpop.f32.mrf.mxu1  ;;  %v2476_v54 = vadd.f32 %v2335_v26, %v12901_v19  ;;  %10626 = vmatprep.mubr.msk.bf16.mxu0 %vm11524_vm2, %v16866_v28  ;;  %v3376_v16 = vrot.slane %v3374_v30, 1  ;;  %v11490_v26 = vld [vmem:[%s11613_s16 + $0xa8] sm:$0xf] }
 0x29d   : > { %v10432_v34 = vpop.f32.mrf.mxu0  ;;  %v13494_v60 = vcombine.low %v11489_v48, %v11490_v26 }
 0x29e   : > { %v10551_v4 = vpop.f32.mrf.mxu1  ;;  %v13484_v59 = vadd.f32 %v13304_v5, %v2476_v54 }
 0x29f   : > { %v2338_v22 = vpop.f32.mrf.mxu0  ;;  %v3381_v30 = vshll.u32 %v13494_v60, 16 }
 0x2a0   : > { %17030 = vst [vmem:[#allocation31_spill] sm:$0xff] %v13484_v59  ;;  %v13486_v10 = vpop.f32.mrf.mxu1  ;;  %10745 = vmatmul.mubr.msk.bf16.gmra.mxu1 %vm707_vm3, %v3370_v57  ;;  %v2477_v19 = vadd.f32 %v2338_v22, %v12911_v40  ;;  %v3377_v57 = vsel %vm518_vm4, %v3373_v46, %v3376_v16 }
 0x2a1   : > { %10748 = vmatprep.mubr.msk.bf16.mxu1 %vm11524_vm2, %v16866_v28  ;;  %v10433_v34 = vpop.f32.mrf.mxu0 }
 0x2a2   : > { %v10554_v4 = vpop.f32.mrf.mxu1  ;;  %v13497_v5 = vadd.f32 %v13319_v35, %v2477_v19  ;;  %v11492_v34 = vld [vmem:[%s11613_s16 + $0xb0] sm:$0xf] }
 0x2a3   : > { %v2343_v54 = vpop.f32.mrf.mxu0  ;;  %10627 = vmatmul.mubr.msk.bf16.gmra.mxu0 %vm707_vm3, %v13260_v52 }
 0x2a4   : > { %17031 = vst [vmem:[#allocation33_spill] sm:$0xff] %v13497_v5  ;;  %v13501_v40 = vpop.f32.mrf.mxu1  ;;  %v2478_v51 = vadd.f32 %v2343_v54, %v12922_v7  ;;  %10630 = vmatprep.mubr.msk.bf16.mxu0 %vm11524_vm2, %v16866_v28  ;;  %v11491_v7 = vld [vmem:[%s11613_s16 + $0xac] sm:$0xf]  ;;  %v3380_v54 = vor.u32 %v3378_v3, %v3376_v16  ;;  %v9506_v3 = vld [vmem:[%s16774_s1] sm:$0xff]  }
 0x2a5   : > { %v10436_v35 = vpop.f32.mrf.mxu0  ;;  %v13517_v4 = vcombine.low %v11491_v7, %v11492_v34  ;;  %v3385_v7 = vshrl.u32 %v13494_v60, 16  ;;  %v9507_v34 = vunpack.c.l.bf16 %v9506_v3 }
 0x2a6   : > { %v10555_v22 = vpop.f32.mrf.mxu1  ;;  %v13510_v19 = vadd.f32 %v13330_v20, %v2478_v51  ;;  %v3383_v35 = vrot.slane %v3381_v30, 1 }
 0x2a7   : > { %v2346_v48 = vpop.f32.mrf.mxu0 }
 0x2a8   : > { %17032 = vst [vmem:[#allocation34_spill] sm:$0xff] %v13510_v19  ;;  %v13512_v26 = vpop.f32.mrf.mxu1  ;;  %10749 = vmatmul.mubr.msk.bf16.gmra.mxu1 %vm707_vm3, %v3377_v57  ;;  %v2479_v46 = vadd.f32 %v2346_v48, %v12932_v13  ;;  %v3388_v13 = vshll.u32 %v13517_v4, 16  ;;  %v3384_v16 = vsel %vm518_vm4, %v3380_v54, %v3383_v35 }
 0x2a9   : > { %10752 = vmatprep.mubr.msk.bf16.mxu1 %vm11524_vm2, %v16866_v28  ;;  %v10437_v22 = vpop.f32.mrf.mxu0 }
 0x2aa   : > { %v10558_v5 = vpop.f32.mrf.mxu1  ;;  %v13523_v20 = vadd.f32 %v13345_v44, %v2479_v46  ;;  %v9508_v46 = vunpack.c.h.bf16 %v9506_v3  ;;  %v17036_v3 = vld [vmem:[#allocation2_spill] sm:$0xff] }
 0x2ab   : > { %v2351_v51 = vpop.f32.mrf.mxu0  ;;  %10631 = vmatmul.mubr.msk.bf16.gmra.mxu0 %vm707_vm3, %v13286_v58  ;;  %v16830_v58 = vmov 0  }
 0x2ac   : > { %17033 = vst [vmem:[#allocation35_spill] sm:$0xff] %v13523_v20  ;;  %v13527_v57 = vpop.f32.mrf.mxu1  ;;  %v2480_v48 = vadd.f32 %v2351_v51, %v12943_v37  ;;  %10634 = vmatprep.mubr.msk.bf16.mxu0 %vm11524_vm2, %v16866_v28  ;;  %v3387_v37 = vor.u32 %v3385_v7, %v3383_v35  ;;  %v3390_v51 = vrot.slane %v3388_v13, 1  ;;  %11280 = vset.pattern.permute.xlu0 %v16830_v58 }
 0x2ad   : > { %v10440_v5 = vpop.f32.mrf.mxu0  ;;  %11291 = vset.pattern.permute.xlu1 %v16830_v58  ;;  %v9600_v58 = vld [vmem:[%s16774_s1 + $0x20] sm:$0xff]  }
 0x2ae   : > { %v10559_v44 = vpop.f32.mrf.mxu1  ;;  %v13539_v30 = vadd.f32 %v13356_v15, %v2480_v48  ;;  %v11281_v5 = vpack.i.bf16 %v9508_v46, %v9507_v34  ;;  %v9597_v15 = vld [vmem:[%s16774_s1 + $0x8] sm:$0xff]   ;;  %v3391_v48 = vsel %vm518_vm4, %v3387_v37, %v3390_v51  ;;  %v3395_v34 = vshll.u32 %v17036_v3, 16 }
 0x2af   : > { %v2354_v22 = vpop.f32.mrf.mxu0  ;;  %v9512_v7 = vunpack.c.h.bf16 %v9597_v15  ;;  %v17037_v46 = vld [vmem:[#allocation3_spill] sm:$0xff]  ;;  %v9524_v59 = vunpack.c.h.bf16 %v9600_v58 }
 0x2b0   : > { %17034 = vst [vmem:[#allocation36_spill] sm:$0xff] %v13539_v30  ;;  %v13541_v20 = vpop.f32.mrf.mxu1  ;;  %10753 = vmatmul.mubr.msk.bf16.gmra.mxu1 %vm707_vm3, %v3384_v16  ;;  %v2481_v54 = vadd.f32 %v2354_v22, %v12953_v39  ;;  %11282 = vperm.xlu0 %11280, %v11281_v5   ;;  %v9511_v39 = vunpack.c.l.bf16 %v9597_v15  ;;  %v3392_v16 = vshrl.u32 %v13517_v4, 16 }
 0x2b1   : > { %10756 = vmatprep.mubr.msk.bf16.mxu1 %vm11524_vm2, %v16866_v28  ;;  %v10441_v44 = vpop.f32.mrf.mxu0 }
 0x2b2   : > { %v10562_v19 = vpop.f32.mrf.mxu1  ;;  %v13553_v35 = vadd.f32 %v13371_v43, %v2481_v54  ;;  %v9598_v43 = vld [vmem:[%s16774_s1 + $0x10] sm:$0xff]   ;;  %v11286_v54 = vpack.i.bf16 %v9512_v7, %v9511_v39 }
 0x2b3   : > { %v2359_v13 = vpop.f32.mrf.mxu0  ;;  %10635 = vmatmul.mubr.msk.bf16.gmra.mxu0 %vm707_vm3, %v13312_v23  ;;  %v9515_v5 = vunpack.c.l.bf16 %v9598_v43  ;;  %v9516_v44 = vunpack.c.h.bf16 %v9598_v43  ;;  %v9523_v23 = vunpack.c.l.bf16 %v9600_v58  ;;  %v3394_v43 = vor.u32 %v3392_v16, %v3390_v51  ;;  %v9602_v51 = vld [vmem:[%s16774_s1 + $0x30] sm:$0xff]  }
 0x2b4   : > { %17035 = vst [vmem:[#allocation38_spill] sm:$0xff] %v13553_v35  ;;  %v13557_v19 = vpop.f32.mrf.mxu1  ;;  %v2482_v22 = vadd.f32 %v2359_v13, %v17037_v46  ;;  %10638 = vmatprep.mubr.msk.bf16.mxu0 %vm11524_vm2, %v16866_v28  ;;  %11287 = vperm.xlu0 %11280, %v11286_v54   ;;  %v11493_v13 = vld [vmem:[%s11613_s16 + $0xbc] sm:$0xf]  ;;  %v11494_v46 = vld [vmem:[%s11613_s16 + $0xc0] sm:$0xf]  ;;  %v9531_v16 = vunpack.c.l.bf16 %v9602_v51 }
 0x2b5   : > { %v10444_v15 = vpop.f32.mrf.mxu0  ;;  %v11292_v30 = vpack.i.bf16 %v9516_v44, %v9515_v5  ;;  %v13576_v52 = vcombine.low %v11493_v13, %v11494_v46  ;;  %v11302_v58 = vpack.i.bf16 %v9524_v59, %v9523_v23  ;;  %v3399_v59 = vshrl.u32 %v17036_v3, 16 }
 0x2b6   : > { %v10563_v37 = vpop.f32.mrf.mxu1  ;;  %v13572_v35 = vadd.f32 %v13382_v63, %v2482_v22  ;;  %v3397_v15 = vrot.slane %v3395_v34, 1  ;;  %v9599_v63 = vld [vmem:[%s16774_s1 + $0x18] sm:$0xff]   ;;  %v17039_v22 = vld [vmem:[#allocation4_spill] sm:$0xff]  ;;  %v9532_v34 = vunpack.c.h.bf16 %v9602_v51 }
 0x2b7   : > { %v2362_v39 = vpop.f32.mrf.mxu0  ;;  %11293 = vperm.xlu1 %11291, %v11292_v30   ;;  %v9519_v5 = vunpack.c.l.bf16 %v9599_v63  ;;  %v9520_v13 = vunpack.c.h.bf16 %v9599_v63 }
 0x2b8   : > { %17038 = vst [vmem:[#allocation39_spill] sm:$0xff] %v13572_v35  ;;  %v13578_v7 = vpop.f32.mrf.mxu1  ;;  %10757 = vmatmul.mubr.msk.bf16.gmra.mxu1 %vm707_vm3, %v3391_v48  ;;  %v2483_v54 = vadd.f32 %v2362_v39, %v17039_v22  ;;  %11303 = vperm.xlu0 %11280, %v11302_v58   ;;  %v3398_v23 = vsel %vm518_vm4, %v3394_v43, %v3397_v15  ;;  %v3402_v39 = vshll.u32 %v13576_v52, 16  ;;  %v17041_v22 = vld [vmem:[#allocation25_spill] sm:$0xff] }
 0x2b9   : > { %10760 = vmatprep.mubr.msk.bf16.mxu1 %vm11524_vm2, %v16866_v28  ;;  %v10445_v44 = vpop.f32.mrf.mxu0  ;;  %v11297_v63 = vpack.i.bf16 %v9520_v13, %v9519_v5  ;;  %v11312_v58 = vpack.i.bf16 %v9532_v34, %v9531_v16  ;;  %v9604_v5 = vld [vmem:[%s16774_s1 + $0x40] sm:$0xff]   ;;  %v3401_v16 = vor.u32 %v3399_v59, %v3397_v15  ;;  %v9606_v15 = vld [vmem:[%s16774_s1 + $0x50] sm:$0xff]  }
 0x2ba   : > { %v10566_v37 = vpop.f32.mrf.mxu1  ;;  %v13591_v48 = vadd.f32 %v13397_v41, %v2483_v54  ;;  %v9601_v41 = vld [vmem:[%s16774_s1 + $0x28] sm:$0xff]   ;;  %v3404_v34 = vrot.slane %v3402_v39, 1  ;;  %v9547_v59 = vunpack.c.l.bf16 %v9606_v15  ;;  %v9548_v39 = vunpack.c.h.bf16 %v9606_v15 }
 0x2bb   : > { %v2367_v46 = vpop.f32.mrf.mxu0  ;;  %10639 = vmatmul.mubr.msk.bf16.gmra.mxu0 %vm707_vm3, %v13338_v8  ;;  %v9527_v44 = vunpack.c.l.bf16 %v9601_v41  ;;  %v9528_v37 = vunpack.c.h.bf16 %v9601_v41  ;;  %11298 = vperm.xlu1 %11291, %v11297_v63   ;;  %v13616_v41 = vld [vmem:[%s11613_s16 + $0xc4] sm:$0xff]   ;;  %v9603_v63 = vld [vmem:[%s16774_s1 + $0x38] sm:$0xff]  }
 0x2bc   : > { %17040 = vst [vmem:[#allocation41_spill] sm:$0xff] %v13591_v48  ;;  %v13595_v30 = vpop.f32.mrf.mxu1  ;;  %v2484_v54 = vadd.f32 %v2367_v46, %v17041_v22  ;;  %10642 = vmatprep.mubr.msk.bf16.mxu0 %vm11524_vm2, %v16866_v28  ;;  %11313 = vperm.xlu0 %11280, %v11312_v58   ;;  %v9539_v46 = vunpack.c.l.bf16 %v9604_v5  ;;  %v9540_v22 = vunpack.c.h.bf16 %v9604_v5  ;;  %v9535_v58 = vunpack.c.l.bf16 %v9603_v63 }
 0x2bd   : > { %v10448_v51 = vpop.f32.mrf.mxu0  ;;  %v11307_v48 = vpack.i.bf16 %v9528_v37, %v9527_v44 }
 0x2be   : > { %v10567_v43 = vpop.f32.mrf.mxu1  ;;  %v13610_v13 = vadd.f32 %v13408_v49, %v2484_v54  ;;  %v17043_v51 = vld [vmem:[#allocation5_spill] sm:$0xff]  ;;  %v11322_v54 = vpack.i.bf16 %v9540_v22, %v9539_v46  ;;  %v3405_v46 = vsel %vm518_vm4, %v3401_v16, %v3404_v34  ;;  %v3409_v22 = vshll.u32 %v13616_v41, 16 }
 0x2bf   : > { %v2370_v35 = vpop.f32.mrf.mxu0  ;;  %11308 = vperm.xlu1 %11291, %v11307_v48   ;;  %v9536_v43 = vunpack.c.h.bf16 %v9603_v63  ;;  %v3406_v48 = vshrl.u32 %v13576_v52, 16 }
 0x2c0   : > { %17042 = vst [vmem:[#allocation42_spill] sm:$0xff] %v13610_v13  ;;  %v13612_v8 = vpop.f32.mrf.mxu1  ;;  %10761 = vmatmul.mubr.msk.bf16.gmra.mxu1 %vm707_vm3, %v3398_v23  ;;  %v2485_v49 = vadd.f32 %v2370_v35, %v17043_v51  ;;  %11323 = vperm.xlu0 %11280, %v11322_v54   ;;  %v17045_v51 = vld [vmem:[#allocation6_spill] sm:$0xff]  ;;  %v11332_v54 = vpack.i.bf16 %v9548_v39, %v9547_v59  ;;  %v3411_v39 = vrot.slane %v3409_v22, 1 }
 0x2c1   : > { %10764 = vmatprep.mubr.msk.bf16.mxu1 %vm11524_vm2, %v16866_v28  ;;  %v10449_v44 = vpop.f32.mrf.mxu0  ;;  %v11317_v63 = vpack.i.bf16 %v9536_v43, %v9535_v58  ;;  %v9608_v58 = vld [vmem:[%s16774_s1 + $0x60] sm:$0xff]   ;;  %v3408_v59 = vor.u32 %v3406_v48, %v3404_v34  ;;  %v9610_v34 = vld [vmem:[%s16774_s1 + $0x70] sm:$0xff]  }
 0x2c2   : > { %v10570_v37 = vpop.f32.mrf.mxu1  ;;  %v13628_v23 = vadd.f32 %v13423_v6, %v2485_v49  ;;  %v9605_v6 = vld [vmem:[%s16774_s1 + $0x48] sm:$0xff]   ;;  %v9563_v48 = vunpack.c.l.bf16 %v9610_v34  ;;  %v9564_v22 = vunpack.c.h.bf16 %v9610_v34 }
 0x2c3   : > { %v2375_v35 = vpop.f32.mrf.mxu0  ;;  %10643 = vmatmul.mubr.msk.bf16.gmra.mxu0 %vm707_vm3, %v13364_v21  ;;  %v9543_v44 = vunpack.c.l.bf16 %v9605_v6  ;;  %v9544_v37 = vunpack.c.h.bf16 %v9605_v6  ;;  %11318 = vperm.xlu1 %11291, %v11317_v63   ;;  %v11441_v6 = vld [vmem:[%s11613_s16 + $0xcc] ss:$0 sps:$4 sm:$0xff]   ;;  %v9607_v63 = vld [vmem:[%s16774_s1 + $0x58] sm:$0xff]  }
 0x2c4   : > { %17044 = vst [vmem:[#allocation44_spill] sm:$0xff] %v13628_v23  ;;  %v13632_v5 = vpop.f32.mrf.mxu1  ;;  %v2486_v49 = vadd.f32 %v2375_v35, %v17045_v51  ;;  %10646 = vmatprep.mubr.msk.bf16.mxu0 %vm11524_vm2, %v16866_v28  ;;  %11333 = vperm.xlu0 %11280, %v11332_v54   ;;  %v9555_v35 = vunpack.c.l.bf16 %v9608_v58  ;;  %v9556_v51 = vunpack.c.h.bf16 %v9608_v58 }
 0x2c5   : > { %v10452_v15 = vpop.f32.mrf.mxu0  ;;  %v11327_v23 = vpack.i.bf16 %v9544_v37, %v9543_v44  ;;  %v9552_v37 = vunpack.c.h.bf16 %v9607_v63 }
 0x2c6   : > { %v10571_v16 = vpop.f32.mrf.mxu1  ;;  %v13647_v43 = vadd.f32 %v13434_v14, %v2486_v49  ;;  %v17047_v15 = vld [vmem:[#allocation7_spill] sm:$0xff]  ;;  %v11342_v14 = vpack.i.bf16 %v9556_v51, %v9555_v35  ;;  %v9551_v49 = vunpack.c.l.bf16 %v9607_v63  ;;  %v3412_v35 = vsel %vm518_vm4, %v3408_v59, %v3411_v39  ;;  %v9612_v59 = vld [vmem:[%s16774_s1 + $0x80] sm:$0xff]  }
 0x2c7   : > { %v2378_v13 = vpop.f32.mrf.mxu0  ;;  %11328 = vperm.xlu1 %11291, %v11327_v23   ;;  %v3413_v23 = vshrl.u32 %v13616_v41, 16  ;;  %v3417_v51 = vshll.u32 %v11441_v6, 16 }
 0x2c8   : > { %17046 = vst [vmem:[#allocation45_spill] sm:$0xff] %v13647_v43  ;;  %v13649_v21 = vpop.f32.mrf.mxu1  ;;  %10765 = vmatmul.mubr.msk.bf16.gmra.mxu1 %vm707_vm3, %v3405_v46  ;;  %v2487_v16 = vadd.f32 %v2378_v13, %v17047_v15  ;;  %11343 = vperm.xlu0 %11280, %v11342_v14   ;;  %v11337_v63 = vpack.i.bf16 %v9552_v37, %v9551_v49  ;;  %v17049_v15 = vld [vmem:[#allocation8_spill] sm:$0xff]  ;;  %v9571_v37 = vunpack.c.l.bf16 %v9612_v59 }
 0x2c9   : > { %10768 = vmatprep.mubr.msk.bf16.mxu1 %vm11524_vm2, %v16866_v28  ;;  %v10453_v54 = vpop.f32.mrf.mxu0  ;;  %v11352_v14 = vpack.i.bf16 %v9564_v22, %v9563_v48  ;;  %v3415_v48 = vor.u32 %v3413_v23, %v3411_v39  ;;  %v3419_v22 = vrot.slane %v3417_v51, 1  ;;  %v9614_v39 = vld [vmem:[%s16774_s1 + $0x90] sm:$0xff]  }
 0x2ca   : > { %v10574_v44 = vpop.f32.mrf.mxu1  ;;  %v13663_v46 = vadd.f32 %v13449_v32, %v2487_v16  ;;  %v9609_v32 = vld [vmem:[%s16774_s1 + $0x68] sm:$0xff]   ;;  %v9579_v23 = vunpack.c.l.bf16 %v9614_v39  ;;  %v9580_v51 = vunpack.c.h.bf16 %v9614_v39  ;;  %v9615_v39 = vld [vmem:[%s16774_s1 + $0x98] sm:$0xff]  }
 0x2cb   : > { %v2383_v13 = vpop.f32.mrf.mxu0  ;;  %10647 = vmatmul.mubr.msk.bf16.gmra.mxu0 %vm707_vm3, %v13390_v56  ;;  %v9559_v54 = vunpack.c.l.bf16 %v9609_v32  ;;  %v9560_v44 = vunpack.c.h.bf16 %v9609_v32  ;;  %11338 = vperm.xlu1 %11291, %v11337_v63   ;;  %v17050_v63 = vld [vmem:[#allocation32_spill] sm:$0xff] }
 0x2cc   : > { %17048 = vst [vmem:[#allocation47_spill] sm:$0xff] %v13663_v46  ;;  %v13667_v58 = vpop.f32.mrf.mxu1  ;;  %v2488_v16 = vadd.f32 %v2383_v13, %v17049_v15  ;;  %10650 = vmatprep.mubr.msk.bf16.mxu0 %vm11524_vm2, %v16866_v28  ;;  %11353 = vperm.xlu0 %11280, %v11352_v14   ;;  %v9572_v13 = vunpack.c.h.bf16 %v9612_v59 }
 0x2cd   : > { %v10456_v34 = vpop.f32.mrf.mxu0  ;;  %v11347_v49 = vpack.i.bf16 %v9560_v44, %v9559_v54 }
 0x2ce   : > { %v10575_v46 = vpop.f32.mrf.mxu1  ;;  %v13681_v6 = vadd.f32 %v13460_v9, %v2488_v16  ;;  %v11362_v9 = vpack.i.bf16 %v9572_v13, %v9571_v37  ;;  %v3420_v37 = vsel %vm518_vm4, %v3415_v48, %v3419_v22  ;;  %v9613_v13 = vld [vmem:[%s16774_s1 + $0x88] sm:$0xff]  }
 0x2cf   : > { %v2386_v15 = vpop.f32.mrf.mxu0  ;;  %v9611_v46 = vld [vmem:[%s16774_s1 + $0x78] sm:$0xff]   ;;  %11348 = vperm.xlu1 %11291, %v11347_v49  }
 0x2d0   : > { %v13683_v43 = vpop.f32.mrf.mxu1  ;;  %10769 = vmatmul.mubr.msk.bf16.gmra.mxu1 %vm707_vm3, %v3412_v35  ;;  %v2489_v32 = vadd.f32 %v2386_v15, %v17050_v63  ;;  %v9567_v16 = vunpack.c.l.bf16 %v9611_v46  ;;  %v9568_v44 = vunpack.c.h.bf16 %v9611_v46  ;;  %11363 = vperm.xlu0 %11280, %v11362_v9   ;;  %v17052_v15 = vld [vmem:[#allocation9_spill] sm:$0xff]  ;;  %v9575_v63 = vunpack.c.l.bf16 %v9613_v13 }
 0x2d1   : > { %10772 = vmatprep.mubr.msk.bf16.mxu1 %vm11524_vm2, %v16866_v28  ;;  %v10457_v14 = vpop.f32.mrf.mxu0 }
 0x2d2   : > { %v10578_v54 = vpop.f32.mrf.mxu1  ;;  %v13696_v35 = vadd.f32 %v13475_v0, %v2489_v32  ;;  %v11357_v49 = vpack.i.bf16 %v9568_v44, %v9567_v16  ;;  %v11372_v0 = vpack.i.bf16 %v9580_v51, %v9579_v23  ;;  %v9576_v32 = vunpack.c.h.bf16 %v9613_v13  ;;  %v9616_v44 = vld [vmem:[%s16774_s1 + $0xa0] sm:$0xff]  }
 0x2d3   : > { %v2391_v34 = vpop.f32.mrf.mxu0  ;;  %10651 = vmatmul.mubr.msk.bf16.gmra.mxu0 %vm707_vm3, %v13416_v47  ;;  %v17054_v23 = vld [vmem:[#allocation10_spill] sm:$0xff] }
 0x2d4   : > { %17051 = vst [vmem:[#allocation48_spill] sm:$0xff] %v13696_v35  ;;  %v13700_v59 = vpop.f32.mrf.mxu1  ;;  %v2490_v46 = vadd.f32 %v2391_v34, %v17052_v15  ;;  %10654 = vmatprep.mubr.msk.bf16.mxu0 %vm11524_vm2, %v16866_v28  ;;  %11358 = vperm.xlu1 %11291, %v11357_v49   ;;  %v11367_v48 = vpack.i.bf16 %v9576_v32, %v9575_v63  ;;  %v9587_v34 = vunpack.c.l.bf16 %v9616_v44  ;;  %v9584_v15 = vunpack.c.h.bf16 %v9615_v39 }
 0x2d5   : > { %v10460_v9 = vpop.f32.mrf.mxu0  ;;  %11373 = vperm.xlu0 %11280, %v11372_v0  }
 0x2d6   : > { %v10579_v14 = vpop.f32.mrf.mxu1  ;;  %v13710_v54 = vadd.f32 %v13486_v10, %v2490_v46  ;;  %v9583_v10 = vunpack.c.l.bf16 %v9615_v39  ;;  %v9618_v46 = vld [vmem:[%s16774_s1 + $0xb0] sm:$0xff]   ;;  %v17056_v39 = vld [vmem:[#allocation11_spill] sm:$0xff] }
 0x2d7   : > { %v2394_v22 = vpop.f32.mrf.mxu0  ;;  %v9595_v32 = vunpack.c.l.bf16 %v9618_v46 }
 0x2d8   : > { %17053 = vst [vmem:[#allocation2_spill] sm:$0xff] %v13710_v54  ;;  %v13712_v16 = vpop.f32.mrf.mxu1  ;;  %10773 = vmatmul.mubr.msk.bf16.gmra.mxu1 %vm707_vm3, %v3420_v37  ;;  %v2491_v51 = vadd.f32 %v2394_v22, %v17054_v23  ;;  %11368 = vperm.xlu1 %11291, %v11367_v48   ;;  %v9617_v37 = vld [vmem:[%s16774_s1 + $0xa8] sm:$0xff]   ;;  %v11377_v48 = vpack.i.bf16 %v9584_v15, %v9583_v10  ;;  %v8103_v22 = vld [vmem:[%s16775_s2] sm:$0xf]  ;;  %v17057_v15 = vmov 0  }
 0x2d9   : > { %v10461_v49 = vpop.f32.mrf.mxu0  ;;  %4557 = vperm.xlu0 %11280, %v9587_v34   ;;  %v9592_v63 = vunpack.c.h.bf16 %v9617_v37  ;;  %v9591_v34 = vunpack.c.l.bf16 %v9617_v37  ;;  %vm8143_vm9 = vcmp.gt.bf16.partialorder %v8103_v22, 0  ;;  %v17058_v37 = vld [vmem:[#allocation12_spill] sm:$0xff]  ;;  %v8104_v22 = vld [vmem:[%s16775_s2 + $0x4] sm:$0xf] }
 0x2da   : > { %v10582_v13 = vpop.f32.mrf.mxu1  ;;  %v13729_v0 = vadd.f32 %v13501_v40, %v2491_v51  ;;  %v9588_v51 = vunpack.c.h.bf16 %v9616_v44  ;;  %v8183_v54 = vsel %vm8143_vm9, 65537, %v17057_v15  ;;  %v8105_v44 = vld [vmem:[%s16775_s2 + $0x8] sm:$0xf]  ;;  %vm8144_vm12 = vcmp.gt.bf16.partialorder %v8104_v22, 0 }
 0x2db   : > { %v2399_v9 = vpop.f32.mrf.mxu0  ;;  %10655 = vmatmul.mubr.msk.bf16.gmra.mxu0 %vm707_vm3, %v13442_v31  ;;  %v11387_v40 = vpack.i.bf16 %v9595_v32, %v9592_v63  ;;  %vm8145_vm10 = vcmp.gt.bf16.partialorder %v8105_v44, 0 }
 0x2dc   : > { %17055 = vst [vmem:[#allocation3_spill] sm:$0xff] %v13729_v0  ;;  %v13733_v14 = vpop.f32.mrf.mxu1  ;;  %v2492_v23 = vadd.f32 %v2399_v9, %v17056_v39  ;;  %10658 = vmatprep.mubr.msk.bf16.mxu0 %vm11524_vm2, %v16866_v28  ;;  %11378 = vperm.xlu1 %11291, %v11377_v48   ;;  %v11382_v10 = vpack.i.bf16 %v9591_v34, %v9588_v51  ;;  %v8223_v9 = vunpack.c.l.b16 %v8183_v54  ;;  %v8107_v34 = vld [vmem:[%s16775_s2 + $0x10] sm:$0xf] }
 0x2dd   : > { %v10464_v49 = vpop.f32.mrf.mxu0  ;;  %11388 = vperm.xlu0 %11280, %v11387_v40   ;;  %vm8147_vm13 = vcmp.gt.bf16.partialorder %v8107_v34, 0 }
 0x2de   : > { %v10583_v13 = vpop.f32.mrf.mxu1  ;;  %v13742_v0 = vadd.f32 %v13512_v26, %v2492_v23  ;;  %vm8263_vm11 = vcmp.ne.s32.totalorder %v8223_v9, 0  ;;  %v8185_v26 = vsel %vm8145_vm10, 65537, %v17057_v15  ;;  %v9596_v23 = vunpack.c.h.bf16 %v9618_v46  ;;  %v17059_v49 = vld [vmem:[#allocation37_spill] sm:$0xff] }
 0x2df   : > { %v2402_v35 = vpop.f32.mrf.mxu0  ;;  %v8303_v54 = vsel %vm8263_vm11, 1, %v17057_v15  ;;  %v8225_v51 = vunpack.c.l.b16 %v8185_v26  ;;  %v8187_v44 = vsel %vm8147_vm13, 65537, %v17057_v15 }
 0x2e0   : > { %v13745_v31 = vpop.f32.mrf.mxu1  ;;  %v2493_v63 = vadd.f32 %v2402_v35, %v17058_v37  ;;  %11383 = vperm.xlu1 %11291, %v11382_v10   ;;  %v8106_v37 = vld [vmem:[%s16775_s2 + $0xc] sm:$0xf] }
 0x2e1   : > { %v10465_v32 = vpop.f32.mrf.mxu0  ;;  %8344 = vperm.xlu0 %11280, %v8303_v54   ;;  %vm8265_vm14 = vcmp.ne.s32.totalorder %v8225_v51, 0  ;;  %vm8146_vm15 = vcmp.gt.bf16.partialorder %v8106_v37, 0 }
 0x2e2   : > { %v10586_v48 = vpop.f32.mrf.mxu1  ;;  %v13756_v39 = vadd.f32 %v13527_v57, %v2493_v63  ;;  %v8184_v57 = vsel %vm8144_vm12, 65537, %v17057_v15  ;;  %v8305_v32 = vsel %vm8265_vm14, 1, %v17057_v15  ;;  %v8186_v54 = vsel %vm8146_vm15, 65537, %v17057_v15 }
 0x2e3   : > { %v2407_v40 = vpop.f32.mrf.mxu0  ;;  %10659 = vmatmul.mubr.msk.bf16.gmra.mxu0 %vm707_vm3, %v13468_v12  ;;  %v8224_v9 = vunpack.c.l.b16 %v8184_v57  ;;  %v8227_v48 = vunpack.c.l.b16 %v8187_v44  ;;  %v8226_v57 = vunpack.c.l.b16 %v8186_v54 }
 0x2e4   : > { %v13761_v35 = vpop.f32.mrf.mxu1  ;;  %v2494_v13 = vadd.f32 %v2407_v40, %v17059_v49  ;;  %10662 = vmatprep.mubr.msk.bf16.mxu0 %vm11524_vm2, %v16866_v28  ;;  %4582 = vperm.xlu1 %11291, %v9596_v23   ;;  %v8109_v23 = vld [vmem:[%s16775_s2 + $0x18] sm:$0xf] }
 0x2e5   : > { %v10468_v46 = vpop.f32.mrf.mxu0  ;;  %8350 = vperm.xlu0 %11280, %v8305_v32   ;;  %vm8264_vm0 = vcmp.ne.s32.totalorder %v8224_v9, 0  ;;  %v17060_v40 = vld [vmem:[#allocation13_spill] sm:$0xff]  ;;  %vm8267_vm1 = vcmp.ne.s32.totalorder %v8227_v48, 0  ;;  %vm8149_vm9 = vcmp.gt.bf16.partialorder %v8109_v23, 0  ;;  %vm8266_vm11 = vcmp.ne.s32.totalorder %v8226_v57, 0 }
 0x2e6   : > { %v10587_v10 = vpop.f32.mrf.mxu1  ;;  %v13775_v63 = vadd.f32 %v13541_v20, %v2494_v13  ;;  %v8304_v20 = vsel %vm8264_vm0, 1, %v17057_v15  ;;  %v8307_v13 = vsel %vm8267_vm1, 1, %v17057_v15  ;;  %v8108_v46 = vld [vmem:[%s16775_s2 + $0x14] sm:$0xf]  ;;  %v8189_v9 = vsel %vm8149_vm9, 65537, %v17057_v15 }
 0x2e7   : > { %v2410_v26 = vpop.f32.mrf.mxu0  ;;  %vm8148_vm10 = vcmp.gt.bf16.partialorder %v8108_v46, 0  ;;  %v8229_v32 = vunpack.c.l.b16 %v8189_v9  ;;  %v8306_v23 = vsel %vm8266_vm11, 1, %v17057_v15 }
 0x2e8   : > { %v13778_v22 = vpop.f32.mrf.mxu1  ;;  %v2495_v51 = vadd.f32 %v2410_v26, %v17060_v40  ;;  %8347 = vperm.xlu1 %11291, %v8304_v20   ;;  %v8188_v48 = vsel %vm8148_vm10, 65537, %v17057_v15  ;;  %v8111_v26 = vld [vmem:[%s16775_s2 + $0x20] sm:$0xf] }
 0x2e9   : > { %v10469_v34 = vpop.f32.mrf.mxu0  ;;  %8356 = vperm.xlu0 %11280, %v8307_v13   ;;  %v8228_v40 = vunpack.c.l.b16 %v8188_v48  ;;  %vm8151_vm12 = vcmp.gt.bf16.partialorder %v8111_v26, 0  ;;  %vm8269_vm13 = vcmp.ne.s32.totalorder %v8229_v32, 0  ;;  %v8113_v32 = vld [vmem:[%s16775_s2 + $0x28] sm:$0xf]  ;;  %v17062_v26 = vld [vmem:[#allocation40_spill] sm:$0xff] }
 0x2ea   : > { %v10686_v49 = vpop.f32.mrf.mxu1  ;;  %v13791_v10 = vadd.f32 %v13557_v19, %v2495_v51  ;;  %v17061_v19 = vld [vmem:[#allocation14_spill] sm:$0xff]  ;;  %v8191_v34 = vsel %vm8151_vm12, 65537, %v17057_v15  ;;  %v8309_v57 = vsel %vm8269_vm13, 1, %v17057_v15  ;;  %vm8153_vm1 = vcmp.gt.bf16.partialorder %v8113_v32, 0  ;;  %v8115_v32 = vld [vmem:[%s16775_s2 + $0x30] sm:$0xf] }
 0x2eb   : > { %v2415_v44 = vpop.f32.mrf.mxu0  ;;  %10663 = vmatmul.mubr.msk.bf16.gmra.mxu0 %vm707_vm3, %v13494_v60  ;;  %v8110_v49 = vld [vmem:[%s16775_s2 + $0x1c] sm:$0xf]  ;;  %vm8268_vm14 = vcmp.ne.s32.totalorder %v8228_v40, 0  ;;  %v8231_v46 = vunpack.c.l.b16 %v8191_v34  ;;  %vm8155_vm11 = vcmp.gt.bf16.partialorder %v8115_v32, 0 }
 0x2ec   : > { %v13796_v37 = vpop.f32.mrf.mxu1  ;;  %v2496_v54 = vadd.f32 %v2415_v44, %v17061_v19  ;;  %10666 = vmatprep.mubr.msk.bf16.mxu0 %vm11524_vm2, %v16866_v28  ;;  %8353 = vperm.xlu1 %11291, %v8306_v23   ;;  %v8308_v48 = vsel %vm8268_vm14, 1, %v17057_v15  ;;  %vm8150_vm15 = vcmp.gt.bf16.partialorder %v8110_v49, 0  ;;  %v8193_v49 = vsel %vm8153_vm1, 65537, %v17057_v15 }
 0x2ed   : > { %v10472_v51 = vpop.f32.mrf.mxu0  ;;  %8362 = vperm.xlu0 %11280, %v8309_v57   ;;  %vm8271_vm0 = vcmp.ne.s32.totalorder %v8231_v46, 0 }
 0x2ee   : > { %v10687_v20 = vpop.f32.mrf.mxu1  ;;  %v13811_v13 = vadd.f32 %v13578_v7, %v2496_v54  ;;  %v8190_v7 = vsel %vm8150_vm15, 65537, %v17057_v15  ;;  %v8311_v40 = vsel %vm8271_vm0, 1, %v17057_v15 }
 0x2ef   : > { %v2418_v9 = vpop.f32.mrf.mxu0  ;;  %v8230_v51 = vunpack.c.l.b16 %v8190_v7  ;;  %v8112_v20 = vld [vmem:[%s16775_s2 + $0x24] sm:$0xf] }
 0x2f0   : > { %v13814_v44 = vpop.f32.mrf.mxu1  ;;  %v2497_v19 = vadd.f32 %v2418_v9, %v17062_v26  ;;  %8359 = vperm.xlu1 %11291, %v8308_v48   ;;  %vm8152_vm9 = vcmp.gt.bf16.partialorder %v8112_v20, 0  ;;  %v8233_v9 = vunpack.c.l.b16 %v8193_v49 }
 0x2f1   : > { %v10473_v54 = vpop.f32.mrf.mxu0  ;;  %8368 = vperm.xlu0 %11280, %v8311_v40   ;;  %vm8270_vm10 = vcmp.ne.s32.totalorder %v8230_v51, 0  ;;  %v8192_v48 = vsel %vm8152_vm9, 65537, %v17057_v15  ;;  %v8195_v40 = vsel %vm8155_vm11, 65537, %v17057_v15  ;;  %v8114_v51 = vld [vmem:[%s16775_s2 + $0x2c] sm:$0xf] }
 0x2f2   : > { %v10690_v23 = vpop.f32.mrf.mxu1  ;;  %v13827_v34 = vadd.f32 %v13595_v30, %v2497_v19  ;;  %v17063_v30 = vld [vmem:[#allocation15_spill] sm:$0xff]  ;;  %v8310_v19 = vsel %vm8270_vm10, 1, %v17057_v15  ;;  %v8232_v7 = vunpack.c.l.b16 %v8192_v48  ;;  %vm8273_vm12 = vcmp.ne.s32.totalorder %v8233_v9, 0  ;;  %v8117_v9 = vld [vmem:[%s16775_s2 + $0x38] sm:$0xf] }
 0x2f3   : > { %v2423_v57 = vpop.f32.mrf.mxu0  ;;  %10667 = vmatmul.mubr.msk.bf16.gmra.mxu0 %vm707_vm3, %v13517_v4  ;;  %v8313_v49 = vsel %vm8273_vm12, 1, %v17057_v15  ;;  %vm8154_vm14 = vcmp.gt.bf16.partialorder %v8114_v51, 0  ;;  %vm8157_vm0 = vcmp.gt.bf16.partialorder %v8117_v9, 0  ;;  %v8116_v51 = vld [vmem:[%s16775_s2 + $0x34] sm:$0xf] }
 0x2f4   : > { %v13832_v46 = vpop.f32.mrf.mxu1  ;;  %v2498_v26 = vadd.f32 %v2423_v57, %v17063_v30  ;;  %10670 = vmatprep.mubr.msk.bf16.mxu0 %vm11524_vm2, %v16866_v28  ;;  %8365 = vperm.xlu1 %11291, %v8310_v19   ;;  %vm8272_vm13 = vcmp.ne.s32.totalorder %v8232_v7, 0  ;;  %v8235_v57 = vunpack.c.l.b16 %v8195_v40  ;;  %v17065_v19 = vld [vmem:[#allocation16_spill] sm:$0xff]  ;;  %vm8156_vm1 = vcmp.gt.bf16.partialorder %v8116_v51, 0 }
 0x2f5   : > { %v10476_v54 = vpop.f32.mrf.mxu0  ;;  %8374 = vperm.xlu0 %11280, %v8313_v49   ;;  %v8312_v32 = vsel %vm8272_vm13, 1, %v17057_v15  ;;  %v8196_v9 = vsel %vm8156_vm1, 65537, %v17057_v15 }
 0x2f6   : > { %v10691_v23 = vpop.f32.mrf.mxu1  ;;  %v13847_v20 = vadd.f32 %v13612_v8, %v2498_v26  ;;  %vm8275_vm15 = vcmp.ne.s32.totalorder %v8235_v57, 0  ;;  %v8194_v8 = vsel %vm8154_vm14, 65537, %v17057_v15 }
 0x2f7   : > { %v2426_v30 = vpop.f32.mrf.mxu0  ;;  %v8315_v7 = vsel %vm8275_vm15, 1, %v17057_v15  ;;  %v8234_v40 = vunpack.c.l.b16 %v8194_v8 }
 0x2f8   : > { %17064 = vst [vmem:[#allocation4_spill] sm:$0xff] %v13847_v20  ;;  %v13850_v48 = vpop.f32.mrf.mxu1  ;;  %v2499_v54 = vadd.f32 %v2426_v30, %v17065_v19  ;;  %8371 = vperm.xlu1 %11291, %v8312_v32   ;;  %v8197_v20 = vsel %vm8157_vm0, 65537, %v17057_v15  ;;  %v8119_v19 = vld [vmem:[%s16775_s2 + $0x40] sm:$0xf] }
 0x2f9   : > { %v10477_v26 = vpop.f32.mrf.mxu0  ;;  %8380 = vperm.xlu0 %11280, %v8315_v7   ;;  %vm8274_vm9 = vcmp.ne.s32.totalorder %v8234_v40, 0  ;;  %v8237_v32 = vunpack.c.l.b16 %v8197_v20  ;;  %vm8159_vm10 = vcmp.gt.bf16.partialorder %v8119_v19, 0  ;;  %v8118_v7 = vld [vmem:[%s16775_s2 + $0x3c] sm:$0xf] }
 0x2fa   : > { %v10694_v23 = vpop.f32.mrf.mxu1  ;;  %v13863_v49 = vadd.f32 %v13632_v5, %v2499_v54  ;;  %v17067_v5 = vld [vmem:[#allocation43_spill] sm:$0xff]  ;;  %v8314_v8 = vsel %vm8274_vm9, 1, %v17057_v15  ;;  %v8236_v26 = vunpack.c.l.b16 %v8196_v9  ;;  %v8199_v20 = vsel %vm8159_vm10, 65537, %v17057_v15 }
 0x2fb   : > { %v2431_v57 = vpop.f32.mrf.mxu0  ;;  %10671 = vmatmul.mubr.msk.bf16.gmra.mxu0 %vm707_vm3, %v17036_v3  ;;  %vm8277_vm11 = vcmp.ne.s32.totalorder %v8237_v32, 0  ;;  %vm8158_vm13 = vcmp.gt.bf16.partialorder %v8118_v7, 0  ;;  %v8121_v32 = vld [vmem:[%s16775_s2 + $0x48] sm:$0xf] }
 0x2fc   : > { %17066 = vst [vmem:[#allocation25_spill] sm:$0xff] %v13863_v49  ;;  %v13868_v30 = vpop.f32.mrf.mxu1  ;;  %v2500_v54 = vadd.f32 %v2431_v57, %v17067_v5  ;;  %10674 = vmatprep.mubr.msk.bf16.mxu0 %vm11524_vm2, %v16866_v28  ;;  %8377 = vperm.xlu1 %11291, %v8314_v8   ;;  %v8317_v57 = vsel %vm8277_vm11, 1, %v17057_v15  ;;  %vm8276_vm12 = vcmp.ne.s32.totalorder %v8236_v26, 0  ;;  %v8239_v5 = vunpack.c.l.b16 %v8199_v20  ;;  %v8120_v20 = vld [vmem:[%s16775_s2 + $0x44] sm:$0xf] }
 0x2fd   : > { %v10480_v23 = vpop.f32.mrf.mxu0  ;;  %8386 = vperm.xlu0 %11280, %v8317_v57   ;;  %v8316_v19 = vsel %vm8276_vm12, 1, %v17057_v15  ;;  %vm8161_vm15 = vcmp.gt.bf16.partialorder %v8121_v32, 0  ;;  %vm8160_vm0 = vcmp.gt.bf16.partialorder %v8120_v20, 0  ;;  %v8122_v20 = vld [vmem:[%s16775_s2 + $0x4c] sm:$0xf] }
 0x2fe   : > { %v10695_v51 = vpop.f32.mrf.mxu1  ;;  %v13883_v40 = vadd.f32 %v13649_v21, %v2500_v54  ;;  %vm8279_vm14 = vcmp.ne.s32.totalorder %v8239_v5, 0  ;;  %v8198_v21 = vsel %vm8158_vm13, 65537, %v17057_v15  ;;  %v8200_v32 = vsel %vm8160_vm0, 65537, %v17057_v15 }
 0x2ff   : > { %v2434_v49 = vpop.f32.mrf.mxu0  ;;  %v8319_v26 = vsel %vm8279_vm14, 1, %v17057_v15  ;;  %v8238_v51 = vunpack.c.l.b16 %v8198_v21  ;;  %vm8162_vm12 = vcmp.gt.bf16.partialorder %v8122_v20, 0  ;;  %v8124_v20 = vld [vmem:[%s16775_s2 + $0x54] sm:$0xf] }
 0x300   : > { %v13886_v9 = vpop.f32.mrf.mxu1  ;;  %v2501_v8 = vadd.f32 %v2434_v49, %v13208_v33  ;;  %8383 = vperm.xlu1 %11291, %v8316_v19   ;;  %v11442_v33 = vld [vmem:[%s16778_s5 + $0x8] sm:$0xff]   ;;  %v8201_v49 = vsel %vm8161_vm15, 65537, %v17057_v15  ;;  %vm8164_vm15 = vcmp.gt.bf16.partialorder %v8124_v20, 0 }
 0x301   : > { %v10481_v54 = vpop.f32.mrf.mxu0  ;;  %8392 = vperm.xlu0 %11280, %v8319_v26   ;;  %vm8278_vm1 = vcmp.ne.s32.totalorder %v8238_v51, 0  ;;  %v8241_v19 = vunpack.c.l.b16 %v8201_v49  ;;  %10870 = vmatprep.subr.bf16.mxu1 %v11442_v33 }
 0x302   : > { %v10698_v23 = vpop.f32.mrf.mxu1  ;;  %v13899_v7 = vadd.f32 %v13667_v58, %v2501_v8  ;;  %v8123_v58 = vld [vmem:[%s16775_s2 + $0x50] sm:$0xf]  ;;  %v8318_v21 = vsel %vm8278_vm1, 1, %v17057_v15  ;;  %v8240_v54 = vunpack.c.l.b16 %v8200_v32  ;;  %10871 = vmatpush3.bf16.msra.mxu1 %v11442_v33 }
 0x303   : > { %v2439_v57 = vpop.f32.mrf.mxu0  ;;  %10675 = vmatmul.mubr.msk.bf16.gmra.mxu0 %vm707_vm3, %v13576_v52  ;;  %vm8163_vm9 = vcmp.gt.bf16.partialorder %v8123_v58, 0  ;;  %vm8281_vm10 = vcmp.ne.s32.totalorder %v8241_v19, 0  ;;  %v8125_v19 = vld [vmem:[%s16775_s2 + $0x58] sm:$0xf] }
 0x304   : > { %v13907_v5 = vpop.f32.mrf.mxu1  ;;  %v2502_v8 = vadd.f32 %v2439_v57, %v13220_v45  ;;  %10678 = vmatprep.mubr.msk.bf16.mxu0 %vm11524_vm2, %v16866_v28  ;;  %8389 = vperm.xlu1 %11291, %v8318_v21   ;;  %v8203_v51 = vsel %vm8163_vm9, 65537, %v17057_v15  ;;  %v8321_v49 = vsel %vm8281_vm10, 1, %v17057_v15  ;;  %vm8280_vm11 = vcmp.ne.s32.totalorder %v8240_v54, 0  ;;  %v17069_v21 = vld [vmem:[#allocation17_spill] sm:$0xff] }
 0x305   : > { %v10484_v23 = vpop.f32.mrf.mxu0  ;;  %v8243_v57 = vunpack.c.l.b16 %v8203_v51  ;;  %8398 = vperm.xlu0 %11280, %v8321_v49   ;;  %v8320_v33 = vsel %vm8280_vm11, 1, %v17057_v15  ;;  %vm8165_vm14 = vcmp.gt.bf16.partialorder %v8125_v19, 0 }
 0x306   : > { %v10699_v26 = vpop.f32.mrf.mxu1  ;;  %v13922_v45 = vadd.f32 %v13683_v43, %v2502_v8  ;;  %v8202_v43 = vsel %vm8162_vm12, 65537, %v17057_v15 }
 0x307   : > { %v2442_v32 = vpop.f32.mrf.mxu0  ;;  %vm8283_vm13 = vcmp.ne.s32.totalorder %v8243_v57, 0  ;;  %v8242_v51 = vunpack.c.l.b16 %v8202_v43  ;;  %v8205_v57 = vsel %vm8165_vm14, 65537, %v17057_v15  ;;  %v8204_v43 = vsel %vm8164_vm15, 65537, %v17057_v15 }
 0x308   : > { %17068 = vst [vmem:[#allocation5_spill] sm:$0xff] %v13922_v45  ;;  %v13925_v58 = vpop.f32.mrf.mxu1  ;;  %v2503_v23 = vadd.f32 %v2442_v32, %v17069_v21  ;;  %8395 = vperm.xlu1 %11291, %v8320_v33   ;;  %v8323_v54 = vsel %vm8283_vm13, 1, %v17057_v15  ;;  %v3782_v45 = vrot.slane %v13028_v2, 1  ;;  %v8245_v19 = vunpack.c.l.b16 %v8205_v57  ;;  %v8127_v2 = vld [vmem:[%s16775_s2 + $0x60] sm:$0xf] }
 0x309   : > { %v10485_v8 = vpop.f32.mrf.mxu0  ;;  %8404 = vperm.xlu0 %11280, %v8323_v54   ;;  %vm8282_vm0 = vcmp.ne.s32.totalorder %v8242_v51, 0  ;;  %vm8167_vm1 = vcmp.gt.bf16.partialorder %v8127_v2, 0  ;;  %v8126_v51 = vld [vmem:[%s16775_s2 + $0x5c] sm:$0xf] }
 0x30a   : > { %v10702_v26 = vpop.f32.mrf.mxu1  ;;  %v13938_v49 = vadd.f32 %v13700_v59, %v2503_v23  ;;  %v17070_v59 = vld [vmem:[#allocation18_spill] sm:$0xff]  ;;  %v8244_v8 = vunpack.c.l.b16 %v8204_v43  ;;  %vm8285_vm9 = vcmp.ne.s32.totalorder %v8245_v19, 0  ;;  %v8207_v54 = vsel %vm8167_vm1, 65537, %v17057_v15  ;;  %v8129_v19 = vld [vmem:[%s16775_s2 + $0x68] sm:$0xf] }
 0x30b   : > { %v2447_v32 = vpop.f32.mrf.mxu0  ;;  %10679 = vmatmul.mubr.msk.bf16.gmra.mxu0 %vm707_vm3, %v13616_v41  ;;  %v8322_v41 = vsel %vm8282_vm0, 1, %v17057_v15  ;;  %vm8166_vm11 = vcmp.gt.bf16.partialorder %v8126_v51, 0  ;;  %vm8169_vm13 = vcmp.gt.bf16.partialorder %v8129_v19, 0  ;;  %v8128_v51 = vld [vmem:[%s16775_s2 + $0x64] sm:$0xf] }
 0x30c   : > { %v13945_v21 = vpop.f32.mrf.mxu1  ;;  %v2504_v23 = vadd.f32 %v2447_v32, %v17070_v59  ;;  %10778 = vmatprep.mubr.msk.bf16.mxu0 %vm11524_vm2, %v16866_v28  ;;  %8401 = vperm.xlu1 %11291, %v8322_v41   ;;  %v8325_v32 = vsel %vm8285_vm9, 1, %v17057_v15  ;;  %vm8284_vm10 = vcmp.ne.s32.totalorder %v8244_v8, 0  ;;  %v8247_v59 = vunpack.c.l.b16 %v8207_v54  ;;  %v17072_v41 = vld [vmem:[#allocation19_spill] sm:$0xff] }
 0x30d   : > { %v10488_v26 = vpop.f32.mrf.mxu0  ;;  %8410 = vperm.xlu0 %11280, %v8325_v32   ;;  %v8324_v2 = vsel %vm8284_vm10, 1, %v17057_v15  ;;  %v8206_v8 = vsel %vm8166_vm11, 65537, %v17057_v15  ;;  %vm8168_vm14 = vcmp.gt.bf16.partialorder %v8128_v51, 0 }
 0x30e   : > { %v10703_v20 = vpop.f32.mrf.mxu1  ;;  %v13960_v57 = vadd.f32 %v13712_v16, %v2504_v23  ;;  %v17073_v16 = vrot.slane %v13042_v29, 1  ;;  %vm8287_vm12 = vcmp.ne.s32.totalorder %v8247_v59, 0  ;;  %v16837_v59 = vrot.slane %v13069_v27, 1 }
 0x30f   : > { %v2450_v33 = vpop.f32.mrf.mxu0  ;;  %v8327_v32 = vsel %vm8287_vm12, 1, %v17057_v15 }
 0x310   : > { %17071 = vst [vmem:[#allocation6_spill] sm:$0xff] %v13960_v57  ;;  %v13963_v43 = vpop.f32.mrf.mxu1  ;;  %v2505_v26 = vadd.f32 %v2450_v33, %v17072_v41  ;;  %v3784_v23 = vsel %vm1293_vm6, %v3782_v45, %v17073_v16  ;;  %8407 = vperm.xlu1 %11291, %v8324_v2   ;;  %v8246_v57 = vunpack.c.l.b16 %v8206_v8  ;;  %v8209_v41 = vsel %vm8169_vm13, 65537, %v17057_v15 }
 0x311   : > { %v10489_v20 = vpop.f32.mrf.mxu0  ;;  %8416 = vperm.xlu0 %11280, %v8327_v32   ;;  %v8249_v19 = vunpack.c.l.b16 %v8209_v41  ;;  %v8208_v16 = vsel %vm8168_vm14, 65537, %v17057_v15  ;;  %v8130_v32 = vld [vmem:[%s16775_s2 + $0x6c] sm:$0xf] }
 0x312   : > { %v10706_v54 = vpop.f32.mrf.mxu1  ;;  %v13979_v33 = vadd.f32 %v13733_v14, %v2505_v26  ;;  %vm8286_vm15 = vcmp.ne.s32.totalorder %v8246_v57, 0  ;;  %v8131_v14 = vld [vmem:[%s16775_s2 + $0x70] sm:$0xf]  ;;  %v8248_v8 = vunpack.c.l.b16 %v8208_v16  ;;  %vm8170_vm10 = vcmp.gt.bf16.partialorder %v8130_v32, 0 }
 0x313   : > { %v2455_v45 = vpop.f32.mrf.mxu0  ;;  %10779 = vmatmul.mubr.msk.bf16.vlgmr.msra.gmra.mxu0 %vm707_vm3, %v3784_v23  ;;  %v8326_v23 = vsel %vm8286_vm15, 1, %v17057_v15  ;;  %vm8171_vm0 = vcmp.gt.bf16.partialorder %v8131_v14, 0  ;;  %vm8289_vm1 = vcmp.ne.s32.totalorder %v8249_v19, 0  ;;  %v8133_v19 = vld [vmem:[%s16775_s2 + $0x78] sm:$0xf] }
 0x314   : > { %v13984_v2 = vpop.f32.mrf.mxu1  ;;  %v2506_v26 = vadd.f32 %v2455_v45, %v13276_v42  ;;  %10782 = vmatprep.mubr.msk.bf16.mxu0 %vm11524_vm2, %v16866_v28  ;;  %8413 = vperm.xlu1 %11291, %v8326_v23   ;;  %v8211_v57 = vsel %vm8171_vm0, 65537, %v17057_v15  ;;  %v8329_v42 = vsel %vm8289_vm1, 1, %v17057_v15  ;;  %vm8288_vm9 = vcmp.ne.s32.totalorder %v8248_v8, 0  ;;  %v17074_v23 = vld [vmem:[#allocation26_spill] sm:$0xff] }
 0x315   : > { %v10492_v20 = vpop.f32.mrf.mxu0  ;;  %v8251_v41 = vunpack.c.l.b16 %v8211_v57  ;;  %8422 = vperm.xlu0 %11280, %v8329_v42   ;;  %v8328_v14 = vsel %vm8288_vm9, 1, %v17057_v15  ;;  %v8210_v8 = vsel %vm8170_vm10, 65537, %v17057_v15  ;;  %vm8173_vm12 = vcmp.gt.bf16.partialorder %v8133_v19, 0 }
 0x316   : > { %v10707_v54 = vpop.f32.mrf.mxu1  ;;  %v13999_v51 = vadd.f32 %v13745_v31, %v2506_v26  ;;  %v17075_v31 = vrot.slane %v13042_v29, 1  ;;  %v8250_v42 = vunpack.c.l.b16 %v8210_v8  ;;  %v8213_v29 = vsel %vm8173_vm12, 65537, %v17057_v15 }
 0x317   : > { %v2458_v45 = vpop.f32.mrf.mxu0  ;;  %vm8291_vm11 = vcmp.ne.s32.totalorder %v8251_v41, 0  ;;  %v8253_v19 = vunpack.c.l.b16 %v8213_v29 }
 0x318   : > { %v14002_v16 = vpop.f32.mrf.mxu1  ;;  %v2507_v20 = vadd.f32 %v2458_v45, %v17074_v23  ;;  %v3786_v26 = vsel %vm1293_vm6, %v17075_v31, %v16837_v59  ;;  %8419 = vperm.xlu1 %11291, %v8328_v14   ;;  %v8331_v32 = vsel %vm8291_vm11, 1, %v17057_v15  ;;  %v8132_v45 = vld [vmem:[%s16775_s2 + $0x74] sm:$0xf]  ;;  %v16838_v31 = vrot.slane %v13095_v25, 1 }
 0x319   : > { %v10493_v54 = vpop.f32.mrf.mxu0  ;;  %vm8172_vm13 = vcmp.gt.bf16.partialorder %v8132_v45, 0  ;;  %8428 = vperm.xlu0 %11280, %v8331_v32   ;;  %vm8290_vm14 = vcmp.ne.s32.totalorder %v8250_v42, 0  ;;  %vm8293_vm0 = vcmp.ne.s32.totalorder %v8253_v19, 0  ;;  %v8134_v42 = vld [vmem:[%s16775_s2 + $0x7c] sm:$0xf] }
 0x31a   : > { %v10710_v57 = vpop.f32.mrf.mxu1  ;;  %v14020_v23 = vadd.f32 %v13761_v35, %v2507_v20  ;;  %v8212_v8 = vsel %vm8172_vm13, 65537, %v17057_v15  ;;  %v8135_v35 = vld [vmem:[%s16775_s2 + $0x80] sm:$0xf]  ;;  %vm8174_vm9 = vcmp.gt.bf16.partialorder %v8134_v42, 0  ;;  %v8137_v19 = vld [vmem:[%s16775_s2 + $0x88] sm:$0xf] }
 0x31b   : > { %v3024_v41 = vpop.f32.mrf.mxu0  ;;  %10783 = vmatmul.mubr.msk.bf16.gmra.mxu0 %vm707_vm3, %v3786_v26  ;;  %v8330_v26 = vsel %vm8290_vm14, 1, %v17057_v15  ;;  %v8252_v54 = vunpack.c.l.b16 %v8212_v8  ;;  %vm8175_vm15 = vcmp.gt.bf16.partialorder %v8135_v35, 0  ;;  %vm8177_vm11 = vcmp.gt.bf16.partialorder %v8137_v19, 0 }
 0x31c   : > { %v14025_v14 = vpop.f32.mrf.mxu1  ;;  %v3207_v20 = vadd.f32 %v3024_v41, %v13302_v1  ;;  %10786 = vmatprep.mubr.msk.bf16.mxu0 %vm11524_vm2, %v16866_v28  ;;  %8425 = vperm.xlu1 %11291, %v8330_v26   ;;  %v8215_v32 = vsel %vm8175_vm15, 65537, %v17057_v15  ;;  %v8333_v1 = vsel %vm8293_vm0, 1, %v17057_v15  ;;  %v17076_v26 = vld [vmem:[#allocation21_spill] sm:$0xff] }
 0x31d   : > { %v10592_v57 = vpop.f32.mrf.mxu0  ;;  %vm8292_vm1 = vcmp.ne.s32.totalorder %v8252_v54, 0  ;;  %v8255_v41 = vunpack.c.l.b16 %v8215_v32  ;;  %8434 = vperm.xlu0 %11280, %v8333_v1   ;;  %v8214_v54 = vsel %vm8174_vm9, 65537, %v17057_v15 }
 0x31e   : > { %v10711_v45 = vpop.f32.mrf.mxu1  ;;  %v14040_v29 = vadd.f32 %v13778_v22, %v3207_v20  ;;  %v8332_v35 = vsel %vm8292_vm1, 1, %v17057_v15  ;;  %v17077_v22 = vrot.slane %v13069_v27, 1  ;;  %v8254_v1 = vunpack.c.l.b16 %v8214_v54 }
 0x31f   : > { %v3027_v59 = vpop.f32.mrf.mxu0  ;;  %vm8295_vm10 = vcmp.ne.s32.totalorder %v8255_v41, 0  ;;  %v8217_v27 = vsel %vm8177_vm11, 65537, %v17057_v15 }
 0x320   : > { %v14043_v8 = vpop.f32.mrf.mxu1  ;;  %v3208_v57 = vadd.f32 %v3027_v59, %v17076_v26  ;;  %v3788_v20 = vsel %vm1293_vm6, %v17077_v22, %v16838_v31  ;;  %8431 = vperm.xlu1 %11291, %v8332_v35   ;;  %v8335_v42 = vsel %vm8295_vm10, 1, %v17057_v15  ;;  %v8136_v59 = vld [vmem:[%s16775_s2 + $0x84] sm:$0xf]  ;;  %v3789_v22 = vrot.slane %v13121_v61, 1 }
 0x321   : > { %v10593_v45 = vpop.f32.mrf.mxu0  ;;  %vm8176_vm12 = vcmp.gt.bf16.partialorder %v8136_v59, 0  ;;  %8440 = vperm.xlu0 %11280, %v8335_v42   ;;  %vm8294_vm13 = vcmp.ne.s32.totalorder %v8254_v1, 0  ;;  %v8257_v19 = vunpack.c.l.b16 %v8217_v27  ;;  %v8138_v1 = vld [vmem:[%s16775_s2 + $0x8c] sm:$0xf]  ;;  %v3793_v61 = vrot.slane %v13175_v11, 1 }
 0x322   : > { %v10714_v32 = vpop.f32.mrf.mxu1  ;;  %v14061_v26 = vadd.f32 %v13796_v37, %v3208_v57  ;;  %v8216_v54 = vsel %vm8176_vm12, 65537, %v17057_v15  ;;  %v8139_v37 = vld [vmem:[%s16775_s2 + $0x90] sm:$0xf]  ;;  %vm8178_vm1 = vcmp.gt.bf16.partialorder %v8138_v1, 0 }
 0x323   : > { %v3032_v41 = vpop.f32.mrf.mxu0  ;;  %10787 = vmatmul.mubr.msk.bf16.gmra.mxu0 %vm707_vm3, %v3788_v20  ;;  %v8334_v20 = vsel %vm8294_vm13, 1, %v17057_v15  ;;  %v8256_v45 = vunpack.c.l.b16 %v8216_v54  ;;  %vm8179_vm14 = vcmp.gt.bf16.partialorder %v8139_v37, 0  ;;  %vm8297_vm15 = vcmp.ne.s32.totalorder %v8257_v19, 0  ;;  %v8141_v19 = vld [vmem:[%s16775_s2 + $0x98] sm:$0xf] }
 0x324   : > { %v14066_v35 = vpop.f32.mrf.mxu1  ;;  %v3209_v57 = vadd.f32 %v3032_v41, %v13328_v18  ;;  %10790 = vmatprep.mubr.msk.bf16.mxu0 %vm11524_vm2, %v16866_v28  ;;  %8437 = vperm.xlu1 %11291, %v8334_v20   ;;  %v8219_v42 = vsel %vm8179_vm14, 65537, %v17057_v15  ;;  %v8337_v18 = vsel %vm8297_vm15, 1, %v17057_v15  ;;  %v17078_v20 = vld [vmem:[#allocation22_spill] sm:$0xff]  ;;  %vm8181_vm10 = vcmp.gt.bf16.partialorder %v8141_v19, 0 }
 0x325   : > { %v10596_v32 = vpop.f32.mrf.mxu0  ;;  %vm8296_vm0 = vcmp.ne.s32.totalorder %v8256_v45, 0  ;;  %v8259_v41 = vunpack.c.l.b16 %v8219_v42  ;;  %8446 = vperm.xlu0 %11280, %v8337_v18   ;;  %v8218_v45 = vsel %vm8178_vm1, 65537, %v17057_v15 }
 0x326   : > { %v10715_v59 = vpop.f32.mrf.mxu1  ;;  %v14081_v27 = vadd.f32 %v13814_v44, %v3209_v57  ;;  %v8336_v37 = vsel %vm8296_vm0, 1, %v17057_v15  ;;  %v17079_v44 = vrot.slane %v13095_v25, 1  ;;  %v8258_v18 = vunpack.c.l.b16 %v8218_v45 }
 0x327   : > { %v3035_v31 = vpop.f32.mrf.mxu0  ;;  %vm8299_vm9 = vcmp.ne.s32.totalorder %v8259_v41, 0  ;;  %v8221_v25 = vsel %vm8181_vm10, 65537, %v17057_v15 }
 0x328   : > { %v14084_v54 = vpop.f32.mrf.mxu1  ;;  %v3210_v32 = vadd.f32 %v3035_v31, %v17078_v20  ;;  %v3790_v57 = vsel %vm1293_vm6, %v17079_v44, %v3789_v22  ;;  %8443 = vperm.xlu1 %11291, %v8336_v37   ;;  %v8339_v1 = vsel %vm8299_vm9, 1, %v17057_v15  ;;  %v8140_v31 = vld [vmem:[%s16775_s2 + $0x94] sm:$0xf]  ;;  %vm8298_vm12 = vcmp.ne.s32.totalorder %v8258_v18, 0 }
 0x329   : > { %v10597_v59 = vpop.f32.mrf.mxu0  ;;  %vm8180_vm11 = vcmp.gt.bf16.partialorder %v8140_v31, 0  ;;  %8452 = vperm.xlu0 %11280, %v8339_v1   ;;  %v8261_v37 = vunpack.c.l.b16 %v8221_v25 }
 0x32a   : > { %v10718_v42 = vpop.f32.mrf.mxu1  ;;  %v14102_v20 = vadd.f32 %v13832_v46, %v3210_v32  ;;  %v8220_v19 = vsel %vm8180_vm11, 65537, %v17057_v15  ;;  %v3791_v46 = vrot.slane %v13147_v50, 1  ;;  %v8338_v32 = vsel %vm8298_vm12, 1, %v17057_v15 }
 0x32b   : > { %v3040_v41 = vpop.f32.mrf.mxu0  ;;  %10791 = vmatmul.mubr.msk.bf16.gmra.mxu0 %vm707_vm3, %v3790_v57  ;;  %v8260_v59 = vunpack.c.l.b16 %v8220_v19  ;;  %vm8301_vm13 = vcmp.ne.s32.totalorder %v8261_v37, 0  ;;  %v8142_v57 = vld [vmem:[%s16775_s2 + $0x9c] sm:$0xf]  ;;  %v17080_v37 = vld [vmem:[#allocation23_spill] sm:$0xff] }
 0x32c   : > { %v14106_v44 = vpop.f32.mrf.mxu1  ;;  %v3211_v45 = vadd.f32 %v3040_v41, %v13354_v62  ;;  %10794 = vmatprep.mubr.msk.bf16.mxu0 %vm11524_vm2, %v16866_v28  ;;  %8449 = vperm.xlu1 %11291, %v8338_v32   ;;  %v8341_v62 = vsel %vm8301_vm13, 1, %v17057_v15  ;;  %vm8182_vm15 = vcmp.gt.bf16.partialorder %v8142_v57, 0  ;;  %v3792_v32 = vsel %vm1293_vm6, %v3789_v22, %v3791_v46 }
 0x32d   : > { %v10600_v42 = vpop.f32.mrf.mxu0  ;;  %vm8300_vm14 = vcmp.ne.s32.totalorder %v8260_v59, 0  ;;  %8458 = vperm.xlu0 %11280, %v8341_v62   ;;  %v8222_v41 = vsel %vm8182_vm15, 65537, %v17057_v15 }
 0x32e   : > { %v10719_v31 = vpop.f32.mrf.mxu1  ;;  %v14118_v1 = vadd.f32 %v13850_v48, %v3211_v45  ;;  %v8340_v25 = vsel %vm8300_vm14, 1, %v17057_v15  ;;  %v8262_v48 = vunpack.c.l.b16 %v8222_v41 }
 0x32f   : > { %v3043_v18 = vpop.f32.mrf.mxu0 }
 0x330   : > { %v14121_v50 = vpop.f32.mrf.mxu1  ;;  %v3212_v19 = vadd.f32 %v3043_v18, %v17080_v37  ;;  %8455 = vperm.xlu1 %11291, %v8340_v25   ;;  %vm8302_vm0 = vcmp.ne.s32.totalorder %v8262_v48, 0 }
 0x331   : > { %v10601_v45 = vpop.f32.mrf.mxu0  ;;  %v8342_v62 = vsel %vm8302_vm0, 1, %v17057_v15  ;;  %v3794_v15 = vsel %vm1293_vm6, %v3791_v46, %v3793_v61 }
 0x332   : > { %v10722_v42 = vpop.f32.mrf.mxu1  ;;  %v14130_v59 = vadd.f32 %v13868_v30, %v3212_v19  ;;  %v17081_v19 = vld [vmem:[#allocation24_spill] sm:$0xff] }
 0x333   : > { %v3048_v31 = vpop.f32.mrf.mxu0  ;;  %10795 = vmatmul.mubr.msk.bf16.gmra.mxu0 %vm707_vm3, %v3792_v32 }
 0x334   : > { %v14133_v57 = vpop.f32.mrf.mxu1  ;;  %v3213_v18 = vadd.f32 %v3048_v31, %v13380_v24  ;;  %10798 = vmatprep.mubr.msk.bf16.mxu0 %vm11524_vm2, %v16866_v28  ;;  %8461 = vperm.xlu1 %11291, %v8342_v62   ;;  %v3795_v31 = vrot.slane %v13205_v53, 1 }
 0x335   : > { %v10604_v22 = vpop.f32.mrf.mxu0 }
 0x336   : > { %v10723_v25 = vpop.f32.mrf.mxu1  ;;  %v14141_v30 = vadd.f32 %v13886_v9, %v3213_v18 }
 0x337   : > { %v3051_v41 = vpop.f32.mrf.mxu0  ;;  %v17082_v25 = vld [vmem:[#allocation51_spill] sm:$0xff] }
 0x338   : > { %v14143_v37 = vpop.f32.mrf.mxu1  ;;  %v3214_v32 = vadd.f32 %v3051_v41, %v17081_v19  ;;  %v3796_v19 = vsel %vm1293_vm6, %v3793_v61, %v3795_v31 }
 0x339   : > { %v10605_v48 = vpop.f32.mrf.mxu0 }
 0x33a   : > { %v10726_v24 = vpop.f32.mrf.mxu1  ;;  %v14148_v45 = vadd.f32 %v13907_v5, %v3214_v32 }
 0x33b   : > { %v3056_v42 = vpop.f32.mrf.mxu0  ;;  %10799 = vmatmul.mubr.msk.bf16.gmra.mxu0 %vm707_vm3, %v3794_v15  ;;  %v3797_v24 = vrot.slane %v13231_v17, 1 }
 0x33c   : > { %v14151_v11 = vpop.f32.mrf.mxu1  ;;  %v3215_v9 = vadd.f32 %v3056_v42, %v13406_v36  ;;  %10802 = vmatprep.mubr.msk.bf16.mxu0 %vm11524_vm2, %v16866_v28 }
 0x33d   : > { %v10608_v62 = vpop.f32.mrf.mxu0 }
 0x33e   : > { %v10727_v18 = vpop.f32.mrf.mxu1  ;;  %v14158_v46 = vadd.f32 %v13925_v58, %v3215_v9 }
 0x33f   : > { %v3059_v22 = vpop.f32.mrf.mxu0  ;;  %v17083_v18 = vld [vmem:[#allocation28_spill] sm:$0xff] }
 0x340   : > { %v14160_v5 = vpop.f32.mrf.mxu1  ;;  %v3216_v41 = vadd.f32 %v3059_v22, %v17082_v25  ;;  %v3798_v25 = vsel %vm1293_vm6, %v3795_v31, %v3797_v24 }
 0x341   : > { %v10609_v32 = vpop.f32.mrf.mxu0 }
 0x342   : > { %v10730_v15 = vpop.f32.mrf.mxu1  ;;  %v14165_v36 = vadd.f32 %v13945_v21, %v3216_v41 }
 0x343   : > { %v3064_v48 = vpop.f32.mrf.mxu0  ;;  %10803 = vmatmul.mubr.msk.bf16.gmra.mxu0 %vm707_vm3, %v3796_v19  ;;  %v17084_v15 = vld [vmem:[#allocation46_spill] sm:$0xff] }
 0x344   : > { %v14168_v53 = vpop.f32.mrf.mxu1  ;;  %v3217_v58 = vadd.f32 %v3064_v48, %v13432_v55  ;;  %10806 = vmatprep.mubr.msk.bf16.mxu0 %vm11524_vm2, %v16866_v28  ;;  %v3799_v48 = vrot.slane %v17084_v15, 1  ;;  %v17087_v15 = vld [vmem:[#allocation31_spill] sm:$0xff] }
 0x345   : > { %v10612_v42 = vpop.f32.mrf.mxu0 }
 0x346   : > { %v10731_v9 = vpop.f32.mrf.mxu1  ;;  %v14175_v61 = vadd.f32 %v13963_v43, %v3217_v58 }
 0x347   : > { %v3067_v62 = vpop.f32.mrf.mxu0 }
 0x348   : > { %v14177_v21 = vpop.f32.mrf.mxu1  ;;  %v3218_v22 = vadd.f32 %v3067_v62, %v17083_v18  ;;  %v17085_v62 = vld [vmem:[#allocation29_spill] sm:$0xff] }
 0x349   : > { %v10613_v41 = vpop.f32.mrf.mxu0 }
 0x34a   : > { %v10734_v19 = vpop.f32.mrf.mxu1  ;;  %v14182_v55 = vadd.f32 %v13984_v2, %v3218_v22  ;;  %v3800_v22 = vsel %vm1293_vm6, %v3797_v24, %v3799_v48 }
 0x34b   : > { %v3072_v32 = vpop.f32.mrf.mxu0  ;;  %10807 = vmatmul.mubr.msk.bf16.gmra.mxu0 %vm707_vm3, %v3798_v25 }
 0x34c   : > { %v14185_v17 = vpop.f32.mrf.mxu1  ;;  %v3219_v43 = vadd.f32 %v3072_v32, %v13458_v38  ;;  %10810 = vmatprep.mubr.msk.bf16.mxu0 %vm11524_vm2, %v16866_v28 }
 0x34d   : > { %v10616_v58 = vpop.f32.mrf.mxu0 }
 0x34e   : > { %v10735_v42 = vpop.f32.mrf.mxu1  ;;  %v14192_v31 = vadd.f32 %v14002_v16, %v3219_v43  ;;  %v17088_v43 = vld [vmem:[#allocation20_spill] sm:$0xff] }
 0x34f   : > { %v3075_v9 = vpop.f32.mrf.mxu0  ;;  %v3801_v58 = vrot.slane %v17088_v43, 1 }
 0x350   : > { %v14194_v2 = vpop.f32.mrf.mxu1  ;;  %v3220_v18 = vadd.f32 %v3075_v9, %v17085_v62 }
 0x351   : > { %v10617_v25 = vpop.f32.mrf.mxu0 }
 0x352   : > { %v10738_v41 = vpop.f32.mrf.mxu1  ;;  %v14199_v38 = vadd.f32 %v14025_v14, %v3220_v18  ;;  %v17090_v18 = vld [vmem:[#allocation33_spill] sm:$0xff] }
 0x353   : > { %v3080_v19 = vpop.f32.mrf.mxu0  ;;  %10811 = vmatmul.mubr.msk.bf16.gmra.mxu0 %vm707_vm3, %v3800_v22  ;;  %v3802_v22 = vsel %vm1293_vm6, %v3799_v48, %v3801_v58 }
 0x354   : > { %17086 = vst [vmem:[#allocation7_spill] sm:$0xff] %v14199_v38  ;;  %v14202_v32 = vpop.f32.mrf.mxu1  ;;  %v3221_v16 = vadd.f32 %v3080_v19, %v17087_v15  ;;  %10814 = vmatprep.mubr.msk.bf16.mxu0 %vm11524_vm2, %v16866_v28 }
 0x355   : > { %v10620_v42 = vpop.f32.mrf.mxu0 }
 0x356   : > { %v10739_v9 = vpop.f32.mrf.mxu1  ;;  %v14209_v24 = vadd.f32 %v14043_v8, %v3221_v16  ;;  %v17092_v42 = vld [vmem:[#allocation34_spill] sm:$0xff]  ;;  %v17093_v16 = vld [vmem:[#allocation49_spill] sm:$0xff] }
 0x357   : > { %v3083_v62 = vpop.f32.mrf.mxu0  ;;  %v3803_v9 = vrot.slane %v17093_v16, 1 }
 0x358   : > { %17089 = vst [vmem:[#allocation8_spill] sm:$0xff] %v14209_v24  ;;  %v14211_v14 = vpop.f32.mrf.mxu1  ;;  %v3222_v25 = vadd.f32 %v3083_v62, %v17090_v18 }
 0x359   : > { %v10621_v41 = vpop.f32.mrf.mxu0 }
 0x35a   : > { %v10742_v38 = vpop.f32.mrf.mxu1  ;;  %v14216_v19 = vadd.f32 %v14066_v35, %v3222_v25  ;;  %v17095_v25 = vld [vmem:[#allocation35_spill] sm:$0xff] }
 0x35b   : > { %v3088_v15 = vpop.f32.mrf.mxu0  ;;  %10815 = vmatmul.mubr.msk.bf16.gmra.mxu0 %vm707_vm3, %v3802_v22  ;;  %v3804_v22 = vsel %vm1293_vm6, %v3801_v58, %v3803_v9 }
 0x35c   : > { %17091 = vst [vmem:[#allocation32_spill] sm:$0xff] %v14216_v19  ;;  %v14219_v43 = vpop.f32.mrf.mxu1  ;;  %v3223_v8 = vadd.f32 %v3088_v15, %v17092_v42  ;;  %10818 = vmatprep.mubr.msk.bf16.mxu0 %vm11524_vm2, %v16866_v28 }
 0x35d   : > { %v10624_v62 = vpop.f32.mrf.mxu0 }
 0x35e   : > { %v10743_v18 = vpop.f32.mrf.mxu1  ;;  %v14226_v48 = vadd.f32 %v14084_v54, %v3223_v8  ;;  %v17097_v62 = vld [vmem:[#allocation36_spill] sm:$0xff]  ;;  %v17098_v8 = vld [vmem:[#allocation30_spill] sm:$0xff] }
 0x35f   : > { %v3091_v38 = vpop.f32.mrf.mxu0  ;;  %v3805_v18 = vrot.slane %v17098_v8, 1 }
 0x360   : > { %17094 = vst [vmem:[#allocation9_spill] sm:$0xff] %v14226_v48  ;;  %v14228_v35 = vpop.f32.mrf.mxu1  ;;  %v3224_v41 = vadd.f32 %v3091_v38, %v17095_v25 }
 0x361   : > { %v10625_v19 = vpop.f32.mrf.mxu0 }
 0x362   : > { %v10746_v24 = vpop.f32.mrf.mxu1  ;;  %v14233_v15 = vadd.f32 %v14106_v44, %v3224_v41  ;;  %v17100_v19 = vld [vmem:[#allocation38_spill] sm:$0xff] }
 0x363   : > { %v3096_v42 = vpop.f32.mrf.mxu0  ;;  %10819 = vmatmul.mubr.msk.bf16.gmra.mxu0 %vm707_vm3, %v3804_v22  ;;  %v3806_v22 = vsel %vm1293_vm6, %v3803_v9, %v3805_v18 }
 0x364   : > { %17096 = vst [vmem:[#allocation10_spill] sm:$0xff] %v14233_v15  ;;  %v14236_v16 = vpop.f32.mrf.mxu1  ;;  %v3225_v54 = vadd.f32 %v3096_v42, %v17097_v62  ;;  %10822 = vmatprep.mubr.msk.bf16.mxu0 %vm11524_vm2, %v16866_v28 }
 0x365   : > { %v10628_v38 = vpop.f32.mrf.mxu0 }
 0x366   : > { %v10747_v25 = vpop.f32.mrf.mxu1  ;;  %v14243_v58 = vadd.f32 %v14121_v50, %v3225_v54  ;;  %v17102_v38 = vld [vmem:[#allocation39_spill] sm:$0xff]  ;;  %v17103_v54 = vld [vmem:[#allocation50_spill] sm:$0xff] }
 0x367   : > { %v3099_v24 = vpop.f32.mrf.mxu0  ;;  %v3807_v25 = vrot.slane %v17103_v54, 1 }
 0x368   : > { %17099 = vst [vmem:[#allocation11_spill] sm:$0xff] %v14243_v58  ;;  %v14245_v44 = vpop.f32.mrf.mxu1  ;;  %v3226_v41 = vadd.f32 %v3099_v24, %v17100_v19 }
 0x369   : > { %v10629_v15 = vpop.f32.mrf.mxu0 }
 0x36a   : > { %v10750_v48 = vpop.f32.mrf.mxu1  ;;  %v14250_v42 = vadd.f32 %v14133_v57, %v3226_v41  ;;  %v17104_v15 = vld [vmem:[#allocation41_spill] sm:$0xff] }
 0x36b   : > { %v3104_v62 = vpop.f32.mrf.mxu0  ;;  %10823 = vmatmul.mubr.msk.bf16.gmra.mxu0 %vm707_vm3, %v3806_v22  ;;  %v3808_v22 = vsel %vm1293_vm6, %v3805_v18, %v3807_v25 }
 0x36c   : > { %17101 = vst [vmem:[#allocation12_spill] sm:$0xff] %v14250_v42  ;;  %v14253_v8 = vpop.f32.mrf.mxu1  ;;  %v3227_v50 = vadd.f32 %v3104_v62, %v17102_v38  ;;  %10826 = vmatprep.mubr.msk.bf16.mxu0 %vm11524_vm2, %v16866_v28 }
 0x36d   : > { %v10632_v24 = vpop.f32.mrf.mxu0 }
 0x36e   : > { %v10751_v19 = vpop.f32.mrf.mxu1  ;;  %v14260_v9 = vadd.f32 %v14143_v37, %v3227_v50  ;;  %v17106_v24 = vld [vmem:[#allocation42_spill] sm:$0xff]  ;;  %v3809_v50 = vrot.slane %v13390_v56, 1 }
 0x36f   : > { %v3107_v48 = vpop.f32.mrf.mxu0 }
 0x370   : > { %v14262_v57 = vpop.f32.mrf.mxu1  ;;  %v3228_v41 = vadd.f32 %v3107_v48, %v17104_v15 }
 0x371   : > { %v10633_v42 = vpop.f32.mrf.mxu0 }
 0x372   : > { %v10754_v58 = vpop.f32.mrf.mxu1  ;;  %v14267_v62 = vadd.f32 %v14151_v11, %v3228_v41  ;;  %v17108_v42 = vld [vmem:[#allocation44_spill] sm:$0xff]  ;;  %v3810_v41 = vsel %vm1293_vm6, %v3807_v25, %v3809_v50  ;;  %v3811_v25 = vrot.slane %v13416_v47, 1 }
 0x373   : > { %v3112_v38 = vpop.f32.mrf.mxu0  ;;  %10827 = vmatmul.mubr.msk.bf16.gmra.mxu0 %vm707_vm3, %v3808_v22  ;;  %v11443_v22 = vld [vmem:[%s16778_s5 + $0x18] sm:$0xff]  }
 0x374   : > { %17105 = vst [vmem:[#allocation37_spill] sm:$0xff] %v14267_v62  ;;  %v14270_v54 = vpop.f32.mrf.mxu1  ;;  %v3229_v37 = vadd.f32 %v3112_v38, %v17106_v24  ;;  %10830 = vmatprep.mubr.msk.bf16.mxu0 %vm11524_vm2, %v16866_v28  ;;  %10996 = vmatprep.subr.bf16.mxu0 %v11443_v22 }
 0x375   : > { %v10636_v19 = vpop.f32.mrf.mxu0  ;;  %10997 = vmatpush3.bf16.msra.mxu0 %v11443_v22  ;;  %v17112_v22 = vld [vmem:[#allocation27_spill] sm:$0xff] }
 0x376   : > { %v10755_v48 = vpop.f32.mrf.mxu1  ;;  %v14277_v18 = vadd.f32 %v14160_v5, %v3229_v37  ;;  %v17110_v37 = vld [vmem:[#allocation45_spill] sm:$0xff] }
 0x377   : > { %v3115_v58 = vpop.f32.mrf.mxu0 }
 0x378   : > { %17107 = vst [vmem:[#allocation13_spill] sm:$0xff] %v14277_v18  ;;  %v14279_v11 = vpop.f32.mrf.mxu1  ;;  %v3230_v15 = vadd.f32 %v3115_v58, %v17108_v42 }
 0x379   : > { %v10637_v38 = vpop.f32.mrf.mxu0 }
 0x37a   : > { %v10758_v24 = vpop.f32.mrf.mxu1  ;;  %v14287_v56 = vadd.f32 %v14168_v53, %v3230_v15 }
 0x37b   : > { %v3120_v19 = vpop.f32.mrf.mxu0  ;;  %10831 = vmatmul.mubr.msk.bf16.gmra.mxu0 %vm707_vm3, %v3810_v41  ;;  %v17111_v24 = vld [vmem:[#allocation47_spill] sm:$0xff] }
 0x37c   : > { %17109 = vst [vmem:[#allocation14_spill] sm:$0xff] %v14287_v56  ;;  %v14290_v5 = vpop.f32.mrf.mxu1  ;;  %v3231_v48 = vadd.f32 %v3120_v19, %v17110_v37  ;;  %10834 = vmatprep.mubr.msk.bf16.mxu0 %vm11524_vm2, %v16866_v28  ;;  %v3812_v56 = vsel %vm1293_vm6, %v3809_v50, %v3811_v25 }
 0x37d   : > { %v10640_v58 = vpop.f32.mrf.mxu0 }
 0x37e   : > { %v10759_v42 = vpop.f32.mrf.mxu1  ;;  %v14297_v38 = vadd.f32 %v14177_v21, %v3231_v48  ;;  %v3813_v48 = vrot.slane %v17112_v22, 1 }
 0x37f   : > { %v3123_v53 = vpop.f32.mrf.mxu0 }
 0x380   : > { %v14299_v15 = vpop.f32.mrf.mxu1  ;;  %v3232_v41 = vadd.f32 %v3123_v53, %v17111_v24  ;;  %v17113_v53 = vld [vmem:[#allocation48_spill] sm:$0xff] }
 0x381   : > { %v10641_v18 = vpop.f32.mrf.mxu0 }
 0x382   : > { %v10762_v19 = vpop.f32.mrf.mxu1  ;;  %v14304_v37 = vadd.f32 %v14185_v17, %v3232_v41 }
 0x383   : > { %v3128_v62 = vpop.f32.mrf.mxu0  ;;  %10835 = vmatmul.mubr.msk.bf16.gmra.mxu0 %vm707_vm3, %v3812_v56  ;;  %v3814_v56 = vsel %vm1293_vm6, %v3811_v25, %v3813_v48 }
 0x384   : > { %v14307_v47 = vpop.f32.mrf.mxu1  ;;  %v3233_v21 = vadd.f32 %v3128_v62, %v13681_v6  ;;  %10838 = vmatprep.mubr.msk.bf16.mxu0 %vm11524_vm2, %v16866_v28 }
 0x385   : > { %v10644_v58 = vpop.f32.mrf.mxu0 }
 0x386   : > { %v10763_v42 = vpop.f32.mrf.mxu1  ;;  %v14314_v50 = vadd.f32 %v14194_v2, %v3233_v21  ;;  %v17115_v58 = vld [vmem:[#allocation2_spill] sm:$0xff]  ;;  %v3815_v21 = vrot.slane %v13468_v12, 1 }
 0x387   : > { %v3131_v18 = vpop.f32.mrf.mxu0 }
 0x388   : > { %v14316_v17 = vpop.f32.mrf.mxu1  ;;  %v3234_v24 = vadd.f32 %v3131_v18, %v17113_v53 }
 0x389   : > { %v10645_v41 = vpop.f32.mrf.mxu0 }
 0x38a   : > { %v10766_v19 = vpop.f32.mrf.mxu1  ;;  %v14321_v6 = vadd.f32 %v14202_v32, %v3234_v24  ;;  %v17116_v24 = vld [vmem:[#allocation3_spill] sm:$0xff] }
 0x38b   : > { %v3136_v62 = vpop.f32.mrf.mxu0  ;;  %10839 = vmatmul.mubr.msk.bf16.gmra.mxu0 %vm707_vm3, %v3814_v56  ;;  %v3816_v56 = vsel %vm1293_vm6, %v3813_v48, %v3815_v21 }
 0x38c   : > { %17114 = vst [vmem:[#allocation40_spill] sm:$0xff] %v14321_v6  ;;  %v14324_v22 = vpop.f32.mrf.mxu1  ;;  %v3235_v2 = vadd.f32 %v3136_v62, %v17115_v58  ;;  %10842 = vmatprep.mubr.msk.bf16.mxu0 %vm11524_vm2, %v16866_v28 }
 0x38d   : > { %v10648_v42 = vpop.f32.mrf.mxu0 }
 0x38e   : > { %v10767_v18 = vpop.f32.mrf.mxu1  ;;  %v14331_v25 = vadd.f32 %v14211_v14, %v3235_v2  ;;  %v3817_v2 = vrot.slane %v13494_v60, 1 }
 0x38f   : > { %v3139_v53 = vpop.f32.mrf.mxu0 }
 0x390   : > { %v14333_v32 = vpop.f32.mrf.mxu1  ;;  %v3236_v41 = vadd.f32 %v3139_v53, %v17116_v24  ;;  %v3818_v24 = vsel %vm1293_vm6, %v3815_v21, %v3817_v2 }
 0x391   : > { %v10649_v19 = vpop.f32.mrf.mxu0 }
 0x392   : > { %v10770_v6 = vpop.f32.mrf.mxu1  ;;  %v14338_v62 = vadd.f32 %v14219_v43, %v3236_v41 }
 0x393   : > { %v3144_v58 = vpop.f32.mrf.mxu0  ;;  %10843 = vmatmul.mubr.msk.bf16.gmra.mxu0 %vm707_vm3, %v3816_v56 }
 0x394   : > { %v14341_v12 = vpop.f32.mrf.mxu1  ;;  %v3237_v14 = vadd.f32 %v3144_v58, %v13742_v0  ;;  %10846 = vmatprep.mubr.msk.bf16.mxu0 %vm11524_vm2, %v16866_v28  ;;  %v3819_v58 = vrot.slane %v13517_v4, 1  ;;  %v3821_v4 = vrot.slane %v17036_v3, 1  ;;  %v3823_v3 = vrot.slane %v13576_v52, 1  ;;  %v11495_v52 = vld [vmem:[%s11613_s16 + $0xc4] sm:$0xff]  }
 0x395   : > { %v10652_v42 = vpop.f32.mrf.mxu0 }
 0x396   : > { %v10771_v18 = vpop.f32.mrf.mxu1  ;;  %v14348_v48 = vadd.f32 %v14228_v35, %v3237_v14 }
 0x397   : > { %v3147_v6 = vpop.f32.mrf.mxu0  ;;  %v3820_v18 = vsel %vm1293_vm6, %v3817_v2, %v3819_v58 }
 0x398   : > { %v14350_v43 = vpop.f32.mrf.mxu1  ;;  %v3238_v53 = vadd.f32 %v3147_v6, %v13756_v39 }
 0x399   : > { %v10653_v41 = vpop.f32.mrf.mxu0 }
 0x39a   : > { %v10774_v56 = vpop.f32.mrf.mxu1  ;;  %v14355_v0 = vadd.f32 %v14236_v16, %v3238_v53 }
 0x39b   : > { %v3152_v19 = vpop.f32.mrf.mxu0  ;;  %10847 = vmatmul.mubr.msk.bf16.gmra.mxu0 %vm707_vm3, %v3818_v24 }
 0x39c   : > { %v14358_v60 = vpop.f32.mrf.mxu1  ;;  %v3239_v35 = vadd.f32 %v3152_v19, %v13775_v63  ;;  %10850 = vmatprep.mubr.msk.bf16.mxu0 %vm11524_vm2, %v16866_v28 }
 0x39d   : > { %v10656_v39 = vpop.f32.mrf.mxu0 }
 0x39e   : > { %v10775_v14 = vpop.f32.mrf.mxu1  ;;  %v14365_v21 = vadd.f32 %v14245_v44, %v3239_v35 }
 0x39f   : > { %v3155_v42 = vpop.f32.mrf.mxu0  ;;  %v17118_v14 = vld [vmem:[#allocation25_spill] sm:$0xff] }
 0x3a0   : > { %v3240_v16 = vadd.f32 %v3155_v42, %v13791_v10 }
 0x3a1   : > { %v10657_v6 = vpop.f32.mrf.mxu0 }
 0x3a2   : > { %v14370_v53 = vadd.f32 %v14253_v8, %v3240_v16  ;;  %v3822_v8 = vsel %vm1293_vm6, %v3819_v58, %v3821_v4 }
 0x3a3   : > { %v3160_v63 = vpop.f32.mrf.mxu0  ;;  %10851 = vmatmul.mubr.msk.bf16.gmra.mxu0 %vm707_vm3, %v3820_v18 }
 0x3a4   : > { %v3241_v24 = vadd.f32 %v3160_v63, %v13811_v13  ;;  %10854 = vmatprep.mubr.msk.bf16.mxu0 %vm11524_vm2, %v16866_v28  ;;  %v17117_v13 = vld [vmem:[#allocation4_spill] sm:$0xff] }
 0x3a5   : > { %v10660_v44 = vpop.f32.mrf.mxu0 }
 0x3a6   : > { %v14378_v41 = vadd.f32 %v14262_v57, %v3241_v24 }
 0x3a7   : > { %v3163_v10 = vpop.f32.mrf.mxu0 }
 0x3a8   : > { %v3242_v2 = vadd.f32 %v3163_v10, %v13827_v34 }
 0x3a9   : > { %v10661_v56 = vpop.f32.mrf.mxu0 }
 0x3aa   : > { %v14383_v19 = vadd.f32 %v14270_v54, %v3242_v2  ;;  %v3824_v54 = vsel %vm1293_vm6, %v3821_v4, %v3823_v3 }
 0x3ab   : > { %v3168_v35 = vpop.f32.mrf.mxu0  ;;  %10855 = vmatmul.mubr.msk.bf16.gmra.mxu0 %vm707_vm3, %v3822_v8 }
 0x3ac   : > { %v3243_v39 = vadd.f32 %v3168_v35, %v17117_v13  ;;  %10858 = vmatprep.mubr.msk.bf16.mxu0 %vm11524_vm2, %v16866_v28  ;;  %v11496_v13 = vld [vmem:[%s11613_s16 + $0xcc] ss:$0 sps:$4 sm:$0xff]  }
 0x3ad   : > { %v10664_v57 = vpop.f32.mrf.mxu0 }
 0x3ae   : > { %v14391_v34 = vadd.f32 %v14279_v11, %v3243_v39  ;;  %v3825_v11 = vrot.slane %v11495_v52, 1 }
 0x3af   : > { %v3171_v58 = vpop.f32.mrf.mxu0 }
 0x3b0   : > { %v3244_v42 = vadd.f32 %v3171_v58, %v17118_v14  ;;  %v14424_v58 = vld [vmem:[%s16778_s5] sm:$0xff]  }
 0x3b1   : > { %v10665_v16 = vpop.f32.mrf.mxu0  ;;  %10912 = vmatprep.subr.bf16.mxu1 %v14424_v58 }
 0x3b2   : > { %v14396_v18 = vadd.f32 %v14290_v5, %v3244_v42  ;;  %v3826_v5 = vsel %vm1293_vm6, %v3823_v3, %v3825_v11 }
 0x3b3   : > { %v3176_v6 = vpop.f32.mrf.mxu0  ;;  %10859 = vmatmul.mubr.msk.bf16.gmra.mxu0 %vm707_vm3, %v3824_v54 }
 0x3b4   : > { %v3245_v63 = vadd.f32 %v3176_v6, %v13883_v40  ;;  %10862 = vmatprep.mubr.msk.bf16.mxu0 %vm11524_vm2, %v16866_v28  ;;  %v17119_v40 = vld [vmem:[#allocation5_spill] sm:$0xff] }
 0x3b5   : > { %v10668_v24 = vpop.f32.mrf.mxu0 }
 0x3b6   : > { %v14404_v44 = vadd.f32 %v14299_v15, %v3245_v63  ;;  %v3827_v15 = vrot.slane %v11496_v13, 1 }
 0x3b7   : > { %v3179_v4 = vpop.f32.mrf.mxu0 }
 0x3b8   : > { %v3246_v10 = vadd.f32 %v3179_v4, %v13899_v7 }
 0x3b9   : > { %v10669_v2 = vpop.f32.mrf.mxu0 }
 0x3ba   : > { %v14409_v8 = vadd.f32 %v14307_v47, %v3246_v10  ;;  %v3828_v47 = vsel %vm1293_vm6, %v3825_v11, %v3827_v15  ;;  %v11283_v15 = vpop.permute.xlu0 %11282 }
 0x3bb   : > { %v3184_v56 = vpop.f32.mrf.mxu0  ;;  %10863 = vmatmul.mubr.msk.bf16.gmra.mxu0 %vm707_vm3, %v3826_v5 }
 0x3bc   : > { %v3247_v35 = vadd.f32 %v3184_v56, %v17119_v40  ;;  %10866 = vmatprep.mubr.msk.bf16.mxu0 %vm11524_vm2, %v16866_v28  ;;  %vm4827_vm2 = vcmask 130048  }
 0x3bd   : > { %v10672_v39 = vpop.f32.mrf.mxu0 }
 0x3be   : > { %v14417_v57 = vadd.f32 %v14316_v17, %v3247_v35  ;;  %v17120_v17 = vld [vmem:[#allocation6_spill] sm:$0xff]  ;;  %v11285_v39 = vunpack.i.h.bf16 %v11283_v15 }
 0x3bf   : > { %v3187_v7 = vpop.f32.mrf.mxu0 }
 0x3c0   : > { %v3248_v3 = vadd.f32 %v3187_v7, %v13938_v49  ;;  %v11284_v7 = vunpack.i.l.bf16 %v11283_v15 }
 0x3c1   : > { %v10673_v14 = vpop.f32.mrf.mxu0 }
 0x3c2   : > { %v14427_v42 = vadd.f32 %v14324_v22, %v3248_v3 }
 0x3c3   : > { %v3192_v28 = vpop.f32.mrf.mxu0  ;;  %10867 = vmatmul.mubr.msk.bf16.gmra.mxu0 %vm707_vm3, %v3828_v47 }
 0x3c4   : > { %v3249_v54 = vadd.f32 %v3192_v28, %v17120_v17 }
 0x3c5   : > { %v10676_v16 = vpop.f32.mrf.mxu0 }
 0x3c6   : > { %v14433_v49 = vadd.f32 %v14333_v32, %v3249_v54 }
 0x3c7   : > { %v3195_v6 = vpop.f32.mrf.mxu0 }
 0x3c8   : > { %v3250_v63 = vadd.f32 %v3195_v6, %v13979_v33  ;;  %v14450_v33 = vld [vmem:[%s16777_s4] ss:$0 sm:$0xff] }
 0x3c9   : > { %v10677_v52 = vpop.f32.mrf.mxu0 }
 0x3ca   : > { %v14437_v11 = vadd.f32 %v14341_v12, %v3250_v63  ;;  %v11288_v52 = vpop.permute.xlu0 %11287 }
 0x3cb   : > { %v3200_v22 = vpop.f32.mrf.mxu0 }
 0x3cc   : > { %v3251_v24 = vadd.f32 %v3200_v22, %v13999_v51 }
 0x3cd   : > { %v10680_v4 = vpop.f32.mrf.mxu0 }
 0x3ce   : > { %v14441_v10 = vadd.f32 %v14350_v43, %v3251_v24  ;;  %v11290_v24 = vunpack.i.h.bf16 %v11288_v52  ;;  %v11289_v4 = vunpack.i.l.bf16 %v11288_v52 }
 0x3cf   : > { %v3203_v5 = vpop.f32.mrf.mxu0 }
 0x3d0   : > { %v3252_v2 = vadd.f32 %v3203_v5, %v14020_v23 }
 0x3d1   : > { %v10681_v56 = vpop.f32.mrf.mxu0 }
 0x3d2   : > { %v14445_v32 = vadd.f32 %v14358_v60, %v3252_v2 }
 0x3d3   : > { %v3935_v40 = vpop.f32.mrf.mxu0 }
 0x3d4   : > { %v4118_v12 = vadd.f32 %v3935_v40, %v14040_v29 }
 0x3d5   : > { %v10780_v51 = vpop.f32.mrf.mxu0 }
 0x3d6   : > { %v4171_v35 = vadd.f32 %v14450_v33, %v4118_v12 }
 0x3d7   : > { %v3938_v43 = vpop.f32.mrf.mxu0 }
 0x3d8   : > { %v4119_v13 = vadd.f32 %v3938_v43, %v14061_v26  ;;  %v4217_v60 = vmax.f32 %v4171_v35, 0.0  ;;  %v11294_v35 = vpop.permute.xlu1 %11293 }
 0x3d9   : > { %v10781_v23 = vpop.f32.mrf.mxu0 }
 0x3da   : > { %v4172_v3 = vadd.f32 %v14450_v33, %v4119_v13  ;;  %v4585_v54 = vmul.f32 %v11284_v7, %v4217_v60  ;;  %v11296_v60 = vunpack.i.h.bf16 %v11294_v35 }
 0x3db   : > { %v3943_v47 = vpop.f32.mrf.mxu0 }
 0x3dc   : > { %v4218_v14 = vmax.f32 %v4172_v3, 0.0  ;;  %v4120_v28 = vadd.f32 %v3943_v47, %v14081_v27  ;;  %v11295_v3 = vunpack.i.l.bf16 %v11294_v35 }
 0x3dd   : > { %v10784_v17 = vpop.f32.mrf.mxu0 }
 0x3de   : > { %v4586_v29 = vmul.f32 %v11285_v39, %v4218_v14  ;;  %v4173_v16 = vadd.f32 %v14450_v33, %v4120_v28 }
 0x3df   : > { %v3946_v6 = vpop.f32.mrf.mxu0 }
 0x3e0   : > { %v14458_v63 = vpack.c.bf16 %v4586_v29, %v4585_v54  ;;  %v4121_v26 = vadd.f32 %v3946_v6, %v14102_v20  ;;  %v4219_v5 = vmax.f32 %v4173_v16, 0.0  ;;  %v11299_v6 = vpop.permute.xlu1 %11298 }
 0x3e1   : > { %v10785_v22 = vpop.f32.mrf.mxu0 }
 0x3e2   : > { %v4174_v2 = vadd.f32 %v14450_v33, %v4121_v26  ;;  %v4660_v27 = vshll.u32 %v14458_v63, 16  ;;  %v4587_v43 = vmul.f32 %v11289_v4, %v4219_v5  ;;  %v4658_v14 = vshrl.u32 %v14458_v63, 16 }
 0x3e3   : > { %v3951_v56 = vpop.f32.mrf.mxu0 }
 0x3e4   : > { %v4220_v40 = vmax.f32 %v4174_v2, 0.0  ;;  %v4122_v12 = vadd.f32 %v3951_v56, %v14118_v1  ;;  %v4662_v23 = vrot.slane %v4660_v27, 1 }
 0x3e5   : > { %v10788_v51 = vpop.f32.mrf.mxu0 }
 0x3e6   : > { %v4588_v13 = vmul.f32 %v11290_v24, %v4220_v40  ;;  %v4175_v15 = vadd.f32 %v14450_v33, %v4122_v12  ;;  %v4663_v16 = vor.u32 %v4662_v23, %v4658_v14  ;;  %v11300_v24 = vunpack.i.l.bf16 %v11299_v6 }
 0x3e7   : > { %v3954_v20 = vpop.f32.mrf.mxu0 }
 0x3e8   : > { %v14465_v39 = vpack.c.bf16 %v4588_v13, %v4587_v43  ;;  %v4123_v7 = vadd.f32 %v3954_v20, %v14130_v59  ;;  %v4221_v28 = vmax.f32 %v4175_v15, 0.0  ;;  %v11301_v13 = vunpack.i.h.bf16 %v11299_v6 }
 0x3e9   : > { %v10789_v47 = vpop.f32.mrf.mxu0 }
 0x3ea   : > { %v4176_v1 = vadd.f32 %v14450_v33, %v4123_v7  ;;  %v4665_v17 = vshll.u32 %v14465_v39, 16  ;;  %v4669_v54 = vshrl.u32 %v14465_v39, 16  ;;  %v4589_v2 = vmul.f32 %v11295_v3, %v4221_v28 }
 0x3eb   : > { %v3959_v29 = vpop.f32.mrf.mxu0  ;;  %v5691_v20 = vrot.slane %v14465_v39, 2 }
 0x3ec   : > { %v4222_v26 = vmax.f32 %v4176_v1, 0.0  ;;  %v4124_v52 = vadd.f32 %v3959_v29, %v14141_v30  ;;  %v4667_v59 = vrot.slane %v4665_v17, 1  ;;  %v14473_v22 = vrot.slane %v4669_v54, 2  ;;  %v11304_v29 = vpop.permute.xlu0 %11303 }
 0x3ed   : > { %v10792_v4 = vpop.f32.mrf.mxu0  ;;  %v14475_v5 = vrot.slane %v4665_v17, 3 }
 0x3ee   : > { %v4590_v56 = vmul.f32 %v11296_v60, %v4222_v26  ;;  %v4177_v27 = vadd.f32 %v14450_v33, %v4124_v52  ;;  %v4668_v40 = vsel %vm518_vm4, %v4663_v16, %v4667_v59  ;;  %v4671_v16 = vor.u32 %v4669_v54, %v4667_v59 }
 0x3ef   : > { %v3962_v12 = vpop.f32.mrf.mxu0  ;;  %10872 = vmatprep.mubr.msk.bf16.mxu1 %vm4827_vm2, %v4668_v40  ;;  %v6036_v51 = vor.u32 %v14475_v5, %v14473_v22  ;;  %v11306_v54 = vunpack.i.h.bf16 %v11304_v29 }
 0x3f0   : > { %v14482_v30 = vpack.c.bf16 %v4590_v56, %v4589_v2  ;;  %v4223_v35 = vmax.f32 %v4177_v27, 0.0  ;;  %v4125_v43 = vadd.f32 %v3962_v12, %v14148_v45 }
 0x3f1   : > { %v10793_v15 = vpop.f32.mrf.mxu0 }
 0x3f2   : > { %v4591_v23 = vmul.f32 %v11300_v24, %v4223_v35  ;;  %v4178_v7 = vadd.f32 %v14450_v33, %v4125_v43  ;;  %v5692_v60 = vrot.slane %v14482_v30, 2  ;;  %v4673_v3 = vshll.u32 %v14482_v30, 16 }
 0x3f3   : > { %v3967_v47 = vpop.f32.mrf.mxu0  ;;  %v4677_v14 = vshrl.u32 %v14482_v30, 16  ;;  %v11305_v24 = vunpack.i.l.bf16 %v11304_v29 }
 0x3f4   : > { %v14490_v28 = vpack.c.bf16 %v4591_v23, %v4590_v56  ;;  %v4224_v1 = vmax.f32 %v4178_v7, 0.0  ;;  %v4126_v17 = vadd.f32 %v3967_v47, %v14158_v46  ;;  %v5693_v45 = vsel %vm1682_vm5, %v5691_v20, %v5692_v60 }
 0x3f5   : > { %v10796_v6 = vpop.f32.mrf.mxu0  ;;  %10998 = vmatprep.mubr.msk.bf16.mxu0 %vm4827_vm2, %v5693_v45  ;;  %v4675_v26 = vrot.slane %v4673_v3, 1  ;;  %v6037_v52 = vrot.slane %v4677_v14, 2  ;;  %v6038_v40 = vrot.slane %v4673_v3, 3  ;;  %v11309_v45 = vpop.permute.xlu1 %11308 }
 0x3f6   : > { %v4592_v4 = vmul.f32 %v11301_v13, %v4224_v1  ;;  %v4179_v2 = vadd.f32 %v14450_v33, %v4126_v17 }
 0x3f7   : > { %v3970_v27 = vpop.f32.mrf.mxu0  ;;  %v4676_v56 = vsel %vm518_vm4, %v4671_v16, %v4675_v26  ;;  %v6039_v43 = vor.u32 %v6038_v40, %v6037_v52  ;;  %v4679_v29 = vor.u32 %v4677_v14, %v4675_v26  ;;  %v11311_v14 = vunpack.i.h.bf16 %v11309_v45 }
 0x3f8   : > { %v14497_v12 = vpack.c.bf16 %v4592_v4, %v4591_v23  ;;  %v4225_v46 = vmax.f32 %v4179_v2, 0.0  ;;  %v4127_v35 = vadd.f32 %v3970_v27, %v14165_v36  ;;  %10873 = vmatmul.mubr.msk.bf16.vlgmr.msra.gmra.mxu1 %vm4827_vm2, %v4676_v56 }
 0x3f9   : > { %v10797_v59 = vpop.f32.mrf.mxu0  ;;  %10913 = vmatpush3.bf16.msra.mxu1 %v14424_v58 }
 0x3fa   : > { %v4593_v15 = vmul.f32 %v11305_v24, %v4225_v46  ;;  %v4180_v13 = vadd.f32 %v14450_v33, %v4127_v35  ;;  %v5694_v20 = vrot.slane %v14497_v12, 2  ;;  %v4681_v7 = vshll.u32 %v14497_v12, 16 }
 0x3fb   : > { %v3975_v3 = vpop.f32.mrf.mxu0  ;;  %v4685_v23 = vshrl.u32 %v14497_v12, 16  ;;  %v11310_v24 = vunpack.i.l.bf16 %v11309_v45  ;;  %v14523_v35 = vsel %vm2067_vm7, %v6036_v51, %v6039_v43  ;;  %v11314_v51 = vpop.permute.xlu0 %11313 }
 0x3fc   : > { %v14506_v47 = vpack.c.bf16 %v4593_v15, %v4592_v4  ;;  %v4226_v36 = vmax.f32 %v4180_v13, 0.0  ;;  %v4128_v1 = vadd.f32 %v3975_v3, %v14175_v61  ;;  %v5695_v17 = vsel %vm1682_vm5, %v5692_v60, %v5694_v20  ;;  %17121 = vst [vmem:[#allocation15_spill] sm:$0xff] %v14523_v35 }
 0x3fd   : > { %v10800_v58 = vpop.f32.mrf.mxu0  ;;  %10999 = vmatmul.mubr.msk.bf16.vlgmr.msra.gmra.mxu0 %vm4827_vm2, %v5695_v17  ;;  %v4683_v16 = vrot.slane %v4681_v7, 1  ;;  %v6041_v6 = vrot.slane %v4685_v23, 2  ;;  %v6042_v52 = vrot.slane %v4681_v7, 3  ;;  %v11315_v45 = vunpack.i.l.bf16 %v11314_v51 }
 0x3fe   : > { %v4594_v2 = vmul.f32 %v11306_v54, %v4226_v36  ;;  %v4181_v27 = vadd.f32 %v14450_v33, %v4128_v1 }
 0x3ff   : > { %v3978_v56 = vpop.f32.mrf.mxu0  ;;  %v4684_v4 = vsel %vm518_vm4, %v4679_v29, %v4683_v16  ;;  %v14513_v40 = vor.u32 %v6042_v52, %v6041_v6  ;;  %v4687_v1 = vor.u32 %v4685_v23, %v4683_v16  ;;  %v11316_v23 = vunpack.i.h.bf16 %v11314_v51  ;;  %v11446_v51 = vld [vmem:[%s16778_s5 + $0x28] sm:$0xff]  }
 0x400   : > { %v14515_v61 = vpack.c.bf16 %v4594_v2, %v4593_v15  ;;  %v4227_v60 = vmax.f32 %v4181_v27, 0.0  ;;  %v4129_v46 = vadd.f32 %v3978_v56, %v14182_v55  ;;  %10876 = vmatprep.mubr.msk.bf16.mxu1 %vm4827_vm2, %v4684_v4  ;;  %v17123_v27 = vld [vmem:[#allocation7_spill] sm:$0xff]  ;;  %11080 = vmatprep.subr.bf16.mxu0 %v11446_v51 }
 0x401   : > { %v10801_v26 = vpop.f32.mrf.mxu0  ;;  %v14527_v54 = vsel %vm2067_vm7, %v6039_v43, %v14513_v40  ;;  %11081 = vmatpush3.bf16.msra.mxu0 %v11446_v51 }
 0x402   : > { %17122 = vst [vmem:[#allocation16_spill] sm:$0xff] %v14527_v54  ;;  %v4595_v59 = vmul.f32 %v11310_v24, %v4227_v60  ;;  %v4182_v15 = vadd.f32 %v14450_v33, %v4129_v46  ;;  %v5696_v13 = vrot.slane %v14515_v61, 2  ;;  %v4689_v55 = vshll.u32 %v14515_v61, 16 }
 0x403   : > { %v3983_v7 = vpop.f32.mrf.mxu0  ;;  %v4693_v24 = vshrl.u32 %v14515_v61, 16 }
 0x404   : > { %v14532_v3 = vpack.c.bf16 %v4595_v59, %v4594_v2  ;;  %v4228_v36 = vmax.f32 %v4182_v15, 0.0  ;;  %v4130_v22 = vadd.f32 %v3983_v7, %v14192_v31  ;;  %v5697_v5 = vsel %vm1682_vm5, %v5694_v20, %v5696_v13 }
 0x405   : > { %v10804_v17 = vpop.f32.mrf.mxu0  ;;  %11002 = vmatprep.mubr.msk.bf16.mxu0 %vm4827_vm2, %v5697_v5  ;;  %v4691_v43 = vrot.slane %v4689_v55, 1  ;;  %v6045_v26 = vrot.slane %v4693_v24, 2  ;;  %v6046_v15 = vrot.slane %v4689_v55, 3 }
 0x406   : > { %v4596_v58 = vmul.f32 %v11311_v14, %v4228_v36  ;;  %v4183_v29 = vadd.f32 %v14450_v33, %v4130_v22  ;;  %v17124_v36 = vld [vmem:[#allocation8_spill] sm:$0xff] }
 0x407   : > { %v3986_v6 = vpop.f32.mrf.mxu0  ;;  %v4692_v52 = vsel %vm518_vm4, %v4687_v1, %v4691_v43  ;;  %v11319_v1 = vpop.permute.xlu1 %11318 }
 0x408   : > { %v14540_v2 = vpack.c.bf16 %v4596_v58, %v4595_v59  ;;  %v4229_v31 = vmax.f32 %v4183_v29, 0.0  ;;  %v4131_v20 = vadd.f32 %v3986_v6, %v17123_v27  ;;  %10877 = vmatmul.mubr.msk.bf16.gmra.mxu1 %vm4827_vm2, %v4692_v52  ;;  %v11320_v55 = vunpack.i.l.bf16 %v11319_v1 }
 0x409   : > { %v10805_v16 = vpop.f32.mrf.mxu0  ;;  %v6047_v27 = vor.u32 %v6046_v15, %v6045_v26 }
 0x40a   : > { %v4597_v56 = vmul.f32 %v11315_v45, %v4229_v31  ;;  %v4184_v4 = vadd.f32 %v14450_v33, %v4131_v20  ;;  %v5698_v60 = vrot.slane %v14540_v2, 2  ;;  %v4697_v46 = vshll.u32 %v14540_v2, 16 }
 0x40b   : > { %v3991_v14 = vpop.f32.mrf.mxu0  ;;  %v4695_v45 = vor.u32 %v4693_v24, %v4691_v43  ;;  %v4701_v6 = vshrl.u32 %v14540_v2, 16  ;;  %v11321_v43 = vunpack.i.h.bf16 %v11319_v1 }
 0x40c   : > { %v14547_v7 = vpack.c.bf16 %v4597_v56, %v4596_v58  ;;  %v4230_v59 = vmax.f32 %v4184_v4, 0.0  ;;  %v4132_v22 = vadd.f32 %v3991_v14, %v17124_v36  ;;  %v5699_v5 = vsel %vm1682_vm5, %v5696_v13, %v5698_v60  ;;  %v17125_v4 = vld [vmem:[#allocation32_spill] sm:$0xff] }
 0x40d   : > { %v10808_v17 = vpop.f32.mrf.mxu0  ;;  %11003 = vmatmul.mubr.msk.bf16.gmra.mxu0 %vm4827_vm2, %v5699_v5  ;;  %v4699_v29 = vrot.slane %v4697_v46, 1  ;;  %v6050_v24 = vrot.slane %v4697_v46, 3 }
 0x40e   : > { %v4598_v58 = vmul.f32 %v11316_v23, %v4230_v59  ;;  %v4185_v52 = vadd.f32 %v14450_v33, %v4132_v22  ;;  %v14564_v23 = vsel %vm2067_vm7, %v14513_v40, %v6047_v27  ;;  %v6049_v59 = vrot.slane %v4701_v6, 2  ;;  %v14576_v40 = vld [vmem:[%s16778_s5 + $0x10] sm:$0xff]  }
 0x40f   : > { %v3994_v31 = vpop.f32.mrf.mxu0  ;;  %v4700_v13 = vsel %vm518_vm4, %v4695_v45, %v4699_v29  ;;  %17126 = vst [vmem:[#allocation43_spill] sm:$0xff] %v14564_v23  ;;  %v17128_v45 = vld [vmem:[#allocation9_spill] sm:$0xff]  ;;  %10954 = vmatprep.subr.bf16.mxu1 %v14576_v40 }
 0x410   : > { %v14558_v20 = vpack.c.bf16 %v4598_v58, %v4597_v56  ;;  %v4231_v16 = vmax.f32 %v4185_v52, 0.0  ;;  %v4133_v14 = vadd.f32 %v3994_v31, %v17125_v4  ;;  %10880 = vmatprep.mubr.msk.bf16.mxu1 %vm4827_vm2, %v4700_v13  ;;  %v4703_v52 = vor.u32 %v4701_v6, %v4699_v29 }
 0x411   : > { %v10809_v36 = vpop.f32.mrf.mxu0 }
 0x412   : > { %v4599_v22 = vmul.f32 %v11320_v55, %v4231_v16  ;;  %v4186_v5 = vadd.f32 %v14450_v33, %v4133_v14  ;;  %v5700_v26 = vrot.slane %v14558_v20, 2  ;;  %v4705_v56 = vshll.u32 %v14558_v20, 16  ;;  %v11324_v55 = vpop.permute.xlu0 %11323 }
 0x413   : > { %v3999_v15 = vpop.f32.mrf.mxu0  ;;  %v6051_v16 = vor.u32 %v6050_v24, %v6049_v59  ;;  %v11325_v4 = vunpack.i.l.bf16 %v11324_v55 }
 0x414   : > { %v14569_v51 = vpack.c.bf16 %v4599_v22, %v4598_v58  ;;  %v4232_v17 = vmax.f32 %v4186_v5, 0.0  ;;  %v4134_v1 = vadd.f32 %v3999_v15, %v17128_v45  ;;  %v5701_v46 = vsel %vm1682_vm5, %v5698_v60, %v5700_v26  ;;  %v17130_v45 = vld [vmem:[#allocation10_spill] sm:$0xff] }
 0x415   : > { %v10812_v31 = vpop.f32.mrf.mxu0  ;;  %11006 = vmatprep.mubr.msk.bf16.mxu0 %vm4827_vm2, %v5701_v46  ;;  %v4707_v13 = vrot.slane %v4705_v56, 1  ;;  %v4709_v5 = vshrl.u32 %v14558_v20, 16  ;;  %v14584_v15 = vsel %vm2067_vm7, %v6047_v27, %v6051_v16  ;;  %v6054_v27 = vrot.slane %v4705_v56, 3 }
 0x416   : > { %17127 = vst [vmem:[#allocation17_spill] sm:$0xff] %v14569_v51  ;;  %v4600_v58 = vmul.f32 %v11321_v43, %v4232_v17  ;;  %v4187_v14 = vadd.f32 %v14450_v33, %v4134_v1  ;;  %17129 = vst [vmem:[#allocation18_spill] sm:$0xff] %v14584_v15  ;;  %v11326_v43 = vunpack.i.h.bf16 %v11324_v55 }
 0x417   : > { %v4002_v36 = vpop.f32.mrf.mxu0  ;;  %v4708_v60 = vsel %vm518_vm4, %v4703_v52, %v4707_v13  ;;  %v6053_v23 = vrot.slane %v4709_v5, 2 }
 0x418   : > { %v14586_v29 = vpack.c.bf16 %v4600_v58, %v4599_v22  ;;  %v4233_v6 = vmax.f32 %v4187_v14, 0.0  ;;  %v4135_v46 = vadd.f32 %v4002_v36, %v17130_v45  ;;  %10881 = vmatmul.mubr.msk.bf16.gmra.mxu1 %vm4827_vm2, %v4708_v60  ;;  %v17132_v14 = vld [vmem:[#allocation11_spill] sm:$0xff]  ;;  %v11329_v60 = vpop.permute.xlu1 %11328 }
 0x419   : > { %v10813_v24 = vpop.f32.mrf.mxu0 }
 0x41a   : > { %v4601_v59 = vmul.f32 %v11325_v4, %v4233_v6  ;;  %v4188_v17 = vadd.f32 %v14450_v33, %v4135_v46  ;;  %v5702_v1 = vrot.slane %v14586_v29, 2  ;;  %v4713_v52 = vshll.u32 %v14586_v29, 16 }
 0x41b   : > { %v4007_v31 = vpop.f32.mrf.mxu0  ;;  %v4711_v4 = vor.u32 %v4709_v5, %v4707_v13  ;;  %v4717_v45 = vshrl.u32 %v14586_v29, 16  ;;  %v11330_v46 = vunpack.i.l.bf16 %v11329_v60 }
 0x41c   : > { %v14593_v15 = vpack.c.bf16 %v4601_v59, %v4600_v58  ;;  %v4234_v22 = vmax.f32 %v4188_v17, 0.0  ;;  %v4136_v54 = vadd.f32 %v4007_v31, %v17132_v14  ;;  %v5703_v36 = vsel %vm1682_vm5, %v5700_v26, %v5702_v1  ;;  %v17133_v26 = vld [vmem:[#allocation12_spill] sm:$0xff] }
 0x41d   : > { %v10816_v55 = vpop.f32.mrf.mxu0  ;;  %11007 = vmatmul.mubr.msk.bf16.gmra.mxu0 %vm4827_vm2, %v5703_v36  ;;  %v4715_v6 = vrot.slane %v4713_v52, 1  ;;  %v6055_v17 = vor.u32 %v6054_v27, %v6053_v23  ;;  %v11331_v36 = vunpack.i.h.bf16 %v11329_v60  ;;  %v6058_v13 = vrot.slane %v4713_v52, 3  ;;  %v11334_v60 = vpop.permute.xlu0 %11333 }
 0x41e   : > { %17131 = vst [vmem:[#allocation19_spill] sm:$0xff] %v14593_v15  ;;  %v4602_v24 = vmul.f32 %v11326_v43, %v4234_v22  ;;  %v4189_v35 = vadd.f32 %v14450_v33, %v4136_v54  ;;  %v6057_v43 = vrot.slane %v4717_v45, 2 }
 0x41f   : > { %v4010_v56 = vpop.f32.mrf.mxu0  ;;  %v4716_v58 = vsel %vm518_vm4, %v4711_v4, %v4715_v6  ;;  %v14606_v55 = vsel %vm2067_vm7, %v6051_v16, %v6055_v17 }
 0x420   : > { %v14601_v15 = vpack.c.bf16 %v4602_v24, %v4601_v59  ;;  %v4235_v31 = vmax.f32 %v4189_v35, 0.0  ;;  %v4137_v14 = vadd.f32 %v4010_v56, %v17133_v26  ;;  %10884 = vmatprep.mubr.msk.bf16.mxu1 %vm4827_vm2, %v4716_v58  ;;  %17134 = vst [vmem:[#allocation26_spill] sm:$0xff] %v14606_v55  ;;  %v4719_v58 = vor.u32 %v4717_v45, %v4715_v6  ;;  %v17137_v45 = vld [vmem:[#allocation37_spill] sm:$0xff] }
 0x421   : > { %v10817_v5 = vpop.f32.mrf.mxu0  ;;  %v11335_v26 = vunpack.i.l.bf16 %v11334_v60 }
 0x422   : > { %v4603_v22 = vmul.f32 %v11330_v46, %v4235_v31  ;;  %v4190_v54 = vadd.f32 %v14450_v33, %v4137_v14  ;;  %v5704_v4 = vrot.slane %v14601_v15, 2  ;;  %v4721_v23 = vshll.u32 %v14601_v15, 16 }
 0x423   : > { %v4015_v59 = vpop.f32.mrf.mxu0  ;;  %v6059_v31 = vor.u32 %v6058_v13, %v6057_v43 }
 0x424   : > { %v14611_v35 = vpack.c.bf16 %v4603_v22, %v4602_v24  ;;  %v4236_v27 = vmax.f32 %v4190_v54, 0.0  ;;  %v4138_v56 = vadd.f32 %v4015_v59, %v14260_v9  ;;  %v5705_v52 = vsel %vm1682_vm5, %v5702_v1, %v5704_v4 }
 0x425   : > { %v10820_v16 = vpop.f32.mrf.mxu0  ;;  %11010 = vmatprep.mubr.msk.bf16.mxu0 %vm4827_vm2, %v5705_v52  ;;  %v4723_v46 = vrot.slane %v4721_v23, 1  ;;  %v4725_v54 = vshrl.u32 %v14601_v15, 16  ;;  %v14620_v9 = vsel %vm2067_vm7, %v6055_v17, %v6059_v31  ;;  %v11336_v52 = vunpack.i.h.bf16 %v11334_v60 }
 0x426   : > { %17135 = vst [vmem:[#allocation21_spill] sm:$0xff] %v14611_v35  ;;  %v4604_v14 = vmul.f32 %v11331_v36, %v4236_v27  ;;  %v4191_v5 = vadd.f32 %v14450_v33, %v4138_v56  ;;  %17136 = vst [vmem:[#allocation22_spill] sm:$0xff] %v14620_v9  ;;  %v6062_v17 = vrot.slane %v4721_v23, 3 }
 0x427   : > { %v4018_v55 = vpop.f32.mrf.mxu0  ;;  %v4724_v24 = vsel %vm518_vm4, %v4719_v58, %v4723_v46  ;;  %v6061_v16 = vrot.slane %v4725_v54, 2 }
 0x428   : > { %v14622_v1 = vpack.c.bf16 %v4604_v14, %v4603_v22  ;;  %v4237_v6 = vmax.f32 %v4191_v5, 0.0  ;;  %v4139_v59 = vadd.f32 %v4018_v55, %v17137_v45  ;;  %10885 = vmatmul.mubr.msk.bf16.gmra.mxu1 %vm4827_vm2, %v4724_v24  ;;  %v17139_v5 = vld [vmem:[#allocation13_spill] sm:$0xff]  ;;  %v11339_v24 = vpop.permute.xlu1 %11338 }
 0x429   : > { %v10821_v13 = vpop.f32.mrf.mxu0 }
 0x42a   : > { %v4605_v43 = vmul.f32 %v11335_v26, %v4237_v6  ;;  %v4192_v36 = vadd.f32 %v14450_v33, %v4139_v59  ;;  %v5706_v27 = vrot.slane %v14622_v1, 2  ;;  %v4729_v56 = vshll.u32 %v14622_v1, 16 }
 0x42b   : > { %v4023_v58 = vpop.f32.mrf.mxu0  ;;  %v4727_v26 = vor.u32 %v4725_v54, %v4723_v46  ;;  %v4733_v59 = vshrl.u32 %v14622_v1, 16  ;;  %v11340_v13 = vunpack.i.l.bf16 %v11339_v24 }
 0x42c   : > { %v14629_v9 = vpack.c.bf16 %v4605_v43, %v4604_v14  ;;  %v4238_v22 = vmax.f32 %v4192_v36, 0.0  ;;  %v4140_v35 = vadd.f32 %v4023_v58, %v17139_v5  ;;  %v5707_v55 = vsel %vm1682_vm5, %v5704_v4, %v5706_v27  ;;  %v17140_v4 = vld [vmem:[#allocation14_spill] sm:$0xff] }
 0x42d   : > { %v10824_v45 = vpop.f32.mrf.mxu0  ;;  %11011 = vmatmul.mubr.msk.bf16.gmra.mxu0 %vm4827_vm2, %v5707_v55  ;;  %v4731_v6 = vrot.slane %v4729_v56, 1  ;;  %v6063_v36 = vor.u32 %v6062_v17, %v6061_v16  ;;  %v6066_v55 = vrot.slane %v4729_v56, 3 }
 0x42e   : > { %17138 = vst [vmem:[#allocation23_spill] sm:$0xff] %v14629_v9  ;;  %v4606_v60 = vmul.f32 %v11336_v52, %v4238_v22  ;;  %v4193_v51 = vadd.f32 %v14450_v33, %v4140_v35  ;;  %v6065_v45 = vrot.slane %v4733_v59, 2 }
 0x42f   : > { %v4026_v23 = vpop.f32.mrf.mxu0  ;;  %v4732_v14 = vsel %vm518_vm4, %v4727_v26, %v4731_v6  ;;  %v14642_v54 = vsel %vm2067_vm7, %v6059_v31, %v6063_v36 }
 0x430   : > { %v14637_v9 = vpack.c.bf16 %v4606_v60, %v4605_v43  ;;  %v4239_v58 = vmax.f32 %v4193_v51, 0.0  ;;  %v4141_v5 = vadd.f32 %v4026_v23, %v17140_v4  ;;  %10888 = vmatprep.mubr.msk.bf16.mxu1 %vm4827_vm2, %v4732_v14  ;;  %17141 = vst [vmem:[#allocation24_spill] sm:$0xff] %v14642_v54  ;;  %v11341_v43 = vunpack.i.h.bf16 %v11339_v24 }
 0x431   : > { %v10825_v46 = vpop.f32.mrf.mxu0  ;;  %v4735_v14 = vor.u32 %v4733_v59, %v4731_v6 }
 0x432   : > { %v4607_v52 = vmul.f32 %v11340_v13, %v4239_v58  ;;  %v4194_v35 = vadd.f32 %v14450_v33, %v4141_v5  ;;  %v5708_v22 = vrot.slane %v14637_v9, 2  ;;  %v4737_v16 = vshll.u32 %v14637_v9, 16  ;;  %v11344_v46 = vpop.permute.xlu0 %11343 }
 0x433   : > { %v4031_v17 = vpop.f32.mrf.mxu0  ;;  %v6067_v58 = vor.u32 %v6066_v55, %v6065_v45 }
 0x434   : > { %v14647_v51 = vpack.c.bf16 %v4607_v52, %v4606_v60  ;;  %v4240_v26 = vmax.f32 %v4194_v35, 0.0  ;;  %v4142_v23 = vadd.f32 %v4031_v17, %v14297_v38  ;;  %v5709_v56 = vsel %vm1682_vm5, %v5706_v27, %v5708_v22 }
 0x435   : > { %v10828_v31 = vpop.f32.mrf.mxu0  ;;  %11014 = vmatprep.mubr.msk.bf16.mxu0 %vm4827_vm2, %v5709_v56  ;;  %v4739_v13 = vrot.slane %v4737_v16, 1  ;;  %v4741_v60 = vshrl.u32 %v14637_v9, 16  ;;  %v14656_v35 = vsel %vm2067_vm7, %v6063_v36, %v6067_v58  ;;  %v11345_v38 = vunpack.i.l.bf16 %v11344_v46 }
 0x436   : > { %17142 = vst [vmem:[#allocation51_spill] sm:$0xff] %v14647_v51  ;;  %v4608_v4 = vmul.f32 %v11341_v43, %v4240_v26  ;;  %v4195_v5 = vadd.f32 %v14450_v33, %v4142_v23  ;;  %17143 = vst [vmem:[#allocation28_spill] sm:$0xff] %v14656_v35  ;;  %v11346_v23 = vunpack.i.h.bf16 %v11344_v46 }
 0x437   : > { %v4034_v54 = vpop.f32.mrf.mxu0  ;;  %v4740_v24 = vsel %vm518_vm4, %v4735_v14, %v4739_v13  ;;  %v6069_v36 = vrot.slane %v4741_v60, 2  ;;  %v6070_v14 = vrot.slane %v4737_v16, 3 }
 0x438   : > { %v14658_v27 = vpack.c.bf16 %v4608_v4, %v4607_v52  ;;  %v4241_v6 = vmax.f32 %v4195_v5, 0.0  ;;  %v4143_v59 = vadd.f32 %v4034_v54, %v14304_v37  ;;  %10889 = vmatmul.mubr.msk.bf16.gmra.mxu1 %vm4827_vm2, %v4740_v24  ;;  %v4743_v24 = vor.u32 %v4741_v60, %v4739_v13 }
 0x439   : > { %v10829_v55 = vpop.f32.mrf.mxu0 }
 0x43a   : > { %v4609_v45 = vmul.f32 %v11345_v38, %v4241_v6  ;;  %v4196_v43 = vadd.f32 %v14450_v33, %v4143_v59  ;;  %v5710_v17 = vrot.slane %v14658_v27, 2  ;;  %v4745_v26 = vshll.u32 %v14658_v27, 16  ;;  %v11349_v55 = vpop.permute.xlu1 %11348 }
 0x43b   : > { %v4039_v56 = vpop.f32.mrf.mxu0  ;;  %v4749_v6 = vshrl.u32 %v14658_v27, 16 }
 0x43c   : > { %v14665_v31 = vpack.c.bf16 %v4609_v45, %v4608_v4  ;;  %v4242_v52 = vmax.f32 %v4196_v43, 0.0  ;;  %v4144_v5 = vadd.f32 %v4039_v56, %v14314_v50  ;;  %v5711_v37 = vsel %vm1682_vm5, %v5708_v22, %v5710_v17  ;;  %v17145_v22 = vld [vmem:[#allocation40_spill] sm:$0xff] }
 0x43d   : > { %v10832_v54 = vpop.f32.mrf.mxu0  ;;  %11015 = vmatmul.mubr.msk.bf16.gmra.mxu0 %vm4827_vm2, %v5711_v37  ;;  %v4747_v38 = vrot.slane %v4745_v26, 1  ;;  %v6071_v4 = vor.u32 %v6070_v14, %v6069_v36  ;;  %v11350_v43 = vunpack.i.l.bf16 %v11349_v55  ;;  %v6074_v13 = vrot.slane %v4745_v26, 3 }
 0x43e   : > { %17144 = vst [vmem:[#allocation46_spill] sm:$0xff] %v14665_v31  ;;  %v4610_v59 = vmul.f32 %v11346_v23, %v4242_v52  ;;  %v4197_v46 = vadd.f32 %v14450_v33, %v4144_v5  ;;  %v6073_v23 = vrot.slane %v4749_v6, 2 }
 0x43f   : > { %v4042_v35 = vpop.f32.mrf.mxu0  ;;  %v4748_v16 = vsel %vm518_vm4, %v4743_v24, %v4747_v38  ;;  %v14678_v37 = vsel %vm2067_vm7, %v6067_v58, %v6071_v4 }
 0x440   : > { %v14673_v31 = vpack.c.bf16 %v4610_v59, %v4609_v45  ;;  %v4243_v50 = vmax.f32 %v4197_v46, 0.0  ;;  %v4145_v56 = vadd.f32 %v4042_v35, %v17145_v22  ;;  %10892 = vmatprep.mubr.msk.bf16.mxu1 %vm4827_vm2, %v4748_v16  ;;  %17146 = vst [vmem:[#allocation29_spill] sm:$0xff] %v14678_v37  ;;  %v11351_v45 = vunpack.i.h.bf16 %v11349_v55 }
 0x441   : > { %v10833_v60 = vpop.f32.mrf.mxu0  ;;  %v4751_v16 = vor.u32 %v4749_v6, %v4747_v38 }
 0x442   : > { %v4611_v52 = vmul.f32 %v11350_v43, %v4243_v50  ;;  %v4198_v5 = vadd.f32 %v14450_v33, %v4145_v56  ;;  %v5712_v54 = vrot.slane %v14673_v31, 2  ;;  %v4753_v36 = vshll.u32 %v14673_v31, 16  ;;  %v11354_v60 = vpop.permute.xlu0 %11353 }
 0x443   : > { %v4047_v14 = vpop.f32.mrf.mxu0  ;;  %v6075_v50 = vor.u32 %v6074_v13, %v6073_v23 }
 0x444   : > { %v14683_v24 = vpack.c.bf16 %v4611_v52, %v4610_v59  ;;  %v4244_v35 = vmax.f32 %v4198_v5, 0.0  ;;  %v4146_v46 = vadd.f32 %v4047_v14, %v14331_v25  ;;  %v5713_v26 = vsel %vm1682_vm5, %v5710_v17, %v5712_v54 }
 0x445   : > { %v10836_v58 = vpop.f32.mrf.mxu0  ;;  %11018 = vmatprep.mubr.msk.bf16.mxu0 %vm4827_vm2, %v5713_v26  ;;  %v4755_v43 = vrot.slane %v4753_v36, 1  ;;  %v4757_v59 = vshrl.u32 %v14673_v31, 16  ;;  %v14692_v5 = vsel %vm2067_vm7, %v6071_v4, %v6075_v50  ;;  %v11355_v25 = vunpack.i.l.bf16 %v11354_v60 }
 0x446   : > { %v4612_v22 = vmul.f32 %v11351_v45, %v4244_v35  ;;  %v4199_v56 = vadd.f32 %v14450_v33, %v4146_v46  ;;  %17147 = vst [vmem:[#allocation31_spill] sm:$0xff] %v14692_v5  ;;  %v11356_v46 = vunpack.i.h.bf16 %v11354_v60 }
 0x447   : > { %v4050_v37 = vpop.f32.mrf.mxu0  ;;  %v4756_v55 = vsel %vm518_vm4, %v4751_v16, %v4755_v43  ;;  %v6077_v4 = vrot.slane %v4757_v59, 2  ;;  %v6078_v16 = vrot.slane %v4753_v36, 3 }
 0x448   : > { %v14694_v17 = vpack.c.bf16 %v4612_v22, %v4611_v52  ;;  %v4245_v38 = vmax.f32 %v4199_v56, 0.0  ;;  %v4147_v6 = vadd.f32 %v4050_v37, %v14338_v62  ;;  %10893 = vmatmul.mubr.msk.bf16.gmra.mxu1 %vm4827_vm2, %v4756_v55  ;;  %v4759_v55 = vor.u32 %v4757_v59, %v4755_v43 }
 0x449   : > { %v10837_v13 = vpop.f32.mrf.mxu0 }
 0x44a   : > { %v4613_v23 = vmul.f32 %v11355_v25, %v4245_v38  ;;  %v4200_v45 = vadd.f32 %v14450_v33, %v4147_v6  ;;  %v5714_v14 = vrot.slane %v14694_v17, 2  ;;  %v4761_v35 = vshll.u32 %v14694_v17, 16  ;;  %v11359_v13 = vpop.permute.xlu1 %11358 }
 0x44b   : > { %v4055_v26 = vpop.f32.mrf.mxu0  ;;  %v4765_v38 = vshrl.u32 %v14694_v17, 16 }
 0x44c   : > { %v14701_v58 = vpack.c.bf16 %v4613_v23, %v4612_v22  ;;  %v4246_v52 = vmax.f32 %v4200_v45, 0.0  ;;  %v4148_v56 = vadd.f32 %v4055_v26, %v14348_v48  ;;  %v5715_v62 = vsel %vm1682_vm5, %v5712_v54, %v5714_v14 }
 0x44d   : > { %v10840_v37 = vpop.f32.mrf.mxu0  ;;  %11019 = vmatmul.mubr.msk.bf16.gmra.mxu0 %vm4827_vm2, %v5715_v62  ;;  %v4763_v25 = vrot.slane %v4761_v35, 1  ;;  %v6079_v22 = vor.u32 %v6078_v16, %v6077_v4  ;;  %v11360_v45 = vunpack.i.l.bf16 %v11359_v13  ;;  %v6082_v43 = vrot.slane %v4761_v35, 3 }
 0x44e   : > { %17148 = vst [vmem:[#allocation20_spill] sm:$0xff] %v14701_v58  ;;  %v4614_v6 = vmul.f32 %v11356_v46, %v4246_v52  ;;  %v4201_v60 = vadd.f32 %v14450_v33, %v4148_v56  ;;  %v6081_v46 = vrot.slane %v4765_v38, 2 }
 0x44f   : > { %v4058_v5 = vpop.f32.mrf.mxu0  ;;  %v4764_v36 = vsel %vm518_vm4, %v4759_v55, %v4763_v25  ;;  %v14714_v26 = vsel %vm2067_vm7, %v6075_v50, %v6079_v22  ;;  %v4767_v55 = vor.u32 %v4765_v38, %v4763_v25 }
 0x450   : > { %v14709_v58 = vpack.c.bf16 %v4614_v6, %v4613_v23  ;;  %v4247_v48 = vmax.f32 %v4201_v60, 0.0  ;;  %v4149_v54 = vadd.f32 %v4058_v5, %v14355_v0  ;;  %10896 = vmatprep.mubr.msk.bf16.mxu1 %vm4827_vm2, %v4764_v36  ;;  %17149 = vst [vmem:[#allocation33_spill] sm:$0xff] %v14714_v26  ;;  %v11361_v23 = vunpack.i.h.bf16 %v11359_v13 }
 0x451   : > { %v10841_v59 = vpop.f32.mrf.mxu0  ;;  %v6083_v36 = vor.u32 %v6082_v43, %v6081_v46 }
 0x452   : > { %v4615_v52 = vmul.f32 %v11360_v45, %v4247_v48  ;;  %v4202_v56 = vadd.f32 %v14450_v33, %v4149_v54  ;;  %v5716_v62 = vrot.slane %v14709_v58, 2  ;;  %v4769_v4 = vshll.u32 %v14709_v58, 16  ;;  %v11364_v54 = vpop.permute.xlu0 %11363 }
 0x453   : > { %v4063_v16 = vpop.f32.mrf.mxu0 }
 0x454   : > { %v14719_v37 = vpack.c.bf16 %v4615_v52, %v4614_v6  ;;  %v4248_v0 = vmax.f32 %v4202_v56, 0.0  ;;  %v4150_v5 = vadd.f32 %v4063_v16, %v14365_v21  ;;  %v5717_v35 = vsel %vm1682_vm5, %v5714_v14, %v5716_v62 }
 0x455   : > { %v10844_v50 = vpop.f32.mrf.mxu0  ;;  %11022 = vmatprep.mubr.msk.bf16.mxu0 %vm4827_vm2, %v5717_v35  ;;  %v4771_v60 = vrot.slane %v4769_v4, 1  ;;  %v4773_v6 = vshrl.u32 %v14709_v58, 16  ;;  %v14728_v56 = vsel %vm2067_vm7, %v6079_v22, %v6083_v36  ;;  %v11365_v21 = vunpack.i.l.bf16 %v11364_v54 }
 0x456   : > { %v4616_v45 = vmul.f32 %v11361_v23, %v4248_v0  ;;  %v4203_v48 = vadd.f32 %v14450_v33, %v4150_v5  ;;  %17150 = vst [vmem:[#allocation34_spill] sm:$0xff] %v14728_v56  ;;  %v11366_v5 = vunpack.i.h.bf16 %v11364_v54 }
 0x457   : > { %v4066_v59 = vpop.f32.mrf.mxu0  ;;  %v4772_v13 = vsel %vm518_vm4, %v4767_v55, %v4771_v60  ;;  %v6085_v22 = vrot.slane %v4773_v6, 2  ;;  %v6086_v55 = vrot.slane %v4769_v4, 3  ;;  %v14747_v4 = vld [vmem:[%s16778_s5 + $0x38] sm:$0xff]  }
 0x458   : > { %v14730_v14 = vpack.c.bf16 %v4616_v45, %v4615_v52  ;;  %v4249_v25 = vmax.f32 %v4203_v48, 0.0  ;;  %v4151_v38 = vadd.f32 %v4066_v59, %v14370_v53  ;;  %10897 = vmatmul.mubr.msk.bf16.gmra.mxu1 %vm4827_vm2, %v4772_v13  ;;  %v4775_v13 = vor.u32 %v4773_v6, %v4771_v60  ;;  %11164 = vmatprep.subr.bf16.mxu0 %v14747_v4 }
 0x459   : > { %v10845_v43 = vpop.f32.mrf.mxu0 }
 0x45a   : > { %v4617_v46 = vmul.f32 %v11365_v21, %v4249_v25  ;;  %v4204_v23 = vadd.f32 %v14450_v33, %v4151_v38  ;;  %v5718_v16 = vrot.slane %v14730_v14, 2  ;;  %v4777_v0 = vshll.u32 %v14730_v14, 16 }
 0x45b   : > { %v4071_v35 = vpop.f32.mrf.mxu0  ;;  %v4781_v25 = vshrl.u32 %v14730_v14, 16 }
 0x45c   : > { %v14737_v50 = vpack.c.bf16 %v4617_v46, %v4616_v45  ;;  %v4250_v52 = vmax.f32 %v4204_v23, 0.0  ;;  %v4152_v48 = vadd.f32 %v4071_v35, %v14378_v41  ;;  %v5719_v53 = vsel %vm1682_vm5, %v5716_v62, %v5718_v16  ;;  %v11369_v45 = vpop.permute.xlu1 %11368 }
 0x45d   : > { %v10848_v59 = vpop.f32.mrf.mxu0  ;;  %11023 = vmatmul.mubr.msk.bf16.gmra.mxu0 %vm4827_vm2, %v5719_v53  ;;  %v4779_v21 = vrot.slane %v4777_v0, 1  ;;  %v6087_v62 = vor.u32 %v6086_v55, %v6085_v22  ;;  %v11370_v23 = vunpack.i.l.bf16 %v11369_v45  ;;  %v6089_v53 = vrot.slane %v4781_v25, 2 }
 0x45e   : > { %v4618_v38 = vmul.f32 %v11366_v5, %v4250_v52  ;;  %v4205_v54 = vadd.f32 %v14450_v33, %v4152_v48  ;;  %v6090_v5 = vrot.slane %v4777_v0, 3  ;;  %v11371_v55 = vunpack.i.h.bf16 %v11369_v45  ;;  %v11374_v45 = vpop.permute.xlu0 %11373 }
 0x45f   : > { %v4074_v43 = vpop.f32.mrf.mxu0  ;;  %v4780_v41 = vsel %vm518_vm4, %v4775_v13, %v4779_v21  ;;  %v14756_v48 = vsel %vm2067_vm7, %v6083_v36, %v6087_v62 }
 0x460   : > { %v14750_v35 = vpack.c.bf16 %v4618_v38, %v4617_v46  ;;  %v4251_v60 = vmax.f32 %v4205_v54, 0.0  ;;  %v4153_v6 = vadd.f32 %v4074_v43, %v14383_v19  ;;  %10900 = vmatprep.mubr.msk.bf16.mxu1 %vm4827_vm2, %v4780_v41  ;;  %17151 = vst [vmem:[#allocation49_spill] sm:$0xff] %v14756_v48 }
 0x461   : > { %v10849_v52 = vpop.f32.mrf.mxu0 }
 0x462   : > { %v4619_v59 = vmul.f32 %v11370_v23, %v4251_v60  ;;  %v4206_v13 = vadd.f32 %v14450_v33, %v4153_v6  ;;  %v5720_v22 = vrot.slane %v14750_v35, 2  ;;  %v4785_v46 = vshll.u32 %v14750_v35, 16  ;;  %v14769_v6 = vld [vmem:[%s16777_s4] ss:$0 sm:$0xff] }
 0x463   : > { %v4079_v54 = vpop.f32.mrf.mxu0  ;;  %v4783_v52 = vor.u32 %v4781_v25, %v4779_v21  ;;  %v6091_v60 = vor.u32 %v6090_v5, %v6089_v53  ;;  %v11375_v25 = vunpack.i.l.bf16 %v11374_v45 }
 0x464   : > { %v14761_v19 = vpack.c.bf16 %v4619_v59, %v4618_v38  ;;  %v4252_v43 = vmax.f32 %v4206_v13, 0.0  ;;  %v4154_v41 = vadd.f32 %v4079_v54, %v14391_v34  ;;  %v5721_v0 = vsel %vm1682_vm5, %v5718_v16, %v5720_v22 }
 0x465   : > { %v10852_v36 = vpop.f32.mrf.mxu0  ;;  %11026 = vmatprep.mubr.msk.bf16.mxu0 %vm4827_vm2, %v5721_v0  ;;  %v4787_v23 = vrot.slane %v4785_v46, 1  ;;  %v4789_v16 = vshrl.u32 %v14750_v35, 16  ;;  %v14775_v21 = vsel %vm2067_vm7, %v6087_v62, %v6091_v60 }
 0x466   : > { %v4620_v33 = vmul.f32 %v11371_v55, %v4252_v43  ;;  %v4207_v38 = vadd.f32 %v14769_v6, %v4154_v41  ;;  %17152 = vst [vmem:[#allocation35_spill] sm:$0xff] %v14775_v21  ;;  %v11376_v36 = vunpack.i.h.bf16 %v11374_v45  ;;  %v6094_v21 = vrot.slane %v4785_v46, 3 }
 0x467   : > { %v4082_v13 = vpop.f32.mrf.mxu0  ;;  %v4788_v34 = vsel %vm518_vm4, %v4783_v52, %v4787_v23  ;;  %v6093_v62 = vrot.slane %v4789_v16, 2 }
 0x468   : > { %v14777_v54 = vpack.c.bf16 %v4620_v33, %v4619_v59  ;;  %v4253_v5 = vmax.f32 %v4207_v38, 0.0  ;;  %v4155_v53 = vadd.f32 %v4082_v13, %v14396_v18  ;;  %10901 = vmatmul.mubr.msk.bf16.gmra.mxu1 %vm4827_vm2, %v4788_v34  ;;  %v4791_v34 = vor.u32 %v4789_v16, %v4787_v23 }
 0x469   : > { %v10853_v55 = vpop.f32.mrf.mxu0 }
 0x46a   : > { %v4621_v43 = vmul.f32 %v11375_v25, %v4253_v5  ;;  %v4208_v41 = vadd.f32 %v14769_v6, %v4155_v53  ;;  %v5722_v0 = vrot.slane %v14777_v54, 2  ;;  %v4793_v52 = vshll.u32 %v14777_v54, 16  ;;  %v11379_v55 = vpop.permute.xlu1 %11378 }
 0x46b   : > { %v4087_v48 = vpop.f32.mrf.mxu0  ;;  %v4797_v5 = vshrl.u32 %v14777_v54, 16 }
 0x46c   : > { %v14784_v56 = vpack.c.bf16 %v4621_v43, %v4620_v33  ;;  %v4254_v59 = vmax.f32 %v4208_v41, 0.0  ;;  %v4156_v38 = vadd.f32 %v4087_v48, %v14404_v44  ;;  %v5723_v18 = vsel %vm1682_vm5, %v5720_v22, %v5722_v0 }
 0x46d   : > { %v10856_v13 = vpop.f32.mrf.mxu0  ;;  %11027 = vmatmul.mubr.msk.bf16.gmra.mxu0 %vm4827_vm2, %v5723_v18  ;;  %v4795_v25 = vrot.slane %v4793_v52, 1  ;;  %v6095_v33 = vor.u32 %v6094_v21, %v6093_v62  ;;  %v11380_v41 = vunpack.i.l.bf16 %v11379_v55  ;;  %v6098_v22 = vrot.slane %v4793_v52, 3 }
 0x46e   : > { %17153 = vst [vmem:[#allocation36_spill] sm:$0xff] %v14784_v56  ;;  %v4622_v53 = vmul.f32 %v11376_v36, %v4254_v59  ;;  %v4209_v45 = vadd.f32 %v14769_v6, %v4156_v38  ;;  %v6097_v36 = vrot.slane %v4797_v5, 2 }
 0x46f   : > { %v4090_v26 = vpop.f32.mrf.mxu0  ;;  %v4796_v46 = vsel %vm518_vm4, %v4791_v34, %v4795_v25  ;;  %v14797_v16 = vsel %vm2067_vm7, %v6091_v60, %v6095_v33  ;;  %v4799_v34 = vor.u32 %v4797_v5, %v4795_v25 }
 0x470   : > { %v14792_v56 = vpack.c.bf16 %v4622_v53, %v4621_v43  ;;  %v4255_v44 = vmax.f32 %v4209_v45, 0.0  ;;  %v4157_v48 = vadd.f32 %v4090_v26, %v14409_v8  ;;  %10904 = vmatprep.mubr.msk.bf16.mxu1 %vm4827_vm2, %v4796_v46  ;;  %17154 = vst [vmem:[#allocation30_spill] sm:$0xff] %v14797_v16  ;;  %v11381_v43 = vunpack.i.h.bf16 %v11379_v55 }
 0x471   : > { %v10857_v23 = vpop.f32.mrf.mxu0  ;;  %v14807_v46 = vor.u32 %v6098_v22, %v6097_v36  ;;  %v4558_v22 = vpop.permute.xlu0 %4557 }
 0x472   : > { %v4623_v59 = vmul.f32 %v11380_v41, %v4255_v44  ;;  %v4210_v38 = vadd.f32 %v14769_v6, %v4157_v48  ;;  %v5724_v18 = vrot.slane %v14792_v56, 2  ;;  %v4801_v21 = vshll.u32 %v14792_v56, 16  ;;  %v11384_v36 = vpop.permute.xlu1 %11383 }
 0x473   : > { %v4095_v62 = vpop.f32.mrf.mxu0 }
 0x474   : > { %v14802_v13 = vpack.c.bf16 %v4623_v59, %v4622_v53  ;;  %v4256_v8 = vmax.f32 %v4210_v38, 0.0  ;;  %v4158_v26 = vadd.f32 %v4095_v62, %v14417_v57  ;;  %v5725_v52 = vsel %vm1682_vm5, %v5722_v0, %v5724_v18 }
 0x475   : > { %v10860_v60 = vpop.f32.mrf.mxu0  ;;  %11030 = vmatprep.mubr.msk.bf16.mxu0 %vm4827_vm2, %v5725_v52  ;;  %v4803_v45 = vrot.slane %v4801_v21, 1  ;;  %v4805_v53 = vshrl.u32 %v14792_v56, 16  ;;  %v14814_v57 = vsel %vm2067_vm7, %v6095_v33, %v14807_v46 }
 0x476   : > { %v4624_v41 = vmul.f32 %v11381_v43, %v4256_v8  ;;  %v4211_v44 = vadd.f32 %v14769_v6, %v4158_v26  ;;  %17155 = vst [vmem:[#allocation38_spill] sm:$0xff] %v14814_v57  ;;  %v11385_v26 = vunpack.i.l.bf16 %v11384_v36 }
 0x477   : > { %v4098_v48 = vpop.f32.mrf.mxu0  ;;  %v4804_v55 = vsel %vm518_vm4, %v4799_v34, %v4803_v45  ;;  %v4807_v52 = vor.u32 %v4805_v53, %v4803_v45 }
 0x478   : > { %v14816_v0 = vpack.c.bf16 %v4624_v41, %v4623_v59  ;;  %v4257_v25 = vmax.f32 %v4211_v44, 0.0  ;;  %v4159_v5 = vadd.f32 %v4098_v48, %v14427_v42  ;;  %10905 = vmatmul.mubr.msk.bf16.gmra.mxu1 %vm4827_vm2, %v4804_v55  ;;  %v6101_v59 = vrot.slane %v4805_v53, 2 }
 0x479   : > { %v10861_v23 = vpop.f32.mrf.mxu0  ;;  %v11386_v53 = vunpack.i.h.bf16 %v11384_v36 }
 0x47a   : > { %v4625_v38 = vmul.f32 %v4558_v22, %v4257_v25  ;;  %v4212_v43 = vadd.f32 %v14769_v6, %v4159_v5  ;;  %v5726_v62 = vrot.slane %v14816_v0, 2  ;;  %v4809_v8 = vshll.u32 %v14816_v0, 16 }
 0x47b   : > { %v4103_v33 = vpop.f32.mrf.mxu0  ;;  %v4813_v5 = vshrl.u32 %v14816_v0, 16  ;;  %v6102_v22 = vrot.slane %v4801_v21, 3 }
 0x47c   : > { %v14823_v34 = vpack.c.bf16 %v4625_v38, %v4625_v38  ;;  %v14825_v60 = vpack.c.bf16 %v4625_v38, %v4624_v41  ;;  %v4258_v42 = vmax.f32 %v4212_v43, 0.0  ;;  %v4160_v44 = vadd.f32 %v4103_v33, %v14433_v49 }
 0x47d   : > { %v10864_v48 = vpop.f32.mrf.mxu0  ;;  %v5727_v55 = vsel %vm1682_vm5, %v5724_v18, %v5726_v62  ;;  %v4811_v25 = vrot.slane %v4809_v8, 1 }
 0x47e   : > { %17156 = vst [vmem:[#allocation39_spill] sm:$0xff] %v14823_v34  ;;  %v4626_v23 = vmul.f32 %v11385_v26, %v4258_v42  ;;  %v4213_v57 = vadd.f32 %v14769_v6, %v4160_v44  ;;  %11031 = vmatmul.mubr.msk.bf16.gmra.mxu0 %vm4827_vm2, %v5727_v55  ;;  %v4817_v45 = vshll.u32 %v14823_v34, 16  ;;  %v6103_v42 = vor.u32 %v6102_v22, %v6101_v59  ;;  %v11389_v44 = vpop.permute.xlu0 %11388 }
 0x47f   : > { %v4106_v41 = vpop.f32.mrf.mxu0  ;;  %v4812_v43 = vsel %vm518_vm4, %v4807_v52, %v4811_v25  ;;  %v4815_v16 = vor.u32 %v4813_v5, %v4811_v25  ;;  %v11391_v52 = vunpack.i.h.bf16 %v11389_v44  ;;  %v6106_v25 = vrot.slane %v4809_v8, 3 }
 0x480   : > { %v14834_v49 = vpack.c.bf16 %v4626_v23, %v4625_v38  ;;  %v4259_v33 = vmax.f32 %v4213_v57, 0.0  ;;  %v4161_v18 = vadd.f32 %v4106_v41, %v14437_v11  ;;  %10908 = vmatprep.mubr.msk.bf16.mxu1 %vm4827_vm2, %v4812_v43  ;;  %v4819_v21 = vrot.slane %v4817_v45, 1 }
 0x481   : > { %v10865_v26 = vpop.f32.mrf.mxu0  ;;  %v6430_v59 = vrot.slane %v14482_v30, 3  ;;  %v14852_v8 = vsel %vm2067_vm7, %v14807_v46, %v6103_v42  ;;  %v6105_v41 = vrot.slane %v4813_v5, 2 }
 0x482   : > { %v4627_v48 = vmul.f32 %v11386_v53, %v4259_v33  ;;  %v4214_v55 = vadd.f32 %v14769_v6, %v4161_v18  ;;  %v4820_v36 = vsel %vm518_vm4, %v4815_v16, %v4819_v21  ;;  %v5728_v34 = vrot.slane %v14834_v49, 2 }
 0x483   : > { %v4111_v38 = vpop.f32.mrf.mxu0  ;;  %10909 = vmatmul.mubr.msk.bf16.gmra.mxu1 %vm4827_vm2, %v4820_v36  ;;  %v6466_v53 = vrot.slane %v14834_v49, 3  ;;  %v11390_v18 = vunpack.i.l.bf16 %v11389_v44  ;;  %v6429_v26 = vrot.slane %v14465_v39, 3 }
 0x484   : > { %v5685_v57 = vpack.c.bf16 %v4627_v48, %v4627_v48  ;;  %v14842_v11 = vpack.c.bf16 %v4627_v48, %v4626_v23  ;;  %v4162_v45 = vadd.f32 %v4111_v38, %v14441_v10  ;;  %10914 = vmatprep.mubr.msk.bf16.mxu1 %vm4827_vm2, %v14458_v63  ;;  %v5729_v16 = vsel %vm1682_vm5, %v5726_v62, %v5728_v34 }
 0x485   : > { %v10868_v22 = vpop.f32.mrf.mxu0  ;;  %v4260_v43 = vmax.f32 %v4214_v55, 0.0  ;;  %11034 = vmatprep.mubr.msk.bf16.mxu0 %vm4827_vm2, %v5729_v16  ;;  %v6107_v48 = vor.u32 %v6106_v25, %v6105_v41  ;;  %v6110_v62 = vshrl.u32 %v14834_v49, 16  ;;  %v6431_v44 = vsel %vm2510_vm8, %v6429_v26, %v6430_v59  ;;  %v14872_v25 = vld [vmem:[%s16778_s5 + $0x20] sm:$0xff]  }
 0x486   : > { %v4215_v23 = vadd.f32 %v14769_v6, %v4162_v45  ;;  %v5730_v10 = vrot.slane %v5685_v57, 2  ;;  %v6468_v33 = vrot.slane %v5685_v57, 3  ;;  %v6119_v41 = vshrl.u32 %v5685_v57, 16 }
 0x487   : > { %v4114_v21 = vpop.f32.mrf.mxu0  ;;  %v6112_v45 = vrot.slane %v6110_v62, 2  ;;  %v4628_v22 = vmul.f32 %v11390_v18, %v4260_v43 }
 0x488   : > { %v4261_v36 = vmax.f32 %v4215_v23, 0.0  ;;  %v14859_v38 = vadd.f32 %v4114_v21, %v14445_v32  ;;  %v5731_v46 = vsel %vm1682_vm5, %v5728_v34, %v5730_v10  ;;  %v14865_v5 = vsel %vm2510_vm8, %v6466_v53, %v6468_v33 }
 0x489   : > { %11035 = vmatmul.mubr.msk.bf16.gmra.mxu0 %vm4827_vm2, %v5731_v46  ;;  %v10869_v55 = vpop.f32.mrf.mxu0  ;;  %v14875_v32 = vsel %vm2067_vm7, %v6103_v42, %v6107_v48  ;;  %v6113_v34 = vshll.u32 %v14834_v49, 16  ;;  %v6122_v23 = vshll.u32 %v5685_v57, 16  ;;  %v6432_v42 = vrot.slane %v14497_v12, 3 }
 0x48a   : > { %v4629_v16 = vmul.f32 %v11391_v52, %v4261_v36  ;;  %11082 = vmatprep.mubr.msk.bf16.mxu0 %vm4827_vm2, %v6431_v44  ;;  %v6121_v21 = vrot.slane %v6119_v41, 2  ;;  %v6434_v52 = vrot.slane %v14515_v61, 3  ;;  %v6442_v55 = vrot.slane %v14601_v15, 3 }
 0x48b   : > { %10915 = vmatmul.mubr.msk.bf16.vlgmr.msra.gmra.mxu1 %vm4827_vm2, %v14465_v39  ;;  %v6115_v10 = vrot.slane %v6113_v34, 3  ;;  %v6124_v43 = vrot.slane %v6122_v23, 3  ;;  %v6433_v62 = vsel %vm2510_vm8, %v6430_v59, %v6432_v42  ;;  %v6438_v59 = vrot.slane %v14558_v20, 3 }
 0x48c   : > { %v14881_v33 = vpack.c.bf16 %v4629_v16, %v4628_v22  ;;  %10955 = vmatpush3.bf16.msra.mxu1 %v14576_v40  ;;  %10918 = vmatprep.mubr.msk.bf16.mxu1 %vm4827_vm2, %v14482_v30  ;;  %v6435_v36 = vsel %vm2510_vm8, %v6432_v42, %v6434_v52  ;;  %v6444_v22 = vrot.slane %v14622_v1, 3  ;;  %v6446_v16 = vrot.slane %v14637_v9, 3 }
 0x48d   : > { %11038 = vmatprep.subr.bf16.mxu1 %v14872_v25  ;;  %v6116_v57 = vor.u32 %v6115_v10, %v6112_v45  ;;  %v6125_v18 = vor.u32 %v6124_v43, %v6121_v21  ;;  %v6448_v10 = vrot.slane %v14658_v27, 3  ;;  %v6450_v42 = vrot.slane %v14673_v31, 3 }
 0x48e   : > { %17157 = vst [vmem:[#allocation50_spill] sm:$0xff] %v14881_v33  ;;  %v6445_v41 = vsel %vm2510_vm8, %v6442_v55, %v6444_v22  ;;  %v6447_v23 = vsel %vm2510_vm8, %v6444_v22, %v6446_v16  ;;  %v7095_v49 = vshrl.u32 %v14490_v28, 16  ;;  %vm8543_vm5 = vcmask 261120  }
 0x48f   : > { %v14890_v26 = vsel %vm2067_vm7, %v6107_v48, %v6116_v57  ;;  %v14894_v40 = vsel %vm2067_vm7, %v6116_v57, %v6125_v18  ;;  %v6436_v48 = vrot.slane %v14540_v2, 3  ;;  %v6449_v21 = vsel %vm2510_vm8, %v6446_v16, %v6448_v10 }
 0x490   : > { %v6451_v43 = vsel %vm2510_vm8, %v6448_v10, %v6450_v42  ;;  %v6454_v57 = vrot.slane %v14709_v58, 3  ;;  %v6464_v16 = vrot.slane %v14816_v0, 3 }
 0x491   : > { %11083 = vmatmul.mubr.msk.bf16.vlgmr.msra.gmra.mxu0 %vm4827_vm2, %v6433_v62  ;;  %v6437_v46 = vsel %vm2510_vm8, %v6434_v52, %v6436_v48  ;;  %v6439_v44 = vsel %vm2510_vm8, %v6436_v48, %v6438_v59  ;;  %v6452_v52 = vrot.slane %v14694_v17, 3  ;;  %v6458_v48 = vrot.slane %v14750_v35, 3 }
 0x492   : > { %11086 = vmatprep.mubr.msk.bf16.mxu0 %vm4827_vm2, %v6435_v36  ;;  %11165 = vmatpush3.bf16.msra.mxu0 %v14747_v4  ;;  %v6440_v4 = vrot.slane %v14586_v29, 3  ;;  %v6456_v36 = vrot.slane %v14730_v14, 3 }
 0x493   : > { %10919 = vmatmul.mubr.msk.bf16.gmra.mxu1 %vm4827_vm2, %v14497_v12  ;;  %v6453_v18 = vsel %vm2510_vm8, %v6450_v42, %v6452_v52  ;;  %v6455_v62 = vsel %vm2510_vm8, %v6452_v52, %v6454_v57  ;;  %v7101_v52 = vshll.u32 %v14506_v47, 16 }
 0x494   : > { %10922 = vmatprep.mubr.msk.bf16.mxu1 %vm4827_vm2, %v14515_v61  ;;  %v6441_v45 = vsel %vm2510_vm8, %v6438_v59, %v6440_v4  ;;  %v6443_v34 = vsel %vm2510_vm8, %v6440_v4, %v6442_v55  ;;  %v6457_v59 = vsel %vm2510_vm8, %v6454_v57, %v6456_v36  ;;  %v6462_v4 = vrot.slane %v14792_v56, 3 }
 0x496   : > { %v6465_v42 = vsel %vm2510_vm8, %v6462_v4, %v6464_v16 }
 0x499   : > { %11087 = vmatmul.mubr.msk.bf16.gmra.mxu0 %vm4827_vm2, %v6437_v46  ;;  %v6459_v46 = vsel %vm2510_vm8, %v6456_v36, %v6458_v48  ;;  %v7108_v36 = vshll.u32 %v14532_v3, 16 }
 0x49a   : > { %11090 = vmatprep.mubr.msk.bf16.mxu0 %vm4827_vm2, %v6439_v44  ;;  %v6460_v44 = vrot.slane %v14777_v54, 3 }
 0x49b   : > { %10923 = vmatmul.mubr.msk.bf16.gmra.mxu1 %vm4827_vm2, %v14540_v2 }
 0x49c   : > { %10926 = vmatprep.mubr.msk.bf16.mxu1 %vm4827_vm2, %v14558_v20 }
 0x4a1   : > { %11091 = vmatmul.mubr.msk.bf16.gmra.mxu0 %vm4827_vm2, %v6441_v45  ;;  %v6461_v45 = vsel %vm2510_vm8, %v6458_v48, %v6460_v44 }
 0x4a2   : > { %11094 = vmatprep.mubr.msk.bf16.mxu0 %vm4827_vm2, %v6443_v34  ;;  %v6463_v34 = vsel %vm2510_vm8, %v6460_v44, %v6462_v4  ;;  %v7115_v44 = vshll.u32 %v14547_v7, 16  ;;  %v15010_v4 = vld [vmem:[%s16778_s5 + $0x30] sm:$0xff]  }
 0x4a3   : > { %10927 = vmatmul.mubr.msk.bf16.gmra.mxu1 %vm4827_vm2, %v14586_v29 }
 0x4a4   : > { %10930 = vmatprep.mubr.msk.bf16.mxu1 %vm4827_vm2, %v14601_v15 }
 0x4a9   : > { %11095 = vmatmul.mubr.msk.bf16.gmra.mxu0 %vm4827_vm2, %v6445_v41  ;;  %v5345_v41 = vrot.slane %v14465_v39, 1 }
 0x4aa   : > { %11098 = vmatprep.mubr.msk.bf16.mxu0 %vm4827_vm2, %v6447_v23  ;;  %v7097_v23 = vshll.u32 %v14490_v28, 16 }
 0x4ab   : > { %10931 = vmatmul.mubr.msk.bf16.gmra.mxu1 %vm4827_vm2, %v14622_v1 }
 0x4ac   : > { %10934 = vmatprep.mubr.msk.bf16.mxu1 %vm4827_vm2, %v14637_v9  ;;  %v7099_v57 = vrot.slane %v7097_v23, 1  ;;  %v7112_v23 = vshrl.u32 %v14532_v3, 16 }
 0x4ae   : > { %v7100_v48 = vor.u32 %v7099_v57, %v7095_v49  ;;  %v17159_v57 = vld [vmem:[#allocation17_spill] sm:$0xff] }
 0x4af   : > { %v7122_v49 = vshll.u32 %v17159_v57, 16 }
 0x4b1   : > { %11099 = vmatmul.mubr.msk.bf16.gmra.mxu0 %vm4827_vm2, %v6449_v21  ;;  %v6467_v21 = vsel %vm2510_vm8, %v6464_v16, %v6466_v53 }
 0x4b2   : > { %11102 = vmatprep.mubr.msk.bf16.mxu0 %vm4827_vm2, %v6451_v43  ;;  %v5344_v43 = vrot.slane %v14458_v63, 1  ;;  %v5347_v63 = vrot.slane %v14482_v30, 1 }
 0x4b3   : > { %10935 = vmatmul.mubr.msk.bf16.gmra.mxu1 %vm4827_vm2, %v14658_v27 }
 0x4b4   : > { %10938 = vmatprep.mubr.msk.bf16.mxu1 %vm4827_vm2, %v14673_v31  ;;  %v5346_v39 = vsel %vm1293_vm6, %v5344_v43, %v5345_v41  ;;  %v5348_v30 = vsel %vm1293_vm6, %v5345_v41, %v5347_v63  ;;  %v5351_v43 = vrot.slane %v14515_v61, 1 }
 0x4b8   : > { %v14966_v55 = vpop.f32.mrf.mxu1 }
 0x4b9   : > { %11103 = vmatmul.mubr.msk.bf16.gmra.mxu0 %vm4827_vm2, %v6453_v18 }
 0x4ba   : > { %11106 = vmatprep.mubr.msk.bf16.mxu0 %vm4827_vm2, %v6455_v62  ;;  %v14974_v22 = vpop.f32.mrf.mxu1  ;;  %v7103_v62 = vrot.slane %v7101_v52, 1 }
 0x4bb   : > { %10939 = vmatmul.mubr.msk.bf16.gmra.mxu1 %vm4827_vm2, %v14694_v17 }
 0x4bc   : > { %10942 = vmatprep.mubr.msk.bf16.mxu1 %vm4827_vm2, %v14709_v58  ;;  %v14981_v10 = vpop.f32.mrf.mxu1 }
 0x4bd   : > { %v15021_v16 = vpop.f32.mrf.mxu0 }
 0x4be   : > { %v14994_v18 = vpop.f32.mrf.mxu1  ;;  %17158 = vst [vmem:[#allocation41_spill] sm:$0xff] %v15021_v16  ;;  %v17168_v16 = vld [vmem:[#allocation46_spill] sm:$0xff] }
 0x4c1   : > { %11107 = vmatmul.mubr.msk.bf16.gmra.mxu0 %vm4827_vm2, %v6457_v59  ;;  %v5349_v59 = vrot.slane %v14497_v12, 1 }
 0x4c2   : > { %11110 = vmatprep.mubr.msk.bf16.mxu0 %vm4827_vm2, %v6459_v46  ;;  %v7104_v46 = vsel %vm518_vm4, %v7100_v48, %v7103_v62  ;;  %v17161_v48 = vld [vmem:[#allocation19_spill] sm:$0xff] }
 0x4c3   : > { %10943 = vmatmul.mubr.msk.bf16.gmra.mxu1 %vm4827_vm2, %v14730_v14  ;;  %v5350_v12 = vsel %vm1293_vm6, %v5347_v63, %v5349_v59  ;;  %v15031_v63 = vpop.f32.mrf.mxu0  ;;  %v5352_v61 = vsel %vm1293_vm6, %v5349_v59, %v5351_v43 }
 0x4c4   : > { %10946 = vmatprep.mubr.msk.bf16.mxu1 %vm4827_vm2, %v14750_v35  ;;  %17160 = vst [vmem:[#allocation42_spill] sm:$0xff] %v15031_v63 }
 0x4c8   : > { %v14998_v53 = vpop.f32.mrf.mxu1 }
 0x4c9   : > { %11111 = vmatmul.mubr.msk.bf16.gmra.mxu0 %vm4827_vm2, %v6461_v45 }
 0x4ca   : > { %11114 = vmatprep.mubr.msk.bf16.mxu0 %vm4827_vm2, %v6463_v34  ;;  %v15012_v45 = vpop.f32.mrf.mxu1  ;;  %v7110_v34 = vrot.slane %v7108_v36, 1 }
 0x4cb   : > { %10947 = vmatmul.mubr.msk.bf16.gmra.mxu1 %vm4827_vm2, %v14777_v54 }
 0x4cc   : > { %10950 = vmatprep.mubr.msk.bf16.mxu1 %vm4827_vm2, %v14792_v56  ;;  %v7114_v52 = vor.u32 %v7112_v23, %v7110_v34 }
 0x4d1   : > { %11115 = vmatmul.mubr.msk.bf16.gmra.mxu0 %vm4827_vm2, %v6465_v42  ;;  %v7117_v42 = vrot.slane %v7115_v44, 1 }
 0x4d2   : > { %11118 = vmatprep.mubr.msk.bf16.mxu0 %vm4827_vm2, %v6467_v21  ;;  %v15025_v21 = vpop.f32.mrf.mxu1 }
 0x4d3   : > { %10951 = vmatmul.mubr.msk.bf16.gmra.mxu1 %vm4827_vm2, %v14816_v0  ;;  %v7118_v36 = vsel %vm518_vm4, %v7114_v52, %v7117_v42  ;;  %v5355_v52 = vrot.slane %v14558_v20, 1 }
 0x4d4   : > { %10956 = vmatprep.mubr.msk.bf16.mxu1 %vm4827_vm2, %v5346_v39  ;;  %v5353_v39 = vrot.slane %v14540_v2, 1  ;;  %v15036_v44 = vpop.f32.mrf.mxu1 }
 0x4d6   : > { %v5354_v2 = vsel %vm1293_vm6, %v5351_v43, %v5353_v39  ;;  %v5356_v20 = vsel %vm1293_vm6, %v5353_v39, %v5355_v52 }
 0x4d9   : > { %11119 = vmatmul.mubr.msk.bf16.gmra.mxu0 %vm4827_vm2, %v14865_v5  ;;  %v7105_v5 = vshrl.u32 %v14506_v47, 16 }
 0x4da   : > { %11166 = vmatprep.mubr.msk.bf16.mxu0 %vm4827_vm2, %v7104_v46  ;;  %v7129_v46 = vshll.u32 %v17161_v48, 16 }
 0x4db   : > { %10957 = vmatmul.mubr.msk.bf16.vlgmr.msra.gmra.mxu1 %vm4827_vm2, %v5348_v30  ;;  %v7107_v41 = vor.u32 %v7105_v5, %v7103_v62  ;;  %v7124_v62 = vrot.slane %v7122_v49, 1  ;;  %v15042_v30 = vpop.f32.mrf.mxu1  ;;  %v7126_v5 = vshrl.u32 %v17159_v57, 16 }
 0x4dc   : > { %11039 = vmatpush3.bf16.msra.mxu1 %v14872_v25  ;;  %10960 = vmatprep.mubr.msk.bf16.mxu1 %vm4827_vm2, %v5350_v12  ;;  %v15046_v12 = vpop.f32.mrf.mxu0  ;;  %v7131_v23 = vrot.slane %v7129_v46, 1 }
 0x4dd   : > { %11122 = vmatprep.subr.bf16.mxu1 %v15010_v4  ;;  %v7111_v25 = vsel %vm518_vm4, %v7107_v41, %v7110_v34  ;;  %v7119_v34 = vshrl.u32 %v14547_v7, 16  ;;  %17162 = vst [vmem:[#allocation44_spill] sm:$0xff] %v15046_v12  ;;  %v7128_v59 = vor.u32 %v7126_v5, %v7124_v62  ;;  %v15052_v49 = vpop.f32.mrf.mxu1  ;;  %v17165_v12 = vld [vmem:[#allocation23_spill] sm:$0xff]  ;;  %v7133_v5 = vshrl.u32 %v17161_v48, 16 }
 0x4de   : > { %v15055_v63 = vpop.f32.mrf.mxu0  ;;  %v7143_v46 = vshll.u32 %v17165_v12, 16 }
 0x4df   : > { %v7121_v41 = vor.u32 %v7119_v34, %v7117_v42  ;;  %17164 = vst [vmem:[#allocation45_spill] sm:$0xff] %v15055_v63 }
 0x4e0   : > { %v15062_v42 = vpop.f32.mrf.mxu0 }
 0x4e1   : > { %11167 = vmatmul.mubr.msk.bf16.vlgmr.msra.gmra.mxu0 %vm4827_vm2, %v7111_v25  ;;  %v5357_v25 = vrot.slane %v14586_v29, 1  ;;  %17166 = vst [vmem:[#allocation47_spill] sm:$0xff] %v15062_v42 }
 0x4e2   : > { %11170 = vmatprep.mubr.msk.bf16.mxu0 %vm4827_vm2, %v7118_v36  ;;  %v17163_v36 = vld [vmem:[#allocation21_spill] sm:$0xff]  ;;  %v15072_v39 = vpop.f32.mrf.mxu0 }
 0x4e3   : > { %10961 = vmatmul.mubr.msk.bf16.gmra.mxu1 %vm4827_vm2, %v5352_v61  ;;  %v7136_v43 = vshll.u32 %v17163_v36, 16  ;;  %v7125_v61 = vsel %vm518_vm4, %v7121_v41, %v7124_v62  ;;  %v5358_v29 = vsel %vm1293_vm6, %v5355_v52, %v5357_v25  ;;  %v15066_v62 = vpop.f32.mrf.mxu1  ;;  %v7140_v41 = vshrl.u32 %v17163_v36, 16  ;;  %17167 = vst [vmem:[#allocation27_spill] sm:$0xff] %v15072_v39 }
 0x4e4   : > { %10964 = vmatprep.mubr.msk.bf16.mxu1 %vm4827_vm2, %v5354_v2  ;;  %v7132_v2 = vsel %vm518_vm4, %v7128_v59, %v7131_v23  ;;  %v7145_v59 = vrot.slane %v7143_v46, 1  ;;  %v7150_v52 = vshll.u32 %v14647_v51, 16  ;;  %v7157_v46 = vshll.u32 %v17168_v16, 16 }
 0x4e5   : > { %v7138_v34 = vrot.slane %v7136_v43, 1  ;;  %v15076_v43 = vpop.f32.mrf.mxu1 }
 0x4e7   : > { %v7142_v42 = vor.u32 %v7140_v41, %v7138_v34  ;;  %v7152_v41 = vrot.slane %v7150_v52, 1 }
 0x4e9   : > { %11171 = vmatmul.mubr.msk.bf16.gmra.mxu0 %vm4827_vm2, %v7125_v61  ;;  %v7135_v61 = vor.u32 %v7133_v5, %v7131_v23  ;;  %v15082_v23 = vpop.f32.mrf.mxu1  ;;  %v15086_v5 = vpop.f32.mrf.mxu0 }
 0x4ea   : > { %11174 = vmatprep.mubr.msk.bf16.mxu0 %vm4827_vm2, %v7132_v2  ;;  %v5359_v2 = vrot.slane %v14601_v15, 1  ;;  %17169 = vst [vmem:[#allocation48_spill] sm:$0xff] %v15082_v23  ;;  %17170 = vst [vmem:[#allocation2_spill] sm:$0xff] %v15086_v5 }
 0x4eb   : > { %10965 = vmatmul.mubr.msk.bf16.gmra.mxu1 %vm4827_vm2, %v5356_v20  ;;  %v5361_v20 = vrot.slane %v14622_v1, 1  ;;  %v7139_v63 = vsel %vm518_vm4, %v7135_v61, %v7138_v34  ;;  %v7147_v34 = vshrl.u32 %v17165_v12, 16  ;;  %v15093_v61 = vpop.f32.mrf.mxu1 }
 0x4ec   : > { %10968 = vmatprep.mubr.msk.bf16.mxu1 %vm4827_vm2, %v5358_v29  ;;  %v7146_v29 = vsel %vm518_vm4, %v7142_v42, %v7145_v59  ;;  %v5360_v15 = vsel %vm1293_vm6, %v5357_v25, %v5359_v2  ;;  %v7159_v42 = vrot.slane %v7157_v46, 1  ;;  %17171 = vst [vmem:[#allocation3_spill] sm:$0xff] %v15093_v61  ;;  %v15096_v25 = vpop.f32.mrf.mxu0 }
 0x4ed   : > { %v5362_v1 = vsel %vm1293_vm6, %v5359_v2, %v5361_v20  ;;  %v7149_v39 = vor.u32 %v7147_v34, %v7145_v59  ;;  %17172 = vst [vmem:[#allocation4_spill] sm:$0xff] %v15096_v25  ;;  %v7164_v2 = vshll.u32 %v14683_v24, 16  ;;  %v15106_v59 = vpop.f32.mrf.mxu1 }
 0x4ee   : > { %v15101_v23 = vpop.f32.mrf.mxu0 }
 0x4ef   : > { %v7153_v52 = vsel %vm518_vm4, %v7149_v39, %v7152_v41  ;;  %17173 = vst [vmem:[#allocation25_spill] sm:$0xff] %v15101_v23  ;;  %v7166_v34 = vrot.slane %v7164_v2, 1  ;;  %v7161_v39 = vshrl.u32 %v17168_v16, 16 }
 0x4f1   : > { %11175 = vmatmul.mubr.msk.bf16.gmra.mxu0 %vm4827_vm2, %v7139_v63  ;;  %v7154_v63 = vshrl.u32 %v14647_v51, 16  ;;  %v7163_v23 = vor.u32 %v7161_v39, %v7159_v42 }
 0x4f2   : > { %11178 = vmatprep.mubr.msk.bf16.mxu0 %vm4827_vm2, %v7146_v29  ;;  %v5363_v29 = vrot.slane %v14637_v9, 1 }
 0x4f3   : > { %10969 = vmatmul.mubr.msk.bf16.gmra.mxu1 %vm4827_vm2, %v5360_v15  ;;  %v7156_v5 = vor.u32 %v7154_v63, %v7152_v41  ;;  %v5365_v15 = vrot.slane %v14658_v27, 1  ;;  %v15114_v41 = vpop.f32.mrf.mxu0  ;;  %v7167_v25 = vsel %vm518_vm4, %v7163_v23, %v7166_v34 }
 0x4f4   : > { %10972 = vmatprep.mubr.msk.bf16.mxu1 %vm4827_vm2, %v5362_v1  ;;  %v17174_v1 = vld [vmem:[#allocation20_spill] sm:$0xff]  ;;  %v5364_v9 = vsel %vm1293_vm6, %v5361_v20, %v5363_v29  ;;  %17175 = vst [vmem:[#allocation5_spill] sm:$0xff] %v15114_v41  ;;  %v7185_v41 = vshll.u32 %v14737_v50, 16 }
 0x4f5   : > { %v7160_v46 = vsel %vm518_vm4, %v7156_v5, %v7159_v42  ;;  %v7171_v61 = vshll.u32 %v17174_v1, 16  ;;  %v5366_v27 = vsel %vm1293_vm6, %v5363_v29, %v5365_v15  ;;  %v7168_v5 = vshrl.u32 %v14683_v24, 16 }
 0x4f6   : > { %v7178_v29 = vshll.u32 %v14719_v37, 16  ;;  %v7175_v23 = vshrl.u32 %v17174_v1, 16 }
 0x4f7   : > { %v7173_v63 = vrot.slane %v7171_v61, 1  ;;  %v7170_v20 = vor.u32 %v7168_v5, %v7166_v34  ;;  %v7182_v34 = vshrl.u32 %v14719_v37, 16  ;;  %v7187_v5 = vrot.slane %v7185_v41, 1 }
 0x4f8   : > { %v7180_v42 = vrot.slane %v7178_v29, 1  ;;  %v7192_v29 = vshll.u32 %v14761_v19, 16 }
 0x4f9   : > { %11179 = vmatmul.mubr.msk.bf16.gmra.mxu0 %vm4827_vm2, %v7153_v52  ;;  %v15117_v52 = vpop.f32.mrf.mxu1  ;;  %v7174_v61 = vsel %vm518_vm4, %v7170_v20, %v7173_v63  ;;  %v7177_v20 = vor.u32 %v7175_v23, %v7173_v63 }
 0x4fa   : > { %11182 = vmatprep.mubr.msk.bf16.mxu0 %vm4827_vm2, %v7160_v46  ;;  %v5367_v46 = vrot.slane %v14673_v31, 1  ;;  %v7194_v23 = vrot.slane %v7192_v29, 1  ;;  %v7206_v29 = vshll.u32 %v14802_v13, 16 }
 0x4fb   : > { %10973 = vmatmul.mubr.msk.bf16.gmra.mxu1 %vm4827_vm2, %v5364_v9  ;;  %v5369_v9 = vrot.slane %v14694_v17, 1  ;;  %v15122_v2 = vpop.f32.mrf.mxu1 }
 0x4fc   : > { %10976 = vmatprep.mubr.msk.bf16.mxu1 %vm4827_vm2, %v5366_v27  ;;  %v15125_v27 = vpop.f32.mrf.mxu0  ;;  %v5368_v31 = vsel %vm1293_vm6, %v5365_v15, %v5367_v46 }
 0x4fd   : > { %17176 = vst [vmem:[#allocation6_spill] sm:$0xff] %v15125_v27  ;;  %v5370_v17 = vsel %vm1293_vm6, %v5367_v46, %v5369_v9  ;;  %v15134_v39 = vpop.f32.mrf.mxu1  ;;  %v5373_v46 = vrot.slane %v14730_v14, 1 }
 0x4fe   : > { %17177 = vst [vmem:[#allocation7_spill] sm:$0xff] %v15134_v39  ;;  %v7181_v39 = vsel %vm518_vm4, %v7177_v20, %v7180_v42 }
 0x4ff   : > { %v15146_v27 = vpop.f32.mrf.mxu1 }
 0x501   : > { %11183 = vmatmul.mubr.msk.bf16.gmra.mxu0 %vm4827_vm2, %v7167_v25  ;;  %v15138_v25 = vpop.f32.mrf.mxu0 }
 0x502   : > { %11186 = vmatprep.mubr.msk.bf16.mxu0 %vm4827_vm2, %v7174_v61  ;;  %17178 = vst [vmem:[#allocation8_spill] sm:$0xff] %v15138_v25  ;;  %v5371_v61 = vrot.slane %v14709_v58, 1  ;;  %v17180_v25 = vld [vmem:[#allocation36_spill] sm:$0xff] }
 0x503   : > { %10977 = vmatmul.mubr.msk.bf16.gmra.mxu1 %vm4827_vm2, %v5368_v31  ;;  %v15142_v15 = vpop.f32.mrf.mxu0  ;;  %v7184_v31 = vor.u32 %v7182_v34, %v7180_v42  ;;  %v7199_v41 = vshll.u32 %v17180_v25, 16  ;;  %v15158_v34 = vpop.f32.mrf.mxu1  ;;  %v7189_v42 = vshrl.u32 %v14737_v50, 16 }
 0x504   : > { %10980 = vmatprep.mubr.msk.bf16.mxu1 %vm4827_vm2, %v5370_v17  ;;  %17179 = vst [vmem:[#allocation32_spill] sm:$0xff] %v15142_v15  ;;  %v5372_v58 = vsel %vm1293_vm6, %v5369_v9, %v5371_v61  ;;  %v5374_v14 = vsel %vm1293_vm6, %v5371_v61, %v5373_v46  ;;  %17182 = vst [vmem:[#allocation10_spill] sm:$0xff] %v15158_v34  ;;  %v5375_v9 = vrot.slane %v14750_v35, 1  ;;  %v5377_v61 = vrot.slane %v14777_v54, 1 }
 0x505   : > { %v7188_v17 = vsel %vm518_vm4, %v7184_v31, %v7187_v5  ;;  %v15154_v63 = vpop.f32.mrf.mxu0  ;;  %v7201_v20 = vrot.slane %v7199_v41, 1  ;;  %v4216_v15 = vadd.f32 %v14769_v6, %v14859_v38  ;;  %v7208_v38 = vrot.slane %v7206_v29, 1 }
 0x506   : > { %17181 = vst [vmem:[#allocation9_spill] sm:$0xff] %v15154_v63  ;;  %v5376_v35 = vsel %vm1293_vm6, %v5373_v46, %v5375_v9  ;;  %v5378_v6 = vsel %vm1293_vm6, %v5375_v9, %v5377_v61  ;;  %v5381_v9 = vrot.slane %v14816_v0, 1 }
 0x507   : > { %v15166_v63 = vpop.f32.mrf.mxu0 }
 0x508   : > { %v15163_v31 = vpop.f32.mrf.mxu1  ;;  %17184 = vst [vmem:[#allocation12_spill] sm:$0xff] %v15166_v63  ;;  %v4583_v63 = vpop.permute.xlu1 %4582 }
 0x509   : > { %11187 = vmatmul.mubr.msk.bf16.gmra.mxu0 %vm4827_vm2, %v7181_v39  ;;  %v7196_v39 = vshrl.u32 %v14761_v19, 16  ;;  %17183 = vst [vmem:[#allocation11_spill] sm:$0xff] %v15163_v31  ;;  %v15180_v54 = vpop.f32.mrf.mxu0 }
 0x50a   : > { %11190 = vmatprep.mubr.msk.bf16.mxu0 %vm4827_vm2, %v7188_v17  ;;  %v7191_v17 = vor.u32 %v7189_v42, %v7187_v5  ;;  %v7213_v5 = vshll.u32 %v14825_v60, 16  ;;  %v15176_v42 = vpop.f32.mrf.mxu1  ;;  %17186 = vst [vmem:[#allocation13_spill] sm:$0xff] %v15180_v54  ;;  %v5379_v54 = vrot.slane %v14792_v56, 1 }
 0x50b   : > { %10981 = vmatmul.mubr.msk.bf16.gmra.mxu1 %vm4827_vm2, %v5372_v58  ;;  %v7198_v58 = vor.u32 %v7196_v39, %v7194_v23  ;;  %17185 = vst [vmem:[#allocation37_spill] sm:$0xff] %v15176_v42  ;;  %v7203_v39 = vshrl.u32 %v17180_v25, 16 }
 0x50c   : > { %10984 = vmatprep.mubr.msk.bf16.mxu1 %vm4827_vm2, %v5374_v14  ;;  %v7195_v14 = vsel %vm518_vm4, %v7191_v17, %v7194_v23  ;;  %v4262_v23 = vmax.f32 %v4216_v15, 0.0  ;;  %v15186_v17 = vpop.f32.mrf.mxu0  ;;  %v7220_v15 = vshll.u32 %v14842_v11, 16  ;;  %v5380_v56 = vsel %vm1293_vm6, %v5377_v61, %v5379_v54  ;;  %v17194_v61 = vld [vmem:[#allocation39_spill] sm:$0xff] }
 0x50d   : > { %v7202_v41 = vsel %vm518_vm4, %v7198_v58, %v7201_v20  ;;  %17187 = vst [vmem:[#allocation14_spill] sm:$0xff] %v15186_v17  ;;  %v7210_v58 = vshrl.u32 %v14802_v13, 16  ;;  %v7205_v46 = vor.u32 %v7203_v39, %v7201_v20  ;;  %v7227_v17 = vshll.u32 %v14881_v33, 16 }
 0x50e   : > { %v4630_v29 = vmul.f32 %v4583_v63, %v4262_v23  ;;  %v5382_v0 = vsel %vm1293_vm6, %v5379_v54, %v5381_v9  ;;  %v7222_v63 = vrot.slane %v7220_v15, 1 }
 0x50f   : > { %v7209_v42 = vsel %vm518_vm4, %v7205_v46, %v7208_v38  ;;  %v7229_v46 = vrot.slane %v7227_v17, 1 }
 0x511   : > { %11191 = vmatmul.mubr.msk.bf16.gmra.mxu0 %vm4827_vm2, %v7195_v14  ;;  %v7215_v14 = vrot.slane %v7213_v5, 1 }
 0x512   : > { %11194 = vmatprep.mubr.msk.bf16.mxu0 %vm4827_vm2, %v7202_v41  ;;  %v15189_v41 = vpop.f32.mrf.mxu1 }
 0x513   : > { %10985 = vmatmul.mubr.msk.bf16.gmra.mxu1 %vm4827_vm2, %v5376_v35  ;;  %17188 = vst [vmem:[#allocation40_spill] sm:$0xff] %v15189_v41  ;;  %v7212_v35 = vor.u32 %v7210_v58, %v7208_v38  ;;  %v15206_v38 = vpack.c.bf16 %v4630_v29, %v4630_v29  ;;  %v7224_v58 = vshrl.u32 %v14842_v11, 16 }
 0x514   : > { %10988 = vmatprep.mubr.msk.bf16.mxu1 %vm4827_vm2, %v5378_v6  ;;  %v15195_v6 = vpop.f32.mrf.mxu0  ;;  %v15200_v20 = vpop.f32.mrf.mxu1 }
 0x515   : > { %17189 = vst [vmem:[#allocation17_spill] sm:$0xff] %v15195_v6  ;;  %v7216_v5 = vsel %vm518_vm4, %v7212_v35, %v7215_v14  ;;  %17190 = vst [vmem:[#allocation19_spill] sm:$0xff] %v15200_v20  ;;  %v7235_v54 = vshll.u32 %v15206_v38, 16 }
 0x516   : > { %17191 = vst [vmem:[#allocation21_spill] sm:$0xff] %v15206_v38  ;;  %v15212_v39 = vpop.f32.mrf.mxu0 }
 0x517   : > { %17193 = vst [vmem:[#allocation46_spill] sm:$0xff] %v15212_v39 }
 0x518   : > { %v15208_v23 = vpop.f32.mrf.mxu1  ;;  %v15220_v6 = vpop.f32.mrf.mxu0 }
 0x519   : > { %11195 = vmatmul.mubr.msk.bf16.gmra.mxu0 %vm4827_vm2, %v7209_v42  ;;  %17192 = vst [vmem:[#allocation23_spill] sm:$0xff] %v15208_v23  ;;  %v7217_v42 = vshrl.u32 %v14825_v60, 16  ;;  %17196 = vst [vmem:[#allocation36_spill] sm:$0xff] %v15220_v6 }
 0x51a   : > { %11198 = vmatprep.mubr.msk.bf16.mxu0 %vm4827_vm2, %v7216_v5  ;;  %v5383_v5 = vrot.slane %v17194_v61, 1  ;;  %v15217_v15 = vpop.f32.mrf.mxu1  ;;  %v7231_v61 = vshrl.u32 %v14881_v33, 16 }
 0x51b   : > { %10989 = vmatmul.mubr.msk.bf16.gmra.mxu1 %vm4827_vm2, %v5380_v56  ;;  %v7219_v35 = vor.u32 %v7217_v42, %v7215_v14  ;;  %v7226_v56 = vor.u32 %v7224_v58, %v7222_v63  ;;  %17195 = vst [vmem:[#allocation20_spill] sm:$0xff] %v15217_v15  ;;  %v15226_v14 = vpop.f32.mrf.mxu0  ;;  %v7237_v42 = vrot.slane %v7235_v54, 1 }
 0x51c   : > { %10992 = vmatprep.mubr.msk.bf16.mxu1 %vm4827_vm2, %v5382_v0  ;;  %v5384_v17 = vsel %vm1293_vm6, %v5381_v9, %v5383_v5  ;;  %17197 = vst [vmem:[#allocation39_spill] sm:$0xff] %v15226_v14  ;;  %v15229_v58 = vpop.f32.mrf.mxu1  ;;  %v15243_v9 = vld [vmem:[%s16778_s5 + $0x40] sm:$0xff]  }
 0x51d   : > { %v7223_v29 = vsel %vm518_vm4, %v7219_v35, %v7222_v63  ;;  %v7230_v0 = vsel %vm518_vm4, %v7226_v56, %v7229_v46  ;;  %17198 = vst [vmem:[#allocation52_spill] sm:$0xff] %v15229_v58  ;;  %v17199_v63 = vld [vmem:[#allocation15_spill] sm:$0xff]  ;;  %v7233_v35 = vor.u32 %v7231_v61, %v7229_v46 }
 0x51e   : > { %v15236_v56 = vpop.f32.mrf.mxu1  ;;  %v17205_v46 = vld [vmem:[#allocation43_spill] sm:$0xff] }
 0x51f   : > { %17201 = vst [vmem:[#allocation53_spill] sm:$0xff] %v15236_v56 }
 0x521   : > { %11199 = vmatmul.mubr.msk.bf16.gmra.mxu0 %vm4827_vm2, %v7223_v29  ;;  %v15234_v29 = vpop.f32.mrf.mxu0 }
 0x522   : > { %11202 = vmatprep.mubr.msk.bf16.mxu0 %vm4827_vm2, %v7230_v0  ;;  %17200 = vst [vmem:[#allocation15_spill] sm:$0xff] %v15234_v29  ;;  %v7238_v0 = vsel %vm518_vm4, %v7233_v35, %v7237_v42  ;;  %vm8062_vm4 = vcmask 257024  }
 0x523   : > { %10993 = vmatmul.mubr.msk.bf16.gmra.mxu1 %vm4827_vm2, %v5384_v17  ;;  %v15247_v54 = vpop.f32.mrf.mxu0  ;;  %v17204_v17 = vld [vmem:[#allocation16_spill] sm:$0xff] }
 0x524   : > { %11040 = vmatprep.mubr.msk.bf16.mxu1 %vm4827_vm2, %v17199_v63  ;;  %17203 = vst [vmem:[#allocation55_spill] sm:$0xff] %v15247_v54  ;;  %v17211_v54 = vld [vmem:[#allocation26_spill] sm:$0xff] }
 0x525   : > { %v15257_v61 = vpop.f32.mrf.mxu0 }
 0x526   : > { %17207 = vst [vmem:[#allocation43_spill] sm:$0xff] %v15257_v61  ;;  %v17217_v61 = vld [vmem:[#allocation22_spill] sm:$0xff] }
 0x527   : > { %v15259_v63 = vpop.f32.mrf.mxu0 }
 0x528   : > { %v15245_v5 = vpop.f32.mrf.mxu1  ;;  %17208 = vst [vmem:[#allocation56_spill] sm:$0xff] %v15259_v63  ;;  %v17218_v63 = vld [vmem:[#allocation24_spill] sm:$0xff] }
 0x529   : > { %11203 = vmatmul.mubr.msk.bf16.gmra.mxu0 %vm4827_vm2, %v7238_v0  ;;  %17202 = vst [vmem:[#allocation54_spill] sm:$0xff] %v15245_v5  ;;  %v17210_v0 = vld [vmem:[#allocation18_spill] sm:$0xff]  ;;  %v17241_v5 = vld [vmem:[#allocation35_spill] sm:$0xff] }
 0x52a   : > { %v15255_v42 = vpop.f32.mrf.mxu1 }
 0x52b   : > { %11041 = vmatmul.mubr.msk.bf16.vlgmr.msra.gmra.mxu1 %vm4827_vm2, %v17204_v17  ;;  %17206 = vst [vmem:[#allocation16_spill] sm:$0xff] %v15255_v42 }
 0x52c   : > { %11123 = vmatpush3.bf16.msra.mxu1 %v15010_v4  ;;  %11044 = vmatprep.mubr.msk.bf16.mxu1 %vm4827_vm2, %v17205_v46  ;;  %v15261_v35 = vpop.f32.mrf.mxu1  ;;  %v15267_v4 = vpop.f32.mrf.mxu0 }
 0x52d   : > { %11206 = vmatprep.subr.bf16.mxu1 %v15243_v9  ;;  %17209 = vst [vmem:[#allocation57_spill] sm:$0xff] %v15261_v35  ;;  %17212 = vst [vmem:[#allocation18_spill] sm:$0xff] %v15267_v4 }
 0x52e   : > { %v15269_v17 = vpop.f32.mrf.mxu1  ;;  %v15273_v29 = vpop.f32.mrf.mxu0 }
 0x52f   : > { %17213 = vst [vmem:[#allocation26_spill] sm:$0xff] %v15269_v17  ;;  %17215 = vst [vmem:[#allocation59_spill] sm:$0xff] %v15273_v29  ;;  %v17225_v29 = vld [vmem:[#allocation28_spill] sm:$0xff] }
 0x533   : > { %11045 = vmatmul.mubr.msk.bf16.gmra.mxu1 %vm4827_vm2, %v17210_v0  ;;  %v15281_v0 = vpop.f32.mrf.mxu0 }
 0x534   : > { %11048 = vmatprep.mubr.msk.bf16.mxu1 %vm4827_vm2, %v17211_v54  ;;  %17219 = vst [vmem:[#allocation22_spill] sm:$0xff] %v15281_v0 }
 0x535   : > { %v15285_v54 = vpop.f32.mrf.mxu0 }
 0x536   : > { %17221 = vst [vmem:[#allocation61_spill] sm:$0xff] %v15285_v54 }
 0x537   : > { %v15289_v39 = vpop.f32.mrf.mxu0 }
 0x538   : > { %v15271_v46 = vpop.f32.mrf.mxu1  ;;  %17223 = vst [vmem:[#allocation63_spill] sm:$0xff] %v15289_v39  ;;  %v17232_v39 = vld [vmem:[#allocation31_spill] sm:$0xff] }
 0x539   : > { %17214 = vst [vmem:[#allocation58_spill] sm:$0xff] %v15271_v46  ;;  %v17237_v46 = vld [vmem:[#allocation49_spill] sm:$0xff] }
 0x53a   : > { %v15275_v14 = vpop.f32.mrf.mxu1 }
 0x53b   : > { %17216 = vst [vmem:[#allocation60_spill] sm:$0xff] %v15275_v14  ;;  %11049 = vmatmul.mubr.msk.bf16.gmra.mxu1 %vm4827_vm2, %v17217_v61  ;;  %v17226_v14 = vld [vmem:[#allocation29_spill] sm:$0xff] }
 0x53c   : > { %11052 = vmatprep.mubr.msk.bf16.mxu1 %vm4827_vm2, %v17218_v63  ;;  %v15283_v6 = vpop.f32.mrf.mxu1  ;;  %v15299_v63 = vpop.f32.mrf.mxu0 }
 0x53d   : > { %17220 = vst [vmem:[#allocation24_spill] sm:$0xff] %v15283_v6  ;;  %17228 = vst [vmem:[#allocation29_spill] sm:$0xff] %v15299_v63 }
 0x53e   : > { %v15287_v4 = vpop.f32.mrf.mxu1  ;;  %v15305_v54 = vpop.f32.mrf.mxu0 }
 0x53f   : > { %17222 = vst [vmem:[#allocation62_spill] sm:$0xff] %v15287_v4  ;;  %17231 = vst [vmem:[#allocation67_spill] sm:$0xff] %v15305_v54  ;;  %v17236_v54 = vld [vmem:[#allocation34_spill] sm:$0xff] }
 0x543   : > { %v15291_v38 = vpop.f32.mrf.mxu1  ;;  %11053 = vmatmul.mubr.msk.bf16.gmra.mxu1 %vm4827_vm2, %v17225_v29  ;;  %v15313_v29 = vpop.f32.mrf.mxu0 }
 0x544   : > { %17224 = vst [vmem:[#allocation64_spill] sm:$0xff] %v15291_v38  ;;  %11056 = vmatprep.mubr.msk.bf16.mxu1 %vm4827_vm2, %v17226_v14  ;;  %v17233_v38 = vld [vmem:[#allocation33_spill] sm:$0xff]  ;;  %17234 = vst [vmem:[#allocation31_spill] sm:$0xff] %v15313_v29 }
 0x545   : > { %v15297_v61 = vpop.f32.mrf.mxu1  ;;  %v15319_v63 = vpop.f32.mrf.mxu0 }
 0x546   : > { %17227 = vst [vmem:[#allocation28_spill] sm:$0xff] %v15297_v61  ;;  %17235 = vst [vmem:[#allocation33_spill] sm:$0xff] %v15319_v63 }
 0x547   : > { %v15301_v0 = vpop.f32.mrf.mxu1 }
 0x548   : > { %17229 = vst [vmem:[#allocation65_spill] sm:$0xff] %v15301_v0 }
 0x549   : > { %v15303_v6 = vpop.f32.mrf.mxu1 }
 0x54a   : > { %17230 = vst [vmem:[#allocation66_spill] sm:$0xff] %v15303_v6 }
 0x54b   : > { %v15307_v4 = vpop.f32.mrf.mxu1  ;;  %11057 = vmatmul.mubr.msk.bf16.gmra.mxu1 %vm4827_vm2, %v17232_v39  ;;  %v15329_v39 = vpop.f32.mrf.mxu0 }
 0x54c   : > { %11060 = vmatprep.mubr.msk.bf16.mxu1 %vm4827_vm2, %v17233_v38  ;;  %17238 = vst [vmem:[#allocation34_spill] sm:$0xff] %v15329_v39 }
 0x54d   : > { %v15315_v14 = vpop.f32.mrf.mxu1  ;;  %v15335_v17 = vpop.f32.mrf.mxu0 }
 0x54e   : > { %17239 = vst [vmem:[#allocation49_spill] sm:$0xff] %v15335_v17 }
 0x54f   : > { %v15317_v61 = vpop.f32.mrf.mxu1  ;;  %v15339_v63 = vpop.f32.mrf.mxu0 }
 0x550   : > { %17240 = vst [vmem:[#allocation68_spill] sm:$0xff] %v15339_v63  ;;  %v17245_v63 = vld [vmem:[#allocation38_spill] sm:$0xff] }
 0x551   : > { %v15321_v0 = vpop.f32.mrf.mxu1  ;;  %v15349_v39 = vpop.f32.mrf.mxu0 }
 0x552   : > { %17243 = vst [vmem:[#allocation35_spill] sm:$0xff] %v15349_v39 }
 0x553   : > { %v15323_v6 = vpop.f32.mrf.mxu1  ;;  %11061 = vmatmul.mubr.msk.bf16.gmra.mxu1 %vm4827_vm2, %v17236_v54  ;;  %v17242_v54 = vld [vmem:[#allocation30_spill] sm:$0xff]  ;;  %v15355_v17 = vpop.f32.mrf.mxu0 }
 0x554   : > { %11064 = vmatprep.mubr.msk.bf16.mxu1 %vm4827_vm2, %v17237_v46  ;;  %17244 = vst [vmem:[#allocation30_spill] sm:$0xff] %v15355_v17 }
 0x555   : > { %v15331_v38 = vpop.f32.mrf.mxu1 }
 0x557   : > { %v15333_v29 = vpop.f32.mrf.mxu1 }
 0x559   : > { %v15337_v35 = vpop.f32.mrf.mxu1 }
 0x55b   : > { %v15341_v42 = vpop.f32.mrf.mxu1  ;;  %11065 = vmatmul.mubr.msk.bf16.gmra.mxu1 %vm4827_vm2, %v17241_v5 }
 0x55c   : > { %11068 = vmatprep.mubr.msk.bf16.mxu1 %vm4827_vm2, %v17242_v54  ;;  %v15365_v54 = vpop.f32.mrf.mxu0 }
 0x55d   : > { %v15347_v46 = vpop.f32.mrf.mxu1  ;;  %17246 = vst [vmem:[#allocation38_spill] sm:$0xff] %v15365_v54 }
 0x55e   : > { %v15371_v20 = vpop.f32.mrf.mxu0 }
 0x55f   : > { %v15351_v56 = vpop.f32.mrf.mxu1  ;;  %17247 = vst [vmem:[#allocation69_spill] sm:$0xff] %v15371_v20 }
 0x561   : > { %v15353_v58 = vpop.f32.mrf.mxu1 }
 0x563   : > { %v15357_v15 = vpop.f32.mrf.mxu1  ;;  %11069 = vmatmul.mubr.msk.bf16.gmra.mxu1 %vm4827_vm2, %v17245_v63 }
 0x564   : > { %11072 = vmatprep.mubr.msk.bf16.mxu1 %vm4827_vm2, %v14852_v8  ;;  %v15381_v8 = vpop.f32.mrf.mxu0 }
 0x565   : > { %v15363_v5 = vpop.f32.mrf.mxu1  ;;  %17248 = vst [vmem:[#allocation70_spill] sm:$0xff] %v15381_v8 }
 0x566   : > { %v15387_v33 = vpop.f32.mrf.mxu0 }
 0x567   : > { %v15367_v23 = vpop.f32.mrf.mxu1  ;;  %17250 = vst [vmem:[#allocation72_spill] sm:$0xff] %v15387_v33 }
 0x569   : > { %v15369_v39 = vpop.f32.mrf.mxu1 }
 0x56b   : > { %v15373_v41 = vpop.f32.mrf.mxu1  ;;  %11073 = vmatmul.mubr.msk.bf16.gmra.mxu1 %vm4827_vm2, %v14875_v32 }
 0x56c   : > { %11076 = vmatprep.mubr.msk.bf16.mxu1 %vm4827_vm2, %v14890_v26  ;;  %v15397_v26 = vpop.f32.mrf.mxu0 }
 0x56d   : > { %v15379_v63 = vpop.f32.mrf.mxu1  ;;  %17251 = vst [vmem:[#allocation73_spill] sm:$0xff] %v15397_v26 }
 0x56e   : > { %v15403_v34 = vpop.f32.mrf.mxu0 }
 0x56f   : > { %v15383_v17 = vpop.f32.mrf.mxu1  ;;  %17254 = vst [vmem:[#allocation76_spill] sm:$0xff] %v15403_v34 }
 0x570   : > { %v15414_v33 = vpop.f32.mrf.mxu0 }
 0x571   : > { %v15385_v54 = vpop.f32.mrf.mxu1  ;;  %17257 = vst [vmem:[#allocation79_spill] sm:$0xff] %v15414_v33 }
 0x572   : > { %17249 = vst [vmem:[#allocation71_spill] sm:$0xff] %v15385_v54 }
 0x573   : > { %v15389_v31 = vpop.f32.mrf.mxu1  ;;  %11077 = vmatmul.mubr.msk.bf16.gmra.mxu1 %vm4827_vm2, %v14894_v40 }
 0x574   : > { %11124 = vmatprep.mubr.msk.bf16.mxu1 %vm4827_vm2, %v14490_v28 }
 0x575   : > { %v15395_v32 = vpop.f32.mrf.mxu1 }
 0x577   : > { %v15399_v20 = vpop.f32.mrf.mxu1 }
 0x578   : > { %17252 = vst [vmem:[#allocation74_spill] sm:$0xff] %v15399_v20 }
 0x579   : > { %v15401_v8 = vpop.f32.mrf.mxu1 }
 0x57a   : > { %17253 = vst [vmem:[#allocation75_spill] sm:$0xff] %v15401_v8  ;;  %v15420_v8 = vpop.f32.mrf.mxu0 }
 0x57b   : > { %v15405_v54 = vpop.f32.mrf.mxu1  ;;  %11125 = vmatmul.mubr.msk.bf16.vlgmr.msra.gmra.mxu1 %vm4827_vm2, %v14506_v47  ;;  %17260 = vst [vmem:[#allocation82_spill] sm:$0xff] %v15420_v8 }
 0x57c   : > { %17255 = vst [vmem:[#allocation77_spill] sm:$0xff] %v15405_v54  ;;  %11207 = vmatpush3.bf16.msra.mxu1 %v15243_v9  ;;  %11128 = vmatprep.mubr.msk.bf16.mxu1 %vm4827_vm2, %v14532_v3  ;;  %v15430_v54 = vpop.f32.mrf.mxu0 }
 0x57d   : > { %v15412_v40 = vpop.f32.mrf.mxu1  ;;  %17263 = vst [vmem:[#allocation85_spill] sm:$0xff] %v15430_v54 }
 0x57e   : > { %17256 = vst [vmem:[#allocation78_spill] sm:$0xff] %v15412_v40 }
 0x57f   : > { %v15416_v26 = vpop.f32.mrf.mxu1 }
 0x580   : > { %17258 = vst [vmem:[#allocation80_spill] sm:$0xff] %v15416_v26  ;;  %v15436_v26 = vpop.f32.mrf.mxu0 }
 0x581   : > { %v15418_v20 = vpop.f32.mrf.mxu1  ;;  %17266 = vst [vmem:[#allocation88_spill] sm:$0xff] %v15436_v26 }
 0x582   : > { %17259 = vst [vmem:[#allocation81_spill] sm:$0xff] %v15418_v20 }
 0x583   : > { %v15422_v34 = vpop.f32.mrf.mxu1  ;;  %11129 = vmatmul.mubr.msk.bf16.gmra.mxu1 %vm4827_vm2, %v14547_v7 }
 0x584   : > { %17261 = vst [vmem:[#allocation83_spill] sm:$0xff] %v15422_v34  ;;  %11132 = vmatprep.mubr.msk.bf16.mxu1 %vm4827_vm2, %v17159_v57  ;;  %v15446_v34 = vpop.f32.mrf.mxu0 }
 0x585   : > { %v15428_v9 = vpop.f32.mrf.mxu1  ;;  %17269 = vst [vmem:[#allocation91_spill] sm:$0xff] %v15446_v34 }
 0x586   : > { %17262 = vst [vmem:[#allocation84_spill] sm:$0xff] %v15428_v9 }
 0x587   : > { %v15432_v40 = vpop.f32.mrf.mxu1 }
 0x588   : > { %17264 = vst [vmem:[#allocation86_spill] sm:$0xff] %v15432_v40  ;;  %v15452_v40 = vpop.f32.mrf.mxu0 }
 0x589   : > { %v15434_v33 = vpop.f32.mrf.mxu1  ;;  %17272 = vst [vmem:[#allocation94_spill] sm:$0xff] %v15452_v40 }
 0x58a   : > { %17265 = vst [vmem:[#allocation87_spill] sm:$0xff] %v15434_v33 }
 0x58b   : > { %v15438_v20 = vpop.f32.mrf.mxu1  ;;  %11133 = vmatmul.mubr.msk.bf16.gmra.mxu1 %vm4827_vm2, %v17161_v48 }
 0x58c   : > { %17267 = vst [vmem:[#allocation89_spill] sm:$0xff] %v15438_v20  ;;  %11136 = vmatprep.mubr.msk.bf16.mxu1 %vm4827_vm2, %v17163_v36  ;;  %v15462_v20 = vpop.f32.mrf.mxu0 }
 0x58d   : > { %v15444_v8 = vpop.f32.mrf.mxu1  ;;  %17275 = vst [vmem:[#allocation97_spill] sm:$0xff] %v15462_v20 }
 0x58e   : > { %17268 = vst [vmem:[#allocation90_spill] sm:$0xff] %v15444_v8  ;;  %v15470_v40 = vpop.f32.mrf.mxu0 }
 0x58f   : > { %v15448_v9 = vpop.f32.mrf.mxu1  ;;  %17278 = vst [vmem:[#allocation100_spill] sm:$0xff] %v15470_v40  ;;  %v5165_v40 = vadd.f32 %v15321_v0, %v14994_v18  ;;  %v5181_v0 = vadd.f32 %v15337_v35, %v15036_v44 }
 0x590   : > { %17270 = vst [vmem:[#allocation92_spill] sm:$0xff] %v15448_v9 }
 0x591   : > { %v15450_v54 = vpop.f32.mrf.mxu1 }
 0x592   : > { %17271 = vst [vmem:[#allocation93_spill] sm:$0xff] %v15450_v54  ;;  %v5170_v54 = vadd.f32 %v15307_v4, %v14966_v55  ;;  %v15484_v55 = vpop.f32.mrf.mxu0 }
 0x593   : > { %v15454_v33 = vpop.f32.mrf.mxu1  ;;  %11137 = vmatmul.mubr.msk.bf16.gmra.mxu1 %vm4827_vm2, %v17165_v12  ;;  %17280 = vst [vmem:[#allocation102_spill] sm:$0xff] %v15484_v55 }
 0x594   : > { %17273 = vst [vmem:[#allocation95_spill] sm:$0xff] %v15454_v33  ;;  %11140 = vmatprep.mubr.msk.bf16.mxu1 %vm4827_vm2, %v14647_v51  ;;  %v5162_v51 = vadd.f32 %v15315_v14, %v14974_v22 }
 0x595   : > { %v15460_v26 = vpop.f32.mrf.mxu1 }
 0x596   : > { %17274 = vst [vmem:[#allocation96_spill] sm:$0xff] %v15460_v26 }
 0x597   : > { %v15464_v8 = vpop.f32.mrf.mxu1 }
 0x598   : > { %17276 = vst [vmem:[#allocation98_spill] sm:$0xff] %v15464_v8 }
 0x599   : > { %v15466_v34 = vpop.f32.mrf.mxu1 }
 0x59a   : > { %17277 = vst [vmem:[#allocation99_spill] sm:$0xff] %v15466_v34  ;;  %v5173_v34 = vadd.f32 %v15317_v61, %v14981_v10 }
 0x59b   : > { %v10958_v33 = vpop.f32.mrf.mxu1  ;;  %11141 = vmatmul.mubr.msk.bf16.gmra.mxu1 %vm4827_vm2, %v17168_v16 }
 0x59c   : > { %v15476_v9 = vadd.f32 %v10958_v33, %v5170_v54  ;;  %11144 = vmatprep.mubr.msk.bf16.mxu1 %vm4827_vm2, %v14683_v24  ;;  %v5186_v33 = vadd.f32 %v15323_v6, %v14998_v53  ;;  %v15494_v54 = vpop.f32.mrf.mxu0  ;;  %v5189_v53 = vadd.f32 %v15333_v29, %v15025_v21  ;;  %v5194_v21 = vadd.f32 %v15347_v46, %v15052_v49  ;;  %v17285_v46 = vld [vmem:[#allocation48_spill] sm:$0xff] }
 0x59d   : > { %v5485_v20 = vpop.f32.mrf.mxu1  ;;  %17281 = vst [vmem:[#allocation103_spill] sm:$0xff] %v15494_v54 }
 0x59e   : > { %17279 = vst [vmem:[#allocation101_spill] sm:$0xff] %v15476_v9  ;;  %v15482_v8 = vadd.f32 %v5485_v20, %v5162_v51  ;;  %v5178_v51 = vadd.f32 %v15331_v38, %v15012_v45  ;;  %v15508_v6 = vpop.f32.mrf.mxu0  ;;  %v5202_v38 = vadd.f32 %v15341_v42, %v15042_v30  ;;  %v5205_v30 = vadd.f32 %v15351_v56, %v15066_v62  ;;  %v17287_v62 = vld [vmem:[#allocation3_spill] sm:$0xff] }
 0x59f   : > { %v10959_v4 = vpop.f32.mrf.mxu1  ;;  %17282 = vst [vmem:[#allocation104_spill] sm:$0xff] %v15508_v6  ;;  %v5210_v56 = vadd.f32 %v15363_v5, %v17287_v62  ;;  %v17292_v62 = vld [vmem:[#allocation10_spill] sm:$0xff]  ;;  %v17333_v6 = vld [vmem:[#allocation93_spill] sm:$0xff] }
 0x5a0   : > { %v15488_v26 = vadd.f32 %v10959_v4, %v5173_v34 }
 0x5a1   : > { %v5488_v22 = vpop.f32.mrf.mxu1 }
 0x5a2   : > { %v15492_v14 = vadd.f32 %v5488_v22, %v5165_v40 }
 0x5a3   : > { %v10962_v9 = vpop.f32.mrf.mxu1  ;;  %11145 = vmatmul.mubr.msk.bf16.gmra.mxu1 %vm4827_vm2, %v17174_v1 }
 0x5a4   : > { %v15500_v10 = vadd.f32 %v10962_v9, %v5186_v33  ;;  %11148 = vmatprep.mubr.msk.bf16.mxu1 %vm4827_vm2, %v14719_v37  ;;  %v15518_v9 = vpop.f32.mrf.mxu0  ;;  %v5197_v33 = vadd.f32 %v15353_v58, %v15076_v43 }
 0x5a5   : > { %v5501_v18 = vpop.f32.mrf.mxu1  ;;  %17283 = vst [vmem:[#allocation105_spill] sm:$0xff] %v15518_v9 }
 0x5a6   : > { %v15506_v34 = vadd.f32 %v5501_v18, %v5178_v51  ;;  %v15532_v35 = vpop.f32.mrf.mxu0  ;;  %v5218_v18 = vadd.f32 %v15357_v15, %v17285_v46  ;;  %v5221_v15 = vadd.f32 %v15367_v23, %v15106_v59  ;;  %v17290_v59 = vld [vmem:[#allocation7_spill] sm:$0xff] }
 0x5a7   : > { %v10963_v20 = vpop.f32.mrf.mxu1  ;;  %17284 = vst [vmem:[#allocation106_spill] sm:$0xff] %v15532_v35  ;;  %v5226_v23 = vadd.f32 %v15379_v63, %v17290_v59  ;;  %v17297_v59 = vld [vmem:[#allocation37_spill] sm:$0xff] }
 0x5a8   : > { %v15512_v61 = vadd.f32 %v10963_v20, %v5189_v53  ;;  %v15542_v20 = vpop.f32.mrf.mxu0 }
 0x5a9   : > { %v5504_v45 = vpop.f32.mrf.mxu1  ;;  %17286 = vst [vmem:[#allocation48_spill] sm:$0xff] %v15542_v20 }
 0x5aa   : > { %v15516_v40 = vadd.f32 %v5504_v45, %v5181_v0 }
 0x5ab   : > { %v10966_v4 = vpop.f32.mrf.mxu1  ;;  %11149 = vmatmul.mubr.msk.bf16.gmra.mxu1 %vm4827_vm2, %v14737_v50 }
 0x5ac   : > { %v15524_v29 = vadd.f32 %v10966_v4, %v5202_v38  ;;  %11152 = vmatprep.mubr.msk.bf16.mxu1 %vm4827_vm2, %v14761_v19  ;;  %v15556_v38 = vpop.f32.mrf.mxu0 }
 0x5ad   : > { %v5517_v44 = vpop.f32.mrf.mxu1  ;;  %17288 = vst [vmem:[#allocation3_spill] sm:$0xff] %v15556_v38 }
 0x5ae   : > { %v15530_v42 = vadd.f32 %v5517_v44, %v5194_v21  ;;  %v5213_v21 = vadd.f32 %v15369_v39, %v15117_v52 }
 0x5af   : > { %v10967_v22 = vpop.f32.mrf.mxu1 }
 0x5b0   : > { %v15536_v51 = vadd.f32 %v10967_v22, %v5205_v30  ;;  %v5234_v30 = vadd.f32 %v15373_v41, %v15122_v2  ;;  %v5237_v2 = vadd.f32 %v15383_v17, %v15146_v27 }
 0x5b1   : > { %v5520_v49 = vpop.f32.mrf.mxu1 }
 0x5b2   : > { %v15540_v53 = vadd.f32 %v5520_v49, %v5197_v33  ;;  %v15566_v33 = vpop.f32.mrf.mxu0 }
 0x5b3   : > { %v10970_v0 = vpop.f32.mrf.mxu1  ;;  %11153 = vmatmul.mubr.msk.bf16.gmra.mxu1 %vm4827_vm2, %v17180_v25  ;;  %17289 = vst [vmem:[#allocation107_spill] sm:$0xff] %v15566_v33  ;;  %v17312_v33 = vld [vmem:[#allocation81_spill] sm:$0xff] }
 0x5b4   : > { %v15548_v45 = vadd.f32 %v10970_v0, %v5218_v18  ;;  %11156 = vmatprep.mubr.msk.bf16.mxu1 %vm4827_vm2, %v14802_v13  ;;  %v15580_v39 = vpop.f32.mrf.mxu0  ;;  %v7563_v0 = vrot.slane %v14506_v47, 1 }
 0x5b5   : > { %v5533_v43 = vpop.f32.mrf.mxu1  ;;  %17291 = vst [vmem:[#allocation7_spill] sm:$0xff] %v15580_v39 }
 0x5b6   : > { %v15554_v58 = vadd.f32 %v5533_v43, %v5210_v56  ;;  %v17293_v56 = vld [vmem:[#allocation71_spill] sm:$0xff]  ;;  %v15592_v27 = vpop.f32.mrf.mxu0 }
 0x5b7   : > { %v10971_v4 = vpop.f32.mrf.mxu1  ;;  %v5229_v43 = vadd.f32 %v17293_v56, %v17292_v62  ;;  %17295 = vst [vmem:[#allocation10_spill] sm:$0xff] %v15592_v27  ;;  %v17302_v27 = vld [vmem:[#allocation75_spill] sm:$0xff] }
 0x5b8   : > { %v15560_v44 = vadd.f32 %v10971_v4, %v5221_v15  ;;  %v7562_v4 = vrot.slane %v14490_v28, 1 }
 0x5b9   : > { %v5536_v5 = vpop.f32.mrf.mxu1 }
 0x5ba   : > { %v15564_v22 = vadd.f32 %v5536_v5, %v5213_v21  ;;  %v17294_v21 = vld [vmem:[#allocation11_spill] sm:$0xff]  ;;  %v7564_v47 = vsel %vm1293_vm6, %v7562_v4, %v7563_v0  ;;  %v7567_v4 = vrot.slane %v14547_v7, 1 }
 0x5bb   : > { %v10974_v49 = vpop.f32.mrf.mxu1  ;;  %11157 = vmatmul.mubr.msk.bf16.gmra.mxu1 %vm4827_vm2, %v14825_v60  ;;  %v5250_v5 = vadd.f32 %v15389_v31, %v17294_v21  ;;  %v7565_v31 = vrot.slane %v14532_v3, 1  ;;  %v17301_v21 = vld [vmem:[#allocation19_spill] sm:$0xff] }
 0x5bc   : > { %v15572_v46 = vadd.f32 %v10974_v49, %v5234_v30  ;;  %11160 = vmatprep.mubr.msk.bf16.mxu1 %vm4827_vm2, %v14842_v11  ;;  %v17296_v49 = vld [vmem:[#allocation50_spill] sm:$0xff] }
 0x5bd   : > { %v5549_v52 = vpop.f32.mrf.mxu1  ;;  %v7568_v7 = vsel %vm1293_vm6, %v7565_v31, %v7567_v4 }
 0x5be   : > { %v15578_v41 = vadd.f32 %v5549_v52, %v5226_v23  ;;  %v5242_v23 = vadd.f32 %v15395_v32, %v17297_v59  ;;  %v5245_v32 = vadd.f32 %v17302_v27, %v17301_v21  ;;  %v17304_v59 = vld [vmem:[#allocation77_spill] sm:$0xff]  ;;  %v17308_v21 = vld [vmem:[#allocation52_spill] sm:$0xff] }
 0x5bf   : > { %v10975_v18 = vpop.f32.mrf.mxu1 }
 0x5c0   : > { %v15585_v63 = vadd.f32 %v10975_v18, %v5237_v2  ;;  %v17298_v2 = vld [vmem:[#allocation40_spill] sm:$0xff]  ;;  %v17299_v18 = vld [vmem:[#allocation74_spill] sm:$0xff] }
 0x5c1   : > { %v5552_v15 = vpop.f32.mrf.mxu1  ;;  %v5253_v62 = vadd.f32 %v17299_v18, %v17298_v2  ;;  %v7566_v2 = vsel %vm1293_vm6, %v7563_v0, %v7565_v31  ;;  %v17306_v18 = vld [vmem:[#allocation20_spill] sm:$0xff]  ;;  %v7569_v0 = vrot.slane %v17159_v57, 1  ;;  %v7571_v31 = vrot.slane %v17161_v48, 1 }
 0x5c2   : > { %v15590_v30 = vadd.f32 %v5552_v15, %v5229_v43  ;;  %v15607_v43 = vpop.f32.mrf.mxu0 }
 0x5c3   : > { %v10978_v17 = vpop.f32.mrf.mxu1  ;;  %11161 = vmatmul.mubr.msk.bf16.gmra.mxu1 %vm4827_vm2, %v17296_v49  ;;  %17300 = vst [vmem:[#allocation71_spill] sm:$0xff] %v15607_v43  ;;  %v17307_v43 = vld [vmem:[#allocation78_spill] sm:$0xff]  ;;  %v7572_v48 = vsel %vm1293_vm6, %v7569_v0, %v7571_v31 }
 0x5c4   : > { %v15599_v52 = vadd.f32 %v10978_v17, %v5250_v5  ;;  %11208 = vmatprep.mubr.msk.bf16.mxu1 %vm4827_vm2, %v7564_v47  ;;  %v17303_v47 = vld [vmem:[#allocation23_spill] sm:$0xff]  ;;  %v5258_v27 = vadd.f32 %v17307_v43, %v17306_v18 }
 0x5c5   : > { %v5565_v28 = vpop.f32.mrf.mxu1  ;;  %v5266_v39 = vadd.f32 %v17304_v59, %v17303_v47  ;;  %v17314_v18 = vld [vmem:[#allocation83_spill] sm:$0xff] }
 0x5c6   : > { %v15605_v56 = vadd.f32 %v5565_v28, %v5242_v23  ;;  %v15619_v23 = vpop.f32.mrf.mxu0 }
 0x5c7   : > { %v10979_v15 = vpop.f32.mrf.mxu1  ;;  %17305 = vst [vmem:[#allocation11_spill] sm:$0xff] %v15619_v23  ;;  %v17311_v23 = vld [vmem:[#allocation53_spill] sm:$0xff] }
 0x5c8   : > { %v15612_v5 = vadd.f32 %v10979_v15, %v5253_v62  ;;  %v15633_v59 = vpop.f32.mrf.mxu0  ;;  %v5261_v43 = vadd.f32 %v17312_v33, %v17311_v23 }
 0x5c9   : > { %v5568_v17 = vpop.f32.mrf.mxu1  ;;  %17310 = vst [vmem:[#allocation50_spill] sm:$0xff] %v15633_v59  ;;  %v17322_v59 = vld [vmem:[#allocation87_spill] sm:$0xff] }
 0x5ca   : > { %v15616_v3 = vadd.f32 %v5568_v17, %v5245_v32  ;;  %v17309_v32 = vld [vmem:[#allocation80_spill] sm:$0xff] }
 0x5cb   : > { %v10982_v28 = vpop.f32.mrf.mxu1  ;;  %11209 = vmatmul.mubr.msk.bf16.vlgmr.msra.gmra.mxu1 %vm4827_vm2, %v7566_v2  ;;  %v5269_v17 = vadd.f32 %v17309_v32, %v17308_v21  ;;  %v17316_v21 = vld [vmem:[#allocation16_spill] sm:$0xff] }
 0x5cc   : > { %v15625_v62 = vadd.f32 %v10982_v28, %v5266_v39  ;;  %11212 = vmatprep.mubr.msk.bf16.mxu1 %vm4827_vm2, %v7568_v7  ;;  %v17313_v7 = vld [vmem:[#allocation54_spill] sm:$0xff]  ;;  %v17317_v32 = vld [vmem:[#allocation84_spill] sm:$0xff] }
 0x5cd   : > { %v5581_v15 = vpop.f32.mrf.mxu1  ;;  %v5282_v38 = vadd.f32 %v17314_v18, %v17313_v7  ;;  %v5274_v33 = vadd.f32 %v17317_v32, %v17316_v21  ;;  %v17324_v32 = vld [vmem:[#allocation89_spill] sm:$0xff] }
 0x5ce   : > { %v15630_v47 = vadd.f32 %v5581_v15, %v5258_v27  ;;  %v7570_v27 = vsel %vm1293_vm6, %v7567_v4, %v7569_v0  ;;  %v15645_v15 = vpop.f32.mrf.mxu0  ;;  %v7573_v4 = vrot.slane %v17163_v36, 1  ;;  %v7575_v0 = vrot.slane %v17165_v12, 1 }
 0x5cf   : > { %v10983_v2 = vpop.f32.mrf.mxu1  ;;  %17315 = vst [vmem:[#allocation37_spill] sm:$0xff] %v15645_v15  ;;  %v17321_v15 = vld [vmem:[#allocation26_spill] sm:$0xff] }
 0x5d0   : > { %v15638_v39 = vadd.f32 %v10983_v2, %v5269_v17  ;;  %v17318_v2 = vld [vmem:[#allocation57_spill] sm:$0xff]  ;;  %v15659_v18 = vpop.f32.mrf.mxu0  ;;  %v5277_v21 = vadd.f32 %v17322_v59, %v17321_v15  ;;  %v7576_v12 = vsel %vm1293_vm6, %v7573_v4, %v7575_v0 }
 0x5d1   : > { %v5584_v28 = vpop.f32.mrf.mxu1  ;;  %17320 = vst [vmem:[#allocation40_spill] sm:$0xff] %v15659_v18  ;;  %v17332_v18 = vld [vmem:[#allocation62_spill] sm:$0xff] }
 0x5d2   : > { %v15642_v20 = vadd.f32 %v5584_v28, %v5261_v43  ;;  %v17319_v43 = vld [vmem:[#allocation86_spill] sm:$0xff] }
 0x5d3   : > { %v10986_v57 = vpop.f32.mrf.mxu1  ;;  %11213 = vmatmul.mubr.msk.bf16.gmra.mxu1 %vm4827_vm2, %v7570_v27  ;;  %v5285_v28 = vadd.f32 %v17319_v43, %v17318_v2  ;;  %v17326_v2 = vld [vmem:[#allocation60_spill] sm:$0xff]  ;;  %v17327_v43 = vld [vmem:[#allocation90_spill] sm:$0xff] }
 0x5d4   : > { %v15651_v23 = vadd.f32 %v10986_v57, %v5282_v38  ;;  %11216 = vmatprep.mubr.msk.bf16.mxu1 %vm4827_vm2, %v7572_v48  ;;  %v17323_v48 = vld [vmem:[#allocation58_spill] sm:$0xff]  ;;  %v5290_v59 = vadd.f32 %v17327_v43, %v17326_v2  ;;  %v5293_v2 = vadd.f32 %v17333_v6, %v17332_v18  ;;  %v17335_v43 = vld [vmem:[#allocation95_spill] sm:$0xff] }
 0x5d5   : > { %v5597_v17 = vpop.f32.mrf.mxu1  ;;  %v5298_v35 = vadd.f32 %v17324_v32, %v17323_v48 }
 0x5d6   : > { %v15656_v7 = vadd.f32 %v5597_v17, %v5274_v33  ;;  %v7574_v33 = vsel %vm1293_vm6, %v7571_v31, %v7573_v4  ;;  %v15671_v17 = vpop.f32.mrf.mxu0  ;;  %v17330_v31 = vld [vmem:[#allocation51_spill] sm:$0xff]  ;;  %v7579_v4 = vrot.slane %v17168_v16, 1 }
 0x5d7   : > { %v10987_v27 = vpop.f32.mrf.mxu1  ;;  %17325 = vst [vmem:[#allocation74_spill] sm:$0xff] %v15671_v17  ;;  %v7577_v32 = vrot.slane %v17330_v31, 1  ;;  %v17338_v31 = vld [vmem:[#allocation96_spill] sm:$0xff] }
 0x5d8   : > { %v15664_v38 = vadd.f32 %v10987_v27, %v5285_v28  ;;  %v17328_v27 = vld [vmem:[#allocation24_spill] sm:$0xff]  ;;  %v15685_v17 = vpop.f32.mrf.mxu0 }
 0x5d9   : > { %v5600_v57 = vpop.f32.mrf.mxu1  ;;  %17331 = vst [vmem:[#allocation19_spill] sm:$0xff] %v15685_v17  ;;  %v7580_v16 = vsel %vm1293_vm6, %v7577_v32, %v7579_v4  ;;  %v17343_v17 = vld [vmem:[#allocation99_spill] sm:$0xff] }
 0x5da   : > { %v15668_v9 = vadd.f32 %v5600_v57, %v5277_v21  ;;  %v17329_v21 = vld [vmem:[#allocation92_spill] sm:$0xff] }
 0x5db   : > { %v10990_v36 = vpop.f32.mrf.mxu1  ;;  %11217 = vmatmul.mubr.msk.bf16.gmra.mxu1 %vm4827_vm2, %v7574_v33  ;;  %v5301_v57 = vadd.f32 %v17329_v21, %v17328_v27  ;;  %v17337_v21 = vld [vmem:[#allocation28_spill] sm:$0xff] }
 0x5dc   : > { %v15677_v15 = vadd.f32 %v10990_v36, %v5298_v35  ;;  %11220 = vmatprep.mubr.msk.bf16.mxu1 %vm4827_vm2, %v7576_v12  ;;  %v17334_v12 = vld [vmem:[#allocation64_spill] sm:$0xff]  ;;  %v5306_v6 = vadd.f32 %v17338_v31, %v17337_v21  ;;  %v17344_v31 = vld [vmem:[#allocation101_spill] sm:$0xff] }
 0x5dd   : > { %v5613_v28 = vpop.f32.mrf.mxu1  ;;  %v5314_v54 = vadd.f32 %v17335_v43, %v17334_v12 }
 0x5de   : > { %v15682_v48 = vadd.f32 %v5613_v28, %v5290_v59  ;;  %v7578_v59 = vsel %vm1293_vm6, %v7575_v0, %v7577_v32  ;;  %v15697_v28 = vpop.f32.mrf.mxu0  ;;  %v7581_v0 = vrot.slane %v14683_v24, 1  ;;  %v7583_v32 = vrot.slane %v17174_v1, 1 }
 0x5df   : > { %v10991_v33 = vpop.f32.mrf.mxu1  ;;  %17336 = vst [vmem:[#allocation75_spill] sm:$0xff] %v15697_v28  ;;  %v17342_v28 = vld [vmem:[#allocation66_spill] sm:$0xff] }
 0x5e0   : > { %v15690_v35 = vadd.f32 %v10991_v33, %v5301_v57  ;;  %v17340_v33 = vld [vmem:[#allocation65_spill] sm:$0xff]  ;;  %v15711_v43 = vpop.f32.mrf.mxu0  ;;  %v5309_v21 = vadd.f32 %v17343_v17, %v17342_v28  ;;  %v7584_v1 = vsel %vm1293_vm6, %v7581_v0, %v7583_v32  ;;  %v17346_v17 = vld [vmem:[#allocation42_spill] sm:$0xff] }
 0x5e1   : > { %v5616_v36 = vpop.f32.mrf.mxu1  ;;  %v5991_v28 = vadd.f32 %v17346_v17, %v15482_v8  ;;  %v17349_v17 = vld [vmem:[#allocation47_spill] sm:$0xff] }
 0x5e2   : > { %v15694_v55 = vadd.f32 %v5616_v36, %v5293_v2  ;;  %v17341_v2 = vld [vmem:[#allocation98_spill] sm:$0xff] }
 0x5e3   : > { %v10994_v27 = vpop.f32.mrf.mxu1  ;;  %11221 = vmatmul.mubr.msk.bf16.gmra.mxu1 %vm4827_vm2, %v7578_v59  ;;  %v5317_v36 = vadd.f32 %v17341_v2, %v17340_v33 }
 0x5e4   : > { %v15703_v18 = vadd.f32 %v10994_v27, %v5314_v54  ;;  %11224 = vmatprep.mubr.msk.bf16.mxu1 %vm4827_vm2, %v7580_v16 }
 0x5e5   : > { %v5629_v57 = vpop.f32.mrf.mxu1 }
 0x5e6   : > { %17339 = vst [vmem:[#allocation23_spill] sm:$0xff] %v15703_v18  ;;  %v15708_v12 = vadd.f32 %v5629_v57, %v5306_v6  ;;  %v17345_v18 = vld [vmem:[#allocation41_spill] sm:$0xff]  ;;  %v7582_v6 = vsel %vm1293_vm6, %v7579_v4, %v7581_v0  ;;  %v15723_v57 = vpop.f32.mrf.mxu0  ;;  %v7587_v0 = vrot.slane %v14737_v50, 1 }
 0x5e7   : > { %v10995_v59 = vpop.f32.mrf.mxu1  ;;  %v5993_v33 = vadd.f32 %v17345_v18, %v17344_v31  ;;  %v17347_v18 = vld [vmem:[#allocation44_spill] sm:$0xff] }
 0x5e8   : > { %v15716_v54 = vadd.f32 %v10995_v59, %v5317_v36  ;;  %v5994_v4 = vadd.f32 %v17347_v18, %v15488_v26 }
 0x5e9   : > { %v5632_v27 = vpop.f32.mrf.mxu1 }
 0x5ea   : > { %v15718_v16 = vadd.f32 %v5632_v27, %v5309_v21  ;;  %v7585_v21 = vrot.slane %v14719_v37, 1  ;;  %v15737_v27 = vpop.f32.mrf.mxu0 }
 0x5eb   : > { %v11042_v24 = vpop.f32.mrf.mxu1  ;;  %11225 = vmatmul.mubr.msk.bf16.gmra.mxu1 %vm4827_vm2, %v7582_v6  ;;  %v17348_v6 = vld [vmem:[#allocation45_spill] sm:$0xff] }
 0x5ec   : > { %v15727_v2 = vadd.f32 %v11042_v24, %v5993_v33  ;;  %11228 = vmatprep.mubr.msk.bf16.mxu1 %vm4827_vm2, %v7584_v1  ;;  %v5992_v24 = vadd.f32 %v17348_v6, %v15492_v14  ;;  %v7586_v26 = vsel %vm1293_vm6, %v7583_v32, %v7585_v21  ;;  %v7588_v50 = vsel %vm1293_vm6, %v7585_v21, %v7587_v0  ;;  %v17350_v14 = vld [vmem:[#allocation27_spill] sm:$0xff] }
 0x5ed   : > { %v6227_v36 = vpop.f32.mrf.mxu1  ;;  %v7591_v21 = vrot.slane %v17180_v25, 1 }
 0x5ee   : > { %v15732_v59 = vadd.f32 %v6227_v36, %v5991_v28  ;;  %v5997_v28 = vadd.f32 %v17349_v17, %v15500_v10  ;;  %v15749_v36 = vpop.f32.mrf.mxu0  ;;  %v17351_v10 = vld [vmem:[#allocation2_spill] sm:$0xff] }
 0x5ef   : > { %v11043_v31 = vpop.f32.mrf.mxu1  ;;  %v5998_v32 = vadd.f32 %v17351_v10, %v15512_v61 }
 0x5f0   : > { %v15740_v33 = vadd.f32 %v11043_v31, %v5994_v4  ;;  %v5995_v4 = vadd.f32 %v17350_v14, %v15506_v34  ;;  %v17353_v14 = vld [vmem:[#allocation25_spill] sm:$0xff] }
 0x5f1   : > { %v6230_v1 = vpop.f32.mrf.mxu1 }
 0x5f2   : > { %v15744_v8 = vadd.f32 %v6230_v1, %v5992_v24  ;;  %v7589_v24 = vrot.slane %v14761_v19, 1  ;;  %v15763_v1 = vpop.f32.mrf.mxu0 }
 0x5f3   : > { %v11046_v37 = vpop.f32.mrf.mxu1  ;;  %11229 = vmatmul.mubr.msk.bf16.gmra.mxu1 %vm4827_vm2, %v7586_v26  ;;  %v17352_v26 = vld [vmem:[#allocation4_spill] sm:$0xff] }
 0x5f4   : > { %v15753_v18 = vadd.f32 %v11046_v37, %v5997_v28  ;;  %11232 = vmatprep.mubr.msk.bf16.mxu1 %vm4827_vm2, %v7588_v50  ;;  %v5996_v37 = vadd.f32 %v17352_v26, %v15516_v40  ;;  %v7590_v61 = vsel %vm1293_vm6, %v7587_v0, %v7589_v24  ;;  %v7592_v25 = vsel %vm1293_vm6, %v7589_v24, %v7591_v21  ;;  %v17354_v40 = vld [vmem:[#allocation5_spill] sm:$0xff] }
 0x5f5   : > { %v6243_v31 = vpop.f32.mrf.mxu1  ;;  %v7595_v24 = vrot.slane %v14825_v60, 1 }
 0x5f6   : > { %v15758_v6 = vadd.f32 %v6243_v31, %v5995_v4  ;;  %v6001_v4 = vadd.f32 %v17353_v14, %v15524_v29  ;;  %v15775_v31 = vpop.f32.mrf.mxu0  ;;  %v17355_v29 = vld [vmem:[#allocation6_spill] sm:$0xff] }
 0x5f7   : > { %v11047_v17 = vpop.f32.mrf.mxu1  ;;  %v6002_v0 = vadd.f32 %v17355_v29, %v15536_v51 }
 0x5f8   : > { %v15766_v28 = vadd.f32 %v11047_v17, %v5998_v32  ;;  %v5999_v32 = vadd.f32 %v17354_v40, %v15530_v42  ;;  %v17357_v40 = vld [vmem:[#allocation32_spill] sm:$0xff] }
 0x5f9   : > { %v6246_v50 = vpop.f32.mrf.mxu1 }
 0x5fa   : > { %v15770_v34 = vadd.f32 %v6246_v50, %v5996_v37  ;;  %v7593_v37 = vrot.slane %v14802_v13, 1  ;;  %v15789_v50 = vpop.f32.mrf.mxu0 }
 0x5fb   : > { %v11050_v19 = vpop.f32.mrf.mxu1  ;;  %11233 = vmatmul.mubr.msk.bf16.gmra.mxu1 %vm4827_vm2, %v7590_v61  ;;  %v17356_v61 = vld [vmem:[#allocation8_spill] sm:$0xff] }
 0x5fc   : > { %v15779_v10 = vadd.f32 %v11050_v19, %v6001_v4  ;;  %11236 = vmatprep.mubr.msk.bf16.mxu1 %vm4827_vm2, %v7592_v25  ;;  %v6000_v19 = vadd.f32 %v17356_v61, %v15540_v53  ;;  %v7594_v51 = vsel %vm1293_vm6, %v7591_v21, %v7593_v37  ;;  %v7596_v60 = vsel %vm1293_vm6, %v7593_v37, %v7595_v24  ;;  %v17358_v53 = vld [vmem:[#allocation9_spill] sm:$0xff] }
 0x5fd   : > { %v6259_v17 = vpop.f32.mrf.mxu1  ;;  %v7599_v37 = vrot.slane %v17296_v49, 1 }
 0x5fe   : > { %v15784_v26 = vadd.f32 %v6259_v17, %v5999_v32  ;;  %v6005_v32 = vadd.f32 %v17357_v40, %v15548_v45  ;;  %v15801_v17 = vpop.f32.mrf.mxu0  ;;  %v17359_v45 = vld [vmem:[#allocation12_spill] sm:$0xff] }
 0x5ff   : > { %v11051_v14 = vpop.f32.mrf.mxu1  ;;  %v6006_v21 = vadd.f32 %v17359_v45, %v15560_v44 }
 0x600   : > { %v15792_v4 = vadd.f32 %v11051_v14, %v6002_v0  ;;  %v6003_v0 = vadd.f32 %v17358_v53, %v15554_v58  ;;  %v17361_v53 = vld [vmem:[#allocation14_spill] sm:$0xff] }
 0x601   : > { %v6262_v25 = vpop.f32.mrf.mxu1 }
 0x602   : > { %v15796_v42 = vadd.f32 %v6262_v25, %v6000_v19  ;;  %v7597_v19 = vrot.slane %v14842_v11, 1  ;;  %v15815_v25 = vpop.f32.mrf.mxu0 }
 0x603   : > { %v11054_v13 = vpop.f32.mrf.mxu1  ;;  %11237 = vmatmul.mubr.msk.bf16.gmra.mxu1 %vm4827_vm2, %v7594_v51  ;;  %v17360_v51 = vld [vmem:[#allocation13_spill] sm:$0xff] }
 0x604   : > { %v15805_v29 = vadd.f32 %v11054_v13, %v6005_v32  ;;  %11240 = vmatprep.mubr.msk.bf16.mxu1 %vm4827_vm2, %v7596_v60  ;;  %v6004_v13 = vadd.f32 %v17360_v51, %v15564_v22  ;;  %v7598_v44 = vsel %vm1293_vm6, %v7595_v24, %v7597_v19  ;;  %v7600_v49 = vsel %vm1293_vm6, %v7597_v19, %v7599_v37  ;;  %v17363_v22 = vld [vmem:[#allocation17_spill] sm:$0xff]  ;;  %v17365_v24 = vld [vmem:[#allocation46_spill] sm:$0xff]  ;;  %v17366_v19 = vld [vmem:[#allocation36_spill] sm:$0xff] }
 0x605   : > { %v6275_v14 = vpop.f32.mrf.mxu1  ;;  %v17364_v51 = vld [vmem:[#allocation21_spill] sm:$0xff] }
 0x606   : > { %v15810_v61 = vadd.f32 %v6275_v14, %v6003_v0  ;;  %v6009_v0 = vadd.f32 %v17361_v53, %v15572_v46  ;;  %v15827_v14 = vpop.f32.mrf.mxu0 }
 0x607   : > { %v11055_v40 = vpop.f32.mrf.mxu1  ;;  %17362 = vst [vmem:[#allocation77_spill] sm:$0xff] %v15827_v14 }
 0x608   : > { %v15818_v32 = vadd.f32 %v11055_v40, %v6006_v21  ;;  %v6007_v21 = vadd.f32 %v17363_v22, %v15578_v41  ;;  %v15841_v53 = vpop.f32.mrf.mxu0  ;;  %v17367_v41 = vld [vmem:[#allocation39_spill] sm:$0xff] }
 0x609   : > { %v6278_v60 = vpop.f32.mrf.mxu1  ;;  %v6013_v22 = vadd.f32 %v17367_v41, %v15599_v52 }
 0x60a   : > { %v15822_v58 = vadd.f32 %v6278_v60, %v6004_v13  ;;  %v7601_v13 = vrot.slane %v17364_v51, 1  ;;  %v6010_v60 = vadd.f32 %v17365_v24, %v15585_v63  ;;  %v17369_v24 = vld [vmem:[#allocation15_spill] sm:$0xff] }
 0x60b   : > { %v11058_v11 = vpop.f32.mrf.mxu1  ;;  %11241 = vmatmul.mubr.msk.bf16.gmra.mxu1 %vm4827_vm2, %v7598_v44 }
 0x60c   : > { %v15831_v45 = vadd.f32 %v11058_v11, %v6009_v0  ;;  %11244 = vmatprep.mubr.msk.bf16.mxu1 %vm4827_vm2, %v7600_v49  ;;  %v6008_v0 = vadd.f32 %v17366_v19, %v15590_v30  ;;  %v17370_v19 = vld [vmem:[#allocation55_spill] sm:$0xff] }
 0x60d   : > { %v6291_v40 = vpop.f32.mrf.mxu1 }
 0x60e   : > { %v15837_v46 = vadd.f32 %v6291_v40, %v6007_v21  ;;  %v7602_v21 = vsel %vm1293_vm6, %v7599_v37, %v7601_v13  ;;  %v15852_v40 = vpop.f32.mrf.mxu0  ;;  %v17372_v13 = vld [vmem:[#allocation43_spill] sm:$0xff] }
 0x60f   : > { %v11059_v44 = vpop.f32.mrf.mxu1  ;;  %17368 = vst [vmem:[#allocation20_spill] sm:$0xff] %v15852_v40  ;;  %v6012_v41 = vadd.f32 %v17372_v13, %v15616_v3  ;;  %v17392_v40 = vld [vmem:[#allocation68_spill] sm:$0xff] }
 0x610   : > { %v15843_v14 = vadd.f32 %v11059_v44, %v6010_v60  ;;  %v6011_v60 = vadd.f32 %v17369_v24, %v15605_v56 }
 0x611   : > { %v6294_v11 = vpop.f32.mrf.mxu1 }
 0x612   : > { %v15847_v49 = vadd.f32 %v6294_v11, %v6008_v0  ;;  %v6014_v0 = vadd.f32 %v17370_v19, %v15612_v5  ;;  %v15863_v11 = vpop.f32.mrf.mxu0  ;;  %v17375_v5 = vld [vmem:[#allocation18_spill] sm:$0xff] }
 0x613   : > { %v11062_v51 = vpop.f32.mrf.mxu1  ;;  %11245 = vmatmul.mubr.msk.bf16.gmra.mxu1 %vm4827_vm2, %v7602_v21  ;;  %17371 = vst [vmem:[#allocation78_spill] sm:$0xff] %v15863_v11  ;;  %v6015_v19 = vadd.f32 %v17375_v5, %v15630_v47 }
 0x614   : > { %v15855_v63 = vadd.f32 %v11062_v51, %v6013_v22  ;;  %v17373_v51 = vld [vmem:[#allocation56_spill] sm:$0xff]  ;;  %v15873_v24 = vpop.f32.mrf.mxu0 }
 0x615   : > { %v6307_v44 = vpop.f32.mrf.mxu1  ;;  %v6017_v56 = vadd.f32 %v17373_v51, %v15625_v62  ;;  %17374 = vst [vmem:[#allocation52_spill] sm:$0xff] %v15873_v24  ;;  %v17378_v62 = vld [vmem:[#allocation22_spill] sm:$0xff] }
 0x616   : > { %v15859_v30 = vadd.f32 %v6307_v44, %v6011_v60  ;;  %v15883_v13 = vpop.f32.mrf.mxu0  ;;  %v6016_v51 = vadd.f32 %v17378_v62, %v15642_v20 }
 0x617   : > { %v11063_v52 = vpop.f32.mrf.mxu1  ;;  %17377 = vst [vmem:[#allocation80_spill] sm:$0xff] %v15883_v13 }
 0x618   : > { %v15865_v37 = vadd.f32 %v11063_v52, %v6014_v0  ;;  %v17376_v52 = vld [vmem:[#allocation59_spill] sm:$0xff]  ;;  %v15893_v5 = vpop.f32.mrf.mxu0 }
 0x619   : > { %v6310_v21 = vpop.f32.mrf.mxu1  ;;  %v6018_v3 = vadd.f32 %v17376_v52, %v15638_v39  ;;  %17380 = vst [vmem:[#allocation53_spill] sm:$0xff] %v15893_v5  ;;  %v17381_v39 = vld [vmem:[#allocation63_spill] sm:$0xff] }
 0x61a   : > { %v15869_v22 = vadd.f32 %v6310_v21, %v6012_v41  ;;  %v6019_v52 = vadd.f32 %v17381_v39, %v15656_v7  ;;  %v15903_v62 = vpop.f32.mrf.mxu0 }
 0x61b   : > { %v11066_v60 = vpop.f32.mrf.mxu1  ;;  %17383 = vst [vmem:[#allocation81_spill] sm:$0xff] %v15903_v62 }
 0x61c   : > { %v15875_v44 = vadd.f32 %v11066_v60, %v6017_v56  ;;  %v17379_v60 = vld [vmem:[#allocation61_spill] sm:$0xff]  ;;  %v15913_v39 = vpop.f32.mrf.mxu0 }
 0x61d   : > { %v6323_v11 = vpop.f32.mrf.mxu1  ;;  %v6021_v47 = vadd.f32 %v17379_v60, %v15651_v23  ;;  %v17384_v23 = vld [vmem:[#allocation67_spill] sm:$0xff]  ;;  %17386 = vst [vmem:[#allocation54_spill] sm:$0xff] %v15913_v39 }
 0x61e   : > { %v15879_v0 = vadd.f32 %v6323_v11, %v6015_v19  ;;  %v6020_v60 = vadd.f32 %v17384_v23, %v15668_v9  ;;  %v15923_v23 = vpop.f32.mrf.mxu0 }
 0x61f   : > { %v11067_v41 = vpop.f32.mrf.mxu1  ;;  %17389 = vst [vmem:[#allocation83_spill] sm:$0xff] %v15923_v23 }
 0x620   : > { %v15885_v21 = vadd.f32 %v11067_v41, %v6018_v3  ;;  %v17382_v41 = vld [vmem:[#allocation29_spill] sm:$0xff] }
 0x621   : > { %v6326_v24 = vpop.f32.mrf.mxu1  ;;  %v6022_v20 = vadd.f32 %v17382_v41, %v15664_v38  ;;  %v17387_v38 = vld [vmem:[#allocation33_spill] sm:$0xff] }
 0x622   : > { %v15889_v56 = vadd.f32 %v6326_v24, %v6016_v51  ;;  %v6023_v41 = vadd.f32 %v17387_v38, %v15682_v48  ;;  %v15933_v38 = vpop.f32.mrf.mxu0 }
 0x623   : > { %v11070_v11 = vpop.f32.mrf.mxu1  ;;  %17393 = vst [vmem:[#allocation16_spill] sm:$0xff] %v15933_v38 }
 0x624   : > { %v15895_v19 = vadd.f32 %v11070_v11, %v6021_v47  ;;  %v17385_v11 = vld [vmem:[#allocation31_spill] sm:$0xff] }
 0x625   : > { %v6339_v13 = vpop.f32.mrf.mxu1  ;;  %v6025_v7 = vadd.f32 %v17385_v11, %v15677_v15  ;;  %v17390_v15 = vld [vmem:[#allocation49_spill] sm:$0xff] }
 0x626   : > { %v15899_v3 = vadd.f32 %v6339_v13, %v6019_v52  ;;  %v6024_v11 = vadd.f32 %v17390_v15, %v15694_v55  ;;  %v15943_v15 = vpop.f32.mrf.mxu0 }
 0x627   : > { %v11071_v24 = vpop.f32.mrf.mxu1  ;;  %17396 = vst [vmem:[#allocation84_spill] sm:$0xff] %v15943_v15 }
 0x628   : > { %v15905_v51 = vadd.f32 %v11071_v24, %v6022_v20  ;;  %v17388_v24 = vld [vmem:[#allocation34_spill] sm:$0xff] }
 0x629   : > { %v6342_v5 = vpop.f32.mrf.mxu1  ;;  %v6026_v9 = vadd.f32 %v17388_v24, %v15690_v35  ;;  %v17394_v35 = vld [vmem:[#allocation35_spill] sm:$0xff] }
 0x62a   : > { %v15909_v47 = vadd.f32 %v6342_v5, %v6020_v60  ;;  %v6027_v24 = vadd.f32 %v17394_v35, %v15708_v12  ;;  %v15953_v35 = vpop.f32.mrf.mxu0 }
 0x62b   : > { %v11074_v13 = vpop.f32.mrf.mxu1  ;;  %17399 = vst [vmem:[#allocation57_spill] sm:$0xff] %v15953_v35 }
 0x62c   : > { %v15915_v52 = vadd.f32 %v11074_v13, %v6025_v7  ;;  %v17391_v13 = vld [vmem:[#allocation23_spill] sm:$0xff] }
 0x62d   : > { %v6355_v62 = vpop.f32.mrf.mxu1  ;;  %v6029_v48 = vadd.f32 %v17392_v40, %v17391_v13  ;;  %v17397_v40 = vld [vmem:[#allocation38_spill] sm:$0xff] }
 0x62e   : > { %v15919_v20 = vadd.f32 %v6355_v62, %v6023_v41  ;;  %v6028_v13 = vadd.f32 %v17397_v40, %v15718_v16  ;;  %v15963_v40 = vpop.f32.mrf.mxu0 }
 0x62f   : > { %v11075_v5 = vpop.f32.mrf.mxu1  ;;  %17402 = vst [vmem:[#allocation86_spill] sm:$0xff] %v15963_v40 }
 0x630   : > { %v15925_v60 = vadd.f32 %v11075_v5, %v6026_v9  ;;  %v17395_v5 = vld [vmem:[#allocation30_spill] sm:$0xff] }
 0x631   : > { %v6358_v39 = vpop.f32.mrf.mxu1  ;;  %v6030_v55 = vadd.f32 %v17395_v5, %v15716_v54  ;;  %v17400_v54 = vld [vmem:[#allocation70_spill] sm:$0xff] }
 0x632   : > { %v15929_v7 = vadd.f32 %v6358_v39, %v6024_v11  ;;  %v6729_v5 = vadd.f32 %v17400_v54, %v15732_v59  ;;  %v15973_v54 = vpop.f32.mrf.mxu0 }
 0x633   : > { %v11078_v62 = vpop.f32.mrf.mxu1  ;;  %17405 = vst [vmem:[#allocation26_spill] sm:$0xff] %v15973_v54 }
 0x634   : > { %v15935_v41 = vadd.f32 %v11078_v62, %v6029_v48  ;;  %v17398_v62 = vld [vmem:[#allocation69_spill] sm:$0xff] }
 0x635   : > { %v6371_v23 = vpop.f32.mrf.mxu1  ;;  %v6731_v12 = vadd.f32 %v17398_v62, %v15727_v2  ;;  %v17403_v2 = vld [vmem:[#allocation73_spill] sm:$0xff] }
 0x636   : > { %v15939_v9 = vadd.f32 %v6371_v23, %v6027_v24  ;;  %v6730_v62 = vadd.f32 %v17403_v2, %v15744_v8  ;;  %v15983_v2 = vpop.f32.mrf.mxu0 }
 0x637   : > { %v11079_v39 = vpop.f32.mrf.mxu1  ;;  %17408 = vst [vmem:[#allocation87_spill] sm:$0xff] %v15983_v2 }
 0x638   : > { %v15945_v11 = vadd.f32 %v11079_v39, %v6030_v55  ;;  %v17401_v39 = vld [vmem:[#allocation72_spill] sm:$0xff] }
 0x639   : > { %v6374_v38 = vpop.f32.mrf.mxu1  ;;  %v6732_v16 = vadd.f32 %v17401_v39, %v15740_v33  ;;  %v17406_v33 = vld [vmem:[#allocation79_spill] sm:$0xff] }
 0x63a   : > { %v15949_v48 = vadd.f32 %v6374_v38, %v6028_v13  ;;  %v6733_v39 = vadd.f32 %v17406_v33, %v15758_v6  ;;  %v15993_v33 = vpop.f32.mrf.mxu0 }
 0x63b   : > { %v11126_v23 = vpop.f32.mrf.mxu1  ;;  %17411 = vst [vmem:[#allocation58_spill] sm:$0xff] %v15993_v33 }
 0x63c   : > { %v15955_v24 = vadd.f32 %v11126_v23, %v6731_v12  ;;  %v17404_v23 = vld [vmem:[#allocation76_spill] sm:$0xff] }
 0x63d   : > { %v6892_v15 = vpop.f32.mrf.mxu1  ;;  %v6735_v59 = vadd.f32 %v17404_v23, %v15753_v18  ;;  %v17409_v18 = vld [vmem:[#allocation85_spill] sm:$0xff] }
 0x63e   : > { %v15959_v55 = vadd.f32 %v6892_v15, %v6729_v5  ;;  %v6734_v23 = vadd.f32 %v17409_v18, %v15770_v34  ;;  %v16003_v18 = vpop.f32.mrf.mxu0 }
 0x63f   : > { %v11127_v38 = vpop.f32.mrf.mxu1  ;;  %17414 = vst [vmem:[#allocation89_spill] sm:$0xff] %v16003_v18 }
 0x640   : > { %v15965_v13 = vadd.f32 %v11127_v38, %v6732_v16  ;;  %v17407_v38 = vld [vmem:[#allocation82_spill] sm:$0xff] }
 0x641   : > { %v6895_v35 = vpop.f32.mrf.mxu1  ;;  %v6736_v8 = vadd.f32 %v17407_v38, %v15766_v28  ;;  %v17412_v28 = vld [vmem:[#allocation91_spill] sm:$0xff] }
 0x642   : > { %v15969_v12 = vadd.f32 %v6895_v35, %v6730_v62  ;;  %v6737_v38 = vadd.f32 %v17412_v28, %v15784_v26  ;;  %v16013_v28 = vpop.f32.mrf.mxu0 }
 0x643   : > { %v11130_v15 = vpop.f32.mrf.mxu1  ;;  %17417 = vst [vmem:[#allocation60_spill] sm:$0xff] %v16013_v28 }
 0x644   : > { %v15975_v5 = vadd.f32 %v11130_v15, %v6735_v59  ;;  %v17410_v15 = vld [vmem:[#allocation88_spill] sm:$0xff] }
 0x645   : > { %v6908_v40 = vpop.f32.mrf.mxu1  ;;  %v6739_v6 = vadd.f32 %v17410_v15, %v15779_v10  ;;  %v17415_v10 = vld [vmem:[#allocation97_spill] sm:$0xff] }
 0x646   : > { %v15979_v16 = vadd.f32 %v6908_v40, %v6733_v39  ;;  %v6738_v15 = vadd.f32 %v17415_v10, %v15796_v42  ;;  %v16023_v10 = vpop.f32.mrf.mxu0 }
 0x647   : > { %v11131_v35 = vpop.f32.mrf.mxu1  ;;  %17420 = vst [vmem:[#allocation90_spill] sm:$0xff] %v16023_v10 }
 0x648   : > { %v15985_v62 = vadd.f32 %v11131_v35, %v6736_v8  ;;  %v17413_v35 = vld [vmem:[#allocation94_spill] sm:$0xff] }
 0x649   : > { %v6911_v54 = vpop.f32.mrf.mxu1  ;;  %v6740_v34 = vadd.f32 %v17413_v35, %v15792_v4  ;;  %v17418_v4 = vld [vmem:[#allocation102_spill] sm:$0xff] }
 0x64a   : > { %v15989_v59 = vadd.f32 %v6911_v54, %v6734_v23  ;;  %v6741_v35 = vadd.f32 %v17418_v4, %v15810_v61  ;;  %v16033_v4 = vpop.f32.mrf.mxu0 }
 0x64b   : > { %v11134_v40 = vpop.f32.mrf.mxu1  ;;  %17423 = vst [vmem:[#allocation24_spill] sm:$0xff] %v16033_v4 }
 0x64c   : > { %v15995_v39 = vadd.f32 %v11134_v40, %v6739_v6  ;;  %v17416_v40 = vld [vmem:[#allocation100_spill] sm:$0xff] }
 0x64d   : > { %v6924_v2 = vpop.f32.mrf.mxu1  ;;  %v6743_v26 = vadd.f32 %v17416_v40, %v15805_v29  ;;  %v17421_v29 = vld [vmem:[#allocation104_spill] sm:$0xff] }
 0x64e   : > { %v15999_v8 = vadd.f32 %v6924_v2, %v6737_v38  ;;  %v6742_v40 = vadd.f32 %v17421_v29, %v15822_v58  ;;  %v16043_v29 = vpop.f32.mrf.mxu0 }
 0x64f   : > { %v11135_v54 = vpop.f32.mrf.mxu1  ;;  %17426 = vst [vmem:[#allocation92_spill] sm:$0xff] %v16043_v29 }
 0x650   : > { %v16005_v23 = vadd.f32 %v11135_v54, %v6740_v34  ;;  %v17419_v54 = vld [vmem:[#allocation103_spill] sm:$0xff] }
 0x651   : > { %v6927_v33 = vpop.f32.mrf.mxu1  ;;  %v6744_v42 = vadd.f32 %v17419_v54, %v15818_v32  ;;  %v17424_v32 = vld [vmem:[#allocation106_spill] sm:$0xff] }
 0x652   : > { %v16009_v6 = vadd.f32 %v6927_v33, %v6738_v15  ;;  %v6745_v54 = vadd.f32 %v17424_v32, %v15837_v46  ;;  %v16053_v32 = vpop.f32.mrf.mxu0 }
 0x653   : > { %v11138_v2 = vpop.f32.mrf.mxu1  ;;  %17429 = vst [vmem:[#allocation51_spill] sm:$0xff] %v16053_v32 }
 0x654   : > { %v16015_v38 = vadd.f32 %v11138_v2, %v6743_v26  ;;  %v17422_v2 = vld [vmem:[#allocation105_spill] sm:$0xff] }
 0x655   : > { %v6940_v18 = vpop.f32.mrf.mxu1  ;;  %v6747_v61 = vadd.f32 %v17422_v2, %v15831_v45  ;;  %v17427_v45 = vld [vmem:[#allocation3_spill] sm:$0xff] }
 0x656   : > { %v16019_v34 = vadd.f32 %v6940_v18, %v6741_v35  ;;  %v6746_v2 = vadd.f32 %v17427_v45, %v15847_v49  ;;  %v16063_v45 = vpop.f32.mrf.mxu0 }
 0x657   : > { %v11139_v33 = vpop.f32.mrf.mxu1  ;;  %17433 = vst [vmem:[#allocation93_spill] sm:$0xff] %v16063_v45 }
 0x658   : > { %v16025_v15 = vadd.f32 %v11139_v33, %v6744_v42  ;;  %v17425_v33 = vld [vmem:[#allocation48_spill] sm:$0xff] }
 0x659   : > { %v6943_v28 = vpop.f32.mrf.mxu1  ;;  %v6748_v58 = vadd.f32 %v17425_v33, %v15843_v14  ;;  %v17430_v14 = vld [vmem:[#allocation7_spill] sm:$0xff] }
 0x65a   : > { %v16029_v26 = vadd.f32 %v6943_v28, %v6742_v40  ;;  %v6749_v33 = vadd.f32 %v17430_v14, %v15859_v30  ;;  %v17436_v30 = vld [vmem:[#allocation11_spill] sm:$0xff]  ;;  %v16075_v14 = vpop.f32.mrf.mxu0 }
 0x65b   : > { %v11142_v18 = vpop.f32.mrf.mxu1  ;;  %17437 = vst [vmem:[#allocation95_spill] sm:$0xff] %v16075_v14 }
 0x65c   : > { %v16035_v35 = vadd.f32 %v11142_v18, %v6747_v61  ;;  %v17428_v18 = vld [vmem:[#allocation107_spill] sm:$0xff] }
 0x65d   : > { %v6956_v10 = vpop.f32.mrf.mxu1  ;;  %v6751_v46 = vadd.f32 %v17428_v18, %v15855_v63  ;;  %v17434_v18 = vld [vmem:[#allocation71_spill] sm:$0xff] }
 0x65e   : > { %v16039_v42 = vadd.f32 %v6956_v10, %v6745_v54 }
 0x65f   : > { %v11143_v28 = vpop.f32.mrf.mxu1 }
 0x660   : > { %v16045_v40 = vadd.f32 %v11143_v28, %v6748_v58  ;;  %v17432_v28 = vld [vmem:[#allocation10_spill] sm:$0xff] }
 0x661   : > { %v6959_v4 = vpop.f32.mrf.mxu1  ;;  %v6752_v49 = vadd.f32 %v17432_v28, %v15865_v37  ;;  %v17439_v28 = vld [vmem:[#allocation50_spill] sm:$0xff] }
 0x662   : > { %v16049_v61 = vadd.f32 %v6959_v4, %v6746_v2  ;;  %v16065_v2 = vpop.permute.xlu0 %8344  ;;  %v6753_v45 = vadd.f32 %v17439_v28, %v15879_v0  ;;  %v17444_v28 = vld [vmem:[#allocation74_spill] sm:$0xff] }
 0x663   : > { %v11146_v10 = vpop.f32.mrf.mxu1  ;;  %vm8463_vm6 = vcmp.eq.s32.totalorder %v16065_v2, 1 }
 0x664   : > { %v16055_v54 = vadd.f32 %v11146_v10, %v6751_v46  ;;  %v6750_v46 = vadd.f32 %v17434_v18, %v15869_v22  ;;  %v17440_v18 = vld [vmem:[#allocation37_spill] sm:$0xff] }
 0x665   : > { %v6972_v29 = vpop.f32.mrf.mxu1 }
 0x666   : > { %v16059_v58 = vadd.f32 %v6972_v29, %v6749_v33  ;;  %v6755_v29 = vadd.f32 %v17436_v30, %v15875_v44 }
 0x667   : > { %v11147_v4 = vpop.f32.mrf.mxu1 }
 0x668   : > { %17431 = vst [vmem:[#allocation62_spill] sm:$0xff] %v16059_v58  ;;  %v16067_v63 = vadd.f32 %v11147_v4, %v6752_v49  ;;  %v16081_v49 = vpop.permute.xlu0 %8350  ;;  %v16083_v4 = vpop.permute.xlu1 %8347 }
 0x669   : > { %v6975_v10 = vpop.f32.mrf.mxu1  ;;  %vm8465_vm3 = vcmp.eq.s32.totalorder %v16081_v49, 1  ;;  %vm8464_vm7 = vcmp.eq.s32.totalorder %v16083_v4, 1 }
 0x66a   : > { %v16071_v32 = vadd.f32 %v6975_v10, %v6750_v46  ;;  %v6756_v46 = vadd.f32 %v17440_v18, %v15885_v21  ;;  %v16089_v10 = vpop.f32.mrf.mxu0 }
 0x66b   : > { %v11150_v33 = vpop.f32.mrf.mxu1 }
 0x66c   : > { %17435 = vst [vmem:[#allocation64_spill] sm:$0xff] %v16071_v32  ;;  %v16077_v37 = vadd.f32 %v11150_v33, %v6755_v29  ;;  %v17442_v29 = vld [vmem:[#allocation40_spill] sm:$0xff]  ;;  %v16099_v32 = vpop.f32.mrf.mxu0  ;;  %v16103_v21 = vpop.permute.xlu1 %8353 }
 0x66d   : > { %v6988_v58 = vpop.f32.mrf.mxu1  ;;  %v6754_v33 = vadd.f32 %v17442_v29, %v15889_v56  ;;  %vm8466_vm8 = vcmp.eq.s32.totalorder %v16103_v21, 1 }
 0x66e   : > { %17438 = vst [vmem:[#allocation28_spill] sm:$0xff] %v16077_v37  ;;  %v16085_v22 = vadd.f32 %v6988_v58, %v6753_v45  ;;  %v6759_v37 = vadd.f32 %v17444_v28, %v15895_v19  ;;  %v16101_v45 = vpop.permute.xlu0 %8356 }
 0x66f   : > { %v11151_v44 = vpop.f32.mrf.mxu1  ;;  %17445 = vst [vmem:[#allocation98_spill] sm:$0xff] %v16101_v45  ;;  %v6758_v45 = vadd.f32 %v15711_v43, %v15909_v47  ;;  %v6764_v47 = vadd.f32 %v15749_v36, %v15925_v60 }
 0x670   : > { %v16091_v30 = vadd.f32 %v11151_v44, %v6756_v46  ;;  %v17446_v46 = vld [vmem:[#allocation19_spill] sm:$0xff] }
 0x671   : > { %v6991_v14 = vpop.f32.mrf.mxu1  ;;  %v6757_v44 = vadd.f32 %v17446_v46, %v15899_v3 }
 0x672   : > { %17441 = vst [vmem:[#allocation96_spill] sm:$0xff] %v16091_v30  ;;  %v16095_v0 = vadd.f32 %v6991_v14, %v6754_v33  ;;  %v17447_v14 = vld [vmem:[#allocation75_spill] sm:$0xff]  ;;  %v16113_v33 = vpop.f32.mrf.mxu0 }
 0x673   : > { %v11154_v58 = vpop.f32.mrf.mxu1  ;;  %v6760_v29 = vadd.f32 %v17447_v14, %v15905_v51  ;;  %v6761_v14 = vadd.f32 %v15737_v27, %v15919_v20  ;;  %v6767_v20 = vadd.f32 %v15775_v31, %v15935_v41 }
 0x674   : > { %17443 = vst [vmem:[#allocation65_spill] sm:$0xff] %v16095_v0  ;;  %v16105_v18 = vadd.f32 %v11154_v58, %v6759_v37  ;;  %v16119_v37 = vpop.permute.xlu0 %8362  ;;  %v16121_v58 = vpop.permute.xlu1 %8359 }
 0x675   : > { %v7004_v30 = vpop.f32.mrf.mxu1  ;;  %v16127_v46 = vpop.f32.mrf.mxu0  ;;  %vm8469_vm9 = vcmp.eq.s32.totalorder %v16119_v37, 1  ;;  %vm8468_vm11 = vcmp.eq.s32.totalorder %v16121_v58, 1 }
 0x676   : > { %v16109_v56 = vadd.f32 %v7004_v30, %v6757_v44  ;;  %v6763_v30 = vadd.f32 %v15723_v57, %v15915_v52 }
 0x677   : > { %v11155_v19 = vpop.f32.mrf.mxu1 }
 0x678   : > { %v16115_v28 = vadd.f32 %v11155_v19, %v6760_v29  ;;  %v16137_v19 = vpop.f32.mrf.mxu0  ;;  %v16141_v57 = vpop.permute.xlu1 %8365 }
 0x679   : > { %v7007_v0 = vpop.f32.mrf.mxu1  ;;  %vm8470_vm10 = vcmp.eq.s32.totalorder %v16141_v57, 1 }
 0x67a   : > { %v16123_v3 = vadd.f32 %v7007_v0, %v6758_v45  ;;  %v16139_v45 = vpop.permute.xlu0 %8368 }
 0x67b   : > { %v11158_v51 = vpop.f32.mrf.mxu1  ;;  %17448 = vst [vmem:[#allocation66_spill] sm:$0xff] %v16139_v45 }
 0x67c   : > { %v16129_v44 = vadd.f32 %v11158_v51, %v6763_v30  ;;  %v6762_v30 = vadd.f32 %v15763_v1, %v15929_v7  ;;  %v6768_v7 = vadd.f32 %v15801_v17, %v15945_v11  ;;  %v17452_v11 = vld [vmem:[#allocation78_spill] sm:$0xff] }
 0x67d   : > { %v7020_v29 = vpop.f32.mrf.mxu1 }
 0x67e   : > { %v16133_v43 = vadd.f32 %v7020_v29, %v6761_v14  ;;  %v16151_v14 = vpop.f32.mrf.mxu0  ;;  %v6765_v29 = vadd.f32 %v15789_v50, %v15939_v9  ;;  %v17450_v50 = vld [vmem:[#allocation77_spill] sm:$0xff] }
 0x67f   : > { %v11159_v0 = vpop.f32.mrf.mxu1  ;;  %v7500_v9 = vadd.f32 %v17450_v50, %v15955_v24  ;;  %v17455_v24 = vld [vmem:[#allocation53_spill] sm:$0xff]  ;;  %v17459_v50 = vld [vmem:[#allocation83_spill] sm:$0xff] }
 0x680   : > { %v16143_v52 = vadd.f32 %v11159_v0, %v6764_v47  ;;  %v16157_v47 = vpop.permute.xlu0 %8374  ;;  %v16159_v0 = vpop.permute.xlu1 %8371 }
 0x681   : > { %v7023_v51 = vpop.f32.mrf.mxu1  ;;  %v7454_v31 = vpop.f32.mrf.mxu0  ;;  %vm8473_vm13 = vcmp.eq.s32.totalorder %v16157_v47, 1  ;;  %vm8472_vm14 = vcmp.eq.s32.totalorder %v16159_v0, 1 }
 0x682   : > { %v16147_v27 = vadd.f32 %v7023_v51, %v6762_v30  ;;  %v6766_v30 = vadd.f32 %v15815_v25, %v15949_v48  ;;  %v7498_v51 = vadd.f32 %v15841_v53, %v15959_v55  ;;  %v17454_v48 = vld [vmem:[#allocation80_spill] sm:$0xff]  ;;  %v16190_v55 = vadd.f32 %v17455_v24, %v15985_v62  ;;  %v17464_v24 = vld [vmem:[#allocation26_spill] sm:$0xff] }
 0x683   : > { %v11162_v36 = vpop.f32.mrf.mxu1  ;;  %v16186_v53 = vadd.f32 %v17454_v48, %v15979_v16  ;;  %v17460_v16 = vld [vmem:[#allocation16_spill] sm:$0xff] }
 0x684   : > { %v16153_v60 = vadd.f32 %v11162_v36, %v6767_v20  ;;  %v17451_v20 = vld [vmem:[#allocation20_spill] sm:$0xff]  ;;  %v7499_v36 = vadd.f32 %v17452_v11, %v15969_v12  ;;  %v17457_v12 = vld [vmem:[#allocation54_spill] sm:$0xff]  ;;  %v16208_v11 = vadd.f32 %v17460_v16, %v16005_v23  ;;  %v16225_v23 = vadd.f32 %v17464_v24, %v16025_v15 }
 0x685   : > { %v7036_v45 = vpop.f32.mrf.mxu1  ;;  %v7501_v17 = vadd.f32 %v17451_v20, %v15965_v13  ;;  %v17456_v13 = vld [vmem:[#allocation81_spill] sm:$0xff]  ;;  %v16204_v20 = vadd.f32 %v17459_v50, %v15999_v8  ;;  %v17461_v62 = vld [vmem:[#allocation84_spill] sm:$0xff]  ;;  %v16234_v50 = vpop.permute.xlu1 %8377  ;;  %v17466_v16 = vld [vmem:[#allocation58_spill] sm:$0xff] }
 0x686   : > { %v16161_v1 = vadd.f32 %v7036_v45, %v6765_v29  ;;  %v17453_v29 = vld [vmem:[#allocation52_spill] sm:$0xff]  ;;  %vm8474_vm15 = vcmp.eq.s32.totalorder %v16234_v50, 1 }
 0x687   : > { %v11163_v41 = vpop.f32.mrf.mxu1  ;;  %v17470_v15 = vld [vmem:[#allocation60_spill] sm:$0xff] }
 0x688   : > { %17449 = vst [vmem:[#allocation99_spill] sm:$0xff] %v16161_v1  ;;  %v16172_v45 = vadd.f32 %v11163_v41, %v6768_v7  ;;  %v16180_v1 = vadd.f32 %v17453_v29, %v15975_v5  ;;  %v16194_v7 = vadd.f32 %v17456_v13, %v15989_v59  ;;  %v16198_v5 = vadd.f32 %v17457_v12, %v15995_v39  ;;  %v11200_v59 = vpop.f32.mrf.mxu0  ;;  %v17462_v39 = vld [vmem:[#allocation57_spill] sm:$0xff]  ;;  %v17465_v13 = vld [vmem:[#allocation87_spill] sm:$0xff]  ;;  %v16232_v12 = vpop.permute.xlu0 %8380 }
 0x689   : > { %v7039_v25 = vpop.f32.mrf.mxu1  ;;  %v16212_v29 = vadd.f32 %v17461_v62, %v16009_v6  ;;  %v16229_v6 = vadd.f32 %v17465_v13, %v16029_v26  ;;  %v16238_v62 = vadd.f32 %v17466_v16, %v16035_v35  ;;  %v17474_v35 = vld [vmem:[#allocation24_spill] sm:$0xff]  ;;  %vm8475_vm0 = vcmp.eq.s32.totalorder %v16232_v12, 1 }
 0x68a   : > { %v16200_v41 = vadd.f32 %v7039_v25, %v6766_v30  ;;  %v16217_v30 = vadd.f32 %v17462_v39, %v16015_v38  ;;  %v17463_v25 = vld [vmem:[#allocation86_spill] sm:$0xff]  ;;  %v16259_v24 = vadd.f32 %v17474_v35, %v16055_v54  ;;  %v17477_v13 = vld [vmem:[#allocation92_spill] sm:$0xff]  ;;  %v7467_v54 = vpop.f32.mrf.mxu0 }
 0x68b   : > { %v11210_v48 = vpop.f32.mrf.mxu1  ;;  %v16221_v8 = vadd.f32 %v17463_v25, %v16019_v34  ;;  %17467 = vst [vmem:[#allocation41_spill] sm:$0xff] %v16238_v62  ;;  %v17468_v34 = vld [vmem:[#allocation89_spill] sm:$0xff]  ;;  %v16246_v25 = vadd.f32 %v17470_v15, %v16045_v40  ;;  %v17478_v40 = vld [vmem:[#allocation51_spill] sm:$0xff] }
 0x68c   : > { %17458 = vst [vmem:[#allocation101_spill] sm:$0xff] %v16200_v41  ;;  %v7864_v38 = vadd.f32 %v11210_v48, %v7500_v9  ;;  %v16242_v39 = vadd.f32 %v17468_v34, %v16039_v42  ;;  %v17472_v9 = vld [vmem:[#allocation90_spill] sm:$0xff]  ;;  %17475 = vst [vmem:[#allocation47_spill] sm:$0xff] %v16259_v24  ;;  %v16267_v34 = vadd.f32 %v17478_v40, %v16067_v63 }
 0x68d   : > { %17471 = vst [vmem:[#allocation44_spill] sm:$0xff] %v16246_v25  ;;  %v7703_v26 = vpop.f32.mrf.mxu1  ;;  %v16255_v48 = vadd.f32 %v17472_v9, %v16049_v61  ;;  %v17476_v42 = vld [vmem:[#allocation62_spill] sm:$0xff]  ;;  %v17479_v25 = vld [vmem:[#allocation64_spill] sm:$0xff]  ;;  %v17482_v9 = vld [vmem:[#allocation95_spill] sm:$0xff] }
 0x68e   : > { %17469 = vst [vmem:[#allocation42_spill] sm:$0xff] %v16242_v39  ;;  %v16263_v16 = vadd.f32 %v17477_v13, %v17476_v42  ;;  %v9467_v15 = vpack.c.bf16 %v7864_v38, %v7864_v38  ;;  %v7862_v41 = vadd.f32 %v7703_v26, %v7498_v51  ;;  %v17480_v39 = vld [vmem:[#allocation93_spill] sm:$0xff]  ;;  %v17481_v61 = vld [vmem:[#allocation28_spill] sm:$0xff]  ;;  %v8633_v35 = vmul.f32 %v7864_v38, %v7864_v38 }
 0x68f   : > { %17473 = vst [vmem:[#allocation45_spill] sm:$0xff] %v16255_v48  ;;  %v16271_v62 = vadd.f32 %v17480_v39, %v17479_v25  ;;  %v16275_v48 = vadd.f32 %v17482_v9, %v17481_v61  ;;  %v11211_v24 = vpop.f32.mrf.mxu1  ;;  %v16279_v42 = vadd.f32 %v16089_v10, %v16085_v22  ;;  %v17483_v13 = vld [vmem:[#allocation96_spill] sm:$0xff]  ;;  %v17484_v51 = vld [vmem:[#allocation65_spill] sm:$0xff]  ;;  %v17485_v25 = vld [vmem:[#allocation98_spill] sm:$0xff]  ;;  %v8505_v26 = vsel %vm8465_vm3, %v7864_v38, 0.0  ;;  %v16309_v38 = vpop.permute.xlu0 %8386 }
 0x690   : > { %v16283_v63 = vadd.f32 %v16099_v32, %v17483_v13  ;;  %v16287_v39 = vadd.f32 %v16113_v33, %v17484_v51  ;;  %vm8467_vm1 = vcmp.eq.s32.totalorder %v17485_v25, 1  ;;  %8065 = vst.msk [vmem:[%s16251_s9 + $0x8] sm:$0xf] %vm8062_vm4, %v9467_v15  ;;  %v9465_v40 = vpack.c.bf16 %v7862_v41, %v7862_v41  ;;  %v16311_v13 = vpop.permute.xlu1 %8383 }
 0x691   : > { %v8631_v61 = vmul.f32 %v7862_v41, %v7862_v41  ;;  %v16296_v22 = vadd.f32 %v16127_v46, %v16105_v18  ;;  %v7865_v10 = vadd.f32 %v11211_v24, %v7501_v17  ;;  %v7706_v32 = vpop.f32.mrf.mxu1  ;;  %v16300_v9 = vadd.f32 %v16137_v19, %v16109_v56 }
 0x692   : > { %v16304_v33 = vadd.f32 %v16151_v14, %v16115_v28  ;;  %v16307_v15 = vadd.f32 %v7454_v31, %v16123_v3  ;;  %8063 = vst.msk [vmem:[%s16251_s9] sm:$0xf] %vm8062_vm4, %v9465_v40  ;;  %v8503_v18 = vsel %vm8463_vm6, %v7862_v41, 0.0  ;;  %v7863_v46 = vadd.f32 %v7706_v32, %v7499_v36  ;;  %v11201_v3 = vpop.f32.mrf.mxu0 }
 0x693   : > { %v16318_v56 = vadd.f32 %v11200_v59, %v16129_v44  ;;  %v16321_v28 = vadd.f32 %v7467_v54, %v16133_v43  ;;  %v8547_v19 = vsel %vm8543_vm5, %v8505_v26, 0.0  ;;  %v8673_v14 = vsel %vm8465_vm3, %v8633_v35, 0.0  ;;  %v11214_v41 = vpop.f32.mrf.mxu1 }
 0x694   : > { %v9468_v31 = vpack.c.bf16 %v7865_v10, %v7865_v10  ;;  %v8634_v17 = vmul.f32 %v7865_v10, %v7865_v10  ;;  %v8671_v36 = vsel %vm8463_vm6, %v8631_v61, 0.0  ;;  %v9466_v44 = vpack.c.bf16 %v7863_v46, %v7863_v46  ;;  %v7470_v32 = vpop.f32.mrf.mxu0 }
 0x695   : > { %v8504_v43 = vsel %vm8464_vm7, %v7863_v46, 0.0  ;;  %v8632_v59 = vmul.f32 %v7863_v46, %v7863_v46  ;;  %v8544_v24 = vsel %vm8543_vm5, %v8503_v18, 0.0  ;;  %v8506_v49 = vsel %vm8466_vm8, %v7865_v10, 0.0  ;;  %v7719_v2 = vpop.f32.mrf.mxu1 }
 0x696   : > { %8066 = vst.msk [vmem:[%s16251_s9 + $0xc] sm:$0xf] %vm8062_vm4, %v9468_v31  ;;  %v8545_v54 = vsel %vm8543_vm5, %v8504_v43, 0.0  ;;  %v7868_v35 = vadd.f32 %v11214_v41, %v16180_v1  ;;  %v8714_v51 = vsel %vm8543_vm5, %v8673_v14, 0.0  ;;  %8064 = vst.msk [vmem:[%s16251_s9 + $0x4] sm:$0xf] %vm8062_vm4, %v9466_v44  ;;  %v7866_v61 = vadd.f32 %v7719_v2, %v16186_v53  ;;  %v16350_v14 = vpop.permute.xlu0 %8392  ;;  %v16352_v41 = vpop.permute.xlu1 %8389 }
 0x697   : > { %v8546_v26 = vadd.f32 %v8545_v54, %v8544_v24  ;;  %v8672_v40 = vsel %vm8464_vm7, %v8632_v59, 0.0  ;;  %v8711_v10 = vsel %vm8543_vm5, %v8671_v36, 0.0  ;;  %v8674_v1 = vsel %vm8466_vm8, %v8634_v17, 0.0  ;;  %v11215_v31 = vpop.f32.mrf.mxu1  ;;  %v17486_v54 = vld [vmem:[#allocation66_spill] sm:$0xff] }
 0x698   : > { %v8712_v18 = vsel %vm8543_vm5, %v8672_v40, 0.0  ;;  %v9471_v46 = vpack.c.bf16 %v7868_v35, %v7868_v35  ;;  %v8549_v4 = vsel %vm8543_vm5, %v8506_v49, 0.0  ;;  %v9469_v53 = vpack.c.bf16 %v7866_v61, %v7866_v61 }
 0x699   : > { %v8548_v44 = vadd.f32 %v8547_v19, %v8546_v26  ;;  %v8713_v43 = vadd.f32 %v8712_v18, %v8711_v10  ;;  %v8637_v36 = vmul.f32 %v7868_v35, %v7868_v35  ;;  %v8507_v21 = vsel %vm8467_vm1, %v7866_v61, 0.0  ;;  %v7722_v24 = vpop.f32.mrf.mxu1  ;;  %v11204_v26 = vpop.f32.mrf.mxu0 }
 0x69a   : > { %8069 = vst.msk [vmem:[%s16251_s9 + $0x18] sm:$0xf] %vm8062_vm4, %v9471_v46  ;;  %v8635_v17 = vmul.f32 %v7866_v61, %v7866_v61  ;;  %v7869_v59 = vadd.f32 %v11215_v31, %v16190_v55  ;;  %vm8471_vm12 = vcmp.eq.s32.totalorder %v17486_v54, 1  ;;  %v8716_v2 = vsel %vm8543_vm5, %v8674_v1, 0.0  ;;  %8067 = vst.msk [vmem:[%s16251_s9 + $0x10] sm:$0xf] %vm8062_vm4, %v9469_v53  ;;  %v16386_v53 = vpop.permute.xlu1 %8395 }
 0x69b   : > { %v8715_v40 = vadd.f32 %v8714_v51, %v8713_v43  ;;  %v8550_v19 = vadd.f32 %v8549_v4, %v8548_v44  ;;  %v16365_v49 = vadd.f32 %v11201_v3, %v16143_v52  ;;  %v8551_v61 = vsel %vm8543_vm5, %v8507_v21, 0.0  ;;  %v11218_v46 = vpop.f32.mrf.mxu1  ;;  %v7483_v21 = vpop.f32.mrf.mxu0 }
 0x69c   : > { %v8675_v55 = vsel %vm8467_vm1, %v8635_v17, 0.0  ;;  %v9472_v10 = vpack.c.bf16 %v7869_v59, %v7869_v59  ;;  %v8638_v18 = vmul.f32 %v7869_v59, %v7869_v59  ;;  %v8509_v51 = vsel %vm8469_vm9, %v7868_v35, 0.0  ;;  %v16384_v35 = vpop.permute.xlu0 %8398 }
 0x69d   : > { %v8552_v1 = vadd.f32 %v8551_v61, %v8550_v19  ;;  %v8717_v31 = vadd.f32 %v8716_v2, %v8715_v40  ;;  %v16374_v4 = vadd.f32 %v7470_v32, %v16147_v27  ;;  %v8677_v52 = vsel %vm8469_vm9, %v8637_v36, 0.0  ;;  %v7735_v43 = vpop.f32.mrf.mxu1  ;;  %v17487_v19 = vld [vmem:[#allocation99_spill] sm:$0xff] }
 0x69e   : > { %v8718_v3 = vsel %vm8543_vm5, %v8675_v55, 0.0  ;;  %8070 = vst.msk [vmem:[%s16251_s9 + $0x1c] sm:$0xf] %vm8062_vm4, %v9472_v10  ;;  %v7867_v25 = vadd.f32 %v7722_v24, %v16194_v7  ;;  %v7872_v44 = vadd.f32 %v11218_v46, %v16198_v5  ;;  %v8510_v32 = vsel %vm8470_vm10, %v7869_v59, 0.0 }
 0x69f   : > { %v8719_v27 = vadd.f32 %v8718_v3, %v8717_v31  ;;  %v8678_v37 = vsel %vm8470_vm10, %v8638_v18, 0.0  ;;  %v7870_v36 = vadd.f32 %v7735_v43, %v16204_v20  ;;  %v11219_v2 = vpop.f32.mrf.mxu1  ;;  %v16398_v57 = vadd.f32 %v11204_v26, %v16153_v60 }
 0x6a0   : > { %v9470_v7 = vpack.c.bf16 %v7867_v25, %v7867_v25  ;;  %v8508_v5 = vsel %vm8468_vm11, %v7867_v25, 0.0  ;;  %v8636_v17 = vmul.f32 %v7867_v25, %v7867_v25  ;;  %v9475_v24 = vpack.c.bf16 %v7872_v44, %v7872_v44  ;;  %v16421_v43 = vpop.permute.xlu0 %8404 }
 0x6a1   : > { %v8553_v59 = vsel %vm8543_vm5, %v8508_v5, 0.0  ;;  %v9473_v40 = vpack.c.bf16 %v7870_v36, %v7870_v36  ;;  %v16401_v20 = vadd.f32 %v7483_v21, %v17487_v19  ;;  %v8555_v61 = vsel %vm8543_vm5, %v8509_v51, 0.0  ;;  %v7738_v46 = vpop.f32.mrf.mxu1 }
 0x6a2   : > { %v8722_v55 = vsel %vm8543_vm5, %v8677_v52, 0.0  ;;  %8068 = vst.msk [vmem:[%s16251_s9 + $0x14] sm:$0xf] %vm8062_vm4, %v9470_v7  ;;  %v8554_v10 = vadd.f32 %v8553_v59, %v8552_v1  ;;  %v8676_v18 = vsel %vm8468_vm11, %v8636_v17, 0.0  ;;  %8073 = vst.msk [vmem:[%s16251_s9 + $0x28] sm:$0xf] %vm8062_vm4, %v9475_v24  ;;  %v8639_v51 = vmul.f32 %v7870_v36, %v7870_v36 }
 0x6a3   : > { %v8557_v31 = vsel %vm8543_vm5, %v8510_v32, 0.0  ;;  %v8724_v60 = vsel %vm8543_vm5, %v8678_v37, 0.0  ;;  %v8720_v26 = vsel %vm8543_vm5, %v8676_v18, 0.0  ;;  %8071 = vst.msk [vmem:[%s16251_s9 + $0x20] sm:$0xf] %vm8062_vm4, %v9473_v40  ;;  %v8511_v58 = vsel %vm8471_vm12, %v7870_v36, 0.0  ;;  %v11222_v25 = vpop.f32.mrf.mxu1 }
 0x6a4   : > { %v8556_v52 = vadd.f32 %v8555_v61, %v8554_v10  ;;  %v8721_v3 = vadd.f32 %v8720_v26, %v8719_v27  ;;  %v7873_v1 = vadd.f32 %v11219_v2, %v16208_v11  ;;  %vm8477_vm2 = vcmp.eq.s32.totalorder %v16309_v38, 1  ;;  %v16427_v27 = vpop.permute.xlu1 %8401  ;;  %v11205_v2 = vpop.f32.mrf.mxu0 }
 0x6a5   : > { %v8513_v32 = vsel %vm8473_vm13, %v7872_v44, 0.0  ;;  %v8641_v37 = vmul.f32 %v7872_v44, %v7872_v44  ;;  %v7871_v21 = vadd.f32 %v7738_v46, %v16212_v29  ;;  %v7876_v7 = vadd.f32 %v11222_v25, %v16217_v30  ;;  %v7751_v24 = vpop.f32.mrf.mxu1 }
 0x6a6   : > { %v8723_v5 = vadd.f32 %v8722_v55, %v8721_v3  ;;  %v8558_v36 = vadd.f32 %v8557_v31, %v8556_v52  ;;  %v8679_v11 = vsel %vm8471_vm12, %v8639_v51, 0.0  ;;  %v9476_v17 = vpack.c.bf16 %v7873_v1, %v7873_v1 }
 0x6a7   : > { %v8559_v59 = vsel %vm8543_vm5, %v8511_v58, 0.0  ;;  %v8642_v40 = vmul.f32 %v7873_v1, %v7873_v1  ;;  %v9474_v44 = vpack.c.bf16 %v7871_v21, %v7871_v21  ;;  %v8512_v29 = vsel %vm8472_vm14, %v7871_v21, 0.0  ;;  %v11223_v61 = vpop.f32.mrf.mxu1  ;;  %v16450_v58 = vpop.permute.xlu0 %8410 }
 0x6a8   : > { %vm8476_vm3 = vcmp.eq.s32.totalorder %v16311_v13, 1  ;;  %vm8478_vm6 = vcmp.eq.s32.totalorder %v16352_v41, 1  ;;  %v8560_v30 = vadd.f32 %v8559_v59, %v8558_v36  ;;  %v8725_v19 = vadd.f32 %v8724_v60, %v8723_v5  ;;  %8074 = vst.msk [vmem:[%s16251_s9 + $0x2c] sm:$0xf] %vm8062_vm4, %v9476_v17 }
 0x6a9   : > { %v8561_v54 = vsel %vm8543_vm5, %v8512_v29, 0.0  ;;  %v16440_v55 = vadd.f32 %v11205_v2, %v16172_v45  ;;  %v8681_v10 = vsel %vm8473_vm13, %v8641_v37, 0.0  ;;  %v8726_v18 = vsel %vm8543_vm5, %v8679_v11, 0.0  ;;  %8072 = vst.msk [vmem:[%s16251_s9 + $0x24] sm:$0xf] %vm8062_vm4, %v9474_v44  ;;  %v7754_v3 = vpop.f32.mrf.mxu1  ;;  %v16460_v37 = vpop.permute.xlu1 %8407 }
 0x6aa   : > { %v8640_v46 = vmul.f32 %v7871_v21, %v7871_v21  ;;  %v9479_v31 = vpack.c.bf16 %v7876_v7, %v7876_v7  ;;  %v8563_v60 = vsel %vm8543_vm5, %v8513_v32, 0.0  ;;  %v8727_v26 = vadd.f32 %v8726_v18, %v8725_v19 }
 0x6ab   : > { %v8514_v51 = vsel %vm8474_vm15, %v7873_v1, 0.0  ;;  %v8562_v52 = vadd.f32 %v8561_v54, %v8560_v30  ;;  %v8682_v47 = vsel %vm8474_vm15, %v8642_v40, 0.0  ;;  %v7874_v25 = vadd.f32 %v7751_v24, %v16221_v8  ;;  %v11226_v36 = vpop.f32.mrf.mxu1 }
 0x6ac   : > { %v8680_v45 = vsel %vm8472_vm14, %v8640_v46, 0.0  ;;  %8077 = vst.msk [vmem:[%s16251_s9 + $0x38] sm:$0xf] %vm8062_vm4, %v9479_v31  ;;  %v7877_v32 = vadd.f32 %v11223_v61, %v16225_v23  ;;  %v8730_v1 = vsel %vm8543_vm5, %v8681_v10, 0.0  ;;  %v7875_v50 = vadd.f32 %v7754_v3, %v16229_v6  ;;  %v16479_v46 = vpop.permute.xlu0 %8416 }
 0x6ad   : > { %v8564_v21 = vadd.f32 %v8563_v60, %v8562_v52  ;;  %v8728_v5 = vsel %vm8543_vm5, %v8680_v45, 0.0  ;;  %vm8479_vm7 = vcmp.eq.s32.totalorder %v16350_v14, 1  ;;  %v8565_v0 = vsel %vm8543_vm5, %v8514_v51, 0.0  ;;  %v7767_v40 = vpop.f32.mrf.mxu1  ;;  %v16489_v12 = vpop.permute.xlu1 %8413 }
 0x6ae   : > { %v8729_v11 = vadd.f32 %v8728_v5, %v8727_v26  ;;  %v9477_v17 = vpack.c.bf16 %v7874_v25, %v7874_v25  ;;  %v8515_v8 = vsel %vm8475_vm0, %v7874_v25, 0.0  ;;  %v8732_v23 = vsel %vm8543_vm5, %v8682_v47, 0.0  ;;  %v17488_v47 = vld [vmem:[#allocation41_spill] sm:$0xff] }
 0x6af   : > { %v8517_v24 = vsel %vm8477_vm2, %v7876_v7, 0.0  ;;  %v8566_v2 = vadd.f32 %v8565_v0, %v8564_v21  ;;  %v8643_v59 = vmul.f32 %v7874_v25, %v7874_v25  ;;  %vm8481_vm8 = vcmp.eq.s32.totalorder %v16384_v35, 1  ;;  %v11227_v18 = vpop.f32.mrf.mxu1  ;;  %v17489_v21 = vld [vmem:[#allocation42_spill] sm:$0xff]  ;;  %v17490_v0 = vld [vmem:[#allocation44_spill] sm:$0xff] }
 0x6b0   : > { %v8731_v6 = vadd.f32 %v8730_v1, %v8729_v11  ;;  %v8645_v44 = vmul.f32 %v7876_v7, %v7876_v7  ;;  %8075 = vst.msk [vmem:[%s16251_s9 + $0x30] sm:$0xf] %vm8062_vm4, %v9477_v17  ;;  %v8567_v29 = vsel %vm8543_vm5, %v8515_v8, 0.0  ;;  %v9480_v30 = vpack.c.bf16 %v7877_v32, %v7877_v32 }
 0x6b1   : > { %v8568_v19 = vadd.f32 %v8567_v29, %v8566_v2  ;;  %v8683_v54 = vsel %vm8475_vm0, %v8643_v59, 0.0  ;;  %v8646_v61 = vmul.f32 %v7877_v32, %v7877_v32  ;;  %v9478_v10 = vpack.c.bf16 %v7875_v50, %v7875_v50  ;;  %v7770_v25 = vpop.f32.mrf.mxu1  ;;  %v16512_v29 = vpop.permute.xlu0 %8422 }
 0x6b2   : > { %vm8482_vm1 = vcmp.eq.s32.totalorder %v16427_v27, 1  ;;  %v8571_v31 = vsel %vm8543_vm5, %v8517_v24, 0.0  ;;  %v8733_v7 = vadd.f32 %v8732_v23, %v8731_v6  ;;  %8078 = vst.msk [vmem:[%s16251_s9 + $0x3c] sm:$0xf] %vm8062_vm4, %v9480_v30  ;;  %v8518_v60 = vsel %vm8478_vm6, %v7877_v32, 0.0 }
 0x6b3   : > { %v8516_v26 = vsel %vm8476_vm3, %v7875_v50, 0.0  ;;  %vm8480_vm9 = vcmp.eq.s32.totalorder %v16386_v53, 1  ;;  %v8734_v51 = vsel %vm8543_vm5, %v8683_v54, 0.0  ;;  %8076 = vst.msk [vmem:[%s16251_s9 + $0x34] sm:$0xf] %vm8062_vm4, %v9478_v10  ;;  %v8644_v3 = vmul.f32 %v7875_v50, %v7875_v50  ;;  %v11230_v24 = vpop.f32.mrf.mxu1  ;;  %v16518_v10 = vpop.permute.xlu1 %8419 }
 0x6b4   : > { %v8569_v52 = vsel %vm8543_vm5, %v8516_v26, 0.0  ;;  %v7880_v45 = vadd.f32 %v11226_v36, %v17488_v47  ;;  %v8735_v1 = vadd.f32 %v8734_v51, %v8733_v7  ;;  %v7878_v5 = vadd.f32 %v7767_v40, %v17489_v21  ;;  %v17491_v47 = vld [vmem:[#allocation45_spill] sm:$0xff]  ;;  %v17492_v21 = vld [vmem:[#allocation47_spill] sm:$0xff] }
 0x6b5   : > { %v8570_v32 = vadd.f32 %v8569_v52, %v8568_v19  ;;  %v7881_v11 = vadd.f32 %v11227_v18, %v17490_v0  ;;  %v8685_v17 = vsel %vm8477_vm2, %v8645_v44, 0.0  ;;  %v8686_v8 = vsel %vm8478_vm6, %v8646_v61, 0.0  ;;  %v7783_v44 = vpop.f32.mrf.mxu1 }
 0x6b6   : > { %v8684_v23 = vsel %vm8476_vm3, %v8644_v3, 0.0  ;;  %v9483_v50 = vpack.c.bf16 %v7880_v45, %v7880_v45  ;;  %v8649_v59 = vmul.f32 %v7880_v45, %v7880_v45  ;;  %v9481_v6 = vpack.c.bf16 %v7878_v5, %v7878_v5 }
 0x6b7   : > { %v8572_v36 = vadd.f32 %v8571_v31, %v8570_v32  ;;  %v8736_v2 = vsel %vm8543_vm5, %v8684_v23, 0.0  ;;  %vm8483_vm10 = vcmp.eq.s32.totalorder %v16421_v43, 1  ;;  %v8573_v40 = vsel %vm8543_vm5, %v8518_v60, 0.0  ;;  %v11231_v26 = vpop.f32.mrf.mxu1 }
 0x6b8   : > { %v8737_v38 = vadd.f32 %v8736_v2, %v8735_v1  ;;  %8081 = vst.msk [vmem:[%s16251_s9 + $0x48] sm:$0xf] %vm8062_vm4, %v9483_v50  ;;  %v8519_v41 = vsel %vm8479_vm7, %v7878_v5, 0.0  ;;  %v8647_v13 = vmul.f32 %v7878_v5, %v7878_v5  ;;  %vm8485_vm11 = vcmp.eq.s32.totalorder %v16450_v58, 1  ;;  %8079 = vst.msk [vmem:[%s16251_s9 + $0x40] sm:$0xf] %vm8062_vm4, %v9481_v6  ;;  %v16541_v2 = vpop.permute.xlu0 %8428 }
 0x6b9   : > { %v8738_v30 = vsel %vm8543_vm5, %v8685_v17, 0.0  ;;  %v8740_v19 = vsel %vm8543_vm5, %v8686_v8, 0.0  ;;  %v8574_v54 = vadd.f32 %v8573_v40, %v8572_v36  ;;  %v9484_v61 = vpack.c.bf16 %v7881_v11, %v7881_v11  ;;  %v7786_v0 = vpop.f32.mrf.mxu1 }
 0x6ba   : > { %v8739_v18 = vadd.f32 %v8738_v30, %v8737_v38  ;;  %v8521_v31 = vsel %vm8481_vm8, %v7880_v45, 0.0  ;;  %v8575_v7 = vsel %vm8543_vm5, %v8519_v41, 0.0  ;;  %v8687_v60 = vsel %vm8479_vm7, %v8647_v13, 0.0  ;;  %v16550_v38 = vpop.permute.xlu1 %8425 }
 0x6bb   : > { %v8689_v51 = vsel %vm8481_vm8, %v8649_v59, 0.0  ;;  %v8576_v52 = vadd.f32 %v8575_v7, %v8574_v54  ;;  %8082 = vst.msk [vmem:[%s16251_s9 + $0x4c] sm:$0xf] %vm8062_vm4, %v9484_v61  ;;  %v8650_v3 = vmul.f32 %v7881_v11, %v7881_v11  ;;  %v7879_v1 = vadd.f32 %v7770_v25, %v17491_v47  ;;  %v11234_v36 = vpop.f32.mrf.mxu1 }
 0x6bc   : > { %vm8484_vm12 = vcmp.eq.s32.totalorder %v16460_v37, 1  ;;  %v8741_v32 = vadd.f32 %v8740_v19, %v8739_v18  ;;  %v8522_v45 = vsel %vm8482_vm1, %v7881_v11, 0.0  ;;  %v7884_v5 = vadd.f32 %v11230_v24, %v17492_v21 }
 0x6bd   : > { %v7882_v14 = vadd.f32 %v7783_v44, %v16263_v16  ;;  %v8742_v35 = vsel %vm8543_vm5, %v8687_v60, 0.0  ;;  %v9482_v17 = vpack.c.bf16 %v7879_v1, %v7879_v1  ;;  %v8520_v8 = vsel %vm8480_vm9, %v7879_v1, 0.0  ;;  %v7799_v19 = vpop.f32.mrf.mxu1 }
 0x6be   : > { %v8648_v23 = vmul.f32 %v7879_v1, %v7879_v1  ;;  %vm8486_vm13 = vcmp.eq.s32.totalorder %v16489_v12, 1  ;;  %v8579_v25 = vsel %vm8543_vm5, %v8521_v31, 0.0  ;;  %v8743_v50 = vadd.f32 %v8742_v35, %v8741_v32 }
 0x6bf   : > { %v8577_v11 = vsel %vm8543_vm5, %v8520_v8, 0.0  ;;  %v9487_v24 = vpack.c.bf16 %v7884_v5, %v7884_v5  ;;  %v8746_v16 = vsel %vm8543_vm5, %v8689_v51, 0.0  ;;  %v8690_v59 = vsel %vm8482_vm1, %v8650_v3, 0.0  ;;  %8080 = vst.msk [vmem:[%s16251_s9 + $0x44] sm:$0xf] %vm8062_vm4, %v9482_v17  ;;  %v11235_v51 = vpop.f32.mrf.mxu1 }
 0x6c0   : > { %v8578_v6 = vadd.f32 %v8577_v11, %v8576_v52  ;;  %v8688_v40 = vsel %vm8480_vm9, %v8648_v23, 0.0  ;;  %v8581_v41 = vsel %vm8543_vm5, %v8522_v45, 0.0  ;;  %v9485_v44 = vpack.c.bf16 %v7882_v14, %v7882_v14 }
 0x6c1   : > { %v8744_v13 = vsel %vm8543_vm5, %v8688_v40, 0.0  ;;  %8085 = vst.msk [vmem:[%s16251_s9 + $0x58] sm:$0xf] %vm8062_vm4, %v9487_v24  ;;  %v8651_v30 = vmul.f32 %v7882_v14, %v7882_v14  ;;  %vm8487_vm14 = vcmp.eq.s32.totalorder %v16479_v46, 1  ;;  %v8653_v61 = vmul.f32 %v7884_v5, %v7884_v5 }
 0x6c2   : > { %v8580_v27 = vadd.f32 %v8579_v25, %v8578_v6  ;;  %v8745_v54 = vadd.f32 %v8744_v13, %v8743_v50  ;;  %v8523_v53 = vsel %vm8483_vm10, %v7882_v14, 0.0  ;;  %vm8489_vm15 = vcmp.eq.s32.totalorder %v16512_v29, 1  ;;  %8083 = vst.msk [vmem:[%s16251_s9 + $0x50] sm:$0xf] %vm8062_vm4, %v9485_v44  ;;  %v7802_v14 = vpop.f32.mrf.mxu1 }
 0x6c3   : > { %v8748_v18 = vsel %vm8543_vm5, %v8690_v59, 0.0  ;;  %v8525_v31 = vsel %vm8485_vm11, %v7884_v5, 0.0  ;;  %v7885_v7 = vadd.f32 %v11231_v26, %v16267_v34  ;;  %v7883_v60 = vadd.f32 %v7786_v0, %v16271_v62  ;;  %v16573_v62 = vpop.permute.xlu0 %8434  ;;  %v16579_v0 = vpop.permute.xlu1 %8431 }
 0x6c4   : > { %v8747_v52 = vadd.f32 %v8746_v16, %v8745_v54  ;;  %v8582_v3 = vadd.f32 %v8581_v41, %v8580_v27  ;;  %v8691_v47 = vsel %vm8483_vm10, %v8651_v30, 0.0  ;;  %v7888_v1 = vadd.f32 %v11234_v36, %v16275_v48  ;;  %v11238_v58 = vpop.f32.mrf.mxu1 }
 0x6c5   : > { %v8583_v32 = vsel %vm8543_vm5, %v8523_v53, 0.0  ;;  %v9488_v45 = vpack.c.bf16 %v7885_v7, %v7885_v7  ;;  %v8654_v21 = vmul.f32 %v7885_v7, %v7885_v7  ;;  %v9486_v5 = vpack.c.bf16 %v7883_v60, %v7883_v60 }
 0x6c6   : > { %vm8488_vm0 = vcmp.eq.s32.totalorder %v16518_v10, 1  ;;  %vm8490_vm2 = vcmp.eq.s32.totalorder %v16550_v38, 1  ;;  %v8693_v34 = vsel %vm8485_vm11, %v8653_v61, 0.0  ;;  %v8584_v43 = vadd.f32 %v8583_v32, %v8582_v3  ;;  %v7815_v40 = vpop.f32.mrf.mxu1 }
 0x6c7   : > { %v8749_v26 = vadd.f32 %v8748_v18, %v8747_v52  ;;  %v8524_v48 = vsel %vm8484_vm12, %v7883_v60, 0.0  ;;  %v8750_v35 = vsel %vm8543_vm5, %v8691_v47, 0.0  ;;  %8086 = vst.msk [vmem:[%s16251_s9 + $0x5c] sm:$0xf] %vm8062_vm4, %v9488_v45  ;;  %8084 = vst.msk [vmem:[%s16251_s9 + $0x54] sm:$0xf] %vm8062_vm4, %v9486_v5  ;;  %v8652_v8 = vmul.f32 %v7883_v60, %v7883_v60 }
 0x6c8   : > { %v8585_v17 = vsel %vm8543_vm5, %v8524_v48, 0.0  ;;  %v9491_v23 = vpack.c.bf16 %v7888_v1, %v7888_v1  ;;  %v8587_v25 = vsel %vm8543_vm5, %v8525_v31, 0.0  ;;  %v8526_v11 = vsel %vm8486_vm13, %v7885_v7, 0.0  ;;  %v11239_v61 = vpop.f32.mrf.mxu1 }
 0x6c9   : > { %v8751_v50 = vadd.f32 %v8750_v35, %v8749_v26  ;;  %v8586_v24 = vadd.f32 %v8585_v17, %v8584_v43  ;;  %v8754_v36 = vsel %vm8543_vm5, %v8693_v34, 0.0  ;;  %v8694_v16 = vsel %vm8486_vm13, %v8654_v21, 0.0 }
 0x6ca   : > { %v8692_v59 = vsel %vm8484_vm12, %v8652_v8, 0.0  ;;  %8089 = vst.msk [vmem:[%s16251_s9 + $0x68] sm:$0xf] %vm8062_vm4, %v9491_v23  ;;  %v7886_v6 = vadd.f32 %v7799_v19, %v16279_v42  ;;  %v7889_v44 = vadd.f32 %v11235_v51, %v16283_v63  ;;  %v7887_v30 = vadd.f32 %v7802_v14, %v16287_v39  ;;  %v16605_v42 = vpop.permute.xlu0 %8440  ;;  %v16610_v39 = vpop.permute.xlu1 %8437 }
 0x6cb   : > { %v8588_v41 = vadd.f32 %v8587_v25, %v8586_v24  ;;  %v8752_v13 = vsel %vm8543_vm5, %v8692_v59, 0.0  ;;  %vm8491_vm3 = vcmp.eq.s32.totalorder %v16541_v2, 1  ;;  %v8589_v12 = vsel %vm8543_vm5, %v8526_v11, 0.0  ;;  %v7818_v52 = vpop.f32.mrf.mxu1 }
 0x6cc   : > { %v8753_v27 = vadd.f32 %v8752_v13, %v8751_v50  ;;  %v9489_v37 = vpack.c.bf16 %v7886_v6, %v7886_v6  ;;  %v8527_v54 = vsel %vm8487_vm14, %v7886_v6, 0.0  ;;  %v8756_v19 = vsel %vm8543_vm5, %v8694_v16, 0.0 }
 0x6cd   : > { %v8529_v63 = vsel %vm8489_vm15, %v7888_v1, 0.0  ;;  %v8590_v53 = vadd.f32 %v8589_v12, %v8588_v41  ;;  %v8655_v18 = vmul.f32 %v7886_v6, %v7886_v6  ;;  %v8657_v7 = vmul.f32 %v7888_v1, %v7888_v1  ;;  %v11242_v34 = vpop.f32.mrf.mxu1 }
 0x6ce   : > { %v8755_v31 = vadd.f32 %v8754_v36, %v8753_v27  ;;  %8087 = vst.msk [vmem:[%s16251_s9 + $0x60] sm:$0xf] %vm8062_vm4, %v9489_v37  ;;  %v8591_v60 = vsel %vm8543_vm5, %v8527_v54, 0.0  ;;  %v9492_v51 = vpack.c.bf16 %v7889_v44, %v7889_v44  ;;  %vm8493_vm6 = vcmp.eq.s32.totalorder %v16573_v62, 1  ;;  %v16634_v50 = vpop.permute.xlu0 %8446 }
 0x6cf   : > { %v8592_v3 = vadd.f32 %v8591_v60, %v8590_v53  ;;  %v8695_v47 = vsel %vm8487_vm14, %v8655_v18, 0.0  ;;  %v8658_v32 = vmul.f32 %v7889_v44, %v7889_v44  ;;  %v9490_v45 = vpack.c.bf16 %v7887_v30, %v7887_v30  ;;  %v7831_v25 = vpop.f32.mrf.mxu1 }
 0x6d0   : > { %vm8494_vm7 = vcmp.eq.s32.totalorder %v16610_v39, 1  ;;  %v8595_v21 = vsel %vm8543_vm5, %v8529_v63, 0.0  ;;  %v8757_v1 = vadd.f32 %v8756_v19, %v8755_v31  ;;  %8090 = vst.msk [vmem:[%s16251_s9 + $0x6c] sm:$0xf] %vm8062_vm4, %v9492_v51  ;;  %v8530_v5 = vsel %vm8490_vm2, %v7889_v44, 0.0 }
 0x6d1   : > { %v8528_v14 = vsel %vm8488_vm0, %v7887_v30, 0.0  ;;  %vm8492_vm8 = vcmp.eq.s32.totalorder %v16579_v0, 1  ;;  %v8758_v46 = vsel %vm8543_vm5, %v8695_v47, 0.0  ;;  %8088 = vst.msk [vmem:[%s16251_s9 + $0x64] sm:$0xf] %vm8062_vm4, %v9490_v45  ;;  %v8656_v26 = vmul.f32 %v7887_v30, %v7887_v30  ;;  %v11243_v6 = vpop.f32.mrf.mxu1 }
 0x6d2   : > { %v8593_v43 = vsel %vm8543_vm5, %v8528_v14, 0.0  ;;  %v7892_v48 = vadd.f32 %v11238_v58, %v16296_v22  ;;  %v8759_v35 = vadd.f32 %v8758_v46, %v8757_v1  ;;  %v7890_v8 = vadd.f32 %v7815_v40, %v16300_v9  ;;  %v16642_v58 = vpop.permute.xlu1 %8443 }
 0x6d3   : > { %v8594_v17 = vadd.f32 %v8593_v43, %v8592_v3  ;;  %v7893_v23 = vadd.f32 %v11239_v61, %v16304_v33  ;;  %v8697_v11 = vsel %vm8489_vm15, %v8657_v7, 0.0  ;;  %v8698_v24 = vsel %vm8490_vm2, %v8658_v32, 0.0  ;;  %v7834_v12 = vpop.f32.mrf.mxu1  ;;  %v16667_v7 = vpop.permute.xlu0 %8452 }
 0x6d4   : > { %v8696_v36 = vsel %vm8488_vm0, %v8656_v26, 0.0  ;;  %v9495_v22 = vpack.c.bf16 %v7892_v48, %v7892_v48  ;;  %v8661_v16 = vmul.f32 %v7892_v48, %v7892_v48  ;;  %v9493_v59 = vpack.c.bf16 %v7890_v8, %v7890_v8 }
 0x6d5   : > { %v8596_v9 = vadd.f32 %v8595_v21, %v8594_v17  ;;  %v8760_v33 = vsel %vm8543_vm5, %v8696_v36, 0.0  ;;  %vm8495_vm1 = vcmp.eq.s32.totalorder %v16605_v42, 1  ;;  %v8597_v29 = vsel %vm8543_vm5, %v8530_v5, 0.0  ;;  %v11246_v31 = vpop.f32.mrf.mxu1 }
 0x6d6   : > { %v8761_v40 = vadd.f32 %v8760_v33, %v8759_v35  ;;  %8093 = vst.msk [vmem:[%s16251_s9 + $0x78] sm:$0xf] %vm8062_vm4, %v9495_v22  ;;  %v8531_v10 = vsel %vm8491_vm3, %v7890_v8, 0.0  ;;  %v8659_v38 = vmul.f32 %v7890_v8, %v7890_v8  ;;  %vm8497_vm9 = vcmp.eq.s32.totalorder %v16634_v50, 1  ;;  %8091 = vst.msk [vmem:[%s16251_s9 + $0x70] sm:$0xf] %vm8062_vm4, %v9493_v59  ;;  %v8450_v3 = vpop.permute.xlu1 %8449 }
 0x6d7   : > { %v8762_v41 = vsel %vm8543_vm5, %v8697_v11, 0.0  ;;  %v8764_v13 = vsel %vm8543_vm5, %v8698_v24, 0.0  ;;  %v8598_v44 = vadd.f32 %v8597_v29, %v8596_v9  ;;  %v9496_v30 = vpack.c.bf16 %v7893_v23, %v7893_v23  ;;  %v7486_v29 = vpop.f32.mrf.mxu0 }
 0x6d8   : > { %v8763_v27 = vadd.f32 %v8762_v41, %v8761_v40  ;;  %v8599_v37 = vsel %vm8543_vm5, %v8531_v10, 0.0  ;;  %v8699_v54 = vsel %vm8491_vm3, %v8659_v38, 0.0  ;;  %v8662_v61 = vmul.f32 %v7893_v23, %v7893_v23 }
 0x6d9   : > { %v8533_v19 = vsel %vm8493_vm6, %v7892_v48, 0.0  ;;  %v8701_v63 = vsel %vm8493_vm6, %v8661_v16, 0.0  ;;  %v8600_v53 = vadd.f32 %v8599_v37, %v8598_v44  ;;  %8094 = vst.msk [vmem:[%s16251_s9 + $0x7c] sm:$0xf] %vm8062_vm4, %v9496_v30  ;;  %v7891_v18 = vadd.f32 %v7818_v52, %v16307_v15  ;;  %v17493_v44 = vld [vmem:[#allocation101_spill] sm:$0xff] }
 0x6da   : > { %vm8496_vm10 = vcmp.eq.s32.totalorder %v16642_v58, 1  ;;  %v8765_v60 = vadd.f32 %v8764_v13, %v8763_v27  ;;  %v8534_v2 = vsel %vm8494_vm7, %v7893_v23, 0.0  ;;  %v7896_v51 = vadd.f32 %v11242_v34, %v16318_v56  ;;  %v7847_v56 = vpop.f32.mrf.mxu1 }
 0x6db   : > { %v7894_v62 = vadd.f32 %v7831_v25, %v16321_v28  ;;  %v8766_v47 = vsel %vm8543_vm5, %v8699_v54, 0.0  ;;  %v9494_v32 = vpack.c.bf16 %v7891_v18, %v7891_v18  ;;  %v8532_v15 = vsel %vm8492_vm8, %v7891_v18, 0.0  ;;  %v16693_v25 = vpop.permute.xlu0 %8458 }
 0x6dc   : > { %v8660_v52 = vmul.f32 %v7891_v18, %v7891_v18  ;;  %vm8498_vm11 = vcmp.eq.s32.totalorder %v8450_v3, 1  ;;  %v8767_v45 = vadd.f32 %v8766_v47, %v8765_v60  ;;  %v8702_v21 = vsel %vm8494_vm7, %v8662_v61, 0.0  ;;  %v11247_v22 = vpop.f32.mrf.mxu1 }
 0x6dd   : > { %v8601_v1 = vsel %vm8543_vm5, %v8532_v15, 0.0  ;;  %v9499_v5 = vpack.c.bf16 %v7896_v51, %v7896_v51  ;;  %v8603_v28 = vsel %vm8543_vm5, %v8533_v19, 0.0  ;;  %v8770_v14 = vsel %vm8543_vm5, %v8701_v63, 0.0  ;;  %8092 = vst.msk [vmem:[%s16251_s9 + $0x74] sm:$0xf] %vm8062_vm4, %v9494_v32 }
 0x6de   : > { %v8602_v34 = vadd.f32 %v8601_v1, %v8600_v53  ;;  %v8700_v46 = vsel %vm8492_vm8, %v8660_v52, 0.0  ;;  %v8605_v43 = vsel %vm8543_vm5, %v8534_v2, 0.0  ;;  %v9497_v26 = vpack.c.bf16 %v7894_v62, %v7894_v62  ;;  %v7850_v37 = vpop.f32.mrf.mxu1 }
 0x6df   : > { %v8768_v39 = vsel %vm8543_vm5, %v8700_v46, 0.0  ;;  %8097 = vst.msk [vmem:[%s16251_s9 + $0x88] sm:$0xf] %vm8062_vm4, %v9499_v5  ;;  %v8663_v48 = vmul.f32 %v7894_v62, %v7894_v62  ;;  %vm8499_vm12 = vcmp.eq.s32.totalorder %v16667_v7, 1  ;;  %v8772_v35 = vsel %vm8543_vm5, %v8702_v21, 0.0 }
 0x6e0   : > { %v8604_v17 = vadd.f32 %v8603_v28, %v8602_v34  ;;  %v8769_v8 = vadd.f32 %v8768_v39, %v8767_v45  ;;  %v8535_v23 = vsel %vm8495_vm1, %v7894_v62, 0.0  ;;  %v8537_v0 = vsel %vm8497_vm9, %v7896_v51, 0.0  ;;  %8095 = vst.msk [vmem:[%s16251_s9 + $0x80] sm:$0xf] %vm8062_vm4, %v9497_v26 }
 0x6e1   : > { %v8665_v11 = vmul.f32 %v7896_v51, %v7896_v51  ;;  %v7897_v24 = vadd.f32 %v11243_v6, %v16365_v49  ;;  %v7895_v36 = vadd.f32 %v7834_v12, %v16374_v4  ;;  %v8703_v16 = vsel %vm8495_vm1, %v8663_v48, 0.0  ;;  %v8456_v49 = vpop.permute.xlu1 %8455 }
 0x6e2   : > { %v8771_v9 = vadd.f32 %v8770_v14, %v8769_v8  ;;  %v8606_v33 = vadd.f32 %v8605_v43, %v8604_v17  ;;  %v7900_v59 = vadd.f32 %v11246_v31, %v16398_v57  ;;  %v8607_v40 = vsel %vm8543_vm5, %v8535_v23, 0.0 }
 0x6e3   : > { %v9500_v10 = vpack.c.bf16 %v7897_v24, %v7897_v24  ;;  %v8666_v38 = vmul.f32 %v7897_v24, %v7897_v24  ;;  %v9498_v41 = vpack.c.bf16 %v7895_v36, %v7895_v36  ;;  %vm8501_vm13 = vcmp.eq.s32.totalorder %v16693_v25, 1 }
 0x6e4   : > { %v8608_v4 = vadd.f32 %v8607_v40, %v8606_v33  ;;  %v8773_v6 = vadd.f32 %v8772_v35, %v8771_v9  ;;  %v8536_v13 = vsel %vm8496_vm10, %v7895_v36, 0.0  ;;  %v7535_v42 = vadd.f32 %v7486_v29, %v17493_v44 }
 0x6e5   : > { %v8774_v30 = vsel %vm8543_vm5, %v8703_v16, 0.0  ;;  %8098 = vst.msk [vmem:[%s16251_s9 + $0x8c] sm:$0xf] %vm8062_vm4, %v9500_v10  ;;  %8096 = vst.msk [vmem:[%s16251_s9 + $0x84] sm:$0xf] %vm8062_vm4, %v9498_v41  ;;  %v8609_v57 = vsel %vm8543_vm5, %v8536_v13, 0.0  ;;  %v8664_v12 = vmul.f32 %v7895_v36, %v7895_v36  ;;  %v9503_v27 = vpack.c.bf16 %v7900_v59, %v7900_v59  ;;  %v8462_v58 = vpop.permute.xlu1 %8461 }
 0x6e6   : > { %v8611_v54 = vsel %vm8543_vm5, %v8537_v0, 0.0  ;;  %v8775_v61 = vadd.f32 %v8774_v30, %v8773_v6  ;;  %v8538_v19 = vsel %vm8498_vm11, %v7897_v24, 0.0  ;;  %v8610_v63 = vadd.f32 %v8609_v57, %v8608_v4 }
 0x6e7   : > { %v8705_v53 = vsel %vm8497_vm9, %v8665_v11, 0.0  ;;  %v8706_v18 = vsel %vm8498_vm11, %v8666_v38, 0.0  ;;  %v8704_v31 = vsel %vm8496_vm10, %v8664_v12, 0.0  ;;  %8101 = vst.msk [vmem:[%s16251_s9 + $0x98] sm:$0xf] %vm8062_vm4, %v9503_v27  ;;  %v7898_v60 = vadd.f32 %v7847_v56, %v16401_v20 }
 0x6e8   : > { %v8612_v2 = vadd.f32 %v8611_v54, %v8610_v63  ;;  %v8776_v51 = vsel %vm8543_vm5, %v8704_v31, 0.0  ;;  %v7901_v62 = vadd.f32 %v11247_v22, %v16440_v55  ;;  %v7899_v47 = vadd.f32 %v7850_v37, %v7535_v42 }
 0x6e9   : > { %v8613_v32 = vsel %vm8543_vm5, %v8538_v19, 0.0  ;;  %v8777_v50 = vadd.f32 %v8776_v51, %v8775_v61  ;;  %v9501_v15 = vpack.c.bf16 %v7898_v60, %v7898_v60  ;;  %v8539_v3 = vsel %vm8499_vm12, %v7898_v60, 0.0 }
 0x6ea   : > { %vm8500_vm14 = vcmp.eq.s32.totalorder %v8456_v49, 1  ;;  %v8778_v52 = vsel %vm8543_vm5, %v8705_v53, 0.0  ;;  %v8614_v20 = vadd.f32 %v8613_v32, %v8612_v2  ;;  %v8667_v45 = vmul.f32 %v7898_v60, %v7898_v60 }
 0x6eb   : > { %v8780_v21 = vsel %vm8543_vm5, %v8706_v18, 0.0  ;;  %v8779_v1 = vadd.f32 %v8778_v52, %v8777_v50  ;;  %8099 = vst.msk [vmem:[%s16251_s9 + $0x90] sm:$0xf] %vm8062_vm4, %v9501_v15  ;;  %v8615_v55 = vsel %vm8543_vm5, %v8539_v3, 0.0  ;;  %v9504_v5 = vpack.c.bf16 %v7901_v62, %v7901_v62 }
 0x6ec   : > { %v8669_v56 = vmul.f32 %v7900_v59, %v7900_v59  ;;  %v8616_v28 = vadd.f32 %v8615_v55, %v8614_v20  ;;  %v8707_v14 = vsel %vm8499_vm12, %v8667_v45, 0.0  ;;  %v9502_v34 = vpack.c.bf16 %v7899_v47, %v7899_v47 }
 0x6ed   : > { %vm8502_vm15 = vcmp.eq.s32.totalorder %v8462_v58, 1  ;;  %v8541_v46 = vsel %vm8501_vm13, %v7900_v59, 0.0  ;;  %v8781_v43 = vadd.f32 %v8780_v21, %v8779_v1  ;;  %8102 = vst.msk [vmem:[%s16251_s9 + $0x9c] sm:$0xf] %vm8062_vm4, %v9504_v5  ;;  %v8540_v39 = vsel %vm8500_vm14, %v7899_v47, 0.0 }
 0x6ee   : > { %v8782_v26 = vsel %vm8543_vm5, %v8707_v14, 0.0  ;;  %v8670_v48 = vmul.f32 %v7901_v62, %v7901_v62  ;;  %8100 = vst.msk [vmem:[%s16251_s9 + $0x94] sm:$0xf] %vm8062_vm4, %v9502_v34  ;;  %v8617_v35 = vsel %vm8543_vm5, %v8540_v39, 0.0  ;;  %v8668_v17 = vmul.f32 %v7899_v47, %v7899_v47 }
 0x6ef   : > { %v8783_v7 = vadd.f32 %v8782_v26, %v8781_v43  ;;  %v8542_v8 = vsel %vm8502_vm15, %v7901_v62, 0.0  ;;  %v8618_v23 = vadd.f32 %v8617_v35, %v8616_v28  ;;  %v8619_v0 = vsel %vm8543_vm5, %v8541_v46, 0.0 }
 0x6f0   : > { %v8709_v11 = vsel %vm8501_vm13, %v8669_v56, 0.0  ;;  %v8708_v24 = vsel %vm8500_vm14, %v8668_v17, 0.0  ;;  %v8621_v9 = vsel %vm8543_vm5, %v8542_v8, 0.0  ;;  %v8710_v33 = vsel %vm8502_vm15, %v8670_v48, 0.0 }
 0x6f1   : > { %v8620_v36 = vadd.f32 %v8619_v0, %v8618_v23  ;;  %v8784_v22 = vsel %vm8543_vm5, %v8708_v24, 0.0  ;;  %v8786_v59 = vsel %vm8543_vm5, %v8709_v11, 0.0  ;;  %v8788_v10 = vsel %vm8543_vm5, %v8710_v33, 0.0 }
 0x6f2   : > { %v8785_v16 = vadd.f32 %v8784_v22, %v8783_v7  ;;  %vm8629_vm4 = vcmask 253952  }
 0x6f3   : > { %v8622_v29 = vadd.f32 %v8621_v9, %v8620_v36 }
 0x6f4   : > { %v8787_v40 = vadd.f32 %v8786_v59, %v8785_v16 }
 0x6f5   : > { %v8623_v25 = vrot.slane %v8622_v29, 4 }
 0x6f6   : > { %v8789_v38 = vadd.f32 %v8788_v10, %v8787_v40 }
 0x6f7   : > { %v8624_v41 = vadd.f32 %v8623_v25, %v8622_v29 }
 0x6f8   : > { %v8790_v49 = vrot.slane %v8789_v38, 4 }
 0x6f9   : > { %v8625_v4 = vrot.slane %v8624_v41, 2 }
 0x6fa   : > { %v8791_v6 = vadd.f32 %v8790_v49, %v8789_v38 }
 0x6fb   : > { %v8626_v13 = vadd.f32 %v8625_v4, %v8624_v41 }
 0x6fc   : > { %v8792_v44 = vrot.slane %v8791_v6, 2 }
 0x6fd   : > { %v8627_v42 = vrot.slane %v8626_v13, 1 }
 0x6fe   : > { %v8793_v30 = vadd.f32 %v8792_v44, %v8791_v6 }
 0x6ff   : > { %v8628_v57 = vadd.f32 %v8627_v42, %v8626_v13 }
 0x700   : > { %v8794_v12 = vrot.slane %v8793_v30, 1 }
 0x701   : > { %8630 = vst.msk [vmem:[%s377_s12] sm:$0x1] %vm8629_vm4, %v8628_v57 }
 0x702   : > { %v8795_v27 = vadd.f32 %v8794_v12, %v8793_v30 }
 0x704   : > { %8796 = vst.msk [vmem:[%s382_s15] sm:$0x1] %vm8629_vm4, %v8795_v27 }
 0x705 PF: > { %s19_s29 = sadd.s32 1, %s11520_s29   ;;  %s17494_s27 = smov %s11516_s28 }
 0x706   : > { %p16_p5 = scmp.ge.s32.totalorder %s19_s29, 4   ;;  %s17495_s28 = smov %s17497_s30 }
 0x708   :  { %18 = sbr.rel (!%p16_p5) target bundleno = 2 (0x2), region = 117 }

</bundles_post_ra>
